<compile_context>
chip_gen: v7x
topology: tpu7x:2x2x1
jax: 0.10.0
libtpu: 0.0.40
codegen_flags: <defaults>
</compile_context>

<pallas_src>
import functools

import jax
import jax.numpy as jnp
from jax.experimental import pallas as pl
from jax.experimental.pallas import tpu as pltpu


def _conv3x3_im2col(src_hw_c, w_ref, b_row, pad_ref, col_ref, *, H, W, cin, zero_halo):
    """3x3 SAME conv via im2col: src (H*W, cin) f32 -> pre-activation (H*W, cout) f32.

    pad_ref : (H+2, W+2, >=cin) f32 staging scratch (halo must be zero; zeroed here iff
              zero_halo — the halo is never written with data, so later calls reuse it).
    col_ref : (H*W, 9*cin) bf16 im2col scratch (fully overwritten every call).
    w_ref   : (9*cin, cout) bf16 weight ref (HWIO weights reshaped host-side).
    """
    f32 = jnp.float32
    bf16 = jnp.bfloat16
    cpad = pad_ref.shape[2]
    if zero_halo:
        pad_ref[pl.ds(0, 1), :, :] = jnp.zeros((1, W + 2, cpad), f32)
        pad_ref[pl.ds(H + 1, 1), :, :] = jnp.zeros((1, W + 2, cpad), f32)
        pad_ref[pl.ds(1, H), pl.ds(0, 1), :] = jnp.zeros((H, 1, cpad), f32)
        pad_ref[pl.ds(1, H), pl.ds(W + 1, 1), :] = jnp.zeros((H, 1, cpad), f32)
    pad_ref[pl.ds(1, H), pl.ds(1, W), pl.ds(0, cin)] = src_hw_c.reshape(H, W, cin)

    for dy in range(3):
        for dx in range(3):
            k = dy * 3 + dx
            win = pad_ref[pl.ds(dy, H), pl.ds(dx, W), pl.ds(0, cin)].reshape(H * W, cin)
            col_ref[:, pl.ds(k * cin, cin)] = win.astype(bf16)

    out = jnp.dot(col_ref[...], w_ref[...], preferred_element_type=f32)
    return out + b_row


def _bifusion_kernel(g_ref, x_ref, w1x1_ref, aw1_ref, aw2_ref, w3_ref,
                     c1_ref, c2_ref, c3_ref, skip_ref, bias_ref, bn1_ref,
                     out_ref, pad_ref, col_a, col_b, cat_ref, *, H, W):
    f32 = jnp.float32
    bf16 = jnp.bfloat16

    g = g_ref[0]                              # (H*W, ch) bf16
    x = x_ref[0]                              # (H*W, ch) bf16
    ch = g.shape[-1]
    cint = w3_ref.shape[-1]
    chalf = c2_ref.shape[-1]
    cout = c3_ref.shape[-1]

    def bias(k, width):                       # (1, width) f32 row from the packed table
        return bias_ref[pl.ds(k, 1), pl.ds(0, width)]

    g32 = g.astype(f32)
    x32 = x.astype(f32)

    # ---- channel-attention gates: g- and x-branch packed block-diagonally (2 matmuls) --
    m = jnp.concatenate([jnp.mean(g32, axis=0, keepdims=True),
                         jnp.mean(x32, axis=0, keepdims=True)], axis=-1)      # (1, 2ch)
    t = jnp.maximum(jnp.dot(m.astype(bf16), aw1_ref[...], preferred_element_type=f32)
                    + bias(3, aw1_ref.shape[-1]), 0.0)
    s = jnp.dot(t.astype(bf16), aw2_ref[...], preferred_element_type=f32) + bias(4, 2 * ch)
    gate = 1.0 / (1.0 + jnp.exp(-s))                                          # (1, 2ch) f32

    # ---- bp = ReLU(BN(Conv3x3( BN(W_g g) * BN(W_x x) )))   (BNs folded host-side) ------
    wg = jnp.dot(g, w1x1_ref[0], preferred_element_type=f32) + bias(0, cint)
    wx = jnp.dot(x, w1x1_ref[1], preferred_element_type=f32) + bias(1, cint)
    bp = _conv3x3_im2col(wg * wx, w3_ref, bias(2, cint), pad_ref, col_a,
                         H=H, W=W, cin=cint, zero_halo=True)
    bp = jnp.maximum(bp, 0.0)

    # ---- concat [g_c | x_c | bp] materialized once in VMEM (never round-trips HBM) -----
    cat_ref[:, pl.ds(0, ch)] = (g32 * gate[:, :ch]).astype(bf16)
    cat_ref[:, pl.ds(ch, ch)] = (x32 * gate[:, ch:]).astype(bf16)
    cat_ref[:, pl.ds(2 * ch, cint)] = bp.astype(bf16)

    # ---- Residual block -----------------------------------------------------------------
    cat = cat_ref[...]                                                        # (H*W, ccat) bf16
    skip = jnp.dot(cat, skip_ref[...], preferred_element_type=f32) + bias(8, cout)
    out_ref[0] = skip.astype(out_ref.dtype)          # park the skip in the output block

    # bn1 + relu overwrite the concat in place, then conv1 (+bn2 folded) as ONE K=ccat dot
    cat_ref[...] = jnp.maximum(cat.astype(f32) * bn1_ref[pl.ds(0, 1), :]
                               + bn1_ref[pl.ds(1, 1), :], 0.0).astype(bf16)
    h = jnp.maximum(jnp.dot(cat_ref[...], c1_ref[...], preferred_element_type=f32)
                    + bias(5, chalf), 0.0)

    # conv2 (3x3, +bn3 folded) + relu, then conv3 (1x1, bias) + skip
    h = jnp.maximum(_conv3x3_im2col(h, c2_ref, bias(6, chalf), pad_ref, col_b,
                                    H=H, W=W, cin=chalf, zero_halo=False), 0.0)
    out = jnp.dot(h.astype(bf16), c3_ref[...], preferred_element_type=f32) + bias(7, cout)
    out_ref[0] = (out + out_ref[0].astype(f32)).astype(out_ref.dtype)


def bifusion_forward(g, x, p):
    """g, x: (B, H, W, C) channel-last float32.  Returns (B, H, W, ch_out) float32."""
    f32, bf16 = jnp.float32, jnp.bfloat16
    B, H, W, ch_1 = g.shape
    ch_2 = x.shape[-1]
    assert ch_1 == ch_2, "BiFusion channel attention requires ch_1 == ch_2"
    hw = H * W
    ch_int = p["wg_w"].shape[1]
    ch_half = p["c1_w"].shape[1]
    ch_out = p["c3_w"].shape[1]
    ccat = ch_1 + ch_2 + ch_int
    cr = p["fc1g_w"].shape[1]

    # ---------------- pack / cast parameters into a few wide bf16 inputs ----------------
    w1x1 = jnp.stack([p["wg_w"], p["wx_w"]], axis=0).astype(bf16)          # (2, ch, ch_int)
    aw1 = jnp.concatenate(
        [jnp.concatenate([p["fc1g_w"], jnp.zeros_like(p["fc1g_w"])], axis=1),
         jnp.concatenate([jnp.zeros_like(p["fc1x_w"]), p["fc1x_w"]], axis=1)],
        axis=0).astype(bf16)                                               # (2ch, 2cr) blk-diag
    aw2 = jnp.concatenate(
        [jnp.concatenate([p["fc2g_w"], jnp.zeros_like(p["fc2g_w"])], axis=1),
         jnp.concatenate([jnp.zeros_like(p["fc2x_w"]), p["fc2x_w"]], axis=1)],
        axis=0).astype(bf16)                                               # (2cr, 2ch) blk-diag
    w3 = p["w3_w"].reshape(9 * ch_int, ch_int).astype(bf16)                # im2col layout
    c1 = p["c1_w"].astype(bf16)
    c2 = p["c2_w"].reshape(9 * ch_half, ch_half).astype(bf16)
    c3 = p["c3_w"].astype(bf16)
    skip = p["skip_w"].astype(bf16)

    bias_rows = [p["wg_b"], p["wx_b"], p["w3_b"],
                 jnp.concatenate([p["fc1g_b"], p["fc1x_b"]], axis=-1),
                 jnp.concatenate([p["fc2g_b"], p["fc2x_b"]], axis=-1),
                 p["c1_b"], p["c2_b"], p["c3_b"], p["skip_b"]]
    bw = max(int(r.size) for r in bias_rows)
    bias_pack = jnp.concatenate(
        [jnp.pad(r.reshape(1, -1).astype(f32), ((0, 0), (0, bw - int(r.size))))
         for r in bias_rows], axis=0)                                      # (9, bw) f32
    bn1 = jnp.concatenate([p["bn1_s"].reshape(1, -1),
                           p["bn1_t"].reshape(1, -1)], axis=0).astype(f32)  # (2, ccat)

    weights = [w1x1, aw1, aw2, w3, c1, c2, c3, skip, bias_pack, bn1]

    def act_spec(c):
        return pl.BlockSpec((1, hw, c), lambda b: (b, 0, 0))

    def full_spec(a):                                  # whole weight resident in VMEM
        return pl.BlockSpec(a.shape, lambda b, nd=a.ndim: (0,) * nd)

    flops = 2 * B * hw * (2 * ch_1 * ch_int + 9 * ch_int * ch_int
                          + ccat * ch_out + ccat * ch_half
                          + 9 * ch_half * ch_half + ch_half * ch_out)
    bytes_accessed = int((g.size + x.size) * 2 + B * hw * ch_out * 4
                         + sum(int(a.size) * a.dtype.itemsize for a in weights))

    cmax = max(ch_int, ch_half)
    out = pl.pallas_call(
        functools.partial(_bifusion_kernel, H=H, W=W),
        out_shape=jax.ShapeDtypeStruct((B, hw, ch_out), jnp.float32),
        grid=(B,),
        in_specs=[act_spec(ch_1), act_spec(ch_2)] + [full_spec(a) for a in weights],
        out_specs=pl.BlockSpec((1, hw, ch_out), lambda b: (b, 0, 0)),
        scratch_shapes=[pltpu.VMEM((H + 2, W + 2, cmax), jnp.float32),   # conv staging (halo)
                        pltpu.VMEM((hw, 9 * ch_int), jnp.bfloat16),      # im2col for W (bp)
                        pltpu.VMEM((hw, 9 * ch_half), jnp.bfloat16),     # im2col for conv2
                        pltpu.VMEM((hw, ccat), jnp.bfloat16)],           # [g_c|x_c|bp] concat
        compiler_params=pltpu.CompilerParams(
            dimension_semantics=("parallel",),          # shard batch across TensorCores
            vmem_limit_bytes=32 * 1024 * 1024),         # within v7x's 64 MiB physical VMEM
        cost_estimate=pl.CostEstimate(
            flops=flops, transcendentals=2 * B * ch_2, bytes_accessed=bytes_accessed),
    )(g.reshape(B, hw, ch_1).astype(bf16),
      x.reshape(B, hw, ch_2).astype(bf16), *weights)
    return out.reshape(B, H, W, ch_out)


# --------------------- host-side parameter construction / BN folding ---------------------

def make_params(key, ch_1, ch_2, r_2, ch_int, ch_out, dtype=jnp.float32):
    """Random BiFusion_block parameters with every conv+BN pair folded (eval mode).
    Conv weights are channel-last: 1x1 as (Cin, Cout), 3x3 as HWIO (3, 3, Cin, Cout)."""
    assert ch_1 == ch_2, "fc1/fc2 channel-attention layers take ch_2 channels -> need ch_1 == ch_2"
    eps = 1e-5
    ch_half = ch_out // 2
    ch_cat = ch_1 + ch_2 + ch_int
    keys = iter(jax.random.split(key, 64))

    def rand(shape, scale=0.05):
        return (jax.random.normal(next(keys), shape, dtype) * scale).astype(dtype)

    def bn(c):  # per-channel (scale, shift) for eval-mode BatchNorm2d
        gamma = 1.0 + 0.1 * jax.random.normal(next(keys), (c,), dtype)
        beta = 0.1 * jax.random.normal(next(keys), (c,), dtype)
        mean = 0.1 * jax.random.normal(next(keys), (c,), dtype)
        var = jnp.abs(jax.random.normal(next(keys), (c,), dtype)) + 0.5
        s = gamma / jnp.sqrt(var + eps)
        return s, beta - mean * s

    def fold(w, b, st):  # fold BN (s, t) into conv weight (..., Cin, Cout) + bias (Cout,)
        s, t = st
        return w * s, b * s + t

    row = lambda v: v.reshape(1, -1)

    wg_w, wg_b = fold(rand((ch_1, ch_int)), rand((ch_int,)), bn(ch_int))            # W_g + BN
    wx_w, wx_b = fold(rand((ch_2, ch_int)), rand((ch_int,)), bn(ch_int))            # W_x + BN
    w3_w, w3_b = fold(rand((3, 3, ch_int, ch_int)), rand((ch_int,)), bn(ch_int))    # W + BN
    cr = ch_2 // r_2
    fc1g_w, fc1g_b = rand((ch_2, cr)), rand((cr,))
    fc2g_w, fc2g_b = rand((cr, ch_2)), rand((ch_2,))
    fc1x_w, fc1x_b = rand((ch_2, cr)), rand((cr,))
    fc2x_w, fc2x_b = rand((cr, ch_2)), rand((ch_2,))
    bn1_s, bn1_t = bn(ch_cat)
    c1_w, c1_b = fold(rand((ch_cat, ch_half)), rand((ch_half,)), bn(ch_half))       # conv1+bn2
    c2_w, c2_b = fold(rand((3, 3, ch_half, ch_half)), rand((ch_half,)), bn(ch_half))  # conv2+bn3
    c3_w, c3_b = rand((ch_half, ch_out)), rand((ch_out,))
    if ch_cat == ch_out:                      # Residual.need_skip == False -> identity skip
        skip_w = jnp.eye(ch_out, dtype=dtype)
        skip_b = jnp.zeros((ch_out,), dtype)
    else:
        skip_w, skip_b = rand((ch_cat, ch_out)), rand((ch_out,))

    return dict(
        fc1g_w=fc1g_w, fc1g_b=row(fc1g_b), fc2g_w=fc2g_w, fc2g_b=row(fc2g_b),
        fc1x_w=fc1x_w, fc1x_b=row(fc1x_b), fc2x_w=fc2x_w, fc2x_b=row(fc2x_b),
        wg_w=wg_w, wg_b=row(wg_b), wx_w=wx_w, wx_b=row(wx_b),
        w3_w=w3_w, w3_b=row(w3_b),
        bn1_s=row(bn1_s), bn1_t=row(bn1_t),
        c1_w=c1_w, c1_b=row(c1_b), c2_w=c2_w, c2_b=row(c2_b),
        c3_w=c3_w, c3_b=row(c3_b),
        skip_w=skip_w, skip_b=row(skip_b),
    )


# ------------------------------ pure-JAX reference (for checking) ------------------------

def bifusion_reference(g, x, p):
    hp = jax.lax.Precision.HIGHEST
    dot = lambda a, w: jnp.dot(a, w, precision=hp)

    def conv3x3(a, w, b):
        y = jax.lax.conv_general_dilated(
            a, w, window_strides=(1, 1), padding="SAME",
            dimension_numbers=("NHWC", "HWIO", "NHWC"), precision=hp)
        return y + b.reshape(1, 1, 1, -1)

    wg = dot(g, p["wg_w"]) + p["wg_b"]
    wx = dot(x, p["wx_w"]) + p["wx_b"]
    bp = jnp.maximum(conv3x3(wg * wx, p["w3_w"], p["w3_b"]), 0.0)

    x_mean = jnp.mean(x, axis=(1, 2), keepdims=True)
    t = jnp.maximum(dot(x_mean, p["fc1x_w"]) + p["fc1x_b"], 0.0)
    x_c = x * jax.nn.sigmoid(dot(t, p["fc2x_w"]) + p["fc2x_b"])

    g_mean = jnp.mean(g, axis=(1, 2), keepdims=True)
    t = jnp.maximum(dot(g_mean, p["fc1g_w"]) + p["fc1g_b"], 0.0)
    g_c = g * jax.nn.sigmoid(dot(t, p["fc2g_w"]) + p["fc2g_b"])

    cat = jnp.concatenate([g_c, x_c, bp], axis=-1)
    skip = dot(cat, p["skip_w"]) + p["skip_b"]
    h = jnp.maximum(cat * p["bn1_s"] + p["bn1_t"], 0.0)
    h = jnp.maximum(dot(h, p["c1_w"]) + p["c1_b"], 0.0)
    h = jnp.maximum(conv3x3(h, p["c2_w"], p["c2_b"]), 0.0)
    return dot(h, p["c3_w"]) + p["c3_b"] + skip


# --------------------------------------- main --------------------------------------------

if __name__ == "__main__":
    B, H, W = 2, 16, 16
    ch_1 = ch_2 = 32
    r_2 = 4
    ch_int = 32
    ch_out = 32

    key = jax.random.PRNGKey(0)
    kg, kx, kp = jax.random.split(key, 3)
    # PyTorch would take NCHW (B, ch, H, W); we use NHWC (channel-last) on TPU.
    g = jax.random.normal(kg, (B, H, W, ch_1), jnp.float32)
    x = jax.random.normal(kx, (B, H, W, ch_2), jnp.float32)
    params = make_params(kp, ch_1, ch_2, r_2, ch_int, ch_out)

    fwd = jax.jit(bifusion_forward)
    out = fwd(g, x, params)
    jax.block_until_ready(out)
    assert out.shape == (B, H, W, ch_out)
    assert bool(jnp.all(jnp.isfinite(out)))

    ref = bifusion_reference(g, x, params)
    err = float(jnp.max(jnp.abs(out - ref)))
    # Tolerance is sized for bf16 matmul operands (deliberate precision choice) against
    # an all-f32 HIGHEST-precision reference.
    assert err < 6e-2, f"max |pallas - reference| = {err}"
    print("KERNEL_OK")
</pallas_src>

<mosaic_0001>
module attributes {stable_mosaic.version = 11 : i64} {
  func.func @_bifusion_kernel(%arg0: i32, %arg1: memref<1x256x32xbf16, #tpu.memory_space<vmem>>, %arg2: memref<1x256x32xbf16, #tpu.memory_space<vmem>>, %arg3: memref<2x32x32xbf16, #tpu.memory_space<vmem>>, %arg4: memref<64x16xbf16, #tpu.memory_space<vmem>>, %arg5: memref<16x64xbf16, #tpu.memory_space<vmem>>, %arg6: memref<288x32xbf16, #tpu.memory_space<vmem>>, %arg7: memref<96x16xbf16, #tpu.memory_space<vmem>>, %arg8: memref<144x16xbf16, #tpu.memory_space<vmem>>, %arg9: memref<16x32xbf16, #tpu.memory_space<vmem>>, %arg10: memref<96x32xbf16, #tpu.memory_space<vmem>>, %arg11: memref<9x64xf32, #tpu.memory_space<vmem>>, %arg12: memref<2x96xf32, #tpu.memory_space<vmem>>, %arg13: memref<1x256x32xf32, #tpu.memory_space<vmem>>, %arg14: memref<18x18x32xf32, #tpu.memory_space<vmem>>, %arg15: memref<256x288xbf16, #tpu.memory_space<vmem>>, %arg16: memref<256x144xbf16, #tpu.memory_space<vmem>>, %arg17: memref<256x96xbf16, #tpu.memory_space<vmem>>) attributes {dimension_semantics = [#tpu.dimension_semantics<parallel>], iteration_bounds = array<i64: 2>, scalar_prefetch = 0 : i64, scratch_operands = 4 : i64, tpu.core_type = #tpu.core_type<tc>, window_params = [{transform_indices = @transform_0, window_bounds = array<i64: 1, 256, 32>}, {transform_indices = @transform_1, window_bounds = array<i64: 1, 256, 32>}, {pipeline_mode = #tpu.pipeline_mode<synchronous>, transform_indices = @transform_2, window_bounds = array<i64: 2, 32, 32>}, {pipeline_mode = #tpu.pipeline_mode<synchronous>, transform_indices = @transform_3, window_bounds = array<i64: 64, 16>}, {pipeline_mode = #tpu.pipeline_mode<synchronous>, transform_indices = @transform_4, window_bounds = array<i64: 16, 64>}, {pipeline_mode = #tpu.pipeline_mode<synchronous>, transform_indices = @transform_5, window_bounds = array<i64: 288, 32>}, {pipeline_mode = #tpu.pipeline_mode<synchronous>, transform_indices = @transform_6, window_bounds = array<i64: 96, 16>}, {pipeline_mode = #tpu.pipeline_mode<synchronous>, transform_indices = @transform_7, window_bounds = array<i64: 144, 16>}, {pipeline_mode = #tpu.pipeline_mode<synchronous>, transform_indices = @transform_8, window_bounds = array<i64: 16, 32>}, {pipeline_mode = #tpu.pipeline_mode<synchronous>, transform_indices = @transform_9, window_bounds = array<i64: 96, 32>}, {pipeline_mode = #tpu.pipeline_mode<synchronous>, transform_indices = @transform_10, window_bounds = array<i64: 9, 64>}, {pipeline_mode = #tpu.pipeline_mode<synchronous>, transform_indices = @transform_11, window_bounds = array<i64: 2, 96>}, {transform_indices = @transform_12, window_bounds = array<i64: 1, 256, 32>}]} {
    %c0 = arith.constant 0 : index
    %c0_0 = arith.constant 0 : index
    %c0_1 = arith.constant 0 : index
    %0 = vector.load %arg1[%c0, %c0_0, %c0_1] : memref<1x256x32xbf16, #tpu.memory_space<vmem>>, vector<1x256x32xbf16>
    %1 = vector.shape_cast %0 : vector<1x256x32xbf16> to vector<256x32xbf16>
    %c0_2 = arith.constant 0 : index
    %c0_3 = arith.constant 0 : index
    %c0_4 = arith.constant 0 : index
    %2 = vector.load %arg2[%c0_2, %c0_3, %c0_4] : memref<1x256x32xbf16, #tpu.memory_space<vmem>>, vector<1x256x32xbf16>
    %3 = vector.shape_cast %2 : vector<1x256x32xbf16> to vector<256x32xbf16>
    %4 = arith.extf %1 : vector<256x32xbf16> to vector<256x32xf32>
    %5 = arith.extf %3 : vector<256x32xbf16> to vector<256x32xf32>
    %cst = arith.constant dense<0.000000e+00> : vector<32xf32>
    %6 = vector.multi_reduction <add>, %4, %cst [0] : vector<256x32xf32> to vector<32xf32>
    %7 = vector.shape_cast %6 : vector<32xf32> to vector<1x32xf32>
    %cst_5 = arith.constant 2.560000e+02 : f32
    %8 = vector.broadcast %cst_5 : f32 to vector<1x32xf32>
    %9 = arith.divf %7, %8 : vector<1x32xf32>
    %cst_6 = arith.constant dense<0.000000e+00> : vector<32xf32>
    %10 = vector.multi_reduction <add>, %5, %cst_6 [0] : vector<256x32xf32> to vector<32xf32>
    %11 = vector.shape_cast %10 : vector<32xf32> to vector<1x32xf32>
    %cst_7 = arith.constant 2.560000e+02 : f32
    %12 = vector.broadcast %cst_7 : f32 to vector<1x32xf32>
    %13 = arith.divf %11, %12 : vector<1x32xf32>
    %14 = tpu.concatenate %9, %13 in 1 : vector<1x32xf32>, vector<1x32xf32> -> vector<1x64xf32>
    %15 = arith.truncf %14 : vector<1x64xf32> to vector<1x64xbf16>
    %c0_8 = arith.constant 0 : index
    %c0_9 = arith.constant 0 : index
    %16 = vector.load %arg4[%c0_8, %c0_9] : memref<64x16xbf16, #tpu.memory_space<vmem>>, vector<64x16xbf16>
    %cst_10 = arith.constant dense<0.000000e+00> : vector<1x16xf32>
    %17 = tpu.matmul %15, %16, %cst_10 {dimension_numbers = #tpu.dot_dimension_numbers<[1], [0], [0], [1], [0, 0, 1, 1], [], []>} : vector<1x64xbf16>, vector<64x16xbf16>, vector<1x16xf32> -> vector<1x16xf32>
    %c3 = arith.constant 3 : index
    %c0_11 = arith.constant 0 : index
    %18 = vector.load %arg11[%c3, %c0_11] : memref<9x64xf32, #tpu.memory_space<vmem>>, vector<1x16xf32>
    %19 = arith.addf %17, %18 : vector<1x16xf32>
    %cst_12 = arith.constant 0.000000e+00 : f32
    %20 = vector.broadcast %cst_12 : f32 to vector<1x16xf32>
    %21 = arith.maximumf %19, %20 : vector<1x16xf32>
    %22 = arith.truncf %21 : vector<1x16xf32> to vector<1x16xbf16>
    %c0_13 = arith.constant 0 : index
    %c0_14 = arith.constant 0 : index
    %23 = vector.load %arg5[%c0_13, %c0_14] : memref<16x64xbf16, #tpu.memory_space<vmem>>, vector<16x64xbf16>
    %cst_15 = arith.constant dense<0.000000e+00> : vector<1x64xf32>
    %24 = tpu.matmul %22, %23, %cst_15 {dimension_numbers = #tpu.dot_dimension_numbers<[1], [0], [0], [1], [0, 0, 1, 1], [], []>} : vector<1x16xbf16>, vector<16x64xbf16>, vector<1x64xf32> -> vector<1x64xf32>
    %c4 = arith.constant 4 : index
    %c0_16 = arith.constant 0 : index
    %25 = vector.load %arg11[%c4, %c0_16] : memref<9x64xf32, #tpu.memory_space<vmem>>, vector<1x64xf32>
    %26 = arith.addf %24, %25 : vector<1x64xf32>
    %cst_17 = arith.constant 0.000000e+00 : f32
    %27 = vector.broadcast %cst_17 : f32 to vector<1x64xf32>
    %28 = arith.subf %27, %26 : vector<1x64xf32>
    %29 = math.exp %28 : vector<1x64xf32>
    %cst_18 = arith.constant 1.000000e+00 : f32
    %30 = vector.broadcast %cst_18 : f32 to vector<1x64xf32>
    %31 = arith.addf %30, %29 : vector<1x64xf32>
    %cst_19 = arith.constant 1.000000e+00 : f32
    %32 = vector.broadcast %cst_19 : f32 to vector<1x64xf32>
    %33 = arith.divf %32, %31 : vector<1x64xf32>
    %c0_20 = arith.constant 0 : index
    %c0_21 = arith.constant 0 : index
    %c0_22 = arith.constant 0 : index
    %34 = vector.load %arg3[%c0_20, %c0_21, %c0_22] : memref<2x32x32xbf16, #tpu.memory_space<vmem>>, vector<1x32x32xbf16>
    %35 = vector.shape_cast %34 : vector<1x32x32xbf16> to vector<32x32xbf16>
    %cst_23 = arith.constant dense<0.000000e+00> : vector<256x32xf32>
    %36 = tpu.matmul %1, %35, %cst_23 {dimension_numbers = #tpu.dot_dimension_numbers<[1], [0], [0], [1], [0, 0, 1, 1], [], []>} : vector<256x32xbf16>, vector<32x32xbf16>, vector<256x32xf32> -> vector<256x32xf32>
    %c0_24 = arith.constant 0 : index
    %c0_25 = arith.constant 0 : index
    %37 = vector.load %arg11[%c0_24, %c0_25] : memref<9x64xf32, #tpu.memory_space<vmem>>, vector<1x32xf32>
    %38 = vector.broadcast %37 : vector<1x32xf32> to vector<256x32xf32>
    %39 = arith.addf %36, %38 : vector<256x32xf32>
    %c1 = arith.constant 1 : index
    %c0_26 = arith.constant 0 : index
    %c0_27 = arith.constant 0 : index
    %40 = vector.load %arg3[%c1, %c0_26, %c0_27] : memref<2x32x32xbf16, #tpu.memory_space<vmem>>, vector<1x32x32xbf16>
    %41 = vector.shape_cast %40 : vector<1x32x32xbf16> to vector<32x32xbf16>
    %cst_28 = arith.constant dense<0.000000e+00> : vector<256x32xf32>
    %42 = tpu.matmul %3, %41, %cst_28 {dimension_numbers = #tpu.dot_dimension_numbers<[1], [0], [0], [1], [0, 0, 1, 1], [], []>} : vector<256x32xbf16>, vector<32x32xbf16>, vector<256x32xf32> -> vector<256x32xf32>
    %c1_29 = arith.constant 1 : index
    %c0_30 = arith.constant 0 : index
    %43 = vector.load %arg11[%c1_29, %c0_30] : memref<9x64xf32, #tpu.memory_space<vmem>>, vector<1x32xf32>
    %44 = vector.broadcast %43 : vector<1x32xf32> to vector<256x32xf32>
    %45 = arith.addf %42, %44 : vector<256x32xf32>
    %46 = arith.mulf %39, %45 : vector<256x32xf32>
    %c2 = arith.constant 2 : index
    %c0_31 = arith.constant 0 : index
    %47 = vector.load %arg11[%c2, %c0_31] : memref<9x64xf32, #tpu.memory_space<vmem>>, vector<1x32xf32>
    %cst_32 = arith.constant 0.000000e+00 : f32
    %48 = vector.broadcast %cst_32 : f32 to vector<1x18x32xf32>
    %c0_33 = arith.constant 0 : index
    %c0_34 = arith.constant 0 : index
    %c0_35 = arith.constant 0 : index
    %49 = vector.load %arg14[%c0_33, %c0_34, %c0_35] : memref<18x18x32xf32, #tpu.memory_space<vmem>>, vector<1x18x32xf32>
    tpu.vector_store %arg14[%c0_33, %c0_34, %c0_35], %48 {strides = array<i32>} : memref<18x18x32xf32, #tpu.memory_space<vmem>>, vector<1x18x32xf32>,
    %cst_36 = arith.constant 0.000000e+00 : f32
    %50 = vector.broadcast %cst_36 : f32 to vector<1x18x32xf32>
    %c17 = arith.constant 17 : index
    %c0_37 = arith.constant 0 : index
    %c0_38 = arith.constant 0 : index
    %51 = vector.load %arg14[%c17, %c0_37, %c0_38] : memref<18x18x32xf32, #tpu.memory_space<vmem>>, vector<1x18x32xf32>
    tpu.vector_store %arg14[%c17, %c0_37, %c0_38], %50 {strides = array<i32>} : memref<18x18x32xf32, #tpu.memory_space<vmem>>, vector<1x18x32xf32>,
    %cst_39 = arith.constant 0.000000e+00 : f32
    %52 = vector.broadcast %cst_39 : f32 to vector<16x1x32xf32>
    %c1_40 = arith.constant 1 : index
    %c0_41 = arith.constant 0 : index
    %c0_42 = arith.constant 0 : index
    %53 = vector.load %arg14[%c1_40, %c0_41, %c0_42] : memref<18x18x32xf32, #tpu.memory_space<vmem>>, vector<16x1x32xf32>
    tpu.vector_store %arg14[%c1_40, %c0_41, %c0_42], %52 {strides = array<i32>} : memref<18x18x32xf32, #tpu.memory_space<vmem>>, vector<16x1x32xf32>,
    %cst_43 = arith.constant 0.000000e+00 : f32
    %54 = vector.broadcast %cst_43 : f32 to vector<16x1x32xf32>
    %c1_44 = arith.constant 1 : index
    %c17_45 = arith.constant 17 : index
    %c0_46 = arith.constant 0 : index
    %55 = vector.load %arg14[%c1_44, %c17_45, %c0_46] : memref<18x18x32xf32, #tpu.memory_space<vmem>>, vector<16x1x32xf32>
    tpu.vector_store %arg14[%c1_44, %c17_45, %c0_46], %54 {strides = array<i32>} : memref<18x18x32xf32, #tpu.memory_space<vmem>>, vector<16x1x32xf32>,
    %56 = vector.shape_cast %46 : vector<256x32xf32> to vector<16x16x32xf32>
    %c1_47 = arith.constant 1 : index
    %c1_48 = arith.constant 1 : index
    %c0_49 = arith.constant 0 : index
    %57 = vector.load %arg14[%c1_47, %c1_48, %c0_49] : memref<18x18x32xf32, #tpu.memory_space<vmem>>, vector<16x16x32xf32>
    tpu.vector_store %arg14[%c1_47, %c1_48, %c0_49], %56 {strides = array<i32>} : memref<18x18x32xf32, #tpu.memory_space<vmem>>, vector<16x16x32xf32>,
    %c0_50 = arith.constant 0 : index
    %c0_51 = arith.constant 0 : index
    %c0_52 = arith.constant 0 : index
    %58 = vector.load %arg14[%c0_50, %c0_51, %c0_52] : memref<18x18x32xf32, #tpu.memory_space<vmem>>, vector<16x16x32xf32>
    %59 = vector.shape_cast %58 : vector<16x16x32xf32> to vector<256x32xf32>
    %60 = arith.truncf %59 : vector<256x32xf32> to vector<256x32xbf16>
    %c0_53 = arith.constant 0 : index
    %c0_54 = arith.constant 0 : index
    %61 = vector.load %arg15[%c0_53, %c0_54] : memref<256x288xbf16, #tpu.memory_space<vmem>>, vector<256x32xbf16>
    tpu.vector_store %arg15[%c0_53, %c0_54], %60 {strides = array<i32>} : memref<256x288xbf16, #tpu.memory_space<vmem>>, vector<256x32xbf16>,
    %c0_55 = arith.constant 0 : index
    %c1_56 = arith.constant 1 : index
    %c0_57 = arith.constant 0 : index
    %62 = vector.load %arg14[%c0_55, %c1_56, %c0_57] : memref<18x18x32xf32, #tpu.memory_space<vmem>>, vector<16x16x32xf32>
    %63 = vector.shape_cast %62 : vector<16x16x32xf32> to vector<256x32xf32>
    %64 = arith.truncf %63 : vector<256x32xf32> to vector<256x32xbf16>
    %c0_58 = arith.constant 0 : index
    %c32 = arith.constant 32 : index
    %65 = vector.load %arg15[%c0_58, %c32] : memref<256x288xbf16, #tpu.memory_space<vmem>>, vector<256x32xbf16>
    tpu.vector_store %arg15[%c0_58, %c32], %64 {strides = array<i32>} : memref<256x288xbf16, #tpu.memory_space<vmem>>, vector<256x32xbf16>,
    %c0_59 = arith.constant 0 : index
    %c2_60 = arith.constant 2 : index
    %c0_61 = arith.constant 0 : index
    %66 = vector.load %arg14[%c0_59, %c2_60, %c0_61] : memref<18x18x32xf32, #tpu.memory_space<vmem>>, vector<16x16x32xf32>
    %67 = vector.shape_cast %66 : vector<16x16x32xf32> to vector<256x32xf32>
    %68 = arith.truncf %67 : vector<256x32xf32> to vector<256x32xbf16>
    %c0_62 = arith.constant 0 : index
    %c64 = arith.constant 64 : index
    %69 = vector.load %arg15[%c0_62, %c64] : memref<256x288xbf16, #tpu.memory_space<vmem>>, vector<256x32xbf16>
    tpu.vector_store %arg15[%c0_62, %c64], %68 {strides = array<i32>} : memref<256x288xbf16, #tpu.memory_space<vmem>>, vector<256x32xbf16>,
    %c1_63 = arith.constant 1 : index
    %c0_64 = arith.constant 0 : index
    %c0_65 = arith.constant 0 : index
    %70 = vector.load %arg14[%c1_63, %c0_64, %c0_65] : memref<18x18x32xf32, #tpu.memory_space<vmem>>, vector<16x16x32xf32>
    %71 = vector.shape_cast %70 : vector<16x16x32xf32> to vector<256x32xf32>
    %72 = arith.truncf %71 : vector<256x32xf32> to vector<256x32xbf16>
    %c0_66 = arith.constant 0 : index
    %c96 = arith.constant 96 : index
    %73 = vector.load %arg15[%c0_66, %c96] : memref<256x288xbf16, #tpu.memory_space<vmem>>, vector<256x32xbf16>
    tpu.vector_store %arg15[%c0_66, %c96], %72 {strides = array<i32>} : memref<256x288xbf16, #tpu.memory_space<vmem>>, vector<256x32xbf16>,
    %c1_67 = arith.constant 1 : index
    %c1_68 = arith.constant 1 : index
    %c0_69 = arith.constant 0 : index
    %74 = vector.load %arg14[%c1_67, %c1_68, %c0_69] : memref<18x18x32xf32, #tpu.memory_space<vmem>>, vector<16x16x32xf32>
    %75 = vector.shape_cast %74 : vector<16x16x32xf32> to vector<256x32xf32>
    %76 = arith.truncf %75 : vector<256x32xf32> to vector<256x32xbf16>
    %c0_70 = arith.constant 0 : index
    %c128 = arith.constant 128 : index
    %77 = vector.load %arg15[%c0_70, %c128] : memref<256x288xbf16, #tpu.memory_space<vmem>>, vector<256x32xbf16>
    tpu.vector_store %arg15[%c0_70, %c128], %76 {strides = array<i32>} : memref<256x288xbf16, #tpu.memory_space<vmem>>, vector<256x32xbf16>,
    %c1_71 = arith.constant 1 : index
    %c2_72 = arith.constant 2 : index
    %c0_73 = arith.constant 0 : index
    %78 = vector.load %arg14[%c1_71, %c2_72, %c0_73] : memref<18x18x32xf32, #tpu.memory_space<vmem>>, vector<16x16x32xf32>
    %79 = vector.shape_cast %78 : vector<16x16x32xf32> to vector<256x32xf32>
    %80 = arith.truncf %79 : vector<256x32xf32> to vector<256x32xbf16>
    %c0_74 = arith.constant 0 : index
    %c160 = arith.constant 160 : index
    %81 = vector.load %arg15[%c0_74, %c160] : memref<256x288xbf16, #tpu.memory_space<vmem>>, vector<256x32xbf16>
    tpu.vector_store %arg15[%c0_74, %c160], %80 {strides = array<i32>} : memref<256x288xbf16, #tpu.memory_space<vmem>>, vector<256x32xbf16>,
    %c2_75 = arith.constant 2 : index
    %c0_76 = arith.constant 0 : index
    %c0_77 = arith.constant 0 : index
    %82 = vector.load %arg14[%c2_75, %c0_76, %c0_77] : memref<18x18x32xf32, #tpu.memory_space<vmem>>, vector<16x16x32xf32>
    %83 = vector.shape_cast %82 : vector<16x16x32xf32> to vector<256x32xf32>
    %84 = arith.truncf %83 : vector<256x32xf32> to vector<256x32xbf16>
    %c0_78 = arith.constant 0 : index
    %c192 = arith.constant 192 : index
    %85 = vector.load %arg15[%c0_78, %c192] : memref<256x288xbf16, #tpu.memory_space<vmem>>, vector<256x32xbf16>
    tpu.vector_store %arg15[%c0_78, %c192], %84 {strides = array<i32>} : memref<256x288xbf16, #tpu.memory_space<vmem>>, vector<256x32xbf16>,
    %c2_79 = arith.constant 2 : index
    %c1_80 = arith.constant 1 : index
    %c0_81 = arith.constant 0 : index
    %86 = vector.load %arg14[%c2_79, %c1_80, %c0_81] : memref<18x18x32xf32, #tpu.memory_space<vmem>>, vector<16x16x32xf32>
    %87 = vector.shape_cast %86 : vector<16x16x32xf32> to vector<256x32xf32>
    %88 = arith.truncf %87 : vector<256x32xf32> to vector<256x32xbf16>
    %c0_82 = arith.constant 0 : index
    %c224 = arith.constant 224 : index
    %89 = vector.load %arg15[%c0_82, %c224] : memref<256x288xbf16, #tpu.memory_space<vmem>>, vector<256x32xbf16>
    tpu.vector_store %arg15[%c0_82, %c224], %88 {strides = array<i32>} : memref<256x288xbf16, #tpu.memory_space<vmem>>, vector<256x32xbf16>,
    %c2_83 = arith.constant 2 : index
    %c2_84 = arith.constant 2 : index
    %c0_85 = arith.constant 0 : index
    %90 = vector.load %arg14[%c2_83, %c2_84, %c0_85] : memref<18x18x32xf32, #tpu.memory_space<vmem>>, vector<16x16x32xf32>
    %91 = vector.shape_cast %90 : vector<16x16x32xf32> to vector<256x32xf32>
    %92 = arith.truncf %91 : vector<256x32xf32> to vector<256x32xbf16>
    %c0_86 = arith.constant 0 : index
    %c256 = arith.constant 256 : index
    %93 = vector.load %arg15[%c0_86, %c256] : memref<256x288xbf16, #tpu.memory_space<vmem>>, vector<256x32xbf16>
    tpu.vector_store %arg15[%c0_86, %c256], %92 {strides = array<i32>} : memref<256x288xbf16, #tpu.memory_space<vmem>>, vector<256x32xbf16>,
    %c0_87 = arith.constant 0 : index
    %c0_88 = arith.constant 0 : index
    %94 = vector.load %arg15[%c0_87, %c0_88] : memref<256x288xbf16, #tpu.memory_space<vmem>>, vector<256x288xbf16>
    %c0_89 = arith.constant 0 : index
    %c0_90 = arith.constant 0 : index
    %95 = vector.load %arg6[%c0_89, %c0_90] : memref<288x32xbf16, #tpu.memory_space<vmem>>, vector<288x32xbf16>
    %cst_91 = arith.constant dense<0.000000e+00> : vector<256x32xf32>
    %96 = tpu.matmul %94, %95, %cst_91 {dimension_numbers = #tpu.dot_dimension_numbers<[1], [0], [0], [1], [0, 0, 1, 1], [], []>} : vector<256x288xbf16>, vector<288x32xbf16>, vector<256x32xf32> -> vector<256x32xf32>
    %97 = vector.broadcast %47 : vector<1x32xf32> to vector<256x32xf32>
    %98 = arith.addf %96, %97 : vector<256x32xf32>
    %cst_92 = arith.constant 0.000000e+00 : f32
    %99 = vector.broadcast %cst_92 : f32 to vector<256x32xf32>
    %100 = arith.maximumf %98, %99 : vector<256x32xf32>
    %101 = vector.extract_strided_slice %33 {offsets = [0, 0], sizes = [1, 32], strides = [1, 1]} : vector<1x64xf32> to vector<1x32xf32>
    %102 = vector.broadcast %101 : vector<1x32xf32> to vector<256x32xf32>
    %103 = arith.mulf %4, %102 : vector<256x32xf32>
    %104 = arith.truncf %103 : vector<256x32xf32> to vector<256x32xbf16>
    %c0_93 = arith.constant 0 : index
    %c0_94 = arith.constant 0 : index
    %105 = vector.load %arg17[%c0_93, %c0_94] : memref<256x96xbf16, #tpu.memory_space<vmem>>, vector<256x32xbf16>
    tpu.vector_store %arg17[%c0_93, %c0_94], %104 {strides = array<i32>} : memref<256x96xbf16, #tpu.memory_space<vmem>>, vector<256x32xbf16>,
    %106 = vector.extract_strided_slice %33 {offsets = [0, 32], sizes = [1, 32], strides = [1, 1]} : vector<1x64xf32> to vector<1x32xf32>
    %107 = vector.broadcast %106 : vector<1x32xf32> to vector<256x32xf32>
    %108 = arith.mulf %5, %107 : vector<256x32xf32>
    %109 = arith.truncf %108 : vector<256x32xf32> to vector<256x32xbf16>
    %c0_95 = arith.constant 0 : index
    %c32_96 = arith.constant 32 : index
    %110 = vector.load %arg17[%c0_95, %c32_96] : memref<256x96xbf16, #tpu.memory_space<vmem>>, vector<256x32xbf16>
    tpu.vector_store %arg17[%c0_95, %c32_96], %109 {strides = array<i32>} : memref<256x96xbf16, #tpu.memory_space<vmem>>, vector<256x32xbf16>,
    %111 = arith.truncf %100 : vector<256x32xf32> to vector<256x32xbf16>
    %c0_97 = arith.constant 0 : index
    %c64_98 = arith.constant 64 : index
    %112 = vector.load %arg17[%c0_97, %c64_98] : memref<256x96xbf16, #tpu.memory_space<vmem>>, vector<256x32xbf16>
    tpu.vector_store %arg17[%c0_97, %c64_98], %111 {strides = array<i32>} : memref<256x96xbf16, #tpu.memory_space<vmem>>, vector<256x32xbf16>,
    %c0_99 = arith.constant 0 : index
    %c0_100 = arith.constant 0 : index
    %113 = vector.load %arg17[%c0_99, %c0_100] : memref<256x96xbf16, #tpu.memory_space<vmem>>, vector<256x96xbf16>
    %c0_101 = arith.constant 0 : index
    %c0_102 = arith.constant 0 : index
    %114 = vector.load %arg10[%c0_101, %c0_102] : memref<96x32xbf16, #tpu.memory_space<vmem>>, vector<96x32xbf16>
    %cst_103 = arith.constant dense<0.000000e+00> : vector<256x32xf32>
    %115 = tpu.matmul %113, %114, %cst_103 {dimension_numbers = #tpu.dot_dimension_numbers<[1], [0], [0], [1], [0, 0, 1, 1], [], []>} : vector<256x96xbf16>, vector<96x32xbf16>, vector<256x32xf32> -> vector<256x32xf32>
    %c8 = arith.constant 8 : index
    %c0_104 = arith.constant 0 : index
    %116 = vector.load %arg11[%c8, %c0_104] : memref<9x64xf32, #tpu.memory_space<vmem>>, vector<1x32xf32>
    %117 = vector.broadcast %116 : vector<1x32xf32> to vector<256x32xf32>
    %118 = arith.addf %115, %117 : vector<256x32xf32>
    %c0_105 = arith.constant 0 : index
    %c0_106 = arith.constant 0 : index
    %c0_107 = arith.constant 0 : index
    %119 = vector.load %arg13[%c0_105, %c0_106, %c0_107] : memref<1x256x32xf32, #tpu.memory_space<vmem>>, vector<1x256x32xf32>
    %120 = vector.shape_cast %119 : vector<1x256x32xf32> to vector<256x32xf32>
    %121 = vector.shape_cast %118 : vector<256x32xf32> to vector<1x256x32xf32>
    tpu.vector_store %arg13[%c0_105, %c0_106, %c0_107], %121 {strides = array<i32>} : memref<1x256x32xf32, #tpu.memory_space<vmem>>, vector<1x256x32xf32>,
    %122 = arith.extf %113 : vector<256x96xbf16> to vector<256x96xf32>
    %c0_108 = arith.constant 0 : index
    %c0_109 = arith.constant 0 : index
    %123 = vector.load %arg12[%c0_108, %c0_109] : memref<2x96xf32, #tpu.memory_space<vmem>>, vector<1x96xf32>
    %124 = vector.broadcast %123 : vector<1x96xf32> to vector<256x96xf32>
    %125 = arith.mulf %122, %124 : vector<256x96xf32>
    %c1_110 = arith.constant 1 : index
    %c0_111 = arith.constant 0 : index
    %126 = vector.load %arg12[%c1_110, %c0_111] : memref<2x96xf32, #tpu.memory_space<vmem>>, vector<1x96xf32>
    %127 = vector.broadcast %126 : vector<1x96xf32> to vector<256x96xf32>
    %128 = arith.addf %125, %127 : vector<256x96xf32>
    %cst_112 = arith.constant 0.000000e+00 : f32
    %129 = vector.broadcast %cst_112 : f32 to vector<256x96xf32>
    %130 = arith.maximumf %128, %129 : vector<256x96xf32>
    %131 = arith.truncf %130 : vector<256x96xf32> to vector<256x96xbf16>
    %c0_113 = arith.constant 0 : index
    %c0_114 = arith.constant 0 : index
    %132 = vector.load %arg17[%c0_113, %c0_114] : memref<256x96xbf16, #tpu.memory_space<vmem>>, vector<256x96xbf16>
    tpu.vector_store %arg17[%c0_113, %c0_114], %131 {strides = array<i32>} : memref<256x96xbf16, #tpu.memory_space<vmem>>, vector<256x96xbf16>,
    %c0_115 = arith.constant 0 : index
    %c0_116 = arith.constant 0 : index
    %133 = vector.load %arg17[%c0_115, %c0_116] : memref<256x96xbf16, #tpu.memory_space<vmem>>, vector<256x96xbf16>
    %c0_117 = arith.constant 0 : index
    %c0_118 = arith.constant 0 : index
    %134 = vector.load %arg7[%c0_117, %c0_118] : memref<96x16xbf16, #tpu.memory_space<vmem>>, vector<96x16xbf16>
    %cst_119 = arith.constant dense<0.000000e+00> : vector<256x16xf32>
    %135 = tpu.matmul %133, %134, %cst_119 {dimension_numbers = #tpu.dot_dimension_numbers<[1], [0], [0], [1], [0, 0, 1, 1], [], []>} : vector<256x96xbf16>, vector<96x16xbf16>, vector<256x16xf32> -> vector<256x16xf32>
    %c5 = arith.constant 5 : index
    %c0_120 = arith.constant 0 : index
    %136 = vector.load %arg11[%c5, %c0_120] : memref<9x64xf32, #tpu.memory_space<vmem>>, vector<1x16xf32>
    %137 = vector.broadcast %136 : vector<1x16xf32> to vector<256x16xf32>
    %138 = arith.addf %135, %137 : vector<256x16xf32>
    %cst_121 = arith.constant 0.000000e+00 : f32
    %139 = vector.broadcast %cst_121 : f32 to vector<256x16xf32>
    %140 = arith.maximumf %138, %139 : vector<256x16xf32>
    %c6 = arith.constant 6 : index
    %c0_122 = arith.constant 0 : index
    %141 = vector.load %arg11[%c6, %c0_122] : memref<9x64xf32, #tpu.memory_space<vmem>>, vector<1x16xf32>
    %142 = vector.shape_cast %140 : vector<256x16xf32> to vector<16x16x16xf32>
    %c1_123 = arith.constant 1 : index
    %c1_124 = arith.constant 1 : index
    %c0_125 = arith.constant 0 : index
    %143 = vector.load %arg14[%c1_123, %c1_124, %c0_125] : memref<18x18x32xf32, #tpu.memory_space<vmem>>, vector<16x16x16xf32>
    tpu.vector_store %arg14[%c1_123, %c1_124, %c0_125], %142 {strides = array<i32>} : memref<18x18x32xf32, #tpu.memory_space<vmem>>, vector<16x16x16xf32>,
    %c0_126 = arith.constant 0 : index
    %c0_127 = arith.constant 0 : index
    %c0_128 = arith.constant 0 : index
    %144 = vector.load %arg14[%c0_126, %c0_127, %c0_128] : memref<18x18x32xf32, #tpu.memory_space<vmem>>, vector<16x16x16xf32>
    %145 = vector.shape_cast %144 : vector<16x16x16xf32> to vector<256x16xf32>
    %146 = arith.truncf %145 : vector<256x16xf32> to vector<256x16xbf16>
    %c0_129 = arith.constant 0 : index
    %c0_130 = arith.constant 0 : index
    %147 = vector.load %arg16[%c0_129, %c0_130] : memref<256x144xbf16, #tpu.memory_space<vmem>>, vector<256x16xbf16>
    tpu.vector_store %arg16[%c0_129, %c0_130], %146 {strides = array<i32>} : memref<256x144xbf16, #tpu.memory_space<vmem>>, vector<256x16xbf16>,
    %c0_131 = arith.constant 0 : index
    %c1_132 = arith.constant 1 : index
    %c0_133 = arith.constant 0 : index
    %148 = vector.load %arg14[%c0_131, %c1_132, %c0_133] : memref<18x18x32xf32, #tpu.memory_space<vmem>>, vector<16x16x16xf32>
    %149 = vector.shape_cast %148 : vector<16x16x16xf32> to vector<256x16xf32>
    %150 = arith.truncf %149 : vector<256x16xf32> to vector<256x16xbf16>
    %c0_134 = arith.constant 0 : index
    %c16 = arith.constant 16 : index
    %151 = vector.load %arg16[%c0_134, %c16] : memref<256x144xbf16, #tpu.memory_space<vmem>>, vector<256x16xbf16>
    tpu.vector_store %arg16[%c0_134, %c16], %150 {strides = array<i32>} : memref<256x144xbf16, #tpu.memory_space<vmem>>, vector<256x16xbf16>,
    %c0_135 = arith.constant 0 : index
    %c2_136 = arith.constant 2 : index
    %c0_137 = arith.constant 0 : index
    %152 = vector.load %arg14[%c0_135, %c2_136, %c0_137] : memref<18x18x32xf32, #tpu.memory_space<vmem>>, vector<16x16x16xf32>
    %153 = vector.shape_cast %152 : vector<16x16x16xf32> to vector<256x16xf32>
    %154 = arith.truncf %153 : vector<256x16xf32> to vector<256x16xbf16>
    %c0_138 = arith.constant 0 : index
    %c32_139 = arith.constant 32 : index
    %155 = vector.load %arg16[%c0_138, %c32_139] : memref<256x144xbf16, #tpu.memory_space<vmem>>, vector<256x16xbf16>
    tpu.vector_store %arg16[%c0_138, %c32_139], %154 {strides = array<i32>} : memref<256x144xbf16, #tpu.memory_space<vmem>>, vector<256x16xbf16>,
    %c1_140 = arith.constant 1 : index
    %c0_141 = arith.constant 0 : index
    %c0_142 = arith.constant 0 : index
    %156 = vector.load %arg14[%c1_140, %c0_141, %c0_142] : memref<18x18x32xf32, #tpu.memory_space<vmem>>, vector<16x16x16xf32>
    %157 = vector.shape_cast %156 : vector<16x16x16xf32> to vector<256x16xf32>
    %158 = arith.truncf %157 : vector<256x16xf32> to vector<256x16xbf16>
    %c0_143 = arith.constant 0 : index
    %c48 = arith.constant 48 : index
    %159 = vector.load %arg16[%c0_143, %c48] : memref<256x144xbf16, #tpu.memory_space<vmem>>, vector<256x16xbf16>
    tpu.vector_store %arg16[%c0_143, %c48], %158 {strides = array<i32>} : memref<256x144xbf16, #tpu.memory_space<vmem>>, vector<256x16xbf16>,
    %c1_144 = arith.constant 1 : index
    %c1_145 = arith.constant 1 : index
    %c0_146 = arith.constant 0 : index
    %160 = vector.load %arg14[%c1_144, %c1_145, %c0_146] : memref<18x18x32xf32, #tpu.memory_space<vmem>>, vector<16x16x16xf32>
    %161 = vector.shape_cast %160 : vector<16x16x16xf32> to vector<256x16xf32>
    %162 = arith.truncf %161 : vector<256x16xf32> to vector<256x16xbf16>
    %c0_147 = arith.constant 0 : index
    %c64_148 = arith.constant 64 : index
    %163 = vector.load %arg16[%c0_147, %c64_148] : memref<256x144xbf16, #tpu.memory_space<vmem>>, vector<256x16xbf16>
    tpu.vector_store %arg16[%c0_147, %c64_148], %162 {strides = array<i32>} : memref<256x144xbf16, #tpu.memory_space<vmem>>, vector<256x16xbf16>,
    %c1_149 = arith.constant 1 : index
    %c2_150 = arith.constant 2 : index
    %c0_151 = arith.constant 0 : index
    %164 = vector.load %arg14[%c1_149, %c2_150, %c0_151] : memref<18x18x32xf32, #tpu.memory_space<vmem>>, vector<16x16x16xf32>
    %165 = vector.shape_cast %164 : vector<16x16x16xf32> to vector<256x16xf32>
    %166 = arith.truncf %165 : vector<256x16xf32> to vector<256x16xbf16>
    %c0_152 = arith.constant 0 : index
    %c80 = arith.constant 80 : index
    %167 = vector.load %arg16[%c0_152, %c80] : memref<256x144xbf16, #tpu.memory_space<vmem>>, vector<256x16xbf16>
    tpu.vector_store %arg16[%c0_152, %c80], %166 {strides = array<i32>} : memref<256x144xbf16, #tpu.memory_space<vmem>>, vector<256x16xbf16>,
    %c2_153 = arith.constant 2 : index
    %c0_154 = arith.constant 0 : index
    %c0_155 = arith.constant 0 : index
    %168 = vector.load %arg14[%c2_153, %c0_154, %c0_155] : memref<18x18x32xf32, #tpu.memory_space<vmem>>, vector<16x16x16xf32>
    %169 = vector.shape_cast %168 : vector<16x16x16xf32> to vector<256x16xf32>
    %170 = arith.truncf %169 : vector<256x16xf32> to vector<256x16xbf16>
    %c0_156 = arith.constant 0 : index
    %c96_157 = arith.constant 96 : index
    %171 = vector.load %arg16[%c0_156, %c96_157] : memref<256x144xbf16, #tpu.memory_space<vmem>>, vector<256x16xbf16>
    tpu.vector_store %arg16[%c0_156, %c96_157], %170 {strides = array<i32>} : memref<256x144xbf16, #tpu.memory_space<vmem>>, vector<256x16xbf16>,
    %c2_158 = arith.constant 2 : index
    %c1_159 = arith.constant 1 : index
    %c0_160 = arith.constant 0 : index
    %172 = vector.load %arg14[%c2_158, %c1_159, %c0_160] : memref<18x18x32xf32, #tpu.memory_space<vmem>>, vector<16x16x16xf32>
    %173 = vector.shape_cast %172 : vector<16x16x16xf32> to vector<256x16xf32>
    %174 = arith.truncf %173 : vector<256x16xf32> to vector<256x16xbf16>
    %c0_161 = arith.constant 0 : index
    %c112 = arith.constant 112 : index
    %175 = vector.load %arg16[%c0_161, %c112] : memref<256x144xbf16, #tpu.memory_space<vmem>>, vector<256x16xbf16>
    tpu.vector_store %arg16[%c0_161, %c112], %174 {strides = array<i32>} : memref<256x144xbf16, #tpu.memory_space<vmem>>, vector<256x16xbf16>,
    %c2_162 = arith.constant 2 : index
    %c2_163 = arith.constant 2 : index
    %c0_164 = arith.constant 0 : index
    %176 = vector.load %arg14[%c2_162, %c2_163, %c0_164] : memref<18x18x32xf32, #tpu.memory_space<vmem>>, vector<16x16x16xf32>
    %177 = vector.shape_cast %176 : vector<16x16x16xf32> to vector<256x16xf32>
    %178 = arith.truncf %177 : vector<256x16xf32> to vector<256x16xbf16>
    %c0_165 = arith.constant 0 : index
    %c128_166 = arith.constant 128 : index
    %179 = vector.load %arg16[%c0_165, %c128_166] : memref<256x144xbf16, #tpu.memory_space<vmem>>, vector<256x16xbf16>
    tpu.vector_store %arg16[%c0_165, %c128_166], %178 {strides = array<i32>} : memref<256x144xbf16, #tpu.memory_space<vmem>>, vector<256x16xbf16>,
    %c0_167 = arith.constant 0 : index
    %c0_168 = arith.constant 0 : index
    %180 = vector.load %arg16[%c0_167, %c0_168] : memref<256x144xbf16, #tpu.memory_space<vmem>>, vector<256x144xbf16>
    %c0_169 = arith.constant 0 : index
    %c0_170 = arith.constant 0 : index
    %181 = vector.load %arg8[%c0_169, %c0_170] : memref<144x16xbf16, #tpu.memory_space<vmem>>, vector<144x16xbf16>
    %cst_171 = arith.constant dense<0.000000e+00> : vector<256x16xf32>
    %182 = tpu.matmul %180, %181, %cst_171 {dimension_numbers = #tpu.dot_dimension_numbers<[1], [0], [0], [1], [0, 0, 1, 1], [], []>} : vector<256x144xbf16>, vector<144x16xbf16>, vector<256x16xf32> -> vector<256x16xf32>
    %183 = vector.broadcast %141 : vector<1x16xf32> to vector<256x16xf32>
    %184 = arith.addf %182, %183 : vector<256x16xf32>
    %cst_172 = arith.constant 0.000000e+00 : f32
    %185 = vector.broadcast %cst_172 : f32 to vector<256x16xf32>
    %186 = arith.maximumf %184, %185 : vector<256x16xf32>
    %187 = arith.truncf %186 : vector<256x16xf32> to vector<256x16xbf16>
    %c0_173 = arith.constant 0 : index
    %c0_174 = arith.constant 0 : index
    %188 = vector.load %arg9[%c0_173, %c0_174] : memref<16x32xbf16, #tpu.memory_space<vmem>>, vector<16x32xbf16>
    %cst_175 = arith.constant dense<0.000000e+00> : vector<256x32xf32>
    %189 = tpu.matmul %187, %188, %cst_175 {dimension_numbers = #tpu.dot_dimension_numbers<[1], [0], [0], [1], [0, 0, 1, 1], [], []>} : vector<256x16xbf16>, vector<16x32xbf16>, vector<256x32xf32> -> vector<256x32xf32>
    %c7 = arith.constant 7 : index
    %c0_176 = arith.constant 0 : index
    %190 = vector.load %arg11[%c7, %c0_176] : memref<9x64xf32, #tpu.memory_space<vmem>>, vector<1x32xf32>
    %191 = vector.broadcast %190 : vector<1x32xf32> to vector<256x32xf32>
    %192 = arith.addf %189, %191 : vector<256x32xf32>
    %c0_177 = arith.constant 0 : index
    %c0_178 = arith.constant 0 : index
    %c0_179 = arith.constant 0 : index
    %193 = vector.load %arg13[%c0_177, %c0_178, %c0_179] : memref<1x256x32xf32, #tpu.memory_space<vmem>>, vector<1x256x32xf32>
    %194 = vector.shape_cast %193 : vector<1x256x32xf32> to vector<256x32xf32>
    %195 = arith.addf %192, %194 : vector<256x32xf32>
    %c0_180 = arith.constant 0 : index
    %c0_181 = arith.constant 0 : index
    %c0_182 = arith.constant 0 : index
    %196 = vector.load %arg13[%c0_180, %c0_181, %c0_182] : memref<1x256x32xf32, #tpu.memory_space<vmem>>, vector<1x256x32xf32>
    %197 = vector.shape_cast %196 : vector<1x256x32xf32> to vector<256x32xf32>
    %198 = vector.shape_cast %195 : vector<256x32xf32> to vector<1x256x32xf32>
    tpu.vector_store %arg13[%c0_180, %c0_181, %c0_182], %198 {strides = array<i32>} : memref<1x256x32xf32, #tpu.memory_space<vmem>>, vector<1x256x32xf32>,
    return
  }
  func.func @transform_0(%arg0: i32) -> (i32, i32, i32) {
    %c0_i32 = arith.constant 0 : i32
    %c0_i32_0 = arith.constant 0 : i32
    %c0_i32_1 = arith.constant 0 : i32
    return %arg0, %c0_i32, %c0_i32_0 : i32, i32, i32
  }
  func.func @transform_1(%arg0: i32) -> (i32, i32, i32) {
    %c0_i32 = arith.constant 0 : i32
    %c0_i32_0 = arith.constant 0 : i32
    %c0_i32_1 = arith.constant 0 : i32
    return %arg0, %c0_i32, %c0_i32_0 : i32, i32, i32
  }
  func.func @transform_2(%arg0: i32) -> (i32, i32, i32) {
    %c0_i32 = arith.constant 0 : i32
    %c0_i32_0 = arith.constant 0 : i32
    %c0_i32_1 = arith.constant 0 : i32
    %c0_i32_2 = arith.constant 0 : i32
    return %c0_i32, %c0_i32_0, %c0_i32_1 : i32, i32, i32
  }
  func.func @transform_3(%arg0: i32) -> (i32, i32) {
    %c0_i32 = arith.constant 0 : i32
    %c0_i32_0 = arith.constant 0 : i32
    %c0_i32_1 = arith.constant 0 : i32
    return %c0_i32, %c0_i32_0 : i32, i32
  }
  func.func @transform_4(%arg0: i32) -> (i32, i32) {
    %c0_i32 = arith.constant 0 : i32
    %c0_i32_0 = arith.constant 0 : i32
    %c0_i32_1 = arith.constant 0 : i32
    return %c0_i32, %c0_i32_0 : i32, i32
  }
  func.func @transform_5(%arg0: i32) -> (i32, i32) {
    %c0_i32 = arith.constant 0 : i32
    %c0_i32_0 = arith.constant 0 : i32
    %c0_i32_1 = arith.constant 0 : i32
    return %c0_i32, %c0_i32_0 : i32, i32
  }
  func.func @transform_6(%arg0: i32) -> (i32, i32) {
    %c0_i32 = arith.constant 0 : i32
    %c0_i32_0 = arith.constant 0 : i32
    %c0_i32_1 = arith.constant 0 : i32
    return %c0_i32, %c0_i32_0 : i32, i32
  }
  func.func @transform_7(%arg0: i32) -> (i32, i32) {
    %c0_i32 = arith.constant 0 : i32
    %c0_i32_0 = arith.constant 0 : i32
    %c0_i32_1 = arith.constant 0 : i32
    return %c0_i32, %c0_i32_0 : i32, i32
  }
  func.func @transform_8(%arg0: i32) -> (i32, i32) {
    %c0_i32 = arith.constant 0 : i32
    %c0_i32_0 = arith.constant 0 : i32
    %c0_i32_1 = arith.constant 0 : i32
    return %c0_i32, %c0_i32_0 : i32, i32
  }
  func.func @transform_9(%arg0: i32) -> (i32, i32) {
    %c0_i32 = arith.constant 0 : i32
    %c0_i32_0 = arith.constant 0 : i32
    %c0_i32_1 = arith.constant 0 : i32
    return %c0_i32, %c0_i32_0 : i32, i32
  }
  func.func @transform_10(%arg0: i32) -> (i32, i32) {
    %c0_i32 = arith.constant 0 : i32
    %c0_i32_0 = arith.constant 0 : i32
    %c0_i32_1 = arith.constant 0 : i32
    return %c0_i32, %c0_i32_0 : i32, i32
  }
  func.func @transform_11(%arg0: i32) -> (i32, i32) {
    %c0_i32 = arith.constant 0 : i32
    %c0_i32_0 = arith.constant 0 : i32
    %c0_i32_1 = arith.constant 0 : i32
    return %c0_i32, %c0_i32_0 : i32, i32
  }
  func.func @transform_12(%arg0: i32) -> (i32, i32, i32) {
    %c0_i32 = arith.constant 0 : i32
    %c0_i32_0 = arith.constant 0 : i32
    %c0_i32_1 = arith.constant 0 : i32
    return %arg0, %c0_i32, %c0_i32_0 : i32, i32, i32
  }
}

</mosaic_0001>

<bundles_post_ra>
// kernel: bifusion_forward.1
= control target key start
LH: loop header
LB: loop body
LE: loop exit
PB: predicated region body
PF: predicated region fallthrough
CT: control target
= control target key end

     0   :  { %s9763_s0 = inlined_call_operand.vmem [shape: bf16[2,256,32], index: 0, kind: input, shape index: {}]   ;;  %s9764_s1 = inlined_call_operand.vmem [shape: bf16[2,256,32], index: 1, kind: input, shape index: {}]   ;;  %s9765_s2 = inlined_call_operand.vmem [shape: bf16[2,32,32], index: 2, kind: input, shape index: {}]   ;;  %s9766_s3 = inlined_call_operand.vmem [shape: bf16[64,16], index: 3, kind: input, shape index: {}]   ;;  %s9767_s4 = inlined_call_operand.vmem [shape: bf16[16,64], index: 4, kind: input, shape index: {}]   ;;  %s9768_s5 = inlined_call_operand.vmem [shape: bf16[288,32], index: 5, kind: input, shape index: {}]   ;;  %s9769_s6 = inlined_call_operand.vmem [shape: bf16[96,16], index: 6, kind: input, shape index: {}]   ;;  %s9770_s7 = inlined_call_operand.vmem [shape: bf16[144,16], index: 7, kind: input, shape index: {}]   ;;  %s9771_s8 = inlined_call_operand.vmem [shape: bf16[16,32], index: 8, kind: input, shape index: {}]   ;;  %s9772_s9 = inlined_call_operand.vmem [shape: bf16[96,32], index: 9, kind: input, shape index: {}]   ;;  %s9773_s10 = inlined_call_operand.vmem [shape: f32[9,64], index: 10, kind: input, shape index: {}]   ;;  %s9774_s11 = inlined_call_operand.vmem [shape: f32[2,96], index: 11, kind: input, shape index: {}]   ;;  %s9775_s12 = inlined_call_operand.hbm [shape: f32[2,256,32], index: 12, kind: output, shape index: {}]  }
   0x1   :  { %9883 = sst [smem:[#allocation25_spill]] %s9763_s0 }
   0x2   :  { %17 = vsyncpa [#allocation7], 0 }
   0x3   :  { %19 = vsyncpa [#allocation7 + $0x1], 0  ;;  %s7061_s21 = smov 0   ;;  %s7063_s22 = smov 0  }
   0x4   :  { %s7065_s23 = smov 0   ;;  %s7067_s24 = smov 0  }
   0x5 LB: > { %s7082_s25 = sadd.s32 4294967295, %s6981_s24   ;;  %s6059_s26 = sadd.s32 4294967294, %s6981_s24   ;;  %s6981_s24 = sphi %s7067_s24, %s9992_s24   ;;  %s6977_s23 = sphi %s7065_s23, %s9991_s23   ;;  %s6973_s22 = sphi %s7063_s22, %s9990_s22   ;;  %s6969_s21 = sphi %s7061_s21, %s9989_s21  }
   0x6   : > { %s7086_s27 = sadd.s32 1, %s6981_s24   ;;  %s294_s28 = sadd.s32 1, %s6977_s23 }
   0x7   : > { %s291_s29 = ssub.s32 %s6981_s24, %s7086_s27  ;;  %p304_p0 = scmp.ne.s32.totalorder %s6977_s23, %s6973_s22 }
   0x8   : > { %p292_p1 = scmp.eq.s32.totalorder %s291_s29, 0  ;;  %p305_p2 = scmp.eq.s32.totalorder %s7082_s25, 1 }
   0x9   : > { %p310_p3 = scmp.ne.s32.totalorder %s6973_s22, %s6969_s21  ;;  %p311_p4 = scmp.eq.s32.totalorder %s6059_s26, 1 }
   0xa   : > { %s7097_s30 = scalar_select %p292_p1, %s6977_s23, %s294_s28  }
   0xb   : > { %p7099_p5 = por %p305_p2, %p304_p0  ;;  %p7103_p6 = por %p311_p4, %p310_p3 }
   0xc   : > { %p6062_p7 = scmp.ge.s32.totalorder %s6981_s24, 1  ;;  %p375_p8 = scmp.lt.s32.totalorder %s6981_s24, 3 }
   0xe   : > { %p376_p9 = pnand %p6062_p7, %p375_p8 }
  0x10   : > { %379 = sbr.rel (%p376_p9) target bundleno = 2228 (0x8b4), region = 68 }
  0x17   : > { %p422_p10 = scmp.lt.s32.totalorder %s7082_s25, 1  ;;  %vm561_vm0 = vcmask 261120   ;;  %v6983_v0 = vmov 0.0   ;;  %v6817_v1 = vld [vmem:[%s9766_s3] sm:$0xff]   ;;  %v6818_v2 = vld [vmem:[%s9766_s3 + $0x8] sm:$0xff]   ;;  %v6819_v3 = vld [vmem:[%s9766_s3 + $0x10] sm:$0xff]  }
  0x18   : > { %6518 = vmatprep.subr.bf16.mxu0 %v6983_v0  ;;  %1501 = vst.msk [vmem:[#allocation2] sm:$0xff] %vm561_vm0, %v6983_v0  ;;  %1502 = vst.msk [vmem:[#allocation2 + $0x8] sm:$0xff] %vm561_vm0, %v6983_v0  ;;  %6530 = vmatprep.subr.bf16.mxu1 %v6983_v0  ;;  %s9897_s0 = sld [smem:[#allocation25_spill]]  ;;  %vm6984_vm1 = vmmov 0   ;;  %s9831_s28 = smov 32   ;;  %vm742_vm2 = vcmask 523264  }
  0x19   : > { %1506 = vst.msk [vmem:[#allocation2 + $0x198] sm:$0xff] %vm561_vm0, %v6983_v0  ;;  %1507 = vst.msk [vmem:[#allocation2 + $0x1a0] sm:$0xff] %vm561_vm0, %v6983_v0  ;;  %s7124_s17 = scalar_select %p422_p10, %s7082_s25, 1  ;;  %6519 = vmatpush3.bf16.msra.mxu0 %v6817_v1  ;;  %6526 = vmatprep.mubr.msk.bf16.mxu0 %vm6984_vm1, %v6983_v0  ;;  %vm797_vm3 = vcmask 130048   ;;  %vm1503_vm4 = vcmask 254976   ;;  %vm1510_vm5 = vcmask 253952  }
  0x1a   : > { %6520 = vmatprep.subr.bf16.mxu0 %v6983_v0  ;;  %6532 = vmatprep.mubr.msk.bf16.mxu1 %vm6984_vm1, %v6983_v0  ;;  %1504 = vst.msk [vmem:[#allocation2 + $0x10] sm:$0x3] %vm1503_vm4, %v6983_v0  ;;  %1508 = vst.msk [vmem:[#allocation2 + $0x1a8] sm:$0x3] %vm1503_vm4, %v6983_v0  ;;  %s9838_s19 = smov 64   ;;  %vm1751_vm6 = vcmask 523520  }
  0x1b   : > { %s6281_s20 = sshll.u32 %s7124_s17, 7  ;;  %1528 = vst.msk [vmem:[#allocation2 + $0x41] sm:$0x1] %vm1510_vm5, %v6983_v0  ;;  %1511 = vst.msk [vmem:[#allocation2 + $0x18] sm:$0x1] %vm1510_vm5, %v6983_v0  ;;  %vm1880_vm7 = vcmask 785920  }
  0x1c   : > { %s7136_s29 = scalar_lea.vmem %s9764_s1, %s6281_s20  ;;  %1512 = vst.msk [vmem:[#allocation2 + $0x30] sm:$0x1] %vm1510_vm5, %v6983_v0  ;;  %1513 = vst.msk [vmem:[#allocation2 + $0x48] sm:$0x1] %vm1510_vm5, %v6983_v0  ;;  %s9903_s18 = smov 64   ;;  %vm2009_vm8 = vcmask 1048320  }
  0x1d   : > { %6521 = vmatpush3.bf16.msra.mxu0 %v6818_v2  ;;  %v7142_v4 = vld [vmem:[%s7136_s29] sm:$0xff]   ;;  %v7145_v5 = vld [vmem:[%s7136_s29 + $0x8] sm:$0xff]   ;;  %v7152_v9 = vld [vmem:[%s7136_s29 + $0x10] sm:$0xff]   ;;  %1514 = vst.msk [vmem:[#allocation2 + $0x60] sm:$0x1] %vm1510_vm5, %v6983_v0  ;;  %vm3502_vm9 = vcmask 785408  }
  0x1e   : > { %9886 = vst [vmem:[#allocation9_spill] sm:$0xff] %v7142_v4  ;;  %9887 = vst [vmem:[#allocation10_spill] sm:$0xff] %v7145_v5  ;;  %6522 = vmatprep.subr.bf16.mxu0 %v6983_v0  ;;  %v9805_v6 = vunpack.c.l.bf16 %v7142_v4  ;;  %v9804_v7 = vunpack.c.h.bf16 %v7142_v4  ;;  %v9807_v8 = vunpack.c.l.bf16 %v7145_v5  ;;  %v9806_v10 = vunpack.c.h.bf16 %v7145_v5  ;;  %v7167_v15 = vld [vmem:[%s7136_s29 + $0x18] sm:$0xff]   ;;  %v7174_v19 = vld [vmem:[%s7136_s29 + $0x20] sm:$0xff]   ;;  %s7251_s26 = scalar_lea.vmem %s9897_s0, %s6281_s20  ;;  %s9904_s20 = smov 32  }
  0x1f   : > { %9888 = vst [vmem:[#allocation11_spill] sm:$0xff] %v7152_v9  ;;  %v9803_v11 = vunpack.c.l.bf16 %v7152_v9  ;;  %9889 = vst [vmem:[#allocation12_spill] sm:$0xff] %v7167_v15  ;;  %v9802_v17 = vunpack.c.h.bf16 %v7152_v9  ;;  %v9801_v21 = vunpack.c.l.bf16 %v7167_v15  ;;  %v9800_v24 = vunpack.c.h.bf16 %v7167_v15  ;;  %v7186_v28 = vld [vmem:[%s7136_s29 + $0x28] sm:$0xff]   ;;  %v7200_v36 = vld [vmem:[%s7136_s29 + $0x30] sm:$0xff]   ;;  %s9881_s17 = smov 16   ;;  %s9877_s16 = smov 112  }
  0x20   : > { %v633_v12 = vsel %vm561_vm0, %v9805_v6, 0.0  ;;  %v634_v13 = vsel %vm561_vm0, %v9804_v7, 0.0  ;;  %v636_v14 = vsel %vm561_vm0, %v9807_v8, 0.0  ;;  %v638_v18 = vsel %vm561_vm0, %v9806_v10, 0.0  ;;  %9890 = vst [vmem:[#allocation13_spill] sm:$0xff] %v7174_v19  ;;  %9891 = vst [vmem:[#allocation14_spill] sm:$0xff] %v7186_v28 }
  0x21   : > { %6523 = vmatpush3.bf16.msra.mxu0 %v6819_v3  ;;  %v635_v16 = vadd.f32 %v634_v13, %v633_v12  ;;  %v640_v22 = vsel %vm561_vm0, %v9803_v11, 0.0  ;;  %v9799_v25 = vunpack.c.l.bf16 %v7174_v19  ;;  %v642_v26 = vsel %vm561_vm0, %v9802_v17, 0.0  ;;  %9892 = vst [vmem:[#allocation15_spill] sm:$0xff] %v7200_v36  ;;  %v7207_v41 = vld [vmem:[%s7136_s29 + $0x38] sm:$0xff]   ;;  %v7219_v49 = vld [vmem:[%s7136_s29 + $0x40] sm:$0xff]   ;;  %v7229_v54 = vld [vmem:[%s7136_s29 + $0x48] sm:$0xff]  }
  0x22   : > { %6524 = vmatprep.subr.bf16.mxu0 %v6983_v0  ;;  %v644_v29 = vsel %vm561_vm0, %v9801_v21, 0.0  ;;  %v9798_v31 = vunpack.c.h.bf16 %v7174_v19  ;;  %v646_v32 = vsel %vm561_vm0, %v9800_v24, 0.0  ;;  %v9797_v35 = vunpack.c.l.bf16 %v7186_v28  ;;  %9893 = vst [vmem:[#allocation16_spill] sm:$0xff] %v7207_v41  ;;  %9894 = vst [vmem:[#allocation17_spill] sm:$0xff] %v7219_v49  ;;  %v7240_v61 = vld [vmem:[%s7136_s29 + $0x50] sm:$0xff]   ;;  %v7258_v13 = vld [vmem:[%s7251_s26] sm:$0xff]  }
  0x23   : > { %v637_v20 = vadd.f32 %v636_v14, %v635_v16  ;;  %v648_v33 = vsel %vm561_vm0, %v9799_v25, 0.0  ;;  %v9796_v38 = vunpack.c.h.bf16 %v7186_v28  ;;  %v9795_v42 = vunpack.c.l.bf16 %v7200_v36  ;;  %9895 = vst [vmem:[#allocation18_spill] sm:$0xff] %v7229_v54  ;;  %9896 = vst [vmem:[#allocation19_spill] sm:$0xff] %v7240_v61  ;;  %v7261_v14 = vld [vmem:[%s7136_s29 + $0x58] sm:$0xff]   ;;  %s6992_s0 = smov 80  }
  0x24   : > { %v650_v39 = vsel %vm561_vm0, %v9798_v31, 0.0  ;;  %v652_v43 = vsel %vm561_vm0, %v9797_v35, 0.0  ;;  %v9794_v45 = vunpack.c.h.bf16 %v7200_v36  ;;  %v9793_v47 = vunpack.c.l.bf16 %v7207_v41  ;;  %9898 = vst [vmem:[#allocation20_spill] sm:$0xff] %v7261_v14  ;;  %1515 = vst.msk [vmem:[#allocation2 + $0x78] sm:$0x1] %vm1510_vm5, %v6983_v0 }
  0x25   : > { %v639_v23 = vadd.f32 %v638_v18, %v637_v20  ;;  %v654_v46 = vsel %vm561_vm0, %v9796_v38, 0.0  ;;  %v656_v50 = vsel %vm561_vm0, %v9795_v42, 0.0  ;;  %v9792_v52 = vunpack.c.h.bf16 %v7207_v41  ;;  %1516 = vst.msk [vmem:[#allocation2 + $0x90] sm:$0x1] %vm1510_vm5, %v6983_v0  ;;  %1517 = vst.msk [vmem:[#allocation2 + $0xa8] sm:$0x1] %vm1510_vm5, %v6983_v0 }
  0x26   : > { %v658_v53 = vsel %vm561_vm0, %v9794_v45, 0.0  ;;  %v9791_v55 = vunpack.c.l.bf16 %v7219_v49  ;;  %v660_v57 = vsel %vm561_vm0, %v9793_v47, 0.0  ;;  %v9790_v59 = vunpack.c.h.bf16 %v7219_v49  ;;  %1518 = vst.msk [vmem:[#allocation2 + $0xc0] sm:$0x1] %vm1510_vm5, %v6983_v0  ;;  %1519 = vst.msk [vmem:[#allocation2 + $0xd8] sm:$0x1] %vm1510_vm5, %v6983_v0 }
  0x27   : > { %v641_v27 = vadd.f32 %v640_v22, %v639_v23  ;;  %v662_v60 = vsel %vm561_vm0, %v9792_v52, 0.0  ;;  %v9789_v62 = vunpack.c.l.bf16 %v7229_v54  ;;  %v9787_v3 = vunpack.c.h.bf16 %v7229_v54  ;;  %1520 = vst.msk [vmem:[#allocation2 + $0xf0] sm:$0x1] %vm1510_vm5, %v6983_v0  ;;  %1521 = vst.msk [vmem:[#allocation2 + $0x108] sm:$0x1] %vm1510_vm5, %v6983_v0 }
  0x28   : > { %v664_v1 = vsel %vm561_vm0, %v9791_v55, 0.0  ;;  %v666_v12 = vsel %vm561_vm0, %v9790_v59, 0.0  ;;  %v9784_v16 = vunpack.c.l.bf16 %v7240_v61  ;;  %v9841_v23 = vunpack.c.l.bf16 %v7258_v13  ;;  %v7395_v59 = vld [vmem:[%s7251_s26 + $0x30] sm:$0xff]   ;;  %1522 = vst.msk [vmem:[#allocation2 + $0x120] sm:$0x1] %vm1510_vm5, %v6983_v0 }
  0x29   : > { %v643_v30 = vadd.f32 %v642_v26, %v641_v27  ;;  %v668_v20 = vsel %vm561_vm0, %v9789_v62, 0.0  ;;  %v9840_v26 = vunpack.c.h.bf16 %v7258_v13  ;;  %v9782_v27 = vunpack.c.h.bf16 %v7240_v61  ;;  %1523 = vst.msk [vmem:[#allocation2 + $0x138] sm:$0x1] %vm1510_vm5, %v6983_v0  ;;  %1524 = vst.msk [vmem:[#allocation2 + $0x150] sm:$0x1] %vm1510_vm5, %v6983_v0 }
  0x2a   : > { %1525 = vst.msk [vmem:[#allocation2 + $0x168] sm:$0x1] %vm1510_vm5, %v6983_v0  ;;  %1526 = vst.msk [vmem:[#allocation2 + $0x180] sm:$0x1] %vm1510_vm5, %v6983_v0  ;;  %vm4433_vm10 = vcmask 261248   ;;  %vm4562_vm11 = vcmask 392448  }
  0x2b   : > { %v645_v34 = vadd.f32 %v644_v29, %v643_v30  ;;  %v670_v29 = vsel %vm561_vm0, %v9787_v3, 0.0  ;;  %v7274_v30 = vld [vmem:[%s7251_s26 + $0x8] sm:$0xff]   ;;  %1527 = vst.msk [vmem:[#allocation2 + $0x29] sm:$0x1] %vm1510_vm5, %v6983_v0  ;;  %1529 = vst.msk [vmem:[#allocation2 + $0x59] sm:$0x1] %vm1510_vm5, %v6983_v0 }
  0x2c   : > { %1530 = vst.msk [vmem:[#allocation2 + $0x71] sm:$0x1] %vm1510_vm5, %v6983_v0  ;;  %1531 = vst.msk [vmem:[#allocation2 + $0x89] sm:$0x1] %vm1510_vm5, %v6983_v0  ;;  %vm4691_vm12 = vcmask 523648   ;;  %vm4820_vm13 = vcmask 654848  }
  0x2d   : > { %v647_v37 = vadd.f32 %v646_v32, %v645_v34  ;;  %v7277_v32 = vld [vmem:[%s7136_s29 + $0x60] sm:$0xff]   ;;  %1532 = vst.msk [vmem:[#allocation2 + $0xa1] sm:$0x1] %vm1510_vm5, %v6983_v0  ;;  %1533 = vst.msk [vmem:[#allocation2 + $0xb9] sm:$0x1] %vm1510_vm5, %v6983_v0  ;;  %vm4949_vm14 = vcmask 786048  }
  0x2e   : > { %9899 = vst [vmem:[#allocation21_spill] sm:$0xff] %v7277_v32  ;;  %1534 = vst.msk [vmem:[#allocation2 + $0xd1] sm:$0x1] %vm1510_vm5, %v6983_v0  ;;  %vm5078_vm15 = vcmask 917248   ;;  %vm5207_vm1 = vcmask 1048448  }
  0x2f   : > { %v649_v40 = vadd.f32 %v648_v33, %v647_v37  ;;  %v9780_v33 = vunpack.c.l.bf16 %v7261_v14  ;;  %v672_v37 = vsel %vm561_vm0, %v9784_v16, 0.0  ;;  %v7368_v16 = vld [vmem:[%s7251_s26 + $0x20] sm:$0xff]   ;;  %1535 = vst.msk [vmem:[#allocation2 + $0xe9] sm:$0x1] %vm1510_vm5, %v6983_v0  ;;  %1536 = vst.msk [vmem:[#allocation2 + $0x101] sm:$0x1] %vm1510_vm5, %v6983_v0 }
  0x30   : > { %1537 = vst.msk [vmem:[#allocation2 + $0x119] sm:$0x1] %vm1510_vm5, %v6983_v0  ;;  %1538 = vst.msk [vmem:[#allocation2 + $0x131] sm:$0x1] %vm1510_vm5, %v6983_v0 }
  0x31   : > { %v651_v44 = vadd.f32 %v650_v39, %v649_v40  ;;  %v9843_v40 = vunpack.c.l.bf16 %v7274_v30  ;;  %1539 = vst.msk [vmem:[#allocation2 + $0x149] sm:$0x1] %vm1510_vm5, %v6983_v0  ;;  %1540 = vst.msk [vmem:[#allocation2 + $0x161] sm:$0x1] %vm1510_vm5, %v6983_v0 }
  0x32   : > { %1541 = vst.msk [vmem:[#allocation2 + $0x179] sm:$0x1] %vm1510_vm5, %v6983_v0  ;;  %1542 = vst.msk [vmem:[#allocation2 + $0x191] sm:$0x1] %vm1510_vm5, %v6983_v0  ;;  %v6842_v0 = vld [vmem:[%s9768_s5 + $0x80] sm:$0xff]  }
  0x33   : > { %v653_v48 = vadd.f32 %v652_v43, %v651_v44  ;;  %v562_v43 = vsel %vm561_vm0, %v9841_v23, 0.0  ;;  %v563_v44 = vsel %vm561_vm0, %v9840_v26, 0.0  ;;  %v6851_v26 = vld [vmem:[%s9768_s5 + $0x18] sm:$0xff]  }
  0x35   : > { %v655_v51 = vadd.f32 %v654_v46, %v653_v48  ;;  %v9777_v46 = vunpack.c.h.bf16 %v7261_v14  ;;  %v674_v48 = vsel %vm561_vm0, %v9782_v27, 0.0 }
  0x37   : > { %v657_v56 = vadd.f32 %v656_v50, %v655_v51  ;;  %v676_v51 = vsel %vm561_vm0, %v9780_v33, 0.0 }
  0x39   : > { %v659_v58 = vadd.f32 %v658_v53, %v657_v56  ;;  %v9776_v53 = vunpack.c.l.bf16 %v7277_v32  ;;  %v564_v56 = vadd.f32 %v563_v44, %v562_v43 }
  0x3b   : > { %v661_v63 = vadd.f32 %v660_v57, %v659_v58  ;;  %v7299_v57 = vld [vmem:[%s7136_s29 + $0x68] sm:$0xff]  }
  0x3c   : > { %9900 = vst [vmem:[#allocation22_spill] sm:$0xff] %v7299_v57  ;;  %v9781_v44 = vunpack.c.h.bf16 %v7299_v57 }
  0x3d   : > { %v663_v2 = vadd.f32 %v662_v60, %v661_v63  ;;  %v9842_v60 = vunpack.c.h.bf16 %v7274_v30  ;;  %v565_v63 = vsel %vm561_vm0, %v9843_v40, 0.0 }
  0x3f   : > { %v665_v18 = vadd.f32 %v664_v1, %v663_v2  ;;  %v9778_v1 = vunpack.c.h.bf16 %v7277_v32  ;;  %v678_v2 = vsel %vm561_vm0, %v9777_v46, 0.0  ;;  %v567_v43 = vsel %vm561_vm0, %v9842_v60, 0.0 }
  0x41   : > { %v667_v22 = vadd.f32 %v666_v12, %v665_v18  ;;  %v7310_v12 = vld [vmem:[%s7251_s26 + $0x10] sm:$0xff]  }
  0x43   : > { %v669_v34 = vadd.f32 %v668_v20, %v667_v22  ;;  %v9779_v20 = vunpack.c.l.bf16 %v7299_v57  ;;  %v680_v22 = vsel %vm561_vm0, %v9776_v53, 0.0 }
  0x45   : > { %v671_v39 = vadd.f32 %v670_v29, %v669_v34  ;;  %v566_v29 = vadd.f32 %v565_v63, %v564_v56  ;;  %v7317_v34 = vld [vmem:[%s7136_s29 + $0x70] sm:$0xff]   ;;  %v684_v56 = vsel %vm561_vm0, %v9779_v20, 0.0  ;;  %v7332_v63 = vld [vmem:[%s7136_s29 + $0x78] sm:$0xff]   ;;  %s9876_s29 = sand.u32 1, %s6973_s22  }
  0x46   : > { %9901 = vst [vmem:[#allocation23_spill] sm:$0xff] %v7317_v34  ;;  %9902 = vst [vmem:[#allocation24_spill] sm:$0xff] %v7332_v63  ;;  %v9785_v46 = vunpack.c.h.bf16 %v7317_v34  ;;  %s6063_s15 = sshll.u32 %s9876_s29, 8 }
  0x47   : > { %v673_v50 = vadd.f32 %v672_v37, %v671_v39  ;;  %v9837_v39 = vunpack.c.l.bf16 %v7310_v12 }
  0x49   : > { %v675_v58 = vadd.f32 %v674_v48, %v673_v50  ;;  %v682_v48 = vsel %vm561_vm0, %v9778_v1, 0.0  ;;  %v569_v53 = vsel %vm561_vm0, %v9837_v39, 0.0 }
  0x4b   : > { %v677_v18 = vadd.f32 %v676_v51, %v675_v58  ;;  %v9783_v51 = vunpack.c.l.bf16 %v7317_v34  ;;  %v568_v58 = vadd.f32 %v567_v43, %v566_v29  ;;  %v9786_v29 = vunpack.c.l.bf16 %v7332_v63 }
  0x4d   : > { %v679_v37 = vadd.f32 %v678_v2, %v677_v18  ;;  %v9836_v18 = vunpack.c.h.bf16 %v7310_v12  ;;  %v688_v43 = vsel %vm561_vm0, %v9783_v51, 0.0  ;;  %v692_v27 = vsel %vm561_vm0, %v9786_v29, 0.0 }
  0x4e   : > { %v9833_v29 = vunpack.c.l.bf16 %v7368_v16 }
  0x4f   : > { %v681_v50 = vadd.f32 %v680_v22, %v679_v37  ;;  %v686_v22 = vsel %vm561_vm0, %v9781_v44, 0.0  ;;  %v7343_v37 = vld [vmem:[%s7251_s26 + $0x18] sm:$0xff]   ;;  %v571_v33 = vsel %vm561_vm0, %v9836_v18, 0.0  ;;  %v9788_v44 = vunpack.c.h.bf16 %v7332_v63 }
  0x50   : > { %v9835_v20 = vunpack.c.l.bf16 %v7343_v37 }
  0x51   : > { %v683_v2 = vadd.f32 %v682_v48, %v681_v50  ;;  %v570_v48 = vadd.f32 %v569_v53, %v568_v58 }
  0x52   : > { %v573_v58 = vsel %vm561_vm0, %v9835_v20, 0.0 }
  0x53   : > { %v685_v1 = vadd.f32 %v684_v56, %v683_v2  ;;  %v690_v56 = vsel %vm561_vm0, %v9785_v46, 0.0  ;;  %v572_v51 = vadd.f32 %v571_v33, %v570_v48  ;;  %v6820_v48 = vld [vmem:[%s9766_s3 + $0x18] sm:$0xff]  }
  0x54   : > { %6525 = vmatpush3.bf16.msra.mxu0 %v6820_v48 }
  0x55   : > { %v687_v50 = vadd.f32 %v686_v22, %v685_v1  ;;  %v9834_v1 = vunpack.c.h.bf16 %v7343_v37  ;;  %v694_v22 = vsel %vm561_vm0, %v9788_v44, 0.0  ;;  %v9830_v44 = vunpack.c.h.bf16 %v7368_v16 }
  0x57   : > { %v689_v2 = vadd.f32 %v688_v43, %v687_v50  ;;  %v574_v50 = vadd.f32 %v573_v58, %v572_v51  ;;  %v575_v33 = vsel %vm561_vm0, %v9834_v1, 0.0  ;;  %v7382_v51 = vld [vmem:[%s7251_s26 + $0x28] sm:$0xff]  }
  0x59   : > { %v691_v53 = vadd.f32 %v690_v56, %v689_v2  ;;  %v576_v2 = vadd.f32 %v575_v33, %v574_v50 }
  0x5b   : > { %v693_v43 = vadd.f32 %v692_v27, %v691_v53  ;;  %v577_v27 = vsel %vm561_vm0, %v9833_v29, 0.0  ;;  %v6847_v29 = vld [vmem:[%s9768_s5 + $0x8] sm:$0xff]  }
  0x5c   : > { %v578_v58 = vadd.f32 %v577_v27, %v576_v2  ;;  %v9827_v27 = vunpack.c.l.bf16 %v7395_v59 }
  0x5d   : > { %v695_v46 = vadd.f32 %v694_v22, %v693_v43  ;;  %v9829_v43 = vunpack.c.l.bf16 %v7382_v51 }
  0x5f   : > { %v696_v56 = vrot.slane %v695_v46, 4  ;;  %v581_v62 = vsel %vm561_vm0, %v9829_v43, 0.0  ;;  %v6845_v43 = vld [vmem:[%s9768_s5] sm:$0xff]  }
  0x61   : > { %v697_v3 = vadd.f32 %v696_v56, %v695_v46  ;;  %v579_v46 = vsel %vm561_vm0, %v9830_v44, 0.0  ;;  %v9828_v56 = vunpack.c.h.bf16 %v7382_v51  ;;  %v6846_v44 = vld [vmem:[%s9768_s5 + $0x48] sm:$0xff]  }
  0x62   : > { %v580_v33 = vadd.f32 %v579_v46, %v578_v58  ;;  %v585_v46 = vsel %vm561_vm0, %v9827_v27, 0.0 }
  0x63   : > { %v698_v53 = vrot.slane %v697_v3, 2 }
  0x65   : > { %v699_v22 = vadd.f32 %v698_v53, %v697_v3  ;;  %v582_v3 = vadd.f32 %v581_v62, %v580_v33  ;;  %v583_v53 = vsel %vm561_vm0, %v9828_v56, 0.0 }
  0x67   : > { %v700_v50 = vrot.slane %v699_v22, 1  ;;  %v584_v58 = vadd.f32 %v583_v53, %v582_v3  ;;  %v7418_v53 = vld [vmem:[%s7251_s26 + $0x40] sm:$0xff]  }
  0x68   : > { %v9820_v47 = vunpack.c.l.bf16 %v7418_v53  ;;  %v9819_v45 = vunpack.c.h.bf16 %v7418_v53 }
  0x69   : > { %v701_v48 = vadd.f32 %v700_v50, %v699_v22  ;;  %v9826_v22 = vunpack.c.h.bf16 %v7395_v59  ;;  %v7407_v50 = vld [vmem:[%s7251_s26 + $0x38] sm:$0xff]   ;;  %v586_v62 = vadd.f32 %v585_v46, %v584_v58 }
  0x6a   : > { %v9823_v33 = vunpack.c.l.bf16 %v7407_v50  ;;  %v9821_v55 = vunpack.c.h.bf16 %v7407_v50 }
  0x6b   : > { %v702_v2 = vmul.f32 0.00390625, %v701_v48  ;;  %v587_v48 = vsel %vm561_vm0, %v9826_v22, 0.0 }
  0x6c   : > { %v589_v3 = vsel %vm561_vm0, %v9823_v33, 0.0  ;;  %v591_v58 = vsel %vm561_vm0, %v9821_v55, 0.0 }
  0x6d   : > { %704 = vrot.lane.b32.xlu0 %v702_v2, %s9831_s28  ;;  %v588_v2 = vadd.f32 %v587_v48, %v586_v62  ;;  %v593_v62 = vsel %vm561_vm0, %v9820_v47, 0.0  ;;  %v7429_v48 = vld [vmem:[%s7251_s26 + $0x48] sm:$0xff]  }
  0x6e   : > { %v9818_v38 = vunpack.c.l.bf16 %v7429_v48  ;;  %v9815_v35 = vunpack.c.h.bf16 %v7429_v48 }
  0x6f   : > { %v590_v52 = vadd.f32 %v589_v3, %v588_v2  ;;  %v595_v2 = vsel %vm561_vm0, %v9819_v45, 0.0 }
  0x71   : > { %v592_v46 = vadd.f32 %v591_v58, %v590_v52  ;;  %v597_v52 = vsel %vm561_vm0, %v9818_v38, 0.0  ;;  %v7440_v58 = vld [vmem:[%s7251_s26 + $0x50] sm:$0xff]  }
  0x72   : > { %v9812_v25 = vunpack.c.l.bf16 %v7440_v58  ;;  %v9810_v24 = vunpack.c.h.bf16 %v7440_v58 }
  0x73   : > { %v594_v42 = vadd.f32 %v593_v62, %v592_v46  ;;  %v599_v46 = vsel %vm561_vm0, %v9815_v35, 0.0 }
  0x75   : > { %v596_v3 = vadd.f32 %v595_v2, %v594_v42  ;;  %v601_v42 = vsel %vm561_vm0, %v9812_v25, 0.0  ;;  %v7451_v2 = vld [vmem:[%s7251_s26 + $0x58] sm:$0xff]  }
  0x76   : > { %v9808_v17 = vunpack.c.l.bf16 %v7451_v2  ;;  %v9809_v11 = vunpack.c.h.bf16 %v7451_v2 }
  0x77   : > { %v598_v31 = vadd.f32 %v597_v52, %v596_v3  ;;  %v603_v3 = vsel %vm561_vm0, %v9810_v24, 0.0 }
  0x79   : > { %v600_v62 = vadd.f32 %v599_v46, %v598_v31  ;;  %v605_v31 = vsel %vm561_vm0, %v9808_v17, 0.0  ;;  %v7462_v46 = vld [vmem:[%s7251_s26 + $0x60] sm:$0xff]  }
  0x7a   : > { %v9811_v6 = vunpack.c.l.bf16 %v7462_v46  ;;  %v9813_v10 = vunpack.c.h.bf16 %v7462_v46 }
  0x7b   : > { %v602_v21 = vadd.f32 %v601_v42, %v600_v62  ;;  %v607_v62 = vsel %vm561_vm0, %v9809_v11, 0.0 }
  0x7d   : > { %v604_v52 = vadd.f32 %v603_v3, %v602_v21  ;;  %v609_v21 = vsel %vm561_vm0, %v9811_v6, 0.0  ;;  %v7473_v3 = vld [vmem:[%s7251_s26 + $0x68] sm:$0xff]  }
  0x7e   : > { %v9814_v17 = vunpack.c.l.bf16 %v7473_v3  ;;  %v9817_v11 = vunpack.c.h.bf16 %v7473_v3 }
  0x7f   : > { %v606_v7 = vadd.f32 %v605_v31, %v604_v52  ;;  %v611_v52 = vsel %vm561_vm0, %v9813_v10, 0.0 }
  0x81   : > { %v608_v42 = vadd.f32 %v607_v62, %v606_v7  ;;  %v613_v7 = vsel %vm561_vm0, %v9814_v17, 0.0  ;;  %v7484_v62 = vld [vmem:[%s7251_s26 + $0x70] sm:$0xff]  }
  0x82   : > { %v9816_v6 = vunpack.c.l.bf16 %v7484_v62  ;;  %v9822_v25 = vunpack.c.h.bf16 %v7484_v62 }
  0x83   : > { %v610_v8 = vadd.f32 %v609_v21, %v608_v42  ;;  %v615_v42 = vsel %vm561_vm0, %v9817_v11, 0.0 }
  0x85   : > { %v612_v31 = vadd.f32 %v611_v52, %v610_v8  ;;  %v617_v8 = vsel %vm561_vm0, %v9816_v6, 0.0  ;;  %v7495_v52 = vld [vmem:[%s7251_s26 + $0x78] sm:$0xff]   ;;  %s9879_s26 = smov 96  }
  0x86   : > { %v9825_v17 = vunpack.c.l.bf16 %v7495_v52  ;;  %v9824_v35 = vunpack.c.h.bf16 %v7495_v52 }
  0x87   : > { %v614_v24 = vadd.f32 %v613_v7, %v612_v31  ;;  %v619_v31 = vsel %vm561_vm0, %v9822_v25, 0.0 }
  0x88   : > { %v623_v6 = vsel %vm561_vm0, %v9824_v35, 0.0 }
  0x89   : > { %v616_v21 = vadd.f32 %v615_v42, %v614_v24  ;;  %v621_v24 = vsel %vm561_vm0, %v9825_v17, 0.0 }
  0x8b   : > { %v618_v10 = vadd.f32 %v617_v8, %v616_v21 }
  0x8d   : > { %v620_v7 = vadd.f32 %v619_v31, %v618_v10 }
  0x8f   : > { %v622_v42 = vadd.f32 %v621_v24, %v620_v7  ;;  %v6821_v7 = vld [vmem:[%s9767_s4] sm:$0xff]  }
  0x90   : > { %6531 = vmatpush3.bf16.msra.mxu1 %v6821_v7 }
  0x91   : > { %v624_v11 = vadd.f32 %v623_v6, %v622_v42  ;;  %v6822_v6 = vld [vmem:[%s9765_s2 + $0x10] sm:$0xff]  }
  0x92   : > { %6572 = vmatprep.subr.bf16.mxu0 %v6822_v6 }
  0x93   : > { %v625_v21 = vrot.slane %v624_v11, 4 }
  0x95   : > { %v626_v8 = vadd.f32 %v625_v21, %v624_v11  ;;  %v6823_v11 = vld [vmem:[%s9765_s2] sm:$0xff]  }
  0x96   : > { %6536 = vmatprep.subr.bf16.mxu1 %v6823_v11 }
  0x97   : > { %v627_v38 = vrot.slane %v626_v8, 2 }
  0x99   : > { %v628_v45 = vadd.f32 %v627_v38, %v626_v8  ;;  %v717_v38 = vld [vmem:[%s9773_s10 + $0x3] sm:$0x1]  ;;  %v6825_v8 = vld [vmem:[%s9765_s2 + $0x8] sm:$0xff]  }
  0x9b   : > { %v629_v47 = vrot.slane %v628_v45, 1 }
  0x9d   : > { %v630_v55 = vadd.f32 %v629_v47, %v628_v45 }
  0x9f   : > { %v632_v25 = vmul.f32 0.00390625, %v630_v55 }
  0xdf   : > { %v705_v10 = vpop.permute.xlu0 %704 }
  0xe0   : > { %v707_v31 = vsel %vm561_vm0, %v632_v25, %v705_v10  ;;  %v6824_v25 = vld [vmem:[%s9765_s2 + $0x18] sm:$0xff]  }
  0xe1   : > { %v708_v33 = vpack.c.bf16 %v707_v31, %v707_v31 }
  0xe3   : > { %6527 = vmatmul.mubr.msk.bf16.vlgmr.msra.gmra.mrb[0].mxu0 %vm742_vm2, %v708_v33 }
  0xe4   : > { %6573 = vmatpush3.bf16.msra.mxu0 %v6822_v6  ;;  %6576 = vmatprep.mubr.msk.bf16.mxu0 %vm561_vm0, %v7142_v4 }
  0xe5   : > { %6574 = vmatprep.subr.bf16.mxu0 %v6824_v25 }
  0xe8   : > { %6575 = vmatpush3.bf16.msra.mxu0 %v6824_v25 }
  0xe9   : > { %6608 = vmatprep.subr.bf16.mxu0 %v6842_v0 }
  0xeb   : > { %6577 = vmatmul.mubr.msk.bf16.vlgmr.msra.gmra.mrb[4].mxu0 %vm561_vm0, %v7145_v5 }
  0xec   : > { %6580 = vmatprep.mubr.msk.bf16.mxu0 %vm561_vm0, %v7152_v9  ;;  %6609 = vmatpush3.bf16.msra.mxu0 %v6842_v0 }
  0xf3   : > { %6581 = vmatmul.mubr.msk.bf16.gmra.mrb[8].mxu0 %vm561_vm0, %v7167_v15 }
  0xf4   : > { %6584 = vmatprep.mubr.msk.bf16.mxu0 %vm561_vm0, %v7174_v19 }
  0xfb   : > { %6585 = vmatmul.mubr.msk.bf16.gmra.mrb[12].mxu0 %vm561_vm0, %v7186_v28 }
  0xfc   : > { %6588 = vmatprep.mubr.msk.bf16.mxu0 %vm561_vm0, %v7200_v36 }
 0x103   : > { %6589 = vmatmul.mubr.msk.bf16.gmra.mrb[16].mxu0 %vm561_vm0, %v7207_v41 }
 0x104   : > { %6592 = vmatprep.mubr.msk.bf16.mxu0 %vm561_vm0, %v7219_v49 }
 0x10b   : > { %6593 = vmatmul.mubr.msk.bf16.gmra.mrb[20].mxu0 %vm561_vm0, %v7229_v54 }
 0x10c   : > { %6596 = vmatprep.mubr.msk.bf16.mxu0 %vm561_vm0, %v7240_v61  ;;  %v7749_v61 = vld [vmem:[%s9773_s10] ss:$0 sm:$0xff] }
 0x113   : > { %6597 = vmatmul.mubr.msk.bf16.gmra.mrb[24].mxu0 %vm561_vm0, %v7261_v14  ;;  %v1575_v14 = vld [vmem:[#allocation2] sm:$0xff] }
 0x114   : > { %6600 = vmatprep.mubr.msk.bf16.mxu0 %vm561_vm0, %v7277_v32  ;;  %v1576_v32 = vld [vmem:[#allocation2 + $0x8] sm:$0xff] }
 0x11b   : > { %6601 = vmatmul.mubr.msk.bf16.gmra.mrb[28].mxu0 %vm561_vm0, %v7299_v57 }
 0x11c   : > { %6604 = vmatprep.mubr.msk.bf16.mxu0 %vm561_vm0, %v7317_v34  ;;  %v7744_v34 = vld [vmem:[%s9773_s10 + $0x1] ss:$0 sm:$0xff] }
 0x123   : > { %6605 = vmatmul.mubr.msk.bf16.gmra.mrb[32].mxu0 %vm561_vm0, %v7332_v63 }
 0x1b6   : > { %v780_v45 = vpop.f32.mrb[0].mxu0 }
 0x1b7   : > { %v781_v47 = vadd.f32 %v780_v45, %v717_v38  ;;  %v6528_v55 = vpop.f32.mrb[1].mxu0  ;;  %v1639_v45 = vld [vmem:[#allocation2 + $0x1] sm:$0xff] }
 0x1b8   : > { %v783_v33 = vpop.f32.mrb[2].mxu0  ;;  %v1768_v55 = vld [vmem:[#allocation2 + $0x2] sm:$0xff] }
 0x1b9   : > { %v786_v24 = vmax.f32 %v781_v47, 0.0  ;;  %v6529_v42 = vpop.f32.mrb[3].mxu0  ;;  %v1640_v47 = vld [vmem:[#allocation2 + $0x9] sm:$0xff] }
 0x1ba   : > { %v1769_v42 = vld [vmem:[#allocation2 + $0xa] sm:$0xff] }
 0x1bb   : > { %v787_v21 = vpack.c.bf16 %v786_v24, %v786_v24  ;;  %v1671_v24 = vpack.c.bf16 %v1640_v47, %v1639_v45 }
 0x1bd   : > { %6533 = vmatmul.mubr.msk.bf16.vlgmr.msra.gmra.mrb[0].mxu1 %vm797_vm3, %v787_v21  ;;  %v1800_v21 = vpack.c.bf16 %v1769_v42, %v1768_v55  ;;  %1703 = vrot.lane.b32.xlu1 %v1671_v24, %s9831_s28  ;;  %s9985_s28 = smov 16  }
 0x1be   : > { %6537 = vmatpush3.bf16.msra.mxu1 %v6823_v11  ;;  %6540 = vmatprep.mubr.msk.bf16.mxu1 %vm561_vm0, %v7258_v13  ;;  %v7592_v10 = vpop.f32.mrb[4].mxu0 }
 0x1bf   : > { %6538 = vmatprep.subr.bf16.mxu1 %v6825_v8  ;;  %v7594_v31 = vpop.f32.mrb[5].mxu0  ;;  %1832 = vrot.lane.b32.xlu0 %v1800_v21, %s9838_s19  ;;  %s8951_s19 = scalar_lea.vmem [#allocation6], %s6063_s15  ;;  %s6991_s15 = smov 48  }
 0x1c0   : > { %v7596_v7 = vpop.f32.mrb[6].mxu0  ;;  %s5985_s29 = sshll.u32 %s8951_s19, 4  ;;  %s9712_s29 = int_to_ptr.vmem [resolvable:$true] %s5985_s29 }
 0x1c1   : > { %v7598_v6 = vpop.f32.mrb[7].mxu0 }
 0x1c2   : > { %6539 = vmatpush3.bf16.msra.mxu1 %v6825_v8  ;;  %v6843_v8 = vld [vmem:[%s9768_s5 + $0x88] sm:$0xff]  }
 0x1c3   : > { %6610 = vmatprep.subr.bf16.mxu0 %v6843_v8 }
 0x1c4   : > { %6611 = vmatpush3.bf16.msra.mxu0 %v6843_v8  ;;  %v6844_v8 = vld [vmem:[%s9768_s5 + $0x40] sm:$0xff]  }
 0x1c5   : > { %6541 = vmatmul.mubr.msk.bf16.vlgmr.msra.gmra.mrb[4].mxu1 %vm561_vm0, %v7274_v30  ;;  %6327 = vmatprep.subr.bf16.mxu1 %v6844_v8  ;;  %v6849_v8 = vld [vmem:[%s9768_s5 + $0x10] sm:$0xff]  }
 0x1c6   : > { %6544 = vmatprep.mubr.msk.bf16.mxu1 %vm561_vm0, %v7310_v12  ;;  %v7666_v11 = vpop.f32.mrb[8].mxu0  ;;  %6328 = vmatpush3.bf16.msra.mxu1 %v6845_v43  ;;  %v6848_v43 = vld [vmem:[%s9768_s5 + $0x50] sm:$0xff]  }
 0x1c7   : > { %v7668_v25 = vpop.f32.mrb[9].mxu0  ;;  %6329 = vmatprep.subr.bf16.mxu1 %v6846_v44  ;;  %v790_v44 = vld [vmem:[%s9773_s10 + $0x4] sm:$0x1] }
 0x1c8   : > { %v7670_v38 = vpop.f32.mrb[10].mxu0 }
 0x1c9   : > { %v7672_v33 = vpop.f32.mrb[11].mxu0 }
 0x1ca   : > { %6330 = vmatpush3.bf16.msra.mxu1 %v6847_v29  ;;  %v6850_v29 = vld [vmem:[%s9768_s5 + $0x58] sm:$0xff]  }
 0x1cb   : > { %6331 = vmatprep.subr.bf16.mxu1 %v6848_v43 }
 0x1cd   : > { %6545 = vmatmul.mubr.msk.bf16.gmra.mrb[8].mxu1 %vm561_vm0, %v7343_v37 }
 0x1ce   : > { %6548 = vmatprep.mubr.msk.bf16.mxu1 %vm561_vm0, %v7368_v16  ;;  %v7682_v35 = vpop.f32.mrb[12].mxu0  ;;  %6332 = vmatpush3.bf16.msra.mxu1 %v6849_v8 }
 0x1cf   : > { %v7684_v45 = vpop.f32.mrb[13].mxu0  ;;  %6333 = vmatprep.subr.bf16.mxu1 %v6850_v29 }
 0x1d0   : > { %v7686_v47 = vpop.f32.mrb[14].mxu0 }
 0x1d1   : > { %v7688_v55 = vpop.f32.mrb[15].mxu0 }
 0x1d2   : > { %6334 = vmatpush3.bf16.msra.mxu1 %v6851_v26  ;;  %v6852_v26 = vld [vmem:[%s9768_s5 + $0x60] sm:$0xff]  }
 0x1d3   : > { %6335 = vmatprep.subr.bf16.mxu1 %v6852_v26 }
 0x1d5   : > { %6549 = vmatmul.mubr.msk.bf16.gmra.mrb[12].mxu1 %vm561_vm0, %v7382_v51 }
 0x1d6   : > { %6552 = vmatprep.mubr.msk.bf16.mxu1 %vm561_vm0, %v7395_v59  ;;  %v7690_v24 = vpop.f32.mrb[16].mxu0 }
 0x1d7   : > { %v7692_v42 = vpop.f32.mrb[17].mxu0 }
 0x1d8   : > { %v7694_v21 = vpop.f32.mrb[18].mxu0 }
 0x1d9   : > { %v7696_v0 = vpop.f32.mrb[19].mxu0 }
 0x1dd   : > { %6553 = vmatmul.mubr.msk.bf16.gmra.mrb[16].mxu1 %vm561_vm0, %v7407_v50 }
 0x1de   : > { %6556 = vmatprep.mubr.msk.bf16.mxu1 %vm561_vm0, %v7418_v53  ;;  %v7698_v17 = vpop.f32.mrb[20].mxu0 }
 0x1df   : > { %v7700_v22 = vpop.f32.mrb[21].mxu0 }
 0x1e0   : > { %v7702_v27 = vpop.f32.mrb[22].mxu0 }
 0x1e1   : > { %v7704_v56 = vpop.f32.mrb[23].mxu0 }
 0x1e5   : > { %6557 = vmatmul.mubr.msk.bf16.gmra.mrb[20].mxu1 %vm561_vm0, %v7429_v48 }
 0x1e6   : > { %6560 = vmatprep.mubr.msk.bf16.mxu1 %vm561_vm0, %v7440_v58  ;;  %v7718_v1 = vpop.f32.mrb[24].mxu0 }
 0x1e7   : > { %v7720_v20 = vpop.f32.mrb[25].mxu0 }
 0x1e8   : > { %v7722_v18 = vpop.f32.mrb[26].mxu0 }
 0x1e9   : > { %v7730_v39 = vpop.f32.mrb[27].mxu0 }
 0x1ed   : > { %6561 = vmatmul.mubr.msk.bf16.gmra.mrb[24].mxu1 %vm561_vm0, %v7451_v2 }
 0x1ee   : > { %6564 = vmatprep.mubr.msk.bf16.mxu1 %vm561_vm0, %v7462_v46  ;;  %v7769_v26 = vpop.f32.mrb[28].mxu0 }
 0x1ef   : > { %v7774_v49 = vpop.f32.mrb[29].mxu0 }
 0x1f5   : > { %6565 = vmatmul.mubr.msk.bf16.gmra.mrb[28].mxu1 %vm561_vm0, %v7473_v3 }
 0x1f6   : > { %6568 = vmatprep.mubr.msk.bf16.mxu1 %vm561_vm0, %v7484_v62 }
 0x1fd   : > { %6569 = vmatmul.mubr.msk.bf16.gmra.mrb[32].mxu1 %vm561_vm0, %v7495_v52 }
 0x290   : > { %v835_v23 = vpop.f32.mrb[0].mxu1 }
 0x291   : > { %v836_v60 = vadd.f32 %v835_v23, %v790_v44  ;;  %v6534_v40 = vpop.f32.mrb[1].mxu1  ;;  %v1607_v23 = vpack.c.bf16 %v1576_v32, %v1575_v14  ;;  %v1342_v44 = vadd.f32 %v7744_v34, %v7594_v31 }
 0x292   : > { %v838_v43 = vpop.f32.mrb[2].mxu1  ;;  %v6853_v40 = vld [vmem:[%s9768_s5 + $0x20] sm:$0xff]  }
 0x293   : > { %v841_v8 = vsub.f32 0.0, %v836_v60  ;;  %v6535_v63 = vpop.f32.mrb[3].mxu1  ;;  %v1350_v60 = vadd.f32 %v7592_v10, %v7744_v34  ;;  %1623 = vst.msk [vmem:[#allocation3] sm:$0xff] %vm561_vm0, %v1607_v23  ;;  %v1833_v43 = vpop.permute.xlu0 %1832  ;;  %6336 = vmatpush3.bf16.msra.mxu1 %v6853_v40  ;;  %v1353_v10 = vadd.f32 %v7596_v7, %v7744_v34 }
 0x294   : > { %v1704_v63 = vpop.permute.xlu1 %1703 }
 0x295   : > { %v842_v57 = vmul.f32 1.442695, %v841_v8  ;;  %1752 = vst.msk [vmem:[#allocation3] sm:$0xff] %vm1751_vm6, %v1704_v63 }
 0x296   : > { %1881 = vst.msk [vmem:[#allocation3] sm:$0xff] %vm1880_vm7, %v1833_v43  ;;  %v6855_v43 = vld [vmem:[%s9768_s5 + $0x28] sm:$0xff]  }
 0x297   : > { %6914 = vpow2.f32 %v842_v57 }
 0x298   : > { %v6542_v29 = vpop.f32.mrb[4].mxu1 }
 0x299   : > { %v1039_v14 = vadd.f32 %v6542_v29, %v7749_v61  ;;  %v1030_v32 = vpop.f32.mrb[5].mxu1  ;;  %v1345_v29 = vadd.f32 %v7744_v34, %v7598_v6 }
 0x29a   : > { %v1031_v57 = vadd.f32 %v7749_v61, %v1030_v32  ;;  %v6543_v8 = vpop.f32.mrb[6].mxu1 }
 0x29b   : > { %v1470_v31 = vmul.f32 %v1350_v60, %v1039_v14  ;;  %v1042_v54 = vadd.f32 %v6543_v8, %v7749_v61  ;;  %v1033_v23 = vpop.f32.mrb[7].mxu1  ;;  %v7778_v60 = vpop.f32.mrb[30].mxu0  ;;  %v1366_v14 = vadd.f32 %v7666_v11, %v7744_v34  ;;  %v1369_v11 = vadd.f32 %v7670_v38, %v7744_v34 }
 0x29c   : > { %v1468_v63 = vmul.f32 %v1342_v44, %v1031_v57  ;;  %v1034_v40 = vadd.f32 %v7749_v61, %v1033_v23  ;;  %v1358_v44 = vadd.f32 %v7744_v34, %v7668_v25  ;;  %v1361_v25 = vadd.f32 %v7744_v34, %v7672_v33 }
 0x29d   : > { %1545 = vst.msk [vmem:[#allocation2 + $0x31] sm:$0xff] %vm561_vm0, %v1470_v31  ;;  %v1471_v32 = vmul.f32 %v1353_v10, %v1042_v54  ;;  %v6854_v54 = vld [vmem:[%s9768_s5 + $0x68] sm:$0xff]  }
 0x29e   : > { %1543 = vst.msk [vmem:[#allocation2 + $0x19] sm:$0xff] %vm561_vm0, %v1468_v63  ;;  %v1469_v7 = vmul.f32 %v1345_v29, %v1034_v40  ;;  %6337 = vmatprep.subr.bf16.mxu1 %v6854_v54  ;;  %v3137_v63 = vlaneseq }
 0x29f   : > { %1546 = vst.msk [vmem:[#allocation2 + $0x39] sm:$0xff] %vm561_vm0, %v1471_v32  ;;  %6338 = vmatpush3.bf16.msra.mxu1 %v6855_v43 }
 0x2a0   : > { %1544 = vst.msk [vmem:[#allocation2 + $0x21] sm:$0xff] %vm561_vm0, %v1469_v7  ;;  %v6546_v6 = vpop.f32.mrb[8].mxu1  ;;  %v3138_v28 = vshrl.u32 %v3137_v63, 7 }
 0x2a1   : > { %v6915_v57 = vpop.eup %6914  ;;  %v1055_v8 = vadd.f32 %v6546_v6, %v7749_v61  ;;  %v1046_v10 = vpop.f32.mrb[9].mxu1 }
 0x2a2   : > { %v844_v31 = vadd.f32 1.0, %v6915_v57  ;;  %v1047_v23 = vadd.f32 %v7749_v61, %v1046_v10  ;;  %v6547_v29 = vpop.f32.mrb[10].mxu1 }
 0x2a3   : > { %v1474_v40 = vmul.f32 %v1366_v14, %v1055_v8  ;;  %v1058_v32 = vadd.f32 %v6547_v29, %v7749_v61  ;;  %v1049_v7 = vpop.f32.mrb[11].mxu1 }
 0x2a4   : > { %6916 = vrcp.f32 %v844_v31  ;;  %v1472_v6 = vmul.f32 %v1358_v44, %v1047_v23  ;;  %v1050_v41 = vadd.f32 %v7749_v61, %v1049_v7  ;;  %v2219_v57 = vld [vmem:[#allocation2 + $0x30] sm:$0xff]  ;;  %v1382_v44 = vadd.f32 %v7682_v35, %v7744_v34 }
 0x2a5   : > { %1549 = vst.msk [vmem:[#allocation2 + $0x61] sm:$0xff] %vm561_vm0, %v1474_v40  ;;  %v1475_v38 = vmul.f32 %v1369_v11, %v1058_v32  ;;  %v2347_v8 = vld [vmem:[#allocation2 + $0x31] sm:$0xff]  ;;  %v1641_v40 = vld [vmem:[#allocation2 + $0x19] sm:$0xff] }
 0x2a6   : > { %v2475_v10 = vld [vmem:[#allocation2 + $0x32] sm:$0xff]  ;;  %v2476_v36 = vld [vmem:[#allocation2 + $0x3a] sm:$0xff]  ;;  %1547 = vst.msk [vmem:[#allocation2 + $0x49] sm:$0xff] %vm561_vm0, %v1472_v6  ;;  %v1473_v33 = vmul.f32 %v1361_v25, %v1050_v41  ;;  %v1374_v41 = vadd.f32 %v7744_v34, %v7684_v45  ;;  %v1385_v25 = vadd.f32 %v7686_v47, %v7744_v34 }
 0x2a7   : > { %v2220_v54 = vld [vmem:[#allocation2 + $0x38] sm:$0xff]  ;;  %1550 = vst.msk [vmem:[#allocation2 + $0x69] sm:$0xff] %vm561_vm0, %v1475_v38  ;;  %v7803_v31 = vpack.c.bf16 %v2476_v36, %v2475_v10  ;;  %v1898_v63 = vld [vmem:[#allocation2 + $0x20] sm:$0xff]  ;;  %v1377_v38 = vadd.f32 %v7744_v34, %v7688_v55  ;;  %v3139_v10 = vsub.s32 0, %v3138_v28  ;;  %v6857_v55 = vld [vmem:[%s9768_s5 + $0x30] sm:$0xff]  }
 0x2a8   : > { %v2251_v14 = vpack.c.bf16 %v2220_v54, %v2219_v57  ;;  %v2348_v43 = vld [vmem:[#allocation2 + $0x39] sm:$0xff]  ;;  %1548 = vst.msk [vmem:[#allocation2 + $0x51] sm:$0xff] %vm561_vm0, %v1473_v33  ;;  %v6550_v29 = vpop.f32.mrb[12].mxu1  ;;  %v1642_v32 = vld [vmem:[#allocation2 + $0x21] sm:$0xff]  ;;  %v7826_v57 = vpop.f32.mrb[31].mxu0 }
 0x2a9   : > { %v1897_v23 = vld [vmem:[#allocation2 + $0x18] sm:$0xff]  ;;  %v2379_v11 = vpack.c.bf16 %v2348_v43, %v2347_v8  ;;  %2523 = vst.msk [vmem:[#allocation3 + $0x10] sm:$0xff] %vm561_vm0, %v7803_v31  ;;  %v1071_v35 = vadd.f32 %v6550_v29, %v7749_v61  ;;  %v1062_v36 = vpop.f32.mrb[13].mxu1  ;;  %v7819_v45 = vpack.c.bf16 %v1642_v32, %v1641_v40  ;;  %v2091_v28 = vld [vmem:[#allocation2 + $0x22] sm:$0xff] }
 0x2aa   : > { %2283 = vrot.lane.b32.xlu1 %v2251_v14, %s9903_s18  ;;  %1963 = vrot.lane.b32.xlu0 %v2251_v14, %s9879_s26  ;;  %v7817_v7 = vpack.c.bf16 %v1898_v63, %v1897_v23  ;;  %1625 = vst.msk [vmem:[#allocation3 + $0x30] sm:$0xff] %vm561_vm0, %v2251_v14  ;;  %v1063_v47 = vadd.f32 %v7749_v61, %v1062_v36  ;;  %v6551_v6 = vpop.f32.mrb[14].mxu1  ;;  %v6856_v14 = vld [vmem:[%s9768_s5 + $0x70] sm:$0xff]   ;;  %v2090_v43 = vld [vmem:[#allocation2 + $0x1a] sm:$0xff] }
 0x2ab   : > { %2075 = vst.msk [vmem:[#allocation3 + $0x20] sm:$0xff] %vm561_vm0, %v2379_v11  ;;  %v1478_v33 = vmul.f32 %v1382_v44, %v1071_v35  ;;  %v1074_v54 = vadd.f32 %v6551_v6, %v7749_v61  ;;  %v1065_v8 = vpop.f32.mrb[15].mxu1  ;;  %2074 = vst.msk [vmem:[#allocation3 + $0x8] sm:$0xff] %vm561_vm0, %v7819_v45  ;;  %6339 = vmatprep.subr.bf16.mxu1 %v6856_v14 }
 0x2ac   : > { %1624 = vst.msk [vmem:[#allocation3 + $0x18] sm:$0xff] %vm561_vm0, %v7817_v7  ;;  %v1476_v44 = vmul.f32 %v1374_v41, %v1063_v47  ;;  %v1066_v23 = vadd.f32 %v7749_v61, %v1065_v8  ;;  %v2223_v29 = vld [vmem:[#allocation2 + $0x60] sm:$0xff]  ;;  %6340 = vmatpush3.bf16.msra.mxu1 %v6857_v55 }
 0x2ad   : > { %1553 = vst.msk [vmem:[#allocation2 + $0x91] sm:$0xff] %vm561_vm0, %v1478_v33  ;;  %v1479_v63 = vmul.f32 %v1385_v25, %v1074_v54  ;;  %v2351_v40 = vld [vmem:[#allocation2 + $0x61] sm:$0xff]  ;;  %v2030_v32 = vld [vmem:[#allocation2 + $0x49] sm:$0xff]  ;;  %v1398_v25 = vadd.f32 %v7690_v24, %v7744_v34  ;;  %v1390_v33 = vadd.f32 %v7744_v34, %v7692_v42  ;;  %v7867_v42 = vpack.c.bf16 %v2091_v28, %v2090_v43 }
 0x2ae   : > { %2411 = vrot.lane.b32.xlu1 %v2379_v11, %s9879_s26  ;;  %1707 = vrot.lane.b32.xlu0 %v2379_v11, %s9904_s20  ;;  %v6917_v35 = vpop.eup %6916  ;;  %v2479_v36 = vld [vmem:[#allocation2 + $0x62] sm:$0xff]  ;;  %v2480_v6 = vld [vmem:[#allocation2 + $0x6a] sm:$0xff]  ;;  %1551 = vst.msk [vmem:[#allocation2 + $0x79] sm:$0xff] %vm561_vm0, %v1476_v44  ;;  %v1477_v15 = vmul.f32 %v1377_v38, %v1066_v23  ;;  %v1401_v44 = vadd.f32 %v7694_v21, %v7744_v34  ;;  %v6858_v21 = vld [vmem:[%s9768_s5 + $0x78] sm:$0xff]  }
 0x2af   : > { %v2224_v19 = vld [vmem:[#allocation2 + $0x68] sm:$0xff]  ;;  %v7844_v41 = vrot.slane %v6917_v35, %v3139_v10  ;;  %v2478_v8 = vld [vmem:[#allocation2 + $0x52] sm:$0xff]  ;;  %1554 = vst.msk [vmem:[#allocation2 + $0x99] sm:$0xff] %vm561_vm0, %v1479_v63  ;;  %v7847_v9 = vpack.c.bf16 %v2480_v6, %v2479_v36  ;;  %v1393_v23 = vadd.f32 %v7744_v34, %v7696_v0  ;;  %v1583_v63 = vld [vmem:[#allocation2 + $0x60] sm:$0xff]  ;;  %v9905_v6 = vunpack.c.l.bf16 %v7274_v30  ;;  %6341 = vmatprep.subr.bf16.mxu1 %v6858_v21 }
 0x2b0   : > { %v2477_v47 = vld [vmem:[#allocation2 + $0x4a] sm:$0xff]  ;;  %v2541_v38 = vld [vmem:[#allocation3 + $0x10] sm:$0xff]  ;;  %1552 = vst.msk [vmem:[#allocation2 + $0x81] sm:$0xff] %vm561_vm0, %v1477_v15  ;;  %v6554_v10 = vpop.f32.mrb[16].mxu1  ;;  %v7865_v24 = vpack.c.bf16 %v2224_v19, %v2223_v29  ;;  %v6859_v0 = vld [vmem:[%s9768_s5 + $0x38] sm:$0xff]   ;;  %v9909_v21 = vunpack.c.l.bf16 %v7310_v12 }
 0x2b1   : > { %v2352_v11 = vld [vmem:[#allocation2 + $0x69] sm:$0xff]  ;;  %v7853_v54 = vpack.c.bf16 %v2478_v8, %v2477_v47  ;;  %6612 = vmatprep.mubr.msk.bf16.mxu0 %vm561_vm0, %v2541_v38  ;;  %2525 = vst.msk [vmem:[#allocation3 + $0x40] sm:$0xff] %vm561_vm0, %v7847_v9  ;;  %v1087_v15 = vadd.f32 %v6554_v10, %v7749_v61  ;;  %v1078_v55 = vpop.f32.mrb[17].mxu1  ;;  %v3143_v47 = vmul.f32 %v7844_v41, %v9905_v6  ;;  %v9906_v8 = vunpack.c.h.bf16 %v7274_v30 }
 0x2b2   : > { %v7855_v14 = vpack.c.bf16 %v2352_v11, %v2351_v40  ;;  %2156 = vrot.lane.b32.xlu1 %v7803_v31, %s9904_s20  ;;  %v2031_v40 = vld [vmem:[#allocation2 + $0x51] sm:$0xff]  ;;  %1836 = vrot.lane.b32.xlu0 %v7803_v31, %s9903_s18  ;;  %v1079_v19 = vadd.f32 %v7749_v61, %v1078_v55  ;;  %v6555_v43 = vpop.f32.mrb[18].mxu1  ;;  %v1584_v29 = vld [vmem:[#allocation2 + $0x68] sm:$0xff]  ;;  %v9907_v6 = vunpack.c.l.bf16 %v7258_v13 }
 0x2b3   : > { %2524 = vst.msk [vmem:[#allocation3 + $0x28] sm:$0xff] %vm561_vm0, %v7853_v54  ;;  %v2060_v28 = vpack.c.bf16 %v2031_v40, %v2030_v32  ;;  %v1581_v35 = vld [vmem:[#allocation2 + $0x48] sm:$0xff]  ;;  %v1582_v36 = vld [vmem:[#allocation2 + $0x50] sm:$0xff]  ;;  %v3144_v11 = vmul.f32 %v7844_v41, %v9906_v8  ;;  %v1482_v38 = vmul.f32 %v1398_v25, %v1087_v15  ;;  %v1090_v31 = vadd.f32 %v6555_v43, %v7749_v61  ;;  %v1081_v10 = vpop.f32.mrb[19].mxu1  ;;  %v7900_v15 = vpop.f32.mrb[32].mxu0 }
 0x2b4   : > { %2077 = vst.msk [vmem:[#allocation3 + $0x50] sm:$0xff] %vm561_vm0, %v7855_v14  ;;  %v1611_v55 = vpack.c.bf16 %v1584_v29, %v1583_v63  ;;  %v1610_v4 = vpack.c.bf16 %v1582_v36, %v1581_v35  ;;  %v1480_v5 = vmul.f32 %v1390_v33, %v1079_v19  ;;  %v1082_v32 = vadd.f32 %v7749_v61, %v1081_v10  ;;  %v7918_v29 = vpop.f32.mrb[33].mxu0  ;;  %v2036_v35 = vld [vmem:[#allocation2 + $0x91] sm:$0xff] }
 0x2b5   : > { %6342 = vmatpush3.bf16.msra.mxu1 %v6859_v0  ;;  %2076 = vst.msk [vmem:[#allocation3 + $0x38] sm:$0xff] %vm561_vm0, %v2060_v28  ;;  %v3174_v40 = vpack.c.bf16 %v3144_v11, %v3143_v47  ;;  %v3141_v30 = vmul.f32 %v7844_v41, %v9907_v6  ;;  %1557 = vst.msk [vmem:[#allocation2 + $0xc1] sm:$0xff] %vm561_vm0, %v1482_v38  ;;  %v1483_v25 = vmul.f32 %v1401_v44, %v1090_v31  ;;  %v7934_v31 = vpop.f32.mrb[34].mxu0  ;;  %v2034_v10 = vld [vmem:[#allocation2 + $0x79] sm:$0xff] }
 0x2b6   : > { %2287 = vrot.lane.b32.xlu1 %v7865_v24, %s9903_s18  ;;  %1627 = vst.msk [vmem:[#allocation3 + $0x60] sm:$0xff] %vm561_vm0, %v1611_v55  ;;  %1626 = vst.msk [vmem:[#allocation3 + $0x48] sm:$0xff] %vm561_vm0, %v1610_v4  ;;  %v9908_v33 = vunpack.c.h.bf16 %v7258_v13  ;;  %v3145_v0 = vmul.f32 %v7844_v41, %v9909_v21  ;;  %v9910_v19 = vunpack.c.h.bf16 %v7310_v12  ;;  %2154 = vrot.lane.b32.xlu0 %v7867_v42, %s9904_s20  ;;  %v2483_v44 = vld [vmem:[#allocation2 + $0x92] sm:$0xff]  ;;  %v2484_v28 = vld [vmem:[#allocation2 + $0x9a] sm:$0xff]  ;;  %v9911_v12 = vunpack.c.l.bf16 %v7343_v37 }
 0x2b7   : > { %1555 = vst.msk [vmem:[#allocation2 + $0xa9] sm:$0xff] %vm561_vm0, %v1480_v5  ;;  %v1481_v4 = vmul.f32 %v1393_v23, %v1082_v32  ;;  %v1414_v13 = vadd.f32 %v7698_v17, %v7744_v34  ;;  %3190 = vst.msk [vmem:[#allocation5 + $0x8] sm:$0xff] %vm561_vm0, %v3174_v40  ;;  %v9912_v47 = vunpack.c.h.bf16 %v7343_v37  ;;  %v2481_v11 = vld [vmem:[#allocation2 + $0x7a] sm:$0xff]  ;;  %v2482_v38 = vld [vmem:[#allocation2 + $0x82] sm:$0xff]  ;;  %v7927_v5 = vpack.c.bf16 %v2484_v28, %v2483_v44 }
 0x2b8   : > { %v3142_v63 = vmul.f32 %v7844_v41, %v9908_v33  ;;  %v3146_v43 = vmul.f32 %v7844_v41, %v9910_v19  ;;  %v3147_v36 = vmul.f32 %v7844_v41, %v9911_v12  ;;  %1558 = vst.msk [vmem:[#allocation2 + $0xc9] sm:$0xff] %vm561_vm0, %v1483_v25  ;;  %v1406_v17 = vadd.f32 %v7744_v34, %v7700_v22  ;;  %v2547_v32 = vld [vmem:[#allocation3 + $0x40] sm:$0xff]  ;;  %v6558_v40 = vpop.f32.mrb[20].mxu1  ;;  %v2035_v21 = vld [vmem:[#allocation2 + $0x81] sm:$0xff]  ;;  %v1588_v28 = vld [vmem:[#allocation2 + $0x98] sm:$0xff] }
 0x2b9   : > { %v3148_v8 = vmul.f32 %v7844_v41, %v9912_v47  ;;  %v1417_v23 = vadd.f32 %v7702_v27, %v7744_v34  ;;  %v7936_v37 = vpack.c.bf16 %v2482_v38, %v2481_v11  ;;  %1556 = vst.msk [vmem:[#allocation2 + $0xb1] sm:$0xff] %vm561_vm0, %v1481_v4  ;;  %v1409_v6 = vadd.f32 %v7744_v34, %v7704_v56  ;;  %v1094_v33 = vpop.f32.mrb[21].mxu1  ;;  %v1585_v4 = vld [vmem:[#allocation2 + $0x78] sm:$0xff]  ;;  %v2221_v38 = vld [vmem:[#allocation2 + $0x48] sm:$0xff] }
 0x2ba   : > { %v3173_v55 = vpack.c.bf16 %v3142_v63, %v3141_v30  ;;  %v7943_v25 = vadd.f32 %v7718_v1, %v7744_v34  ;;  %v3175_v22 = vpack.c.bf16 %v3146_v43, %v3145_v0  ;;  %2415 = vrot.lane.b32.xlu1 %v7855_v14, %s9879_s26  ;;  %v2544_v27 = vld [vmem:[#allocation3 + $0x28] sm:$0xff]  ;;  %2527 = vst.msk [vmem:[#allocation3 + $0x70] sm:$0xff] %vm561_vm0, %v7927_v5  ;;  %v6559_v19 = vpop.f32.mrb[22].mxu1  ;;  %v9913_v11 = vunpack.c.l.bf16 %v7368_v16 }
 0x2bb   : > { %v1103_v30 = vadd.f32 %v6558_v40, %v7749_v61  ;;  %v7952_v63 = vadd.f32 %v7744_v34, %v7720_v20  ;;  %v7956_v56 = vadd.f32 %v7722_v18, %v7744_v34  ;;  %v2037_v1 = vld [vmem:[#allocation2 + $0x99] sm:$0xff]  ;;  %v3176_v0 = vpack.c.bf16 %v3148_v8, %v3147_v36  ;;  %1961 = vrot.lane.b32.xlu0 %v7817_v7, %s9879_s26  ;;  %v1587_v18 = vld [vmem:[#allocation2 + $0x90] sm:$0xff]  ;;  %v1097_v36 = vpop.f32.mrb[23].mxu1 }
 0x2bc   : > { %3189 = vst.msk [vmem:[#allocation5] sm:$0xff] %vm561_vm0, %v3173_v55  ;;  %6613 = vmatmul.mubr.msk.bf16.vlgmr.msra.gmra.mrb[36].mxu0 %vm561_vm0, %v2544_v27  ;;  %2526 = vst.msk [vmem:[#allocation3 + $0x58] sm:$0xff] %vm561_vm0, %v7936_v37  ;;  %v1095_v20 = vadd.f32 %v7749_v61, %v1094_v33  ;;  %v2063_v43 = vpack.c.bf16 %v2037_v1, %v2036_v35  ;;  %v2062_v44 = vpack.c.bf16 %v2035_v21, %v2034_v10  ;;  %v1586_v8 = vld [vmem:[#allocation2 + $0x80] sm:$0xff]  ;;  %v2222_v10 = vld [vmem:[#allocation2 + $0x50] sm:$0xff] }
 0x2bd   : > { %3191 = vst.msk [vmem:[#allocation5 + $0x10] sm:$0xff] %vm561_vm0, %v3175_v22  ;;  %6616 = vmatprep.mubr.msk.bf16.mxu0 %vm561_vm0, %v2547_v32  ;;  %v1486_v12 = vmul.f32 %v1414_v13, %v1103_v30  ;;  %v1106_v7 = vadd.f32 %v6559_v19, %v7749_v61  ;;  %v1613_v47 = vpack.c.bf16 %v1588_v28, %v1587_v18  ;;  %3192 = vst.msk [vmem:[#allocation5 + $0x18] sm:$0xff] %vm561_vm0, %v3176_v0  ;;  %v2349_v27 = vld [vmem:[#allocation2 + $0x49] sm:$0xff]  ;;  %v2350_v30 = vld [vmem:[#allocation2 + $0x51] sm:$0xff]  ;;  %v7998_v18 = vpop.f32.mrb[35].mxu0 }
 0x2be   : > { %v3149_v35 = vmul.f32 %v7844_v41, %v9913_v11  ;;  %v1484_v55 = vmul.f32 %v1406_v17, %v1095_v20  ;;  %v1098_v40 = vadd.f32 %v7749_v61, %v1097_v36  ;;  %2079 = vst.msk [vmem:[#allocation3 + $0x80] sm:$0xff] %vm561_vm0, %v2063_v43  ;;  %2078 = vst.msk [vmem:[#allocation3 + $0x68] sm:$0xff] %vm561_vm0, %v2062_v44  ;;  %v9914_v32 = vunpack.c.h.bf16 %v7368_v16 }
 0x2bf   : > { %v1612_v13 = vpack.c.bf16 %v1586_v8, %v1585_v4  ;;  %2160 = vrot.lane.b32.xlu1 %v7847_v9, %s9904_s20  ;;  %1561 = vst.msk [vmem:[#allocation2 + $0xf1] sm:$0xff] %vm561_vm0, %v1486_v12  ;;  %v1487_v33 = vmul.f32 %v1417_v23, %v1106_v7  ;;  %1629 = vst.msk [vmem:[#allocation3 + $0x90] sm:$0xff] %vm561_vm0, %v1613_v47  ;;  %v9915_v17 = vunpack.c.l.bf16 %v7382_v51  ;;  %v9916_v21 = vunpack.c.h.bf16 %v7382_v51  ;;  %v2487_v19 = vld [vmem:[#allocation2 + $0xc2] sm:$0xff]  ;;  %v2488_v43 = vld [vmem:[#allocation2 + $0xca] sm:$0xff] }
 0x2c0   : > { %v3150_v22 = vmul.f32 %v7844_v41, %v9914_v32  ;;  %v9917_v0 = vunpack.c.l.bf16 %v7395_v59  ;;  %1705 = vrot.lane.b32.xlu0 %v7819_v45, %s9904_s20  ;;  %1559 = vst.msk [vmem:[#allocation2 + $0xd9] sm:$0xff] %vm561_vm0, %v1484_v55  ;;  %v1485_v23 = vmul.f32 %v1409_v6, %v1098_v40  ;;  %v7996_v44 = vadd.f32 %v7744_v34, %v7730_v39  ;;  %v2040_v51 = vld [vmem:[#allocation2 + $0xc1] sm:$0xff]  ;;  %v2485_v7 = vld [vmem:[#allocation2 + $0xaa] sm:$0xff]  ;;  %v2486_v36 = vld [vmem:[#allocation2 + $0xb2] sm:$0xff] }
 0x2c1   : > { %v3151_v1 = vmul.f32 %v7844_v41, %v9915_v17  ;;  %v3152_v16 = vmul.f32 %v7844_v41, %v9916_v21  ;;  %1628 = vst.msk [vmem:[#allocation3 + $0x78] sm:$0xff] %vm561_vm0, %v1612_v13  ;;  %v9918_v4 = vunpack.c.h.bf16 %v7395_v59  ;;  %v8004_v45 = vpack.c.bf16 %v2222_v10, %v2221_v38  ;;  %1562 = vst.msk [vmem:[#allocation2 + $0xf9] sm:$0xff] %vm561_vm0, %v1487_v33  ;;  %v2038_v39 = vld [vmem:[#allocation2 + $0xa9] sm:$0xff]  ;;  %v2553_v55 = vld [vmem:[#allocation3 + $0x70] sm:$0xff]  ;;  %v6562_v59 = vpop.f32.mrb[24].mxu1 }
 0x2c2   : > { %v3153_v20 = vmul.f32 %v7844_v41, %v9917_v0  ;;  %v3177_v28 = vpack.c.bf16 %v3150_v22, %v3149_v35  ;;  %v8006_v47 = vpack.c.bf16 %v2488_v43, %v2487_v19  ;;  %v9919_v8 = vunpack.c.l.bf16 %v7407_v50  ;;  %1560 = vst.msk [vmem:[#allocation2 + $0xe1] sm:$0xff] %vm561_vm0, %v1485_v23  ;;  %v1592_v19 = vld [vmem:[#allocation2 + $0xc8] sm:$0xff] }
 0x2c3   : > { %v3154_v12 = vmul.f32 %v7844_v41, %v9918_v4  ;;  %v3178_v6 = vpack.c.bf16 %v3152_v16, %v3151_v1  ;;  %v8012_v35 = vpack.c.bf16 %v2486_v36, %v2485_v7  ;;  %v8017_v38 = vadd.f32 %v7769_v26, %v7744_v34  ;;  %2285 = vrot.lane.b32.xlu1 %v8004_v45, %s9903_s18  ;;  %v2550_v22 = vld [vmem:[#allocation3 + $0x58] sm:$0xff]  ;;  %v1110_v26 = vpop.f32.mrb[25].mxu1 }
 0x2c4   : > { %v3155_v11 = vmul.f32 %v7844_v41, %v9919_v8  ;;  %3193 = vst.msk [vmem:[#allocation5 + $0x20] sm:$0xff] %vm561_vm0, %v3177_v28  ;;  %v9920_v40 = vunpack.c.h.bf16 %v7407_v50  ;;  %v8025_v32 = vpack.c.bf16 %v2350_v30, %v2349_v27  ;;  %2529 = vst.msk [vmem:[#allocation3 + $0xa0] sm:$0xff] %vm561_vm0, %v8006_v47  ;;  %v1119_v33 = vadd.f32 %v6562_v59, %v7749_v61  ;;  %v2041_v1 = vld [vmem:[#allocation2 + $0xc9] sm:$0xff]  ;;  %v2039_v50 = vld [vmem:[#allocation2 + $0xb1] sm:$0xff] }
 0x2c5   : > { %v3179_v10 = vpack.c.bf16 %v3154_v12, %v3153_v20  ;;  %v8032_v17 = vadd.f32 %v7744_v34, %v7774_v49  ;;  %3194 = vst.msk [vmem:[#allocation5 + $0x28] sm:$0xff] %vm561_vm0, %v3178_v6  ;;  %v9921_v21 = vunpack.c.l.bf16 %v7418_v53  ;;  %1834 = vrot.lane.b32.xlu0 %v7867_v42, %s9903_s18  ;;  %6617 = vmatmul.mubr.msk.bf16.gmra.mrb[40].mxu0 %vm561_vm0, %v2550_v22  ;;  %2528 = vst.msk [vmem:[#allocation3 + $0x88] sm:$0xff] %vm561_vm0, %v8012_v35  ;;  %v6563_v49 = vpop.f32.mrb[26].mxu1  ;;  %v1591_v20 = vld [vmem:[#allocation2 + $0xc0] sm:$0xff]  ;;  %v1589_v43 = vld [vmem:[#allocation2 + $0xa8] sm:$0xff] }
 0x2c6   : > { %v3156_v13 = vmul.f32 %v7844_v41, %v9920_v40  ;;  %v1111_v30 = vadd.f32 %v7749_v61, %v1110_v26  ;;  %v2065_v16 = vpack.c.bf16 %v2041_v1, %v2040_v51  ;;  %v2064_v0 = vpack.c.bf16 %v2039_v50, %v2038_v39  ;;  %6620 = vmatprep.mubr.msk.bf16.mxu0 %vm561_vm0, %v2553_v55  ;;  %v1113_v28 = vpop.f32.mrb[27].mxu1  ;;  %v1590_v12 = vld [vmem:[#allocation2 + $0xb0] sm:$0xff]  ;;  %v2228_v55 = vld [vmem:[#allocation2 + $0x98] sm:$0xff] }
 0x2c7   : > { %v3157_v27 = vmul.f32 %v7844_v41, %v9921_v21  ;;  %3195 = vst.msk [vmem:[#allocation5 + $0x30] sm:$0xff] %vm561_vm0, %v3179_v10  ;;  %v1490_v23 = vmul.f32 %v7943_v25, %v1119_v33  ;;  %v1122_v42 = vadd.f32 %v6563_v49, %v7749_v61  ;;  %v1615_v4 = vpack.c.bf16 %v1592_v19, %v1591_v20  ;;  %v2227_v25 = vld [vmem:[#allocation2 + $0x90] sm:$0xff]  ;;  %v2361_v1 = vld [vmem:[#allocation2 + $0xd9] sm:$0xff] }
 0x2c8   : > { %v3180_v7 = vpack.c.bf16 %v3156_v13, %v3155_v11  ;;  %v1488_v36 = vmul.f32 %v7952_v63, %v1111_v30  ;;  %v1114_v51 = vadd.f32 %v7749_v61, %v1113_v28  ;;  %2081 = vst.msk [vmem:[#allocation3 + $0xb0] sm:$0xff] %vm561_vm0, %v2065_v16  ;;  %2080 = vst.msk [vmem:[#allocation3 + $0x98] sm:$0xff] %vm561_vm0, %v2064_v0  ;;  %v9922_v6 = vunpack.c.h.bf16 %v7418_v53  ;;  %v8060_v11 = vld [vmem:[#allocation2 + $0xf1] sm:$0xff]  ;;  %v2492_v33 = vld [vmem:[#allocation2 + $0xfa] sm:$0xff] }
 0x2c9   : > { %v1614_v39 = vpack.c.bf16 %v1590_v12, %v1589_v43  ;;  %2413 = vrot.lane.b32.xlu1 %v8025_v32, %s9879_s26  ;;  %1565 = vst.msk [vmem:[#allocation2 + $0x121] sm:$0xff] %vm561_vm0, %v1490_v23  ;;  %v1491_v63 = vmul.f32 %v7956_v56, %v1122_v42  ;;  %1631 = vst.msk [vmem:[#allocation3 + $0xc0] sm:$0xff] %vm561_vm0, %v1615_v4  ;;  %v9923_v59 = vunpack.c.l.bf16 %v7429_v48  ;;  %v9924_v10 = vunpack.c.h.bf16 %v7429_v48  ;;  %v2491_v56 = vld [vmem:[#allocation2 + $0xf2] sm:$0xff]  ;;  %v2489_v16 = vld [vmem:[#allocation2 + $0xda] sm:$0xff]  ;;  %v6566_v4 = vpop.f32.mrb[28].mxu1 }
 0x2ca   : > { %v3158_v8 = vmul.f32 %v7844_v41, %v9922_v6  ;;  %3196 = vst.msk [vmem:[#allocation5 + $0x38] sm:$0xff] %vm561_vm0, %v3180_v7  ;;  %v9925_v13 = vunpack.c.l.bf16 %v7440_v58  ;;  %1967 = vrot.lane.b32.xlu0 %v7865_v24, %s9879_s26  ;;  %1563 = vst.msk [vmem:[#allocation2 + $0x109] sm:$0xff] %vm561_vm0, %v1488_v36  ;;  %v1489_v26 = vmul.f32 %v7996_v44, %v1114_v51  ;;  %v9926_v48 = vunpack.c.h.bf16 %v7440_v58  ;;  %v2490_v24 = vld [vmem:[#allocation2 + $0xe2] sm:$0xff]  ;;  %v1595_v20 = vld [vmem:[#allocation2 + $0xf0] sm:$0xff]  ;;  %v1126_v51 = vpop.f32.mrb[29].mxu1 }
 0x2cb   : > { %v3159_v53 = vmul.f32 %v7844_v41, %v9923_v59  ;;  %v3160_v40 = vmul.f32 %v7844_v41, %v9924_v10  ;;  %1630 = vst.msk [vmem:[#allocation3 + $0xa8] sm:$0xff] %vm561_vm0, %v1614_v39  ;;  %v9927_v30 = vunpack.c.l.bf16 %v7451_v2  ;;  %v8083_v0 = vpack.c.bf16 %v2492_v33, %v2491_v56  ;;  %1566 = vst.msk [vmem:[#allocation2 + $0x129] sm:$0xff] %vm561_vm0, %v1491_v63  ;;  %v2559_v23 = vld [vmem:[#allocation3 + $0xa0] sm:$0xff]  ;;  %v2362_v28 = vld [vmem:[#allocation2 + $0xe1] sm:$0xff]  ;;  %v6567_v63 = vpop.f32.mrb[30].mxu1 }
 0x2cc   : > { %v3161_v22 = vmul.f32 %v7844_v41, %v9925_v13  ;;  %v3181_v50 = vpack.c.bf16 %v3158_v8, %v3157_v27  ;;  %v3162_v21 = vmul.f32 %v7844_v41, %v9926_v48  ;;  %v1449_v44 = vadd.f32 %v7778_v60, %v7744_v34  ;;  %1564 = vst.msk [vmem:[#allocation2 + $0x111] sm:$0xff] %vm561_vm0, %v1489_v26  ;;  %v2045_v39 = vld [vmem:[#allocation2 + $0xf9] sm:$0xff]  ;;  %v2355_v26 = vld [vmem:[#allocation2 + $0x91] sm:$0xff] }
 0x2cd   : > { %v3163_v49 = vmul.f32 %v7844_v41, %v9927_v30  ;;  %v3182_v19 = vpack.c.bf16 %v3160_v40, %v3159_v53  ;;  %v9928_v27 = vunpack.c.h.bf16 %v7451_v2  ;;  %v8091_v43 = vpack.c.bf16 %v2228_v55, %v2227_v25  ;;  %2158 = vrot.lane.b32.xlu1 %v7853_v54, %s9904_s20  ;;  %v2556_v2 = vld [vmem:[#allocation3 + $0x88] sm:$0xff]  ;;  %2531 = vst.msk [vmem:[#allocation3 + $0xd0] sm:$0xff] %vm561_vm0, %v8083_v0  ;;  %v1594_v40 = vld [vmem:[#allocation2 + $0xe0] sm:$0xff] }
 0x2ce   : > { %v8093_v42 = vpack.c.bf16 %v2490_v24, %v2489_v16  ;;  %v1441_v12 = vadd.f32 %v7744_v34, %v7826_v57  ;;  %3197 = vst.msk [vmem:[#allocation5 + $0x40] sm:$0xff] %vm561_vm0, %v3181_v50  ;;  %v3183_v60 = vpack.c.bf16 %v3162_v21, %v3161_v22  ;;  %v8103_v7 = vpack.c.bf16 %v2362_v28, %v2361_v1  ;;  %v1596_v6 = vld [vmem:[#allocation2 + $0xf8] sm:$0xff]  ;;  %v1129_v22 = vpop.f32.mrb[31].mxu1 }
 0x2cf   : > { %v3164_v58 = vmul.f32 %v7844_v41, %v9928_v27  ;;  %v1135_v36 = vadd.f32 %v6566_v4, %v7749_v61  ;;  %3198 = vst.msk [vmem:[#allocation5 + $0x48] sm:$0xff] %vm561_vm0, %v3182_v19  ;;  %v9929_v8 = vunpack.c.l.bf16 %v7462_v46  ;;  %1711 = vrot.lane.b32.xlu0 %v7855_v14, %s9904_s20  ;;  %6621 = vmatmul.mubr.msk.bf16.gmra.mrb[44].mxu0 %vm561_vm0, %v2556_v2  ;;  %v1593_v10 = vld [vmem:[#allocation2 + $0xd8] sm:$0xff]  ;;  %v9932_v30 = vunpack.c.h.bf16 %v7473_v3 }
 0x2d0   : > { %2530 = vst.msk [vmem:[#allocation3 + $0xb8] sm:$0xff] %vm561_vm0, %v8093_v42  ;;  %v1127_v55 = vadd.f32 %v7749_v61, %v1126_v51  ;;  %v2067_v59 = vpack.c.bf16 %v2045_v39, %v8060_v11  ;;  %v1617_v53 = vpack.c.bf16 %v1596_v6, %v1595_v20  ;;  %3199 = vst.msk [vmem:[#allocation5 + $0x50] sm:$0xff] %vm561_vm0, %v3183_v60  ;;  %6624 = vmatprep.mubr.msk.bf16.mxu0 %vm561_vm0, %v2559_v23  ;;  %v2356_v1 = vld [vmem:[#allocation2 + $0x99] sm:$0xff] }
 0x2d1   : > { %v3184_v57 = vpack.c.bf16 %v3164_v58, %v3163_v49  ;;  %v3165_v25 = vmul.f32 %v7844_v41, %v9929_v8  ;;  %v1494_v13 = vmul.f32 %v8017_v38, %v1135_v36  ;;  %v1138_v14 = vadd.f32 %v6567_v63, %v7749_v61  ;;  %2082 = vst.msk [vmem:[#allocation3 + $0xc8] sm:$0xff] %vm561_vm0, %v8103_v7  ;;  %v2367_v49 = vld [vmem:[#allocation2 + $0x121] sm:$0xff] }
 0x2d2   : > { %v1616_v56 = vpack.c.bf16 %v1594_v40, %v1593_v10  ;;  %v9930_v11 = vunpack.c.h.bf16 %v7462_v46  ;;  %v1492_v50 = vmul.f32 %v8032_v17, %v1127_v55  ;;  %v1130_v48 = vadd.f32 %v7749_v61, %v1129_v22  ;;  %2083 = vst.msk [vmem:[#allocation3 + $0xe0] sm:$0xff] %vm561_vm0, %v2067_v59  ;;  %1633 = vst.msk [vmem:[#allocation3 + $0xf0] sm:$0xff] %vm561_vm0, %v1617_v53  ;;  %v2237_v16 = vld [vmem:[#allocation2 + $0x108] sm:$0xff]  ;;  %v8141_v24 = vld [vmem:[#allocation2 + $0x120] sm:$0xff]  ;;  %v6570_v10 = vpop.f32.mrb[32].mxu1 }
 0x2d3   : > { %3200 = vst.msk [vmem:[#allocation5 + $0x58] sm:$0xff] %vm561_vm0, %v3184_v57  ;;  %v9931_v38 = vunpack.c.l.bf16 %v7473_v3  ;;  %v3168_v46 = vmul.f32 %v7844_v41, %v9932_v30  ;;  %2291 = vrot.lane.b32.xlu1 %v8091_v43, %s9903_s18  ;;  %1569 = vst.msk [vmem:[#allocation2 + $0x151] sm:$0xff] %vm561_vm0, %v1494_v13  ;;  %v1495_v17 = vmul.f32 %v1449_v44, %v1138_v14  ;;  %v9933_v19 = vunpack.c.l.bf16 %v7484_v62  ;;  %v2495_v23 = vld [vmem:[#allocation2 + $0x122] sm:$0xff]  ;;  %v2496_v28 = vld [vmem:[#allocation2 + $0x12a] sm:$0xff] }
 0x2d4   : > { %v3166_v33 = vmul.f32 %v7844_v41, %v9930_v11  ;;  %1632 = vst.msk [vmem:[#allocation3 + $0xd8] sm:$0xff] %vm561_vm0, %v1616_v56  ;;  %v9934_v3 = vunpack.c.h.bf16 %v7484_v62  ;;  %1840 = vrot.lane.b32.xlu0 %v7847_v9, %s9903_s18  ;;  %1567 = vst.msk [vmem:[#allocation2 + $0x139] sm:$0xff] %vm561_vm0, %v1492_v50  ;;  %v2365_v44 = vld [vmem:[#allocation2 + $0x109] sm:$0xff]  ;;  %v1493_v4 = vmul.f32 %v1441_v12, %v1130_v48  ;;  %v9935_v2 = vunpack.c.l.bf16 %v7495_v52  ;;  %v2494_v57 = vld [vmem:[#allocation2 + $0x112] sm:$0xff]  ;;  %v1142_v11 = vpop.f32.mrb[33].mxu1 }
 0x2d5   : > { %v3167_v21 = vmul.f32 %v7844_v41, %v9931_v38  ;;  %v3169_v27 = vmul.f32 %v7844_v41, %v9933_v19  ;;  %v9936_v51 = vunpack.c.h.bf16 %v7495_v52  ;;  %v8158_v39 = vpack.c.bf16 %v2356_v1, %v2355_v26  ;;  %v2493_v6 = vld [vmem:[#allocation2 + $0x10a] sm:$0xff]  ;;  %1570 = vst.msk [vmem:[#allocation2 + $0x159] sm:$0xff] %vm561_vm0, %v1495_v17  ;;  %v2565_v55 = vld [vmem:[#allocation3 + $0xd0] sm:$0xff]  ;;  %v6571_v1 = vpop.f32.mrb[34].mxu1 }
 0x2d6   : > { %v3185_v20 = vpack.c.bf16 %v3166_v33, %v3165_v25  ;;  %v3170_v58 = vmul.f32 %v7844_v41, %v9934_v3  ;;  %v3171_v36 = vmul.f32 %v7844_v41, %v9935_v2  ;;  %v2368_v9 = vld [vmem:[#allocation2 + $0x129] sm:$0xff]  ;;  %v8160_v8 = vpack.c.bf16 %v2496_v28, %v2495_v23  ;;  %v2366_v53 = vld [vmem:[#allocation2 + $0x111] sm:$0xff]  ;;  %1568 = vst.msk [vmem:[#allocation2 + $0x141] sm:$0xff] %vm561_vm0, %v1493_v4  ;;  %v1145_v38 = vpop.f32.mrb[35].mxu1  ;;  %v2354_v19 = vld [vmem:[#allocation2 + $0x81] sm:$0xff] }
 0x2d7   : > { %v3186_v60 = vpack.c.bf16 %v3168_v46, %v3167_v21  ;;  %v3172_v62 = vmul.f32 %v7844_v41, %v9936_v51  ;;  %v1462_v12 = vadd.f32 %v7900_v15, %v7744_v34  ;;  %v8166_v63 = vpack.c.bf16 %v2368_v9, %v2367_v49  ;;  %v2238_v52 = vld [vmem:[#allocation2 + $0x110] sm:$0xff]  ;;  %2419 = vrot.lane.b32.xlu1 %v8158_v39, %s9879_s26  ;;  %v2562_v15 = vld [vmem:[#allocation3 + $0xb8] sm:$0xff] }
 0x2d8   : > { %3201 = vst.msk [vmem:[#allocation5 + $0x60] sm:$0xff] %vm561_vm0, %v3185_v20  ;;  %v3187_v25 = vpack.c.bf16 %v3170_v58, %v3169_v27  ;;  %v8168_v59 = vpack.c.bf16 %v2494_v57, %v2493_v6  ;;  %v1454_v40 = vadd.f32 %v7744_v34, %v7918_v29  ;;  %v8176_v14 = vpack.c.bf16 %v2238_v52, %v2237_v16  ;;  %v1600_v33 = vld [vmem:[#allocation2 + $0x128] sm:$0xff]  ;;  %v2353_v20 = vld [vmem:[#allocation2 + $0x79] sm:$0xff] }
 0x2d9   : > { %3202 = vst.msk [vmem:[#allocation5 + $0x68] sm:$0xff] %vm561_vm0, %v3186_v60  ;;  %v3188_v13 = vpack.c.bf16 %v3172_v62, %v3171_v36  ;;  %v8178_v22 = vpack.c.bf16 %v2366_v53, %v2365_v44  ;;  %2533 = vst.msk [vmem:[#allocation3 + $0x100] sm:$0xff] %vm561_vm0, %v8160_v8  ;;  %v1151_v56 = vadd.f32 %v6570_v10, %v7749_v61  ;;  %1965 = vrot.lane.b32.xlu0 %v8004_v45, %s9879_s26 }
 0x2da   : > { %v1465_v29 = vadd.f32 %v7934_v31, %v7744_v34  ;;  %3203 = vst.msk [vmem:[#allocation5 + $0x70] sm:$0xff] %vm561_vm0, %v3187_v25  ;;  %6625 = vmatmul.mubr.msk.bf16.gmra.mrb[48].mxu0 %vm561_vm0, %v2562_v15  ;;  %2532 = vst.msk [vmem:[#allocation3 + $0xe8] sm:$0xff] %vm561_vm0, %v8168_v59  ;;  %v1143_v26 = vadd.f32 %v7749_v61, %v1142_v11  ;;  %v1457_v50 = vadd.f32 %v7744_v34, %v7998_v18  ;;  %v2225_v34 = vld [vmem:[#allocation2 + $0x78] sm:$0xff]  ;;  %v2226_v18 = vld [vmem:[#allocation2 + $0x80] sm:$0xff] }
 0x2db   : > { %2085 = vst.msk [vmem:[#allocation3 + $0x110] sm:$0xff] %vm561_vm0, %v8166_v63  ;;  %v1619_v31 = vpack.c.bf16 %v1600_v33, %v8141_v24  ;;  %3204 = vst.msk [vmem:[#allocation5 + $0x78] sm:$0xff] %vm561_vm0, %v3188_v13  ;;  %6628 = vmatprep.mubr.msk.bf16.mxu0 %vm561_vm0, %v2565_v55  ;;  %v1498_v45 = vmul.f32 %v1462_v12, %v1151_v56  ;;  %v1154_v48 = vadd.f32 %v6571_v1, %v7749_v61  ;;  %v2243_v21 = vld [vmem:[#allocation2 + $0x150] sm:$0xff]  ;;  %v2241_v16 = vld [vmem:[#allocation2 + $0x138] sm:$0xff] }
 0x2dc   : > { %2084 = vst.msk [vmem:[#allocation3 + $0xf8] sm:$0xff] %vm561_vm0, %v8178_v22  ;;  %1634 = vst.msk [vmem:[#allocation3 + $0x108] sm:$0xff] %vm561_vm0, %v8176_v14  ;;  %v1496_v30 = vmul.f32 %v1454_v40, %v1143_v26  ;;  %v1146_v46 = vadd.f32 %v7749_v61, %v1145_v38  ;;  %2164 = vrot.lane.b32.xlu1 %v7927_v5, %s9904_s20  ;;  %v2371_v49 = vld [vmem:[#allocation2 + $0x151] sm:$0xff]  ;;  %v2369_v24 = vld [vmem:[#allocation2 + $0x139] sm:$0xff]  ;;  %v8212_v23 = vpack.c.bf16 %v2226_v18, %v2225_v34 }
 0x2dd   : > { %1635 = vst.msk [vmem:[#allocation3 + $0x120] sm:$0xff] %vm561_vm0, %v1619_v31  ;;  %1573 = vst.msk [vmem:[#allocation2 + $0x181] sm:$0xff] %vm561_vm0, %v1498_v45  ;;  %v1499_v17 = vmul.f32 %v1465_v29, %v1154_v48  ;;  %1709 = vrot.lane.b32.xlu0 %v8025_v32, %s9904_s20  ;;  %v2499_v27 = vld [vmem:[#allocation2 + $0x152] sm:$0xff]  ;;  %v2500_v3 = vld [vmem:[#allocation2 + $0x15a] sm:$0xff]  ;;  %v2382_v25 = vpack.c.bf16 %v2354_v19, %v2353_v20 }
 0x2de   : > { %v2244_v58 = vld [vmem:[#allocation2 + $0x158] sm:$0xff]  ;;  %1571 = vst.msk [vmem:[#allocation2 + $0x169] sm:$0xff] %vm561_vm0, %v1496_v30  ;;  %v1497_v61 = vmul.f32 %v1457_v50, %v1146_v46  ;;  %v2498_v44 = vld [vmem:[#allocation2 + $0x142] sm:$0xff]  ;;  %v8216_v2 = vpack.c.bf16 %v2500_v3, %v2499_v27  ;;  %v2235_v20 = vld [vmem:[#allocation2 + $0xf0] sm:$0xff] }
 0x2df   : > { %v2497_v28 = vld [vmem:[#allocation2 + $0x13a] sm:$0xff]  ;;  %v8214_v4 = vpack.c.bf16 %v2244_v58, %v2243_v21  ;;  %1574 = vst.msk [vmem:[#allocation2 + $0x189] sm:$0xff] %vm561_vm0, %v1499_v17  ;;  %v2360_v18 = vld [vmem:[#allocation2 + $0xc9] sm:$0xff]  ;;  %v2363_v3 = vld [vmem:[#allocation2 + $0xf1] sm:$0xff] }
 0x2e0   : > { %v2372_v60 = vld [vmem:[#allocation2 + $0x159] sm:$0xff]  ;;  %v2571_v32 = vld [vmem:[#allocation3 + $0x100] sm:$0xff]  ;;  %v2370_v62 = vld [vmem:[#allocation2 + $0x141] sm:$0xff]  ;;  %1572 = vst.msk [vmem:[#allocation2 + $0x171] sm:$0xff] %vm561_vm0, %v1497_v61  ;;  %v8222_v6 = vpack.c.bf16 %v2498_v44, %v2497_v28  ;;  %2289 = vrot.lane.b32.xlu1 %v8212_v23, %s9903_s18 }
 0x2e1   : > { %v8219_v36 = vpack.c.bf16 %v2372_v60, %v2371_v49  ;;  %v2242_v51 = vld [vmem:[#allocation2 + $0x140] sm:$0xff]  ;;  %v2568_v57 = vld [vmem:[#allocation3 + $0xe8] sm:$0xff]  ;;  %v8228_v12 = vpack.c.bf16 %v2370_v62, %v2369_v24  ;;  %2535 = vst.msk [vmem:[#allocation3 + $0x130] sm:$0xff] %vm561_vm0, %v8216_v2  ;;  %1637 = vst.msk [vmem:[#allocation3 + $0x150] sm:$0xff] %vm561_vm0, %v8214_v4  ;;  %1838 = vrot.lane.b32.xlu0 %v7853_v54, %s9903_s18 }
 0x2e2   : > { %v8226_v9 = vpack.c.bf16 %v2242_v51, %v2241_v16  ;;  %6629 = vmatmul.mubr.msk.bf16.gmra.mrb[52].mxu0 %vm561_vm0, %v2568_v57  ;;  %2534 = vst.msk [vmem:[#allocation3 + $0x118] sm:$0xff] %vm561_vm0, %v8222_v6  ;;  %v2231_v55 = vld [vmem:[#allocation2 + $0xc0] sm:$0xff]  ;;  %v2232_v54 = vld [vmem:[#allocation2 + $0xc8] sm:$0xff]  ;;  %v2230_v49 = vld [vmem:[#allocation2 + $0xb0] sm:$0xff] }
 0x2e3   : > { %2087 = vst.msk [vmem:[#allocation3 + $0x140] sm:$0xff] %vm561_vm0, %v8219_v36  ;;  %6632 = vmatprep.mubr.msk.bf16.mxu0 %vm561_vm0, %v2571_v32  ;;  %2086 = vst.msk [vmem:[#allocation3 + $0x128] sm:$0xff] %vm561_vm0, %v8228_v12  ;;  %v2257_v45 = vpack.c.bf16 %v2232_v54, %v2231_v55  ;;  %v2359_v34 = vld [vmem:[#allocation2 + $0xc1] sm:$0xff]  ;;  %v2357_v17 = vld [vmem:[#allocation2 + $0xa9] sm:$0xff] }
 0x2e4   : > { %1636 = vst.msk [vmem:[#allocation3 + $0x138] sm:$0xff] %vm561_vm0, %v8226_v9  ;;  %2417 = vrot.lane.b32.xlu1 %v2382_v25, %s9879_s26  ;;  %v2375_v52 = vld [vmem:[#allocation2 + $0x181] sm:$0xff]  ;;  %v2358_v16 = vld [vmem:[#allocation2 + $0xb1] sm:$0xff]  ;;  %v2364_v58 = vld [vmem:[#allocation2 + $0xf9] sm:$0xff] }
 0x2e5   : > { %v2245_v53 = vld [vmem:[#allocation2 + $0x168] sm:$0xff]  ;;  %1971 = vrot.lane.b32.xlu0 %v8091_v43, %s9879_s26  ;;  %v2384_v24 = vpack.c.bf16 %v2358_v16, %v2357_v17  ;;  %v2236_v19 = vld [vmem:[#allocation2 + $0xf8] sm:$0xff]  ;;  %v2387_v61 = vpack.c.bf16 %v2364_v58, %v2363_v3 }
 0x2e6   : > { %v2503_v10 = vld [vmem:[#allocation2 + $0x182] sm:$0xff]  ;;  %v2504_v40 = vld [vmem:[#allocation2 + $0x18a] sm:$0xff]  ;;  %v2259_v27 = vpack.c.bf16 %v2236_v19, %v2235_v20 }
 0x2e7   : > { %v2373_v13 = vld [vmem:[#allocation2 + $0x169] sm:$0xff]  ;;  %v2502_v56 = vld [vmem:[#allocation2 + $0x172] sm:$0xff]  ;;  %v8249_v29 = vpack.c.bf16 %v2504_v40, %v2503_v10  ;;  %v2378_v3 = vld [vmem:[#allocation2 + $0x1a1] sm:$0xff] }
 0x2e8   : > { %v2501_v15 = vld [vmem:[#allocation2 + $0x16a] sm:$0xff]  ;;  %v2577_v33 = vld [vmem:[#allocation3 + $0x130] sm:$0xff]  ;;  %2162 = vrot.lane.b32.xlu1 %v7936_v37, %s9904_s20 }
 0x2e9   : > { %v2376_v11 = vld [vmem:[#allocation2 + $0x189] sm:$0xff]  ;;  %v2374_v50 = vld [vmem:[#allocation2 + $0x171] sm:$0xff]  ;;  %v8253_v31 = vpack.c.bf16 %v2502_v56, %v2501_v15  ;;  %2537 = vst.msk [vmem:[#allocation3 + $0x160] sm:$0xff] %vm561_vm0, %v8249_v29  ;;  %1715 = vrot.lane.b32.xlu0 %v8158_v39, %s9904_s20  ;;  %v2385_v39 = vpack.c.bf16 %v2360_v18, %v2359_v34 }
 0x2ea   : > { %v8251_v26 = vpack.c.bf16 %v2376_v11, %v2375_v52  ;;  %v2246_v1 = vld [vmem:[#allocation2 + $0x170] sm:$0xff]  ;;  %v2574_v43 = vld [vmem:[#allocation3 + $0x118] sm:$0xff]  ;;  %v8259_v38 = vpack.c.bf16 %v2374_v50, %v2373_v13 }
 0x2eb   : > { %v8257_v48 = vpack.c.bf16 %v2246_v1, %v2245_v53  ;;  %6633 = vmatmul.mubr.msk.bf16.gmra.mrb[56].mxu0 %vm561_vm0, %v2574_v43  ;;  %2536 = vst.msk [vmem:[#allocation3 + $0x148] sm:$0xff] %vm561_vm0, %v8253_v31  ;;  %v2229_v46 = vld [vmem:[#allocation2 + $0xa8] sm:$0xff] }
 0x2ec   : > { %2089 = vst.msk [vmem:[#allocation3 + $0x170] sm:$0xff] %vm561_vm0, %v8251_v26  ;;  %6636 = vmatprep.mubr.msk.bf16.mxu0 %vm561_vm0, %v2577_v33  ;;  %2088 = vst.msk [vmem:[#allocation3 + $0x158] sm:$0xff] %vm561_vm0, %v8259_v38  ;;  %2295 = vrot.lane.b32.xlu1 %v2257_v45, %s9903_s18  ;;  %v2240_v44 = vld [vmem:[#allocation2 + $0x128] sm:$0xff] }
 0x2ed   : > { %1638 = vst.msk [vmem:[#allocation3 + $0x168] sm:$0xff] %vm561_vm0, %v8257_v48  ;;  %1844 = vrot.lane.b32.xlu0 %v7927_v5, %s9903_s18  ;;  %v2256_v5 = vpack.c.bf16 %v2230_v49, %v2229_v46  ;;  %v2248_v56 = vld [vmem:[#allocation2 + $0x188] sm:$0xff] }
 0x2f0   : > { %v2583_v21 = vld [vmem:[#allocation3 + $0x160] sm:$0xff]  ;;  %2423 = vrot.lane.b32.xlu1 %v2385_v39, %s9879_s26 }
 0x2f1   : > { %1969 = vrot.lane.b32.xlu0 %v8212_v23, %s9879_s26  ;;  %v2234_v23 = vld [vmem:[#allocation2 + $0xe0] sm:$0xff] }
 0x2f2   : > { %v2580_v30 = vld [vmem:[#allocation3 + $0x148] sm:$0xff] }
 0x2f3   : > { %6637 = vmatmul.mubr.msk.bf16.gmra.mrb[60].mxu0 %vm561_vm0, %v2580_v30  ;;  %v2506_v30 = vld [vmem:[#allocation2 + $0x1a2] sm:$0xff] }
 0x2f4   : > { %6640 = vmatprep.mubr.msk.bf16.mxu0 %vm561_vm0, %v2583_v21  ;;  %2168 = vrot.lane.b32.xlu1 %v8006_v47, %s9904_s20 }
 0x2f5   : > { %1713 = vrot.lane.b32.xlu0 %v2382_v25, %s9904_s20 }
 0x2f8   : > { %2293 = vrot.lane.b32.xlu1 %v2256_v5, %s9903_s18 }
 0x2f9   : > { %1842 = vrot.lane.b32.xlu0 %v7936_v37, %s9903_s18  ;;  %v2233_v37 = vld [vmem:[#allocation2 + $0xd8] sm:$0xff] }
 0x2fa   : > { %v2258_v28 = vpack.c.bf16 %v2234_v23, %v2233_v37 }
 0x2fc   : > { %2421 = vrot.lane.b32.xlu1 %v2384_v24, %s9879_s26 }
 0x2fd   : > { %1975 = vrot.lane.b32.xlu0 %v2257_v45, %s9879_s26 }
 0x300   : > { %2166 = vrot.lane.b32.xlu1 %v8012_v35, %s9904_s20 }
 0x301   : > { %1719 = vrot.lane.b32.xlu0 %v2385_v39, %s9904_s20 }
 0x304   : > { %2299 = vrot.lane.b32.xlu1 %v2259_v27, %s9903_s18 }
 0x305   : > { %1848 = vrot.lane.b32.xlu0 %v8006_v47, %s9903_s18  ;;  %v2239_v47 = vld [vmem:[#allocation2 + $0x120] sm:$0xff] }
 0x306   : > { %v2261_v60 = vpack.c.bf16 %v2240_v44, %v2239_v47 }
 0x308   : > { %2427 = vrot.lane.b32.xlu1 %v2387_v61, %s9879_s26 }
 0x309   : > { %1973 = vrot.lane.b32.xlu0 %v2256_v5, %s9879_s26 }
 0x30c   : > { %2172 = vrot.lane.b32.xlu1 %v8083_v0, %s9904_s20 }
 0x30d   : > { %1717 = vrot.lane.b32.xlu0 %v2384_v24, %s9904_s20 }
 0x310   : > { %2297 = vrot.lane.b32.xlu1 %v2258_v28, %s9903_s18 }
 0x311   : > { %1846 = vrot.lane.b32.xlu0 %v8012_v35, %s9903_s18 }
 0x314   : > { %2425 = vrot.lane.b32.xlu1 %v8103_v7, %s9879_s26 }
 0x315   : > { %1979 = vrot.lane.b32.xlu0 %v2259_v27, %s9879_s26  ;;  %v2377_v27 = vld [vmem:[#allocation2 + $0x199] sm:$0xff] }
 0x316   : > { %v2394_v23 = vpack.c.bf16 %v2378_v3, %v2377_v27 }
 0x318   : > { %2170 = vrot.lane.b32.xlu1 %v8093_v42, %s9904_s20 }
 0x319   : > { %1723 = vrot.lane.b32.xlu0 %v2387_v61, %s9904_s20 }
 0x31c   : > { %2303 = vrot.lane.b32.xlu1 %v2261_v60, %s9903_s18  ;;  %v2284_v35 = vpop.permute.xlu1 %2283  ;;  %v1964_v32 = vpop.permute.xlu0 %1963 }
 0x31d   : > { %1852 = vrot.lane.b32.xlu0 %v8083_v0, %s9903_s18 }
 0x320   : > { %2431 = vrot.lane.b32.xlu1 %v8166_v63, %s9879_s26  ;;  %v2412_v51 = vpop.permute.xlu1 %2411  ;;  %v1708_v62 = vpop.permute.xlu0 %1707 }
 0x321   : > { %1977 = vrot.lane.b32.xlu0 %v2258_v28, %s9879_s26  ;;  %1754 = vst.msk [vmem:[#allocation3 + $0x30] sm:$0xff] %vm1751_vm6, %v1708_v62 }
 0x324   : > { %2176 = vrot.lane.b32.xlu1 %v8160_v8, %s9904_s20  ;;  %v2157_v0 = vpop.permute.xlu1 %2156  ;;  %v1837_v57 = vpop.permute.xlu0 %1836 }
 0x325   : > { %1721 = vrot.lane.b32.xlu0 %v8103_v7, %s9904_s20  ;;  %2203 = vst.msk [vmem:[#allocation3 + $0x20] sm:$0xff] %vm1751_vm6, %v2157_v0 }
 0x326   : > { %1883 = vst.msk [vmem:[#allocation3 + $0x30] sm:$0xff] %vm1880_vm7, %v1837_v57 }
 0x328   : > { %2301 = vrot.lane.b32.xlu1 %v8176_v14, %s9903_s18  ;;  %v2288_v7 = vpop.permute.xlu1 %2287  ;;  %v2155_v25 = vpop.permute.xlu0 %2154 }
 0x329   : > { %1850 = vrot.lane.b32.xlu0 %v8093_v42, %s9903_s18  ;;  %2202 = vst.msk [vmem:[#allocation3 + $0x8] sm:$0xff] %vm1751_vm6, %v2155_v25 }
 0x32a   : > { %2331 = vst.msk [vmem:[#allocation3 + $0x8] sm:$0xff] %vm1880_vm7, %v2284_v35 }
 0x32b   : > { %2459 = vst.msk [vmem:[#allocation3 + $0x8] sm:$0xff] %vm2009_vm8, %v2412_v51 }
 0x32c   : > { %2429 = vrot.lane.b32.xlu1 %v8178_v22, %s9879_s26  ;;  %v2416_v42 = vpop.permute.xlu1 %2415 }
 0x32d   : > { %1983 = vrot.lane.b32.xlu0 %v2261_v60, %s9879_s26  ;;  %v1962_v55 = vpop.permute.xlu0 %1961 }
 0x32e   : > { %2010 = vst.msk [vmem:[#allocation3] sm:$0xff] %vm2009_vm8, %v1962_v55 }
 0x330   : > { %2174 = vrot.lane.b32.xlu1 %v8168_v59, %s9904_s20 }
 0x331   : > { %1727 = vrot.lane.b32.xlu0 %v8166_v63, %s9904_s20  ;;  %v2161_v54 = vpop.permute.xlu1 %2160 }
 0x332   : > { %2205 = vst.msk [vmem:[#allocation3 + $0x50] sm:$0xff] %vm1751_vm6, %v2161_v54  ;;  %v1706_v52 = vpop.permute.xlu0 %1705  ;;  %v2540_v63 = vld [vmem:[#allocation3 + $0x8] sm:$0xff] }
 0x333   : > { %1753 = vst.msk [vmem:[#allocation3 + $0x18] sm:$0xff] %vm1751_vm6, %v1706_v52  ;;  %2815 = vmatprep.mubr.bf16.mxu1 %v2540_v63 }
 0x334   : > { %2307 = vrot.lane.b32.xlu1 %v8214_v4, %s9903_s18 }
 0x335   : > { %1856 = vrot.lane.b32.xlu0 %v8160_v8, %s9903_s18  ;;  %v2286_v53 = vpop.permute.xlu1 %2285  ;;  %v2539_v40 = vld [vmem:[#allocation3] sm:$0xff] }
 0x336   : > { %2332 = vst.msk [vmem:[#allocation3 + $0x20] sm:$0xff] %vm1880_vm7, %v2286_v53  ;;  %2816 = vmatmul.mubr.bf16.vlgmr.msra.gmra.mrb[36].mxu1 %v2539_v40 }
 0x337   : > { %v1835_v10 = vpop.permute.xlu0 %1834 }
 0x338   : > { %2435 = vrot.lane.b32.xlu1 %v8219_v36, %s9879_s26  ;;  %1882 = vst.msk [vmem:[#allocation3 + $0x18] sm:$0xff] %vm1880_vm7, %v1835_v10 }
 0x339   : > { %1981 = vrot.lane.b32.xlu0 %v8176_v14, %s9879_s26  ;;  %2011 = vst.msk [vmem:[#allocation3 + $0x18] sm:$0xff] %vm2009_vm8, %v1964_v32 }
 0x33b   : > { %v2414_v8 = vpop.permute.xlu1 %2413 }
 0x33c   : > { %2180 = vrot.lane.b32.xlu1 %v8216_v2, %s9904_s20  ;;  %2460 = vst.msk [vmem:[#allocation3 + $0x20] sm:$0xff] %vm2009_vm8, %v2414_v8  ;;  %v1968_v14 = vpop.permute.xlu0 %1967 }
 0x33d   : > { %1725 = vrot.lane.b32.xlu0 %v8178_v22, %s9904_s20  ;;  %v2247_v22 = vld [vmem:[#allocation2 + $0x180] sm:$0xff] }
 0x33e   : > { %v8372_v50 = vpack.c.bf16 %v2248_v56, %v2247_v22 }
 0x33f   : > { %v2159_v13 = vpop.permute.xlu1 %2158 }
 0x340   : > { %2305 = vrot.lane.b32.xlu1 %v8226_v9, %s9903_s18  ;;  %2204 = vst.msk [vmem:[#allocation3 + $0x38] sm:$0xff] %vm1751_vm6, %v2159_v13  ;;  %v2542_v1 = vld [vmem:[#allocation3 + $0x18] sm:$0xff] }
 0x341   : > { %1854 = vrot.lane.b32.xlu0 %v8168_v59, %s9903_s18  ;;  %v1712_v15 = vpop.permute.xlu0 %1711  ;;  %2333 = vst.msk [vmem:[#allocation3 + $0x38] sm:$0xff] %vm1880_vm7, %v2288_v7 }
 0x342   : > { %1756 = vst.msk [vmem:[#allocation3 + $0x60] sm:$0xff] %vm1751_vm6, %v1712_v15 }
 0x343   : > { %2461 = vst.msk [vmem:[#allocation3 + $0x38] sm:$0xff] %vm2009_vm8, %v2416_v42  ;;  %v2543_v59 = vld [vmem:[#allocation3 + $0x20] sm:$0xff] }
 0x344   : > { %2433 = vrot.lane.b32.xlu1 %v8228_v12, %s9879_s26  ;;  %2823 = vmatprep.mubr.bf16.mxu1 %v2543_v59 }
 0x345   : > { %1987 = vrot.lane.b32.xlu0 %v8214_v4, %s9879_s26  ;;  %v2292_v11 = vpop.permute.xlu1 %2291  ;;  %2824 = vmatmul.mubr.bf16.gmra.mrb[40].mxu1 %v2542_v1 }
 0x346   : > { %v1841_v33 = vpop.permute.xlu0 %1840 }
 0x347   : > { %1885 = vst.msk [vmem:[#allocation3 + $0x60] sm:$0xff] %vm1880_vm7, %v1841_v33 }
 0x348   : > { %2178 = vrot.lane.b32.xlu1 %v8222_v6, %s9904_s20 }
 0x349   : > { %1731 = vrot.lane.b32.xlu0 %v8219_v36, %s9904_s20  ;;  %v2420_v45 = vpop.permute.xlu1 %2419 }
 0x34a   : > { %v2546_v43 = vld [vmem:[#allocation3 + $0x38] sm:$0xff] }
 0x34b   : > { %v1966_v4 = vpop.permute.xlu0 %1965  ;;  %2831 = vmatprep.mubr.bf16.mxu1 %v2546_v43 }
 0x34c   : > { %2012 = vst.msk [vmem:[#allocation3 + $0x30] sm:$0xff] %vm2009_vm8, %v1966_v4  ;;  %2311 = vrot.lane.b32.xlu1 %v8372_v50, %s9903_s18 }
 0x34d   : > { %1985 = vrot.lane.b32.xlu0 %v8226_v9, %s9879_s26 }
 0x34e   : > { %v2165_v34 = vpop.permute.xlu1 %2164 }
 0x34f   : > { %2207 = vst.msk [vmem:[#allocation3 + $0x80] sm:$0xff] %vm1751_vm6, %v2165_v34  ;;  %v1710_v18 = vpop.permute.xlu0 %1709 }
 0x350   : > { %1755 = vst.msk [vmem:[#allocation3 + $0x48] sm:$0xff] %vm1751_vm6, %v1710_v18  ;;  %2439 = vrot.lane.b32.xlu1 %v8251_v26, %s9879_s26  ;;  %v2505_v26 = vld [vmem:[#allocation2 + $0x19a] sm:$0xff] }
 0x351   : > { %1729 = vrot.lane.b32.xlu0 %v8228_v12, %s9904_s20  ;;  %v2522_v46 = vpack.c.bf16 %v2506_v30, %v2505_v26 }
 0x352   : > { %v2290_v36 = vpop.permute.xlu1 %2289 }
 0x353   : > { %2334 = vst.msk [vmem:[#allocation3 + $0x50] sm:$0xff] %vm1880_vm7, %v2290_v36  ;;  %v1839_v39 = vpop.permute.xlu0 %1838  ;;  %v2545_v21 = vld [vmem:[#allocation3 + $0x30] sm:$0xff] }
 0x354   : > { %1884 = vst.msk [vmem:[#allocation3 + $0x48] sm:$0xff] %vm1880_vm7, %v1839_v39  ;;  %2832 = vmatmul.mubr.bf16.gmra.mrb[44].mxu1 %v2545_v21  ;;  %2309 = vrot.lane.b32.xlu1 %v8257_v48, %s9903_s18 }
 0x355   : > { %2013 = vst.msk [vmem:[#allocation3 + $0x48] sm:$0xff] %vm2009_vm8, %v1968_v14  ;;  %1858 = vrot.lane.b32.xlu0 %v8222_v6, %s9903_s18  ;;  %v2249_v6 = vld [vmem:[#allocation2 + $0x198] sm:$0xff] }
 0x356   : > { %v2418_v9 = vpop.permute.xlu1 %2417  ;;  %2538 = vst.msk [vmem:[#allocation3 + $0x178] sm:$0xff] %vm561_vm0, %v2522_v46 }
 0x357   : > { %2462 = vst.msk [vmem:[#allocation3 + $0x50] sm:$0xff] %vm2009_vm8, %v2418_v9  ;;  %v1972_v12 = vpop.permute.xlu0 %1971 }
 0x358   : > { %2437 = vrot.lane.b32.xlu1 %v8259_v38, %s9879_s26 }
 0x359   : > { %1860 = vrot.lane.b32.xlu0 %v8216_v2, %s9903_s18  ;;  %v2250_v2 = vld [vmem:[#allocation2 + $0x1a0] sm:$0xff] }
 0x35a   : > { %v2163_v49 = vpop.permute.xlu1 %2162  ;;  %v2266_v19 = vpack.c.bf16 %v2250_v2, %v2249_v6 }
 0x35b   : > { %2206 = vst.msk [vmem:[#allocation3 + $0x68] sm:$0xff] %vm1751_vm6, %v2163_v49  ;;  %v1716_v5 = vpop.permute.xlu0 %1715 }
 0x35c   : > { %2335 = vst.msk [vmem:[#allocation3 + $0x68] sm:$0xff] %vm1880_vm7, %v2292_v11  ;;  %2182 = vrot.lane.b32.xlu1 %v8253_v31, %s9904_s20  ;;  %v2548_v20 = vld [vmem:[#allocation3 + $0x48] sm:$0xff] }
 0x35d   : > { %1758 = vst.msk [vmem:[#allocation3 + $0x90] sm:$0xff] %vm1751_vm6, %v1716_v5  ;;  %1989 = vrot.lane.b32.xlu0 %v8257_v48, %s9879_s26  ;;  %v2586_v48 = vld [vmem:[#allocation3 + $0x178] sm:$0xff] }
 0x35e   : > { %2463 = vst.msk [vmem:[#allocation3 + $0x68] sm:$0xff] %vm2009_vm8, %v2420_v45  ;;  %v2296_v17 = vpop.permute.xlu1 %2295  ;;  %v2549_v16 = vld [vmem:[#allocation3 + $0x50] sm:$0xff]  ;;  %6641 = vmatmul.mubr.msk.bf16.gmra.mrb[64].mxu0 %vm561_vm0, %v2586_v48 }
 0x35f   : > { %v1845_v24 = vpop.permute.xlu0 %1844  ;;  %2839 = vmatprep.mubr.bf16.mxu1 %v2549_v16 }
 0x360   : > { %1887 = vst.msk [vmem:[#allocation3 + $0x90] sm:$0xff] %vm1880_vm7, %v1845_v24  ;;  %2184 = vrot.lane.b32.xlu1 %v8249_v29, %s9904_s20  ;;  %2840 = vmatmul.mubr.bf16.gmra.mrb[48].mxu1 %v2548_v20 }
 0x361   : > { %1733 = vrot.lane.b32.xlu0 %v8259_v38, %s9904_s20 }
 0x362   : > { %v2424_v58 = vpop.permute.xlu1 %2423 }
 0x363   : > { %v1970_v61 = vpop.permute.xlu0 %1969 }
 0x364   : > { %2014 = vst.msk [vmem:[#allocation3 + $0x60] sm:$0xff] %vm2009_vm8, %v1970_v61  ;;  %2313 = vrot.lane.b32.xlu1 %v2266_v19, %s9903_s18 }
 0x365   : > { %v2552_v37 = vld [vmem:[#allocation3 + $0x68] sm:$0xff]  ;;  %1862 = vrot.lane.b32.xlu0 %v8253_v31, %s9903_s18 }
 0x366   : > { %2847 = vmatprep.mubr.bf16.mxu1 %v2552_v37  ;;  %v2169_v29 = vpop.permute.xlu1 %2168 }
 0x367   : > { %2209 = vst.msk [vmem:[#allocation3 + $0xb0] sm:$0xff] %vm1751_vm6, %v2169_v29  ;;  %v1714_v38 = vpop.permute.xlu0 %1713 }
 0x368   : > { %1757 = vst.msk [vmem:[#allocation3 + $0x78] sm:$0xff] %vm1751_vm6, %v1714_v38  ;;  %2441 = vrot.lane.b32.xlu1 %v2394_v23, %s9879_s26 }
 0x369   : > { %1991 = vrot.lane.b32.xlu0 %v8372_v50, %s9879_s26 }
 0x36a   : > { %v2294_v28 = vpop.permute.xlu1 %2293 }
 0x36b   : > { %2336 = vst.msk [vmem:[#allocation3 + $0x80] sm:$0xff] %vm1880_vm7, %v2294_v28  ;;  %v1843_v47 = vpop.permute.xlu0 %1842  ;;  %v2551_v44 = vld [vmem:[#allocation3 + $0x60] sm:$0xff] }
 0x36c   : > { %1886 = vst.msk [vmem:[#allocation3 + $0x78] sm:$0xff] %vm1880_vm7, %v1843_v47  ;;  %2848 = vmatmul.mubr.bf16.gmra.mrb[52].mxu1 %v2551_v44  ;;  %3206 = vrot.lane.b32.xlu1 %v7844_v41, %s9879_s26 }
 0x36d   : > { %2015 = vst.msk [vmem:[#allocation3 + $0x78] sm:$0xff] %vm2009_vm8, %v1972_v12 }
 0x36e   : > { %v2422_v31 = vpop.permute.xlu1 %2421 }
 0x36f   : > { %2464 = vst.msk [vmem:[#allocation3 + $0x80] sm:$0xff] %vm2009_vm8, %v2422_v31  ;;  %v1976_v60 = vpop.permute.xlu0 %1975 }
 0x372   : > { %v2167_v35 = vpop.permute.xlu1 %2166 }
 0x373   : > { %2208 = vst.msk [vmem:[#allocation3 + $0x98] sm:$0xff] %vm1751_vm6, %v2167_v35  ;;  %v1720_v32 = vpop.permute.xlu0 %1719 }
 0x374   : > { %2337 = vst.msk [vmem:[#allocation3 + $0x98] sm:$0xff] %vm1880_vm7, %v2296_v17  ;;  %v2554_v41 = vld [vmem:[#allocation3 + $0x78] sm:$0xff] }
 0x375   : > { %1760 = vst.msk [vmem:[#allocation3 + $0xc0] sm:$0xff] %vm1751_vm6, %v1720_v32 }
 0x376   : > { %2465 = vst.msk [vmem:[#allocation3 + $0x98] sm:$0xff] %vm2009_vm8, %v2424_v58  ;;  %v2300_v51 = vpop.permute.xlu1 %2299  ;;  %v2555_v62 = vld [vmem:[#allocation3 + $0x80] sm:$0xff] }
 0x377   : > { %v1849_v0 = vpop.permute.xlu0 %1848  ;;  %2855 = vmatprep.mubr.bf16.mxu1 %v2555_v62 }
 0x378   : > { %1889 = vst.msk [vmem:[#allocation3 + $0xc0] sm:$0xff] %vm1880_vm7, %v1849_v0  ;;  %2856 = vmatmul.mubr.bf16.gmra.mrb[56].mxu1 %v2554_v41 }
 0x37a   : > { %v2428_v57 = vpop.permute.xlu1 %2427 }
 0x37b   : > { %v1974_v7 = vpop.permute.xlu0 %1973 }
 0x37c   : > { %2016 = vst.msk [vmem:[#allocation3 + $0x90] sm:$0xff] %vm2009_vm8, %v1974_v7 }
 0x37d   : > { %v2558_v25 = vld [vmem:[#allocation3 + $0x98] sm:$0xff] }
 0x37e   : > { %2863 = vmatprep.mubr.bf16.mxu1 %v2558_v25  ;;  %v2173_v42 = vpop.permute.xlu1 %2172 }
 0x37f   : > { %2211 = vst.msk [vmem:[#allocation3 + $0xe0] sm:$0xff] %vm1751_vm6, %v2173_v42  ;;  %v1718_v55 = vpop.permute.xlu0 %1717 }
 0x380   : > { %1759 = vst.msk [vmem:[#allocation3 + $0xa8] sm:$0xff] %vm1751_vm6, %v1718_v55 }
 0x382   : > { %v2298_v54 = vpop.permute.xlu1 %2297 }
 0x383   : > { %2338 = vst.msk [vmem:[#allocation3 + $0xb0] sm:$0xff] %vm1880_vm7, %v2298_v54  ;;  %v1847_v52 = vpop.permute.xlu0 %1846  ;;  %v2557_v63 = vld [vmem:[#allocation3 + $0x90] sm:$0xff] }
 0x384   : > { %1888 = vst.msk [vmem:[#allocation3 + $0xa8] sm:$0xff] %vm1880_vm7, %v1847_v52  ;;  %2864 = vmatmul.mubr.bf16.gmra.mrb[60].mxu1 %v2557_v63 }
 0x385   : > { %2017 = vst.msk [vmem:[#allocation3 + $0xa8] sm:$0xff] %vm2009_vm8, %v1976_v60 }
 0x386   : > { %v2426_v53 = vpop.permute.xlu1 %2425 }
 0x387   : > { %2466 = vst.msk [vmem:[#allocation3 + $0xb0] sm:$0xff] %vm2009_vm8, %v2426_v53  ;;  %v1980_v10 = vpop.permute.xlu0 %1979 }
 0x38a   : > { %v2171_v40 = vpop.permute.xlu1 %2170 }
 0x38b   : > { %2210 = vst.msk [vmem:[#allocation3 + $0xc8] sm:$0xff] %vm1751_vm6, %v2171_v40  ;;  %v1724_v8 = vpop.permute.xlu0 %1723 }
 0x38c   : > { %2339 = vst.msk [vmem:[#allocation3 + $0xc8] sm:$0xff] %vm1880_vm7, %v2300_v51  ;;  %v2560_v22 = vld [vmem:[#allocation3 + $0xa8] sm:$0xff] }
 0x38d   : > { %1762 = vst.msk [vmem:[#allocation3 + $0xf0] sm:$0xff] %vm1751_vm6, %v1724_v8 }
 0x38e   : > { %2467 = vst.msk [vmem:[#allocation3 + $0xc8] sm:$0xff] %vm2009_vm8, %v2428_v57  ;;  %v2304_v14 = vpop.permute.xlu1 %2303  ;;  %v2561_v13 = vld [vmem:[#allocation3 + $0xb0] sm:$0xff] }
 0x38f   : > { %v1853_v15 = vpop.permute.xlu0 %1852  ;;  %2871 = vmatprep.mubr.bf16.mxu1 %v2561_v13  ;;  %v8447_v59 = vpop.f32.mrb[36].mxu0  ;;  %v6860_v57 = vld [vmem:[%s9769_s6] sm:$0xff]  }
 0x390   : > { %1891 = vst.msk [vmem:[#allocation3 + $0xf0] sm:$0xff] %vm1880_vm7, %v1853_v15  ;;  %2872 = vmatmul.mubr.bf16.gmra.mrb[64].mxu1 %v2560_v22  ;;  %v8449_v1 = vpop.f32.mrb[37].mxu0  ;;  %6688 = vmatprep.subr.bf16.mxu1 %v6860_v57 }
 0x391   : > { %v8451_v50 = vpop.f32.mrb[38].mxu0  ;;  %6689 = vmatpush3.bf16.msra.mxu1 %v6860_v57 }
 0x392   : > { %v2432_v56 = vpop.permute.xlu1 %2431  ;;  %v8454_v43 = vpop.f32.mrb[39].mxu0 }
 0x393   : > { %v1978_v11 = vpop.permute.xlu0 %1977 }
 0x394   : > { %2018 = vst.msk [vmem:[#allocation3 + $0xc0] sm:$0xff] %vm2009_vm8, %v1978_v11 }
 0x395   : > { %v2564_v33 = vld [vmem:[#allocation3 + $0xc8] sm:$0xff] }
 0x396   : > { %2879 = vmatprep.mubr.bf16.mxu1 %v2564_v33  ;;  %v2177_v45 = vpop.permute.xlu1 %2176 }
 0x397   : > { %2213 = vst.msk [vmem:[#allocation3 + $0x110] sm:$0xff] %vm1751_vm6, %v2177_v45  ;;  %v1722_v4 = vpop.permute.xlu0 %1721 }
 0x398   : > { %1761 = vst.msk [vmem:[#allocation3 + $0xd8] sm:$0xff] %vm1751_vm6, %v1722_v4  ;;  %v8459_v39 = vpop.f32.mrb[40].mxu0 }
 0x399   : > { %v8462_v21 = vpop.f32.mrb[41].mxu0 }
 0x39a   : > { %v2302_v34 = vpop.permute.xlu1 %2301  ;;  %v8464_v12 = vpop.f32.mrb[42].mxu0 }
 0x39b   : > { %2340 = vst.msk [vmem:[#allocation3 + $0xe0] sm:$0xff] %vm1880_vm7, %v2302_v34  ;;  %v1851_v18 = vpop.permute.xlu0 %1850  ;;  %v2563_v36 = vld [vmem:[#allocation3 + $0xc0] sm:$0xff]  ;;  %v8467_v30 = vpop.f32.mrb[43].mxu0  ;;  %v6861_v34 = vld [vmem:[%s9769_s6 + $0x8] sm:$0xff]  }
 0x39c   : > { %1890 = vst.msk [vmem:[#allocation3 + $0xd8] sm:$0xff] %vm1880_vm7, %v1851_v18  ;;  %2880 = vmatmul.mubr.bf16.gmra.mrb[68].mxu1 %v2563_v36  ;;  %6690 = vmatprep.subr.bf16.mxu1 %v6861_v34 }
 0x39d   : > { %2019 = vst.msk [vmem:[#allocation3 + $0xd8] sm:$0xff] %vm2009_vm8, %v1980_v10  ;;  %6691 = vmatpush3.bf16.msra.mxu1 %v6861_v34 }
 0x39e   : > { %v2430_v9 = vpop.permute.xlu1 %2429 }
 0x39f   : > { %2468 = vst.msk [vmem:[#allocation3 + $0xe0] sm:$0xff] %vm2009_vm8, %v2430_v9  ;;  %v1984_v26 = vpop.permute.xlu0 %1983 }
 0x3a2   : > { %v2175_v46 = vpop.permute.xlu1 %2174  ;;  %v8472_v5 = vpop.f32.mrb[44].mxu0 }
 0x3a3   : > { %2212 = vst.msk [vmem:[#allocation3 + $0xf8] sm:$0xff] %vm1751_vm6, %v2175_v46  ;;  %v1728_v49 = vpop.permute.xlu0 %1727  ;;  %v8475_v6 = vpop.f32.mrb[45].mxu0 }
 0x3a4   : > { %2341 = vst.msk [vmem:[#allocation3 + $0xf8] sm:$0xff] %vm1880_vm7, %v2304_v14  ;;  %v8477_v16 = vpop.f32.mrb[46].mxu0  ;;  %v2566_v20 = vld [vmem:[#allocation3 + $0xd8] sm:$0xff] }
 0x3a5   : > { %1764 = vst.msk [vmem:[#allocation3 + $0x120] sm:$0xff] %vm1751_vm6, %v1728_v49  ;;  %v8479_v19 = vpop.f32.mrb[47].mxu0 }
 0x3a6   : > { %2469 = vst.msk [vmem:[#allocation3 + $0xf8] sm:$0xff] %vm2009_vm8, %v2432_v56  ;;  %v2308_v2 = vpop.permute.xlu1 %2307  ;;  %v2567_v17 = vld [vmem:[#allocation3 + $0xe0] sm:$0xff] }
 0x3a7   : > { %v1857_v24 = vpop.permute.xlu0 %1856  ;;  %2887 = vmatprep.mubr.bf16.mxu1 %v2567_v17 }
 0x3a8   : > { %1893 = vst.msk [vmem:[#allocation3 + $0x120] sm:$0xff] %vm1880_vm7, %v1857_v24  ;;  %2888 = vmatmul.mubr.bf16.gmra.mrb[72].mxu1 %v2566_v20 }
 0x3aa   : > { %v2436_v27 = vpop.permute.xlu1 %2435 }
 0x3ab   : > { %v1982_v3 = vpop.permute.xlu0 %1981 }
 0x3ac   : > { %2020 = vst.msk [vmem:[#allocation3 + $0xf0] sm:$0xff] %vm2009_vm8, %v1982_v3 }
 0x3ad   : > { %v2570_v48 = vld [vmem:[#allocation3 + $0xf8] sm:$0xff]  ;;  %v8483_v58 = vpop.f32.mrb[48].mxu0 }
 0x3ae   : > { %2895 = vmatprep.mubr.bf16.mxu1 %v2570_v48  ;;  %v8485_v61 = vpop.f32.mrb[49].mxu0  ;;  %v2181_v37 = vpop.permute.xlu1 %2180 }
 0x3af   : > { %v8487_v23 = vpop.f32.mrb[50].mxu0  ;;  %2215 = vst.msk [vmem:[#allocation3 + $0x140] sm:$0xff] %vm1751_vm6, %v2181_v37  ;;  %v1726_v29 = vpop.permute.xlu0 %1725  ;;  %v9937_v37 = vld [vmem:[#allocation10_spill] sm:$0xff] }
 0x3b0   : > { %v8490_v38 = vpop.f32.mrb[51].mxu0  ;;  %1763 = vst.msk [vmem:[#allocation3 + $0x108] sm:$0xff] %vm1751_vm6, %v1726_v29  ;;  %v9938_v29 = vunpack.c.l.bf16 %v9937_v37 }
 0x3b2   : > { %v2306_v28 = vpop.permute.xlu1 %2305 }
 0x3b3   : > { %2342 = vst.msk [vmem:[#allocation3 + $0x110] sm:$0xff] %vm1880_vm7, %v2306_v28  ;;  %v1855_v47 = vpop.permute.xlu0 %1854  ;;  %v2569_v44 = vld [vmem:[#allocation3 + $0xf0] sm:$0xff] }
 0x3b4   : > { %1892 = vst.msk [vmem:[#allocation3 + $0x108] sm:$0xff] %vm1880_vm7, %v1855_v47  ;;  %2896 = vmatmul.mubr.bf16.gmra.mrb[76].mxu1 %v2569_v44  ;;  %v9939_v47 = vunpack.c.h.bf16 %v9937_v37  ;;  %v9943_v37 = vld [vmem:[#allocation11_spill] sm:$0xff] }
 0x3b5   : > { %v8495_v31 = vpop.f32.mrb[52].mxu0  ;;  %2021 = vst.msk [vmem:[#allocation3 + $0x108] sm:$0xff] %vm2009_vm8, %v1984_v26 }
 0x3b6   : > { %v8498_v60 = vpop.f32.mrb[53].mxu0  ;;  %v2434_v35 = vpop.permute.xlu1 %2433 }
 0x3b7   : > { %v8500_v32 = vpop.f32.mrb[54].mxu0  ;;  %2470 = vst.msk [vmem:[#allocation3 + $0x110] sm:$0xff] %vm2009_vm8, %v2434_v35  ;;  %v1988_v51 = vpop.permute.xlu0 %1987  ;;  %v9940_v35 = vld [vmem:[#allocation9_spill] sm:$0xff] }
 0x3b8   : > { %v8503_v62 = vpop.f32.mrb[55].mxu0 }
 0x3ba   : > { %v2179_v0 = vpop.permute.xlu1 %2178 }
 0x3bb   : > { %2214 = vst.msk [vmem:[#allocation3 + $0x128] sm:$0xff] %vm1751_vm6, %v2179_v0  ;;  %v1732_v41 = vpop.permute.xlu0 %1731 }
 0x3bc   : > { %2343 = vst.msk [vmem:[#allocation3 + $0x128] sm:$0xff] %vm1880_vm7, %v2308_v2  ;;  %v2572_v63 = vld [vmem:[#allocation3 + $0x108] sm:$0xff] }
 0x3bd   : > { %1766 = vst.msk [vmem:[#allocation3 + $0x150] sm:$0xff] %vm1751_vm6, %v1732_v41  ;;  %v9942_v41 = vunpack.c.h.bf16 %v9940_v35 }
 0x3be   : > { %v8511_v7 = vpop.f32.mrb[56].mxu0  ;;  %2471 = vst.msk [vmem:[#allocation3 + $0x128] sm:$0xff] %vm2009_vm8, %v2436_v27  ;;  %v2312_v42 = vpop.permute.xlu1 %2311  ;;  %v2573_v55 = vld [vmem:[#allocation3 + $0x110] sm:$0xff] }
 0x3bf   : > { %v8514_v25 = vpop.f32.mrb[57].mxu0  ;;  %v1986_v52 = vpop.permute.xlu0 %1985  ;;  %2903 = vmatprep.mubr.bf16.mxu1 %v2573_v55 }
 0x3c0   : > { %v8516_v54 = vpop.f32.mrb[58].mxu0  ;;  %2022 = vst.msk [vmem:[#allocation3 + $0x120] sm:$0xff] %vm2009_vm8, %v1986_v52  ;;  %2904 = vmatmul.mubr.bf16.gmra.mrb[80].mxu1 %v2572_v63 }
 0x3c1   : > { %v8518_v53 = vpop.f32.mrb[59].mxu0 }
 0x3c2   : > { %v2440_v10 = vpop.permute.xlu1 %2439 }
 0x3c3   : > { %v1730_v40 = vpop.permute.xlu0 %1729 }
 0x3c4   : > { %1765 = vst.msk [vmem:[#allocation3 + $0x138] sm:$0xff] %vm1751_vm6, %v1730_v40  ;;  %v6863_v40 = vld [vmem:[%s9769_s6 + $0x18] sm:$0xff]  }
 0x3c5   : > { %v2576_v8 = vld [vmem:[#allocation3 + $0x128] sm:$0xff] }
 0x3c6   : > { %v8522_v14 = vpop.f32.mrb[60].mxu0  ;;  %2911 = vmatprep.mubr.bf16.mxu1 %v2576_v8  ;;  %v2310_v15 = vpop.permute.xlu1 %2309 }
 0x3c7   : > { %v8524_v13 = vpop.f32.mrb[61].mxu0  ;;  %2344 = vst.msk [vmem:[#allocation3 + $0x140] sm:$0xff] %vm1880_vm7, %v2310_v15  ;;  %v1859_v56 = vpop.permute.xlu0 %1858  ;;  %v2575_v11 = vld [vmem:[#allocation3 + $0x120] sm:$0xff]  ;;  %v8573_v15 = vld [vmem:[%s9773_s10 + $0x2] ss:$0 sm:$0xff] }
 0x3c8   : > { %v8526_v22 = vpop.f32.mrb[62].mxu0  ;;  %1894 = vst.msk [vmem:[#allocation3 + $0x138] sm:$0xff] %vm1880_vm7, %v1859_v56  ;;  %2912 = vmatmul.mubr.bf16.gmra.mrb[84].mxu1 %v2575_v11 }
 0x3c9   : > { %v8529_v33 = vpop.f32.mrb[63].mxu0  ;;  %2023 = vst.msk [vmem:[#allocation3 + $0x138] sm:$0xff] %vm2009_vm8, %v1988_v51  ;;  %v9941_v51 = vunpack.c.l.bf16 %v9940_v35 }
 0x3ca   : > { %v2438_v45 = vpop.permute.xlu1 %2437 }
 0x3cb   : > { %2472 = vst.msk [vmem:[#allocation3 + $0x140] sm:$0xff] %vm2009_vm8, %v2438_v45  ;;  %v1861_v4 = vpop.permute.xlu0 %1860 }
 0x3cc   : > { %1895 = vst.msk [vmem:[#allocation3 + $0x150] sm:$0xff] %vm1880_vm7, %v1861_v4  ;;  %v6865_v4 = vld [vmem:[%s9772_s9] sm:$0xff]  }
 0x3cd   : > { %6644 = vmatprep.subr.bf16.mxu0 %v6865_v4 }
 0x3ce   : > { %v2183_v18 = vpop.permute.xlu1 %2182  ;;  %6645 = vmatpush3.bf16.msra.mxu0 %v6865_v4 }
 0x3cf   : > { %2216 = vst.msk [vmem:[#allocation3 + $0x158] sm:$0xff] %vm1751_vm6, %v2183_v18  ;;  %v1990_v36 = vpop.permute.xlu0 %1989 }
 0x3d0   : > { %2345 = vst.msk [vmem:[#allocation3 + $0x158] sm:$0xff] %vm1880_vm7, %v2312_v42  ;;  %v2578_v49 = vld [vmem:[#allocation3 + $0x138] sm:$0xff] }
 0x3d1   : > { %2024 = vst.msk [vmem:[#allocation3 + $0x150] sm:$0xff] %vm2009_vm8, %v1990_v36  ;;  %2473 = vst.msk [vmem:[#allocation3 + $0x158] sm:$0xff] %vm2009_vm8, %v2440_v10  ;;  %v6862_v10 = vld [vmem:[%s9769_s6 + $0x10] sm:$0xff]  }
 0x3d2   : > { %v2185_v9 = vpop.permute.xlu1 %2184  ;;  %v2579_v26 = vld [vmem:[#allocation3 + $0x140] sm:$0xff]  ;;  %6692 = vmatprep.subr.bf16.mxu1 %v6862_v10 }
 0x3d3   : > { %2217 = vst.msk [vmem:[#allocation3 + $0x170] sm:$0xff] %vm1751_vm6, %v2185_v9  ;;  %v1734_v46 = vpop.permute.xlu0 %1733  ;;  %2919 = vmatprep.mubr.bf16.mxu1 %v2579_v26  ;;  %6693 = vmatpush3.bf16.msra.mxu1 %v6862_v10  ;;  %v6864_v9 = vld [vmem:[%s9769_s6 + $0x20] sm:$0xff]   ;;  %v6866_v26 = vld [vmem:[%s9772_s9 + $0x8] sm:$0xff]  }
 0x3d4   : > { %1767 = vst.msk [vmem:[#allocation3 + $0x168] sm:$0xff] %vm1751_vm6, %v1734_v46  ;;  %2920 = vmatmul.mubr.bf16.gmra.mrb[88].mxu1 %v2578_v49  ;;  %6694 = vmatprep.subr.bf16.mxu1 %v6863_v40  ;;  %v6869_v10 = vld [vmem:[%s9772_s9 + $0x20] sm:$0xff]  }
 0x3d5   : > { %6646 = vmatprep.subr.bf16.mxu0 %v6866_v26 }
 0x3d6   : > { %v2314_v2 = vpop.permute.xlu1 %2313  ;;  %6647 = vmatpush3.bf16.msra.mxu0 %v6866_v26 }
 0x3d7   : > { %2346 = vst.msk [vmem:[#allocation3 + $0x170] sm:$0xff] %vm1880_vm7, %v2314_v2  ;;  %v1863_v17 = vpop.permute.xlu0 %1862  ;;  %6695 = vmatpush3.bf16.msra.mxu1 %v6863_v40 }
 0x3d8   : > { %1896 = vst.msk [vmem:[#allocation3 + $0x168] sm:$0xff] %vm1880_vm7, %v1863_v17  ;;  %v2582_v24 = vld [vmem:[#allocation3 + $0x158] sm:$0xff]  ;;  %v2581_v20 = vld [vmem:[#allocation3 + $0x150] sm:$0xff]  ;;  %6696 = vmatprep.subr.bf16.mxu1 %v6864_v9 }
 0x3d9   : > { %2927 = vmatprep.mubr.bf16.mxu1 %v2582_v24 }
 0x3da   : > { %v2442_v27 = vpop.permute.xlu1 %2441 }
 0x3db   : > { %2474 = vst.msk [vmem:[#allocation3 + $0x170] sm:$0xff] %vm2009_vm8, %v2442_v27  ;;  %v1992_v3 = vpop.permute.xlu0 %1991  ;;  %6697 = vmatpush3.bf16.msra.mxu1 %v6864_v9 }
 0x3dc   : > { %2025 = vst.msk [vmem:[#allocation3 + $0x168] sm:$0xff] %vm2009_vm8, %v1992_v3  ;;  %2928 = vmatmul.mubr.bf16.gmra.mrb[92].mxu1 %v2581_v20  ;;  %v6867_v20 = vld [vmem:[%s9772_s9 + $0x10] sm:$0xff]  }
 0x3dd   : > { %6648 = vmatprep.subr.bf16.mxu0 %v6867_v20 }
 0x3de   : > { %v8548_v48 = vpop.permute.xlu1 %3206  ;;  %6649 = vmatpush3.bf16.msra.mxu0 %v6867_v20 }
 0x3df   : > { %v3211_v28 = vmul.f32 %v8548_v48, %v9938_v29  ;;  %v3212_v44 = vmul.f32 %v8548_v48, %v9939_v47  ;;  %v3209_v0 = vmul.f32 %v8548_v48, %v9941_v51  ;;  %v3210_v57 = vmul.f32 %v8548_v48, %v9942_v41 }
 0x3e0   : > { %v9944_v29 = vunpack.c.l.bf16 %v9943_v37 }
 0x3e1   : > { %v3242_v42 = vpack.c.bf16 %v3212_v44, %v3211_v28  ;;  %v3241_v55 = vpack.c.bf16 %v3210_v57, %v3209_v0  ;;  %v9945_v28 = vunpack.c.h.bf16 %v9943_v37  ;;  %v6868_v0 = vld [vmem:[%s9772_s9 + $0x18] sm:$0xff]  }
 0x3e2   : > { %v2585_v52 = vld [vmem:[#allocation3 + $0x170] sm:$0xff]  ;;  %6650 = vmatprep.subr.bf16.mxu0 %v6868_v0 }
 0x3e3   : > { %3275 = vrot.lane.b32.xlu1 %v3242_v42, %s9904_s20  ;;  %3273 = vrot.lane.b32.xlu0 %v3241_v55, %s9904_s20  ;;  %v2584_v63 = vld [vmem:[#allocation3 + $0x168] sm:$0xff]  ;;  %v3214_v47 = vmul.f32 %v8548_v48, %v9945_v28 }
 0x3e4   : > { %2935 = vmatprep.mubr.bf16.mxu1 %v2585_v52  ;;  %6651 = vmatpush3.bf16.msra.mxu0 %v6868_v0 }
 0x3e5   : > { %2936 = vmatmul.mubr.bf16.gmra.mrb[96].mxu1 %v2584_v63  ;;  %6652 = vmatprep.subr.bf16.mxu0 %v6869_v10 }
 0x3e8   : > { %6653 = vmatpush3.bf16.msra.mxu0 %v6869_v10 }
 0x409   : > { %v6343_v8 = vpop.f32.mrb[36].mxu1 }
 0x40a   : > { %v6344_v56 = vpop.f32.mrb[37].mxu1 }
 0x40b   : > { %v6345_v11 = vadd.f32 %v6344_v56, %v6343_v8  ;;  %v6346_v45 = vpop.f32.mrb[38].mxu1 }
 0x40c   : > { %v6347_v34 = vpop.f32.mrb[39].mxu1 }
 0x40d   : > { %v2818_v18 = vadd.f32 %v6345_v11, %v8573_v15  ;;  %v6348_v36 = vadd.f32 %v6347_v34, %v6346_v45  ;;  %v9946_v45 = vld [vmem:[#allocation12_spill] sm:$0xff] }
 0x40e   : > { %v9947_v4 = vunpack.c.l.bf16 %v9946_v45  ;;  %v9948_v34 = vunpack.c.h.bf16 %v9946_v45 }
 0x40f   : > { %v2979_v46 = vadd.f32 %v8449_v1, %v2818_v18  ;;  %v2821_v49 = vadd.f32 %v6348_v36, %v8573_v15  ;;  %v3213_v1 = vmul.f32 %v8548_v48, %v9944_v29 }
 0x410   : > { %v3216_v18 = vmul.f32 %v8548_v48, %v9948_v34 }
 0x411   : > { %v2982_v2 = vadd.f32 %v8454_v43, %v2821_v49  ;;  %v3105_v17 = vmax.f32 %v2979_v46, 0.0  ;;  %v3243_v42 = vpack.c.bf16 %v3214_v47, %v3213_v1  ;;  %v9949_v47 = vld [vmem:[#allocation13_spill] sm:$0xff] }
 0x413   : > { %v3106_v24 = vmax.f32 %v2982_v2, 0.0 }
 0x415   : > { %v3337_v27 = vpack.c.bf16 %v3106_v24, %v3105_v17 }
 0x417   : > { %3369 = vrot.lane.b32.xlu0 %v3337_v27, %s9903_s18  ;;  %v6871_v27 = vld [vmem:[%s9769_s6 + $0x28] sm:$0xff]  }
 0x418   : > { %v6349_v3 = vpop.f32.mrb[40].mxu1  ;;  %6698 = vmatprep.subr.bf16.mxu1 %v6871_v27 }
 0x419   : > { %v6350_v44 = vpop.f32.mrb[41].mxu1  ;;  %6699 = vmatpush3.bf16.msra.mxu1 %v6871_v27 }
 0x41a   : > { %v6351_v43 = vadd.f32 %v6350_v44, %v6349_v3  ;;  %v6352_v35 = vpop.f32.mrb[42].mxu1  ;;  %v9950_v44 = vunpack.c.l.bf16 %v9949_v47 }
 0x41b   : > { %v6353_v51 = vpop.f32.mrb[43].mxu1  ;;  %3277 = vrot.lane.b32.xlu0 %v3243_v42, %s9904_s20 }
 0x41c   : > { %v2826_v41 = vadd.f32 %v6351_v43, %v8573_v15  ;;  %v6354_v57 = vadd.f32 %v6353_v51, %v6352_v35  ;;  %v9951_v43 = vunpack.c.h.bf16 %v9949_v47  ;;  %v9955_v47 = vld [vmem:[#allocation15_spill] sm:$0xff] }
 0x41e   : > { %v2987_v55 = vadd.f32 %v8447_v59, %v2826_v41  ;;  %v2829_v52 = vadd.f32 %v6354_v57, %v8573_v15  ;;  %v3215_v59 = vmul.f32 %v8548_v48, %v9947_v4  ;;  %v3218_v35 = vmul.f32 %v8548_v48, %v9951_v43 }
 0x41f   : > { %v9957_v43 = vunpack.c.h.bf16 %v9955_v47 }
 0x420   : > { %v2990_v63 = vadd.f32 %v8451_v50, %v2829_v52  ;;  %v3107_v40 = vmax.f32 %v2987_v55, 0.0  ;;  %v6870_v50 = vld [vmem:[%s9772_s9 + $0x28] sm:$0xff]   ;;  %v3244_v17 = vpack.c.bf16 %v3216_v18, %v3215_v59  ;;  %v9952_v18 = vld [vmem:[#allocation14_spill] sm:$0xff] }
 0x421   : > { %6654 = vmatprep.subr.bf16.mxu0 %v6870_v50 }
 0x422   : > { %v3108_v8 = vmax.f32 %v2990_v63, 0.0  ;;  %6655 = vmatpush3.bf16.msra.mxu0 %v6870_v50 }
 0x424   : > { %v3338_v56 = vpack.c.bf16 %v3108_v8, %v3107_v40 }
 0x426   : > { %3371 = vrot.lane.b32.xlu1 %v3338_v56, %s9903_s18 }
 0x427   : > { %v6355_v11 = vpop.f32.mrb[44].mxu1 }
 0x428   : > { %v6356_v36 = vpop.f32.mrb[45].mxu1 }
 0x429   : > { %v6357_v9 = vadd.f32 %v6356_v36, %v6355_v11  ;;  %v6358_v26 = vpop.f32.mrb[46].mxu1  ;;  %v9954_v36 = vunpack.c.h.bf16 %v9952_v18 }
 0x42a   : > { %v6359_v46 = vpop.f32.mrb[47].mxu1  ;;  %3279 = vrot.lane.b32.xlu1 %v3244_v17, %s9904_s20 }
 0x42b   : > { %v2834_v49 = vadd.f32 %v6357_v9, %v8573_v15  ;;  %v6360_v2 = vadd.f32 %v6359_v46, %v6358_v26  ;;  %v3220_v9 = vmul.f32 %v8548_v48, %v9954_v36 }
 0x42d   : > { %v2995_v24 = vadd.f32 %v8462_v21, %v2834_v49  ;;  %v2837_v20 = vadd.f32 %v6360_v2, %v8573_v15  ;;  %v3217_v21 = vmul.f32 %v8548_v48, %v9950_v44  ;;  %v9956_v44 = vunpack.c.l.bf16 %v9955_v47 }
 0x42f   : > { %v2998_v3 = vadd.f32 %v8467_v30, %v2837_v20  ;;  %v3109_v37 = vmax.f32 %v2995_v24, 0.0  ;;  %v3245_v55 = vpack.c.bf16 %v3218_v35, %v3217_v21  ;;  %v3221_v21 = vmul.f32 %v8548_v48, %v9956_v44 }
 0x430   : > { %v3222_v35 = vmul.f32 %v8548_v48, %v9957_v43 }
 0x431   : > { %v3110_v29 = vmax.f32 %v2998_v3, 0.0  ;;  %v8638_v10 = vpop.f32.mrb[64].mxu0 }
 0x432   : > { %v8641_v8 = vpop.f32.mrb[65].mxu0 }
 0x433   : > { %v3339_v1 = vpack.c.bf16 %v3110_v29, %v3109_v37  ;;  %v6361_v28 = vpop.f32.mrb[48].mxu1  ;;  %v8643_v56 = vpop.f32.mrb[66].mxu0 }
 0x434   : > { %v6362_v51 = vpop.f32.mrb[49].mxu1  ;;  %v8645_v4 = vpop.f32.mrb[67].mxu0 }
 0x435   : > { %v6363_v0 = vadd.f32 %v6362_v51, %v6361_v28  ;;  %3373 = vrot.lane.b32.xlu0 %v3339_v1, %s9903_s18  ;;  %v6364_v41 = vpop.f32.mrb[50].mxu1 }
 0x436   : > { %v6365_v30 = vpop.f32.mrb[51].mxu1 }
 0x437   : > { %v2842_v57 = vadd.f32 %v6363_v0, %v8573_v15  ;;  %v6366_v42 = vadd.f32 %v6365_v30, %v6364_v41 }
 0x439   : > { %v3003_v52 = vadd.f32 %v8459_v39, %v2842_v57  ;;  %v2845_v63 = vadd.f32 %v6366_v42, %v8573_v15  ;;  %3281 = vrot.lane.b32.xlu0 %v3245_v55, %s9904_s20  ;;  %v9953_v39 = vunpack.c.l.bf16 %v9952_v18  ;;  %v3247_v57 = vpack.c.bf16 %v3222_v35, %v3221_v21  ;;  %v9958_v18 = vld [vmem:[#allocation16_spill] sm:$0xff] }
 0x43b   : > { %v3006_v40 = vadd.f32 %v8464_v12, %v2845_v63  ;;  %v3111_v11 = vmax.f32 %v3003_v52, 0.0  ;;  %v3219_v50 = vmul.f32 %v8548_v48, %v9953_v39  ;;  %v9959_v39 = vunpack.c.l.bf16 %v9958_v18 }
 0x43d   : > { %v3112_v45 = vmax.f32 %v3006_v40, 0.0  ;;  %v3246_v24 = vpack.c.bf16 %v3220_v9, %v3219_v50  ;;  %v9960_v50 = vunpack.c.h.bf16 %v9958_v18 }
 0x43f   : > { %v3340_v59 = vpack.c.bf16 %v3112_v45, %v3111_v11  ;;  %v6367_v34 = vpop.f32.mrb[52].mxu1  ;;  %v3224_v36 = vmul.f32 %v8548_v48, %v9960_v50 }
 0x440   : > { %v6368_v26 = vpop.f32.mrb[53].mxu1 }
 0x441   : > { %v6369_v12 = vadd.f32 %v6368_v26, %v6367_v34  ;;  %v6370_v46 = vpop.f32.mrb[54].mxu1  ;;  %3375 = vrot.lane.b32.xlu1 %v3340_v59, %s9903_s18 }
 0x442   : > { %v6371_v49 = vpop.f32.mrb[55].mxu1 }
 0x443   : > { %v2850_v2 = vadd.f32 %v6369_v12, %v8573_v15  ;;  %v6372_v17 = vadd.f32 %v6371_v49, %v6370_v46 }
 0x445   : > { %v3011_v20 = vadd.f32 %v8475_v6, %v2850_v2  ;;  %v2853_v27 = vadd.f32 %v6372_v17, %v8573_v15  ;;  %3283 = vrot.lane.b32.xlu1 %v3246_v24, %s9904_s20 }
 0x447   : > { %v3014_v3 = vadd.f32 %v8479_v19, %v2853_v27  ;;  %v3113_v37 = vmax.f32 %v3011_v20, 0.0 }
 0x449   : > { %v3114_v29 = vmax.f32 %v3014_v3, 0.0 }
 0x44b   : > { %v3341_v1 = vpack.c.bf16 %v3114_v29, %v3113_v37  ;;  %v6373_v28 = vpop.f32.mrb[56].mxu1 }
 0x44c   : > { %v6374_v51 = vpop.f32.mrb[57].mxu1 }
 0x44d   : > { %v6375_v6 = vadd.f32 %v6374_v51, %v6373_v28  ;;  %3377 = vrot.lane.b32.xlu0 %v3341_v1, %s9903_s18  ;;  %v6376_v0 = vpop.f32.mrb[58].mxu1  ;;  %v9961_v1 = vld [vmem:[#allocation17_spill] sm:$0xff] }
 0x44e   : > { %v6377_v41 = vpop.f32.mrb[59].mxu1  ;;  %v9962_v28 = vunpack.c.l.bf16 %v9961_v1  ;;  %v9963_v44 = vunpack.c.h.bf16 %v9961_v1 }
 0x44f   : > { %v2858_v19 = vadd.f32 %v6375_v6, %v8573_v15  ;;  %v6378_v30 = vadd.f32 %v6377_v41, %v6376_v0 }
 0x450   : > { %v3225_v47 = vmul.f32 %v8548_v48, %v9962_v28  ;;  %v3226_v21 = vmul.f32 %v8548_v48, %v9963_v44 }
 0x451   : > { %v3019_v42 = vadd.f32 %v8472_v5, %v2858_v19  ;;  %v2861_v55 = vadd.f32 %v6378_v30, %v8573_v15  ;;  %3285 = vrot.lane.b32.xlu0 %v3247_v57, %s9904_s20  ;;  %v3223_v5 = vmul.f32 %v8548_v48, %v9959_v39 }
 0x452   : > { %v3249_v0 = vpack.c.bf16 %v3226_v21, %v3225_v47 }
 0x453   : > { %v3022_v52 = vadd.f32 %v8477_v16, %v2861_v55  ;;  %v3115_v63 = vmax.f32 %v3019_v42, 0.0  ;;  %v3248_v2 = vpack.c.bf16 %v3224_v36, %v3223_v5 }
 0x455   : > { %v3116_v40 = vmax.f32 %v3022_v52, 0.0  ;;  %v3276_v11 = vpop.permute.xlu1 %3275  ;;  %v3274_v45 = vpop.permute.xlu0 %3273 }
 0x456   : > { %3322 = vst.msk [vmem:[#allocation5 + $0x8] sm:$0xff] %vm1751_vm6, %v3276_v11  ;;  %3321 = vst.msk [vmem:[#allocation5] sm:$0xff] %vm1751_vm6, %v3274_v45 }
 0x457   : > { %v3342_v59 = vpack.c.bf16 %v3116_v40, %v3115_v63  ;;  %v6379_v34 = vpop.f32.mrb[60].mxu1  ;;  %v9964_v63 = vld [vmem:[#allocation18_spill] sm:$0xff] }
 0x458   : > { %v6380_v9 = vpop.f32.mrb[61].mxu1  ;;  %v9965_v40 = vunpack.c.l.bf16 %v9964_v63  ;;  %v9966_v45 = vunpack.c.h.bf16 %v9964_v63 }
 0x459   : > { %v6381_v16 = vadd.f32 %v6380_v9, %v6379_v34  ;;  %v6382_v26 = vpop.f32.mrb[62].mxu1  ;;  %3379 = vrot.lane.b32.xlu1 %v3342_v59, %s9903_s18 }
 0x45a   : > { %v6383_v12 = vpop.f32.mrb[63].mxu1  ;;  %v3227_v11 = vmul.f32 %v8548_v48, %v9965_v40  ;;  %v3228_v59 = vmul.f32 %v8548_v48, %v9966_v45 }
 0x45b   : > { %v2866_v46 = vadd.f32 %v6381_v16, %v8573_v15  ;;  %v6384_v49 = vadd.f32 %v6383_v12, %v6382_v26 }
 0x45c   : > { %v3250_v50 = vpack.c.bf16 %v3228_v59, %v3227_v11 }
 0x45d   : > { %v3027_v17 = vadd.f32 %v8485_v61, %v2866_v46  ;;  %v2869_v24 = vadd.f32 %v6384_v49, %v8573_v15  ;;  %3287 = vrot.lane.b32.xlu1 %v3248_v2, %s9904_s20  ;;  %v9967_v2 = vld [vmem:[#allocation19_spill] sm:$0xff] }
 0x45f   : > { %v3030_v20 = vadd.f32 %v8490_v38, %v2869_v24  ;;  %v3117_v27 = vmax.f32 %v3027_v17, 0.0  ;;  %v9968_v17 = vunpack.c.l.bf16 %v9967_v2 }
 0x461   : > { %v3118_v3 = vmax.f32 %v3030_v20, 0.0  ;;  %v3229_v24 = vmul.f32 %v8548_v48, %v9968_v17  ;;  %v9969_v20 = vunpack.c.h.bf16 %v9967_v2  ;;  %v8746_v2 = vld [vmem:[%s9774_s11] ss:$0 sm:$0xff] }
 0x463   : > { %v3343_v37 = vpack.c.bf16 %v3118_v3, %v3117_v27  ;;  %v6385_v29 = vpop.f32.mrb[64].mxu1  ;;  %v3230_v27 = vmul.f32 %v8548_v48, %v9969_v20 }
 0x464   : > { %v6386_v43 = vpop.f32.mrb[65].mxu1 }
 0x465   : > { %v6387_v61 = vadd.f32 %v6386_v43, %v6385_v29  ;;  %3381 = vrot.lane.b32.xlu0 %v3343_v37, %s9903_s18  ;;  %v6388_v35 = vpop.f32.mrb[66].mxu1  ;;  %v3251_v28 = vpack.c.bf16 %v3230_v27, %v3229_v24 }
 0x466   : > { %v6389_v51 = vpop.f32.mrb[67].mxu1 }
 0x467   : > { %v2874_v38 = vadd.f32 %v6387_v61, %v8573_v15  ;;  %v6390_v6 = vadd.f32 %v6389_v51, %v6388_v35 }
 0x469   : > { %v3035_v41 = vadd.f32 %v8483_v58, %v2874_v38  ;;  %v2877_v19 = vadd.f32 %v6390_v6, %v8573_v15  ;;  %3289 = vrot.lane.b32.xlu0 %v3249_v0, %s9904_s20  ;;  %v9970_v38 = vld [vmem:[#allocation20_spill] sm:$0xff] }
 0x46a   : > { %v9971_v6 = vunpack.c.l.bf16 %v9970_v38 }
 0x46b   : > { %v3038_v30 = vadd.f32 %v8487_v23, %v2877_v19  ;;  %v3119_v57 = vmax.f32 %v3035_v41, 0.0  ;;  %v9972_v41 = vunpack.c.h.bf16 %v9970_v38 }
 0x46c   : > { %v3231_v0 = vmul.f32 %v8548_v48, %v9971_v6 }
 0x46d   : > { %v3120_v42 = vmax.f32 %v3038_v30, 0.0  ;;  %v3232_v19 = vmul.f32 %v8548_v48, %v9972_v41 }
 0x46f   : > { %v3344_v55 = vpack.c.bf16 %v3120_v42, %v3119_v57  ;;  %v6391_v52 = vpop.f32.mrb[68].mxu1 }
 0x470   : > { %v6392_v34 = vpop.f32.mrb[69].mxu1 }
 0x471   : > { %v6393_v58 = vadd.f32 %v6392_v34, %v6391_v52  ;;  %v6394_v18 = vpop.f32.mrb[70].mxu1  ;;  %3383 = vrot.lane.b32.xlu1 %v3344_v55, %s9903_s18  ;;  %v3252_v52 = vpack.c.bf16 %v3232_v19, %v3231_v0  ;;  %v9976_v0 = vld [vmem:[#allocation22_spill] sm:$0xff] }
 0x472   : > { %v6395_v39 = vpop.f32.mrb[71].mxu1  ;;  %v9977_v41 = vunpack.c.l.bf16 %v9976_v0 }
 0x473   : > { %v2882_v23 = vadd.f32 %v6393_v58, %v8573_v15  ;;  %v6396_v5 = vadd.f32 %v6395_v39, %v6394_v18 }
 0x475   : > { %v3043_v36 = vadd.f32 %v8498_v60, %v2882_v23  ;;  %v2885_v9 = vadd.f32 %v6396_v5, %v8573_v15  ;;  %3291 = vrot.lane.b32.xlu1 %v3250_v50, %s9904_s20  ;;  %v9973_v23 = vld [vmem:[#allocation21_spill] sm:$0xff] }
 0x476   : > { %v9974_v5 = vunpack.c.l.bf16 %v9973_v23 }
 0x477   : > { %v3046_v16 = vadd.f32 %v8503_v62, %v2885_v9  ;;  %v3121_v26 = vmax.f32 %v3043_v36, 0.0 }
 0x478   : > { %v3233_v50 = vmul.f32 %v8548_v48, %v9974_v5 }
 0x479   : > { %v3122_v12 = vmax.f32 %v3046_v16, 0.0 }
 0x47b   : > { %v3345_v46 = vpack.c.bf16 %v3122_v12, %v3121_v26  ;;  %v6397_v49 = vpop.f32.mrb[72].mxu1 }
 0x47c   : > { %v6398_v3 = vpop.f32.mrb[73].mxu1 }
 0x47d   : > { %v6399_v60 = vadd.f32 %v6398_v3, %v6397_v49  ;;  %3385 = vrot.lane.b32.xlu0 %v3345_v46, %s9903_s18  ;;  %v6400_v37 = vpop.f32.mrb[74].mxu1 }
 0x47e   : > { %v6401_v29 = vpop.f32.mrb[75].mxu1 }
 0x47f   : > { %v2890_v62 = vadd.f32 %v6399_v60, %v8573_v15  ;;  %v6402_v1 = vadd.f32 %v6401_v29, %v6400_v37  ;;  %v8754_v60 = vld [vmem:[%s9774_s11 + $0x1] ss:$0 sm:$0xff] }
 0x481   : > { %v3051_v47 = vadd.f32 %v8495_v31, %v2890_v62  ;;  %v2893_v44 = vadd.f32 %v6402_v1, %v8573_v15  ;;  %3293 = vrot.lane.b32.xlu0 %v3251_v28, %s9904_s20 }
 0x483   : > { %v3054_v21 = vadd.f32 %v8500_v32, %v2893_v44  ;;  %v3123_v43 = vmax.f32 %v3051_v47, 0.0 }
 0x485   : > { %v3124_v61 = vmax.f32 %v3054_v21, 0.0 }
 0x487   : > { %v3346_v35 = vpack.c.bf16 %v3124_v61, %v3123_v43  ;;  %v6403_v51 = vpop.f32.mrb[76].mxu1 }
 0x488   : > { %v6404_v30 = vpop.f32.mrb[77].mxu1 }
 0x489   : > { %v6405_v31 = vadd.f32 %v6404_v30, %v6403_v51  ;;  %v6406_v57 = vpop.f32.mrb[78].mxu1  ;;  %3387 = vrot.lane.b32.xlu1 %v3346_v35, %s9903_s18  ;;  %v3370_v45 = vpop.permute.xlu0 %3369 }
 0x48a   : > { %v6407_v42 = vpop.f32.mrb[79].mxu1  ;;  %3417 = vst.msk [vmem:[#allocation5] sm:$0xff] %vm1880_vm7, %v3370_v45 }
 0x48b   : > { %v2898_v32 = vadd.f32 %v6405_v31, %v8573_v15  ;;  %v6408_v55 = vadd.f32 %v6407_v42, %v6406_v57  ;;  %v9978_v42 = vunpack.c.h.bf16 %v9976_v0 }
 0x48d   : > { %v3059_v63 = vadd.f32 %v8514_v25, %v2898_v32  ;;  %v2901_v40 = vadd.f32 %v6408_v55, %v8573_v15  ;;  %3295 = vrot.lane.b32.xlu1 %v3252_v52, %s9904_s20  ;;  %v3278_v18 = vpop.permute.xlu0 %3277  ;;  %v9975_v25 = vunpack.c.h.bf16 %v9973_v23  ;;  %v3236_v32 = vmul.f32 %v8548_v48, %v9978_v42 }
 0x48e   : > { %3323 = vst.msk [vmem:[#allocation5 + $0x10] sm:$0xff] %vm1751_vm6, %v3278_v18 }
 0x48f   : > { %v3062_v11 = vadd.f32 %v8518_v53, %v2901_v40  ;;  %v3125_v59 = vmax.f32 %v3059_v63, 0.0  ;;  %v3234_v36 = vmul.f32 %v8548_v48, %v9975_v25  ;;  %v9979_v25 = vld [vmem:[#allocation23_spill] sm:$0xff] }
 0x491   : > { %v3126_v34 = vmax.f32 %v3062_v11, 0.0  ;;  %v3433_v49 = vld [vmem:[#allocation5] sm:$0xff]  ;;  %v3253_v17 = vpack.c.bf16 %v3234_v36, %v3233_v50  ;;  %v9980_v36 = vunpack.c.l.bf16 %v9979_v25 }
 0x492   : > { %6656 = vmatprep.mubr.msk.bf16.mxu0 %vm3502_vm9, %v3433_v49  ;;  %v3744_v24 = vunpack.c.l.bf16 %v3433_v49  ;;  %v3745_v20 = vunpack.c.h.bf16 %v3433_v49 }
 0x493   : > { %v3347_v58 = vpack.c.bf16 %v3126_v34, %v3125_v59  ;;  %v6409_v39 = vpop.f32.mrb[80].mxu1 }
 0x494   : > { %v6410_v9 = vpop.f32.mrb[81].mxu1  ;;  %v3781_v37 = vmul.f32 %v8746_v2, %v3744_v24  ;;  %v3782_v29 = vmul.f32 %v8746_v2, %v3745_v20 }
 0x495   : > { %v6411_v53 = vadd.f32 %v6410_v9, %v6409_v39  ;;  %3389 = vrot.lane.b32.xlu0 %v3347_v58, %s9903_s18  ;;  %v6412_v16 = vpop.f32.mrb[82].mxu1  ;;  %v9981_v9 = vunpack.c.h.bf16 %v9979_v25 }
 0x496   : > { %v6413_v26 = vpop.f32.mrb[83].mxu1  ;;  %v3818_v47 = vadd.f32 %v8754_v60, %v3781_v37 }
 0x497   : > { %v2906_v12 = vadd.f32 %v6411_v53, %v8573_v15  ;;  %v6414_v46 = vadd.f32 %v6413_v26, %v6412_v16  ;;  %v3238_v53 = vmul.f32 %v8548_v48, %v9981_v9 }
 0x498   : > { %v3372_v28 = vpop.permute.xlu1 %3371  ;;  %v3850_v51 = vmax.f32 %v3818_v47, 0.0 }
 0x499   : > { %v3067_v27 = vadd.f32 %v8511_v7, %v2906_v12  ;;  %v2909_v3 = vadd.f32 %v6414_v46, %v8573_v15  ;;  %3297 = vrot.lane.b32.xlu0 %v3253_v17, %s9904_s20  ;;  %v3819_v7 = vadd.f32 %v8754_v60, %v3782_v29  ;;  %3418 = vst.msk [vmem:[#allocation5 + $0x8] sm:$0xff] %vm1880_vm7, %v3372_v28 }
 0x49b   : > { %v3070_v62 = vadd.f32 %v8516_v54, %v2909_v3  ;;  %v6415_v1 = vpop.f32.mrb[84].mxu1  ;;  %v3127_v21 = vmax.f32 %v3067_v27, 0.0  ;;  %v3851_v38 = vmax.f32 %v3819_v7, 0.0  ;;  %v3235_v54 = vmul.f32 %v8548_v48, %v9977_v41 }
 0x49c   : > { %v6416_v44 = vpop.f32.mrb[85].mxu1  ;;  %v3280_v57 = vpop.permute.xlu1 %3279 }
 0x49d   : > { %v3128_v43 = vmax.f32 %v3070_v62, 0.0  ;;  %v6417_v61 = vadd.f32 %v6416_v44, %v6415_v1  ;;  %v6418_v35 = vpop.f32.mrb[86].mxu1  ;;  %v3882_v55 = vpack.c.bf16 %v3851_v38, %v3850_v51  ;;  %3324 = vst.msk [vmem:[#allocation5 + $0x18] sm:$0xff] %vm1751_vm6, %v3280_v57  ;;  %v3254_v45 = vpack.c.bf16 %v3236_v32, %v3235_v54 }
 0x49e   : > { %v6419_v6 = vpop.f32.mrb[87].mxu1 }
 0x49f   : > { %v3348_v19 = vpack.c.bf16 %v3128_v43, %v3127_v21  ;;  %v2914_v30 = vadd.f32 %v6417_v61, %v8573_v15  ;;  %v6420_v31 = vadd.f32 %v6419_v6, %v6418_v35  ;;  %3898 = vst.msk [vmem:[#allocation5] sm:$0xff] %vm3502_vm9, %v3882_v55 }
 0x4a0   : > { %v3434_v40 = vld [vmem:[#allocation5 + $0x8] sm:$0xff] }
 0x4a1   : > { %v3075_v52 = vadd.f32 %v8524_v13, %v2914_v30  ;;  %v2917_v63 = vadd.f32 %v6420_v31, %v8573_v15  ;;  %3391 = vrot.lane.b32.xlu1 %v3348_v19, %s9903_s18  ;;  %v3746_v59 = vunpack.c.l.bf16 %v3434_v40  ;;  %v3747_v34 = vunpack.c.h.bf16 %v3434_v40  ;;  %6657 = vmatmul.mubr.msk.bf16.vlgmr.msra.gmra.mrb[68].mxu0 %vm3502_vm9, %v3434_v40  ;;  %v9982_v19 = vld [vmem:[#allocation24_spill] sm:$0xff] }
 0x4a2   : > { %v9983_v30 = vunpack.c.l.bf16 %v9982_v19  ;;  %v9984_v55 = vunpack.c.h.bf16 %v9982_v19 }
 0x4a3   : > { %v3078_v11 = vadd.f32 %v8529_v33, %v2917_v63  ;;  %v3129_v58 = vmax.f32 %v3075_v52, 0.0  ;;  %v3783_v13 = vmul.f32 %v8746_v2, %v3746_v59  ;;  %v3784_v39 = vmul.f32 %v8746_v2, %v3747_v34 }
 0x4a4   : > { %v3237_v33 = vmul.f32 %v8548_v48, %v9980_v36  ;;  %v3240_v52 = vmul.f32 %v8548_v48, %v9984_v55 }
 0x4a5   : > { %v3130_v18 = vmax.f32 %v3078_v11, 0.0  ;;  %3299 = vrot.lane.b32.xlu1 %v3254_v45, %s9904_s20  ;;  %v3820_v16 = vadd.f32 %v8754_v60, %v3783_v13  ;;  %v3821_v26 = vadd.f32 %v8754_v60, %v3784_v39 }
 0x4a6   : > { %v3914_v17 = vld [vmem:[#allocation5] sm:$0xff]  ;;  %v3255_v62 = vpack.c.bf16 %v3238_v53, %v3237_v33 }
 0x4a7   : > { %v3349_v23 = vpack.c.bf16 %v3130_v18, %v3129_v58  ;;  %v3374_v5 = vpop.permute.xlu0 %3373  ;;  %v6421_v50 = vpop.f32.mrb[88].mxu1  ;;  %v3852_v24 = vmax.f32 %v3820_v16, 0.0  ;;  %v3853_v20 = vmax.f32 %v3821_v26, 0.0  ;;  %6700 = vmatprep.mubr.msk.bf16.mxu1 %vm3502_vm9, %v3914_v17 }
 0x4a8   : > { %3419 = vst.msk [vmem:[#allocation5 + $0x10] sm:$0xff] %vm1880_vm7, %v3374_v5  ;;  %v6422_v12 = vpop.f32.mrb[89].mxu1 }
 0x4a9   : > { %v6423_v46 = vadd.f32 %v6422_v12, %v6421_v50  ;;  %v6424_v49 = vpop.f32.mrb[90].mxu1  ;;  %3393 = vrot.lane.b32.xlu0 %v3349_v23, %s9903_s18  ;;  %v3883_v1 = vpack.c.bf16 %v3853_v20, %v3852_v24 }
 0x4aa   : > { %v6425_v27 = vpop.f32.mrb[91].mxu1 }
 0x4ab   : > { %v2922_v3 = vadd.f32 %v6423_v46, %v8573_v15  ;;  %v6426_v37 = vadd.f32 %v6425_v27, %v6424_v49  ;;  %v3282_v29 = vpop.permute.xlu0 %3281  ;;  %3899 = vst.msk [vmem:[#allocation5 + $0x8] sm:$0xff] %vm3502_vm9, %v3883_v1 }
 0x4ac   : > { %3325 = vst.msk [vmem:[#allocation5 + $0x20] sm:$0xff] %vm1751_vm6, %v3282_v29 }
 0x4ad   : > { %v3083_v28 = vadd.f32 %v8522_v14, %v2922_v3  ;;  %v2925_v47 = vadd.f32 %v6426_v37, %v8573_v15  ;;  %3301 = vrot.lane.b32.xlu0 %v3255_v62, %s9904_s20 }
 0x4af   : > { %v3086_v7 = vadd.f32 %v8526_v22, %v2925_v47  ;;  %v6427_v44 = vpop.f32.mrb[92].mxu1  ;;  %v3435_v21 = vld [vmem:[#allocation5 + $0x10] sm:$0xff]  ;;  %v3131_v51 = vmax.f32 %v3083_v28, 0.0  ;;  %v3239_v22 = vmul.f32 %v8548_v48, %v9983_v30 }
 0x4b0   : > { %6660 = vmatprep.mubr.msk.bf16.mxu0 %vm3502_vm9, %v3435_v21  ;;  %v3748_v43 = vunpack.c.l.bf16 %v3435_v21  ;;  %v3749_v61 = vunpack.c.h.bf16 %v3435_v21  ;;  %v6428_v35 = vpop.f32.mrb[93].mxu1 }
 0x4b1   : > { %v3132_v38 = vmax.f32 %v3086_v7, 0.0  ;;  %v6429_v6 = vadd.f32 %v6428_v35, %v6427_v44  ;;  %v6430_v0 = vpop.f32.mrb[94].mxu1  ;;  %v3256_v13 = vpack.c.bf16 %v3240_v52, %v3239_v22 }
 0x4b2   : > { %v3785_v14 = vmul.f32 %v8746_v2, %v3748_v43  ;;  %v3786_v41 = vmul.f32 %v8746_v2, %v3749_v61  ;;  %v6431_v54 = vpop.f32.mrb[95].mxu1  ;;  %v3915_v59 = vld [vmem:[#allocation5 + $0x8] sm:$0xff] }
 0x4b3   : > { %v3350_v31 = vpack.c.bf16 %v3132_v38, %v3131_v51  ;;  %v6432_v57 = vadd.f32 %v6431_v54, %v6430_v0  ;;  %v3376_v42 = vpop.permute.xlu1 %3375  ;;  %v2930_v32 = vadd.f32 %v6429_v6, %v8573_v15  ;;  %6701 = vmatmul.mubr.msk.bf16.vlgmr.msra.gmra.mrb[100].mxu1 %vm3502_vm9, %v3915_v59 }
 0x4b4   : > { %v3822_v63 = vadd.f32 %v8754_v60, %v3785_v14  ;;  %v3823_v40 = vadd.f32 %v8754_v60, %v3786_v41  ;;  %3420 = vst.msk [vmem:[#allocation5 + $0x18] sm:$0xff] %vm1880_vm7, %v3376_v42 }
 0x4b5   : > { %v3091_v11 = vadd.f32 %v8641_v8, %v2930_v32  ;;  %3395 = vrot.lane.b32.xlu1 %v3350_v31, %s9903_s18  ;;  %v2933_v45 = vadd.f32 %v6432_v57, %v8573_v15 }
 0x4b6   : > { %v3854_v34 = vmax.f32 %v3822_v63, 0.0  ;;  %v3855_v58 = vmax.f32 %v3823_v40, 0.0 }
 0x4b7   : > { %v3094_v18 = vadd.f32 %v8645_v4, %v2933_v45  ;;  %v3284_v48 = vpop.permute.xlu1 %3283  ;;  %v3133_v5 = vmax.f32 %v3091_v11, 0.0 }
 0x4b8   : > { %v3884_v39 = vpack.c.bf16 %v3855_v58, %v3854_v34  ;;  %v6433_v23 = vpop.f32.mrb[96].mxu1  ;;  %3326 = vst.msk [vmem:[#allocation5 + $0x28] sm:$0xff] %vm1751_vm6, %v3284_v48 }
 0x4b9   : > { %v3134_v50 = vmax.f32 %v3094_v18, 0.0  ;;  %v6434_v8 = vpop.f32.mrb[97].mxu1  ;;  %3303 = vrot.lane.b32.xlu1 %v3256_v13, %s9904_s20 }
 0x4ba   : > { %3900 = vst.msk [vmem:[#allocation5 + $0x10] sm:$0xff] %vm3502_vm9, %v3884_v39  ;;  %v6435_v25 = vadd.f32 %v6434_v8, %v6433_v23  ;;  %v6436_v36 = vpop.f32.mrb[98].mxu1 }
 0x4bb   : > { %v3351_v33 = vpack.c.bf16 %v3134_v50, %v3133_v5  ;;  %v6437_v9 = vpop.f32.mrb[99].mxu1  ;;  %v3436_v53 = vld [vmem:[#allocation5 + $0x18] sm:$0xff] }
 0x4bc   : > { %v2938_v4 = vadd.f32 %v6435_v25, %v8573_v15  ;;  %v6438_v16 = vadd.f32 %v6437_v9, %v6436_v36  ;;  %6661 = vmatmul.mubr.msk.bf16.gmra.mrb[72].mxu0 %vm3502_vm9, %v3436_v53  ;;  %v3750_v26 = vunpack.c.l.bf16 %v3436_v53  ;;  %v3751_v12 = vunpack.c.h.bf16 %v3436_v53 }
 0x4bd   : > { %3397 = vrot.lane.b32.xlu0 %v3351_v33, %s9903_s18 }
 0x4be   : > { %v3099_v46 = vadd.f32 %v8638_v10, %v2938_v4  ;;  %v2941_v49 = vadd.f32 %v6438_v16, %v8573_v15  ;;  %v3787_v17 = vmul.f32 %v8746_v2, %v3750_v26  ;;  %v3788_v24 = vmul.f32 %v8746_v2, %v3751_v12 }
 0x4bf   : > { %v3378_v20 = vpop.permute.xlu0 %3377 }
 0x4c0   : > { %v3102_v27 = vadd.f32 %v8643_v56, %v2941_v49  ;;  %v3824_v3 = vadd.f32 %v8754_v60, %v3787_v17  ;;  %v3825_v37 = vadd.f32 %v8754_v60, %v3788_v24  ;;  %3421 = vst.msk [vmem:[#allocation5 + $0x20] sm:$0xff] %vm1880_vm7, %v3378_v20  ;;  %v3135_v62 = vmax.f32 %v3099_v46, 0.0 }
 0x4c1   : > { %v3916_v29 = vld [vmem:[#allocation5 + $0x10] sm:$0xff] }
 0x4c2   : > { %v3136_v1 = vmax.f32 %v3102_v27, 0.0  ;;  %v3856_v28 = vmax.f32 %v3824_v3, 0.0  ;;  %v3857_v10 = vmax.f32 %v3825_v37, 0.0  ;;  %6704 = vmatprep.mubr.msk.bf16.mxu1 %vm3502_vm9, %v3916_v29 }
 0x4c3   : > { %v3286_v15 = vpop.permute.xlu0 %3285 }
 0x4c4   : > { %v3352_v47 = vpack.c.bf16 %v3136_v1, %v3135_v62  ;;  %v3885_v7 = vpack.c.bf16 %v3857_v10, %v3856_v28  ;;  %3327 = vst.msk [vmem:[#allocation5 + $0x30] sm:$0xff] %vm1751_vm6, %v3286_v15 }
 0x4c6   : > { %3901 = vst.msk [vmem:[#allocation5 + $0x18] sm:$0xff] %vm3502_vm9, %v3885_v7  ;;  %3399 = vrot.lane.b32.xlu1 %v3352_v47, %s9903_s18 }
 0x4c7   : > { %v3437_v56 = vld [vmem:[#allocation5 + $0x20] sm:$0xff] }
 0x4c8   : > { %6664 = vmatprep.mubr.msk.bf16.mxu0 %vm3502_vm9, %v3437_v56  ;;  %v3752_v44 = vunpack.c.l.bf16 %v3437_v56  ;;  %v3753_v21 = vunpack.c.h.bf16 %v3437_v56 }
 0x4ca   : > { %v3789_v43 = vmul.f32 %v8746_v2, %v3752_v44  ;;  %v3790_v61 = vmul.f32 %v8746_v2, %v3753_v21 }
 0x4cb   : > { %v3380_v35 = vpop.permute.xlu1 %3379 }
 0x4cc   : > { %v3826_v51 = vadd.f32 %v8754_v60, %v3789_v43  ;;  %v3827_v38 = vadd.f32 %v8754_v60, %v3790_v61  ;;  %3422 = vst.msk [vmem:[#allocation5 + $0x28] sm:$0xff] %vm1880_vm7, %v3380_v35 }
 0x4cd   : > { %v3917_v6 = vld [vmem:[#allocation5 + $0x18] sm:$0xff] }
 0x4ce   : > { %v3858_v0 = vmax.f32 %v3826_v51, 0.0  ;;  %v3859_v14 = vmax.f32 %v3827_v38, 0.0  ;;  %6705 = vmatmul.mubr.msk.bf16.gmra.mrb[104].mxu1 %vm3502_vm9, %v3917_v6 }
 0x4cf   : > { %v3288_v41 = vpop.permute.xlu1 %3287 }
 0x4d0   : > { %v3886_v54 = vpack.c.bf16 %v3859_v14, %v3858_v0  ;;  %3328 = vst.msk [vmem:[#allocation5 + $0x38] sm:$0xff] %vm1751_vm6, %v3288_v41 }
 0x4d2   : > { %3902 = vst.msk [vmem:[#allocation5 + $0x20] sm:$0xff] %vm3502_vm9, %v3886_v54 }
 0x4d3   : > { %v3438_v19 = vld [vmem:[#allocation5 + $0x28] sm:$0xff] }
 0x4d4   : > { %6665 = vmatmul.mubr.msk.bf16.gmra.mrb[76].mxu0 %vm3502_vm9, %v3438_v19  ;;  %v3754_v30 = vunpack.c.l.bf16 %v3438_v19  ;;  %v3755_v22 = vunpack.c.h.bf16 %v3438_v19 }
 0x4d6   : > { %v3791_v31 = vmul.f32 %v8746_v2, %v3754_v30  ;;  %v3792_v57 = vmul.f32 %v8746_v2, %v3755_v22 }
 0x4d7   : > { %v3382_v42 = vpop.permute.xlu0 %3381 }
 0x4d8   : > { %v3828_v32 = vadd.f32 %v8754_v60, %v3791_v31  ;;  %v3829_v55 = vadd.f32 %v8754_v60, %v3792_v57  ;;  %3423 = vst.msk [vmem:[#allocation5 + $0x30] sm:$0xff] %vm1880_vm7, %v3382_v42 }
 0x4d9   : > { %v3918_v52 = vld [vmem:[#allocation5 + $0x20] sm:$0xff] }
 0x4da   : > { %v3860_v63 = vmax.f32 %v3828_v32, 0.0  ;;  %v3861_v40 = vmax.f32 %v3829_v55, 0.0  ;;  %6708 = vmatprep.mubr.msk.bf16.mxu1 %vm3502_vm9, %v3918_v52 }
 0x4db   : > { %v3290_v11 = vpop.permute.xlu0 %3289 }
 0x4dc   : > { %v3887_v45 = vpack.c.bf16 %v3861_v40, %v3860_v63  ;;  %3329 = vst.msk [vmem:[#allocation5 + $0x40] sm:$0xff] %vm1751_vm6, %v3290_v11 }
 0x4de   : > { %3903 = vst.msk [vmem:[#allocation5 + $0x28] sm:$0xff] %vm3502_vm9, %v3887_v45  ;;  %v4321_v45 = vld [vmem:[#allocation2 + $0x1] sm:$0xff] }
 0x4df   : > { %v3439_v59 = vld [vmem:[#allocation5 + $0x30] sm:$0xff] }
 0x4e0   : > { %6668 = vmatprep.mubr.msk.bf16.mxu0 %vm3502_vm9, %v3439_v59  ;;  %v3756_v34 = vunpack.c.l.bf16 %v3439_v59  ;;  %v3757_v58 = vunpack.c.h.bf16 %v3439_v59  ;;  %v4322_v59 = vld [vmem:[#allocation2 + $0x9] sm:$0xff] }
 0x4e2   : > { %v3793_v18 = vmul.f32 %v8746_v2, %v3756_v34  ;;  %v3794_v48 = vmul.f32 %v8746_v2, %v3757_v58 }
 0x4e3   : > { %v3384_v13 = vpop.permute.xlu1 %3383 }
 0x4e4   : > { %v3830_v39 = vadd.f32 %v8754_v60, %v3793_v18  ;;  %v3831_v23 = vadd.f32 %v8754_v60, %v3794_v48  ;;  %3424 = vst.msk [vmem:[#allocation5 + $0x38] sm:$0xff] %vm1880_vm7, %v3384_v13  ;;  %v4353_v18 = vpack.c.bf16 %v4322_v59, %v4321_v45  ;;  %v4450_v48 = vld [vmem:[#allocation2 + $0x2] sm:$0xff]  ;;  %v4451_v13 = vld [vmem:[#allocation2 + $0xa] sm:$0xff] }
 0x4e5   : > { %v3919_v5 = vld [vmem:[#allocation5 + $0x28] sm:$0xff] }
 0x4e6   : > { %v3862_v50 = vmax.f32 %v3830_v39, 0.0  ;;  %v3863_v8 = vmax.f32 %v3831_v23, 0.0  ;;  %6709 = vmatmul.mubr.msk.bf16.gmra.mrb[108].mxu1 %vm3502_vm9, %v3919_v5  ;;  %v4482_v23 = vpack.c.bf16 %v4451_v13, %v4450_v48  ;;  %4385 = vrot.lane.b32.xlu0 %v4353_v18, %s9881_s17  ;;  %s9987_s17 = smov 96  }
 0x4e7   : > { %v3292_v25 = vpop.permute.xlu1 %3291 }
 0x4e8   : > { %v3888_v36 = vpack.c.bf16 %v3863_v8, %v3862_v50  ;;  %3330 = vst.msk [vmem:[#allocation5 + $0x48] sm:$0xff] %vm1751_vm6, %v3292_v25  ;;  %4514 = vrot.lane.b32.xlu1 %v4482_v23, %s9904_s20 }
 0x4ea   : > { %3904 = vst.msk [vmem:[#allocation5 + $0x30] sm:$0xff] %vm3502_vm9, %v3888_v36 }
 0x4eb   : > { %v3440_v33 = vld [vmem:[#allocation5 + $0x38] sm:$0xff] }
 0x4ec   : > { %6669 = vmatmul.mubr.msk.bf16.gmra.mrb[80].mxu0 %vm3502_vm9, %v3440_v33  ;;  %v3758_v9 = vunpack.c.l.bf16 %v3440_v33  ;;  %v3759_v53 = vunpack.c.h.bf16 %v3440_v33 }
 0x4ee   : > { %v3795_v4 = vmul.f32 %v8746_v2, %v3758_v9  ;;  %v3796_v16 = vmul.f32 %v8746_v2, %v3759_v53 }
 0x4ef   : > { %v3386_v26 = vpop.permute.xlu0 %3385 }
 0x4f0   : > { %v3832_v12 = vadd.f32 %v8754_v60, %v3795_v4  ;;  %v3833_v46 = vadd.f32 %v8754_v60, %v3796_v16  ;;  %3425 = vst.msk [vmem:[#allocation5 + $0x40] sm:$0xff] %vm1880_vm7, %v3386_v26 }
 0x4f1   : > { %v3920_v49 = vld [vmem:[#allocation5 + $0x30] sm:$0xff] }
 0x4f2   : > { %v3864_v17 = vmax.f32 %v3832_v12, 0.0  ;;  %v3865_v24 = vmax.f32 %v3833_v46, 0.0  ;;  %6712 = vmatprep.mubr.msk.bf16.mxu1 %vm3502_vm9, %v3920_v49 }
 0x4f3   : > { %v3294_v20 = vpop.permute.xlu0 %3293 }
 0x4f4   : > { %v3889_v27 = vpack.c.bf16 %v3865_v24, %v3864_v17  ;;  %3331 = vst.msk [vmem:[#allocation5 + $0x50] sm:$0xff] %vm1751_vm6, %v3294_v20 }
 0x4f6   : > { %3905 = vst.msk [vmem:[#allocation5 + $0x38] sm:$0xff] %vm3502_vm9, %v3889_v27 }
 0x4f7   : > { %v3441_v3 = vld [vmem:[#allocation5 + $0x40] sm:$0xff] }
 0x4f8   : > { %6672 = vmatprep.mubr.msk.bf16.mxu0 %vm3502_vm9, %v3441_v3  ;;  %v3760_v37 = vunpack.c.l.bf16 %v3441_v3  ;;  %v3761_v29 = vunpack.c.h.bf16 %v3441_v3 }
 0x4fa   : > { %v3797_v62 = vmul.f32 %v8746_v2, %v3760_v37  ;;  %v3798_v1 = vmul.f32 %v8746_v2, %v3761_v29 }
 0x4fb   : > { %v3388_v28 = vpop.permute.xlu1 %3387 }
 0x4fc   : > { %v3834_v10 = vadd.f32 %v8754_v60, %v3797_v62  ;;  %v3835_v15 = vadd.f32 %v8754_v60, %v3798_v1  ;;  %3426 = vst.msk [vmem:[#allocation5 + $0x48] sm:$0xff] %vm1880_vm7, %v3388_v28 }
 0x4fd   : > { %v3921_v47 = vld [vmem:[#allocation5 + $0x38] sm:$0xff] }
 0x4fe   : > { %v3866_v7 = vmax.f32 %v3834_v10, 0.0  ;;  %v3867_v56 = vmax.f32 %v3835_v15, 0.0  ;;  %6713 = vmatmul.mubr.msk.bf16.gmra.mrb[112].mxu1 %vm3502_vm9, %v3921_v47 }
 0x4ff   : > { %v3296_v44 = vpop.permute.xlu1 %3295 }
 0x500   : > { %v3890_v21 = vpack.c.bf16 %v3867_v56, %v3866_v7  ;;  %3332 = vst.msk [vmem:[#allocation5 + $0x58] sm:$0xff] %vm1751_vm6, %v3296_v44 }
 0x502   : > { %3906 = vst.msk [vmem:[#allocation5 + $0x40] sm:$0xff] %vm3502_vm9, %v3890_v21 }
 0x503   : > { %v3442_v43 = vld [vmem:[#allocation5 + $0x48] sm:$0xff] }
 0x504   : > { %6673 = vmatmul.mubr.msk.bf16.gmra.mrb[84].mxu0 %vm3502_vm9, %v3442_v43  ;;  %v3762_v61 = vunpack.c.l.bf16 %v3442_v43  ;;  %v3763_v35 = vunpack.c.h.bf16 %v3442_v43 }
 0x506   : > { %v3799_v51 = vmul.f32 %v8746_v2, %v3762_v61  ;;  %v3800_v38 = vmul.f32 %v8746_v2, %v3763_v35 }
 0x507   : > { %v3390_v6 = vpop.permute.xlu0 %3389 }
 0x508   : > { %v3836_v0 = vadd.f32 %v8754_v60, %v3799_v51  ;;  %v3837_v14 = vadd.f32 %v8754_v60, %v3800_v38  ;;  %3427 = vst.msk [vmem:[#allocation5 + $0x50] sm:$0xff] %vm1880_vm7, %v3390_v6 }
 0x509   : > { %v3922_v41 = vld [vmem:[#allocation5 + $0x40] sm:$0xff] }
 0x50a   : > { %v3868_v54 = vmax.f32 %v3836_v0, 0.0  ;;  %v3869_v19 = vmax.f32 %v3837_v14, 0.0  ;;  %6716 = vmatprep.mubr.msk.bf16.mxu1 %vm3502_vm9, %v3922_v41 }
 0x50b   : > { %v3298_v30 = vpop.permute.xlu0 %3297 }
 0x50c   : > { %v3891_v22 = vpack.c.bf16 %v3869_v19, %v3868_v54  ;;  %3333 = vst.msk [vmem:[#allocation5 + $0x60] sm:$0xff] %vm1751_vm6, %v3298_v30 }
 0x50e   : > { %3907 = vst.msk [vmem:[#allocation5 + $0x48] sm:$0xff] %vm3502_vm9, %v3891_v22 }
 0x50f   : > { %v3443_v31 = vld [vmem:[#allocation5 + $0x50] sm:$0xff] }
 0x510   : > { %6676 = vmatprep.mubr.msk.bf16.mxu0 %vm3502_vm9, %v3443_v31  ;;  %v3764_v57 = vunpack.c.l.bf16 %v3443_v31  ;;  %v3765_v42 = vunpack.c.h.bf16 %v3443_v31 }
 0x512   : > { %v3801_v32 = vmul.f32 %v8746_v2, %v3764_v57  ;;  %v3802_v55 = vmul.f32 %v8746_v2, %v3765_v42 }
 0x513   : > { %v3392_v52 = vpop.permute.xlu1 %3391 }
 0x514   : > { %v3838_v63 = vadd.f32 %v8754_v60, %v3801_v32  ;;  %v3839_v40 = vadd.f32 %v8754_v60, %v3802_v55  ;;  %3428 = vst.msk [vmem:[#allocation5 + $0x58] sm:$0xff] %vm1880_vm7, %v3392_v52 }
 0x515   : > { %v3923_v11 = vld [vmem:[#allocation5 + $0x48] sm:$0xff] }
 0x516   : > { %v3870_v34 = vmax.f32 %v3838_v63, 0.0  ;;  %v3871_v58 = vmax.f32 %v3839_v40, 0.0  ;;  %6717 = vmatmul.mubr.msk.bf16.gmra.mrb[116].mxu1 %vm3502_vm9, %v3923_v11 }
 0x517   : > { %v3300_v39 = vpop.permute.xlu1 %3299 }
 0x518   : > { %v3892_v5 = vpack.c.bf16 %v3871_v58, %v3870_v34  ;;  %3334 = vst.msk [vmem:[#allocation5 + $0x68] sm:$0xff] %vm1751_vm6, %v3300_v39 }
 0x51a   : > { %3908 = vst.msk [vmem:[#allocation5 + $0x50] sm:$0xff] %vm3502_vm9, %v3892_v5 }
 0x51b   : > { %v3394_v50 = vpop.permute.xlu0 %3393  ;;  %v3444_v8 = vld [vmem:[#allocation5 + $0x58] sm:$0xff] }
 0x51c   : > { %3429 = vst.msk [vmem:[#allocation5 + $0x60] sm:$0xff] %vm1880_vm7, %v3394_v50  ;;  %6677 = vmatmul.mubr.msk.bf16.gmra.mrb[88].mxu0 %vm3502_vm9, %v3444_v8  ;;  %v3766_v25 = vunpack.c.l.bf16 %v3444_v8  ;;  %v3767_v36 = vunpack.c.h.bf16 %v3444_v8 }
 0x51e   : > { %v3803_v33 = vmul.f32 %v8746_v2, %v3766_v25  ;;  %v3804_v9 = vmul.f32 %v8746_v2, %v3767_v36 }
 0x51f   : > { %v3302_v53 = vpop.permute.xlu0 %3301 }
 0x520   : > { %v3840_v4 = vadd.f32 %v8754_v60, %v3803_v33  ;;  %v3841_v16 = vadd.f32 %v8754_v60, %v3804_v9  ;;  %3335 = vst.msk [vmem:[#allocation5 + $0x70] sm:$0xff] %vm1751_vm6, %v3302_v53 }
 0x521   : > { %v3924_v26 = vld [vmem:[#allocation5 + $0x50] sm:$0xff] }
 0x522   : > { %v3872_v12 = vmax.f32 %v3840_v4, 0.0  ;;  %v3873_v46 = vmax.f32 %v3841_v16, 0.0  ;;  %6720 = vmatprep.mubr.msk.bf16.mxu1 %vm3502_vm9, %v3924_v26  ;;  %v8966_v4 = vld [vmem:[%s9773_s10 + $0x5] ss:$0 sm:$0xff] }
 0x523   : > { %v3445_v49 = vld [vmem:[#allocation5 + $0x60] sm:$0xff]  ;;  %v6872_v26 = vld [vmem:[%s9770_s7] sm:$0xff]  }
 0x524   : > { %v3893_v17 = vpack.c.bf16 %v3873_v46, %v3872_v12  ;;  %6680 = vmatprep.mubr.msk.bf16.mxu0 %vm3502_vm9, %v3445_v49  ;;  %v3768_v24 = vunpack.c.l.bf16 %v3445_v49  ;;  %v3769_v20 = vunpack.c.h.bf16 %v3445_v49  ;;  %v4257_v12 = vld [vmem:[#allocation2] sm:$0xff]  ;;  %v4258_v46 = vld [vmem:[#allocation2 + $0x8] sm:$0xff] }
 0x526   : > { %3909 = vst.msk [vmem:[#allocation5 + $0x58] sm:$0xff] %vm3502_vm9, %v3893_v17  ;;  %v3805_v27 = vmul.f32 %v8746_v2, %v3768_v24  ;;  %v3806_v3 = vmul.f32 %v8746_v2, %v3769_v20  ;;  %v6989_v24 = vmov 0   ;;  %v4289_v20 = vpack.c.bf16 %v4258_v46, %v4257_v12 }
 0x527   : > { %v3396_v37 = vpop.permute.xlu1 %3395  ;;  %5444 = vmatprep.subr.bf16.mxu0 %v6989_v24 }
 0x528   : > { %v3842_v29 = vadd.f32 %v8754_v60, %v3805_v27  ;;  %v3843_v62 = vadd.f32 %v8754_v60, %v3806_v3  ;;  %3430 = vst.msk [vmem:[#allocation5 + $0x68] sm:$0xff] %vm1880_vm7, %v3396_v37  ;;  %5445 = vmatpush1.bf16.msra.mxu0 %v6872_v26 }
 0x529   : > { %4305 = vst.msk [vmem:[#allocation4] sm:$0xff] %vm797_vm3, %v4289_v20  ;;  %5446 = vmatprep.subr.bf16.mxu0 %v6989_v24 }
 0x52a   : > { %v3874_v1 = vmax.f32 %v3842_v29, 0.0  ;;  %v3875_v28 = vmax.f32 %v3843_v62, 0.0  ;;  %v6873_v62 = vld [vmem:[%s9770_s7 + $0x8] sm:$0xff]  }
 0x52b   : > { %v3304_v10 = vpop.permute.xlu1 %3303 }
 0x52c   : > { %v3894_v15 = vpack.c.bf16 %v3875_v28, %v3874_v1  ;;  %3336 = vst.msk [vmem:[#allocation5 + $0x78] sm:$0xff] %vm1751_vm6, %v3304_v10  ;;  %5447 = vmatpush1.bf16.msra.mxu0 %v6873_v62  ;;  %v6880_v62 = vld [vmem:[%s9770_s7 + $0x40] sm:$0xff]  }
 0x52d   : > { %v3925_v47 = vld [vmem:[#allocation5 + $0x58] sm:$0xff]  ;;  %5448 = vmatprep.subr.bf16.mxu0 %v6989_v24 }
 0x52e   : > { %3910 = vst.msk [vmem:[#allocation5 + $0x60] sm:$0xff] %vm3502_vm9, %v3894_v15  ;;  %6721 = vmatmul.mubr.msk.bf16.gmra.mrb[120].mxu1 %vm3502_vm9, %v3925_v47 }
 0x52f   : > { %v3398_v7 = vpop.permute.xlu0 %3397  ;;  %v3446_v56 = vld [vmem:[#allocation5 + $0x68] sm:$0xff] }
 0x530   : > { %3431 = vst.msk [vmem:[#allocation5 + $0x70] sm:$0xff] %vm1880_vm7, %v3398_v7  ;;  %6681 = vmatmul.mubr.msk.bf16.gmra.mrb[92].mxu0 %vm3502_vm9, %v3446_v56  ;;  %v3770_v44 = vunpack.c.l.bf16 %v3446_v56  ;;  %v3771_v21 = vunpack.c.h.bf16 %v3446_v56 }
 0x532   : > { %v3807_v43 = vmul.f32 %v8746_v2, %v3770_v44  ;;  %v3808_v61 = vmul.f32 %v8746_v2, %v3771_v21  ;;  %v6874_v21 = vld [vmem:[%s9770_s7 + $0x10] sm:$0xff]  }
 0x533   : > { %5449 = vmatpush1.bf16.msra.mxu0 %v6874_v21 }
 0x534   : > { %v3844_v35 = vadd.f32 %v8754_v60, %v3807_v43  ;;  %v3845_v51 = vadd.f32 %v8754_v60, %v3808_v61  ;;  %5450 = vmatprep.subr.bf16.mxu0 %v6989_v24 }
 0x535   : > { %v3926_v38 = vld [vmem:[#allocation5 + $0x60] sm:$0xff] }
 0x536   : > { %v3876_v6 = vmax.f32 %v3844_v35, 0.0  ;;  %v3877_v0 = vmax.f32 %v3845_v51, 0.0  ;;  %6724 = vmatprep.mubr.msk.bf16.mxu1 %vm3502_vm9, %v3926_v38 }
 0x537   : > { %v3447_v14 = vld [vmem:[#allocation5 + $0x70] sm:$0xff] }
 0x538   : > { %v3895_v41 = vpack.c.bf16 %v3877_v0, %v3876_v6  ;;  %v3400_v54 = vpop.permute.xlu1 %3399  ;;  %6684 = vmatprep.mubr.msk.bf16.mxu0 %vm3502_vm9, %v3447_v14  ;;  %v3772_v19 = vunpack.c.l.bf16 %v3447_v14  ;;  %v3773_v30 = vunpack.c.h.bf16 %v3447_v14  ;;  %v6875_v14 = vld [vmem:[%s9770_s7 + $0x18] sm:$0xff]  }
 0x539   : > { %3432 = vst.msk [vmem:[#allocation5 + $0x78] sm:$0xff] %vm1880_vm7, %v3400_v54  ;;  %5451 = vmatpush1.bf16.msra.mxu0 %v6875_v14 }
 0x53a   : > { %3911 = vst.msk [vmem:[#allocation5 + $0x68] sm:$0xff] %vm3502_vm9, %v3895_v41  ;;  %v3809_v22 = vmul.f32 %v8746_v2, %v3772_v19  ;;  %v3810_v31 = vmul.f32 %v8746_v2, %v3773_v30  ;;  %5452 = vmatprep.subr.bf16.mxu0 %v6989_v24 }
 0x53c   : > { %v3846_v57 = vadd.f32 %v8754_v60, %v3809_v22  ;;  %v3847_v42 = vadd.f32 %v8754_v60, %v3810_v31 }
 0x53e   : > { %v3878_v32 = vmax.f32 %v3846_v57, 0.0  ;;  %v3879_v55 = vmax.f32 %v3847_v42, 0.0 }
 0x540   : > { %v3896_v52 = vpack.c.bf16 %v3879_v55, %v3878_v32  ;;  %v3448_v63 = vld [vmem:[#allocation5 + $0x78] sm:$0xff] }
 0x541   : > { %6685 = vmatmul.mubr.msk.bf16.gmra.mrb[96].mxu0 %vm3502_vm9, %v3448_v63  ;;  %v3774_v40 = vunpack.c.l.bf16 %v3448_v63  ;;  %v3775_v11 = vunpack.c.h.bf16 %v3448_v63  ;;  %v3927_v45 = vld [vmem:[#allocation5 + $0x68] sm:$0xff] }
 0x542   : > { %3912 = vst.msk [vmem:[#allocation5 + $0x70] sm:$0xff] %vm3502_vm9, %v3896_v52  ;;  %6725 = vmatmul.mubr.msk.bf16.gmra.mrb[124].mxu1 %vm3502_vm9, %v3927_v45 }
 0x543   : > { %v3811_v59 = vmul.f32 %v8746_v2, %v3774_v40  ;;  %v3812_v34 = vmul.f32 %v8746_v2, %v3775_v11  ;;  %v8947_v2 = vld [vmem:[%s9773_s10 + $0x8] ss:$0 sm:$0xff]  ;;  %v6876_v40 = vld [vmem:[%s9770_s7 + $0x20] sm:$0xff]  }
 0x544   : > { %5453 = vmatpush1.bf16.msra.mxu0 %v6876_v40  ;;  %v6877_v11 = vld [vmem:[%s9770_s7 + $0x28] sm:$0xff]  }
 0x545   : > { %v3848_v58 = vadd.f32 %v8754_v60, %v3811_v59  ;;  %v3849_v18 = vadd.f32 %v8754_v60, %v3812_v34  ;;  %5454 = vmatprep.subr.bf16.mxu0 %v6989_v24  ;;  %v6878_v59 = vld [vmem:[%s9770_s7 + $0x30] sm:$0xff]  }
 0x547   : > { %v3880_v48 = vmax.f32 %v3848_v58, 0.0  ;;  %v3881_v13 = vmax.f32 %v3849_v18, 0.0 }
 0x548   : > { %5455 = vmatpush1.bf16.msra.mxu0 %v6877_v11 }
 0x549   : > { %v3897_v39 = vpack.c.bf16 %v3881_v13, %v3880_v48  ;;  %v3928_v23 = vld [vmem:[#allocation5 + $0x70] sm:$0xff]  ;;  %5456 = vmatprep.subr.bf16.mxu0 %v6989_v24 }
 0x54a   : > { %6728 = vmatprep.mubr.msk.bf16.mxu1 %vm3502_vm9, %v3928_v23 }
 0x54b   : > { %3913 = vst.msk [vmem:[#allocation5 + $0x78] sm:$0xff] %vm3502_vm9, %v3897_v39 }
 0x54c   : > { %5457 = vmatpush1.bf16.msra.mxu0 %v6878_v59 }
 0x54d   : > { %5458 = vmatprep.subr.bf16.mxu0 %v6989_v24 }
 0x552   : > { %v3929_v5 = vld [vmem:[#allocation5 + $0x78] sm:$0xff] }
 0x553   : > { %6729 = vmatmul.mubr.msk.bf16.gmra.mrb[128].mxu1 %vm3502_vm9, %v3929_v5 }
 0x558   : > { %v4386_v27 = vpop.permute.xlu0 %4385 }
 0x559   : > { %4434 = vst.msk [vmem:[#allocation4] sm:$0xff] %vm4433_vm10, %v4386_v27 }
 0x55a   : > { %v4515_v29 = vpop.permute.xlu1 %4514 }
 0x55b   : > { %4563 = vst.msk [vmem:[#allocation4] sm:$0xff] %vm4562_vm11, %v4515_v29 }
 0x574   : > { %v6658_v60 = vpop.f32.mrb[68].mxu0 }
 0x575   : > { %v3594_v50 = vadd.f32 %v6658_v60, %v8947_v2  ;;  %v3585_v8 = vpop.f32.mrb[69].mxu0 }
 0x576   : > { %v3586_v25 = vadd.f32 %v8947_v2, %v3585_v8  ;;  %v6659_v36 = vpop.f32.mrb[70].mxu0 }
 0x577   : > { %3714 = vst.msk [vmem:[%s8951_s19 + $0x10] sm:$0xff] %vm561_vm0, %v3594_v50  ;;  %v3597_v33 = vadd.f32 %v6659_v36, %v8947_v2  ;;  %v3588_v9 = vpop.f32.mrb[71].mxu0 }
 0x578   : > { %3712 = vst.msk [vmem:[%s8951_s19] sm:$0xff] %vm561_vm0, %v3586_v25  ;;  %v3589_v53 = vadd.f32 %v8947_v2, %v3588_v9 }
 0x579   : > { %3715 = vst.msk [vmem:[%s8951_s19 + $0x18] sm:$0xff] %vm561_vm0, %v3597_v33  ;;  %v6879_v33 = vld [vmem:[%s9770_s7 + $0x38] sm:$0xff]  }
 0x57a   : > { %3713 = vst.msk [vmem:[%s8951_s19 + $0x8] sm:$0xff] %vm561_vm0, %v3589_v53  ;;  %5459 = vmatpush1.bf16.msra.mxu0 %v6879_v33 }
 0x57b   : > { %5460 = vmatprep.subr.bf16.mxu0 %v6989_v24 }
 0x57e   : > { %5461 = vmatpush1.bf16.msra.mxu0 %v6880_v62 }
 0x586   : > { %v6702_v16 = vpop.f32.mrb[100].mxu1 }
 0x587   : > { %v4074_v49 = vadd.f32 %v6702_v16, %v8966_v4  ;;  %v4065_v17 = vpop.f32.mrb[101].mxu1 }
 0x588   : > { %v4066_v3 = vadd.f32 %v8966_v4, %v4065_v17  ;;  %v6703_v37 = vpop.f32.mrb[102].mxu1 }
 0x589   : > { %v4194_v1 = vmax.f32 %v4074_v49, 0.0  ;;  %v4077_v28 = vadd.f32 %v6703_v37, %v8966_v4  ;;  %v4068_v10 = vpop.f32.mrb[103].mxu1 }
 0x58a   : > { %v4192_v15 = vmax.f32 %v4066_v3, 0.0  ;;  %v4069_v47 = vadd.f32 %v8966_v4, %v4068_v10 }
 0x58b   : > { %4227 = vst.msk [vmem:[#allocation2 + $0x31] sm:$0xff] %vm797_vm3, %v4194_v1  ;;  %v4195_v7 = vmax.f32 %v4077_v28, 0.0 }
 0x58c   : > { %4225 = vst.msk [vmem:[#allocation2 + $0x19] sm:$0xff] %vm797_vm3, %v4192_v15  ;;  %v4193_v56 = vmax.f32 %v4069_v47, 0.0 }
 0x58d   : > { %4228 = vst.msk [vmem:[#allocation2 + $0x39] sm:$0xff] %vm797_vm3, %v4195_v7 }
 0x58e   : > { %4226 = vst.msk [vmem:[#allocation2 + $0x21] sm:$0xff] %vm797_vm3, %v4193_v56 }
 0x58f   : > { %v6662_v44 = vpop.f32.mrb[72].mxu0 }
 0x590   : > { %v3610_v43 = vadd.f32 %v6662_v44, %v8947_v2  ;;  %v3601_v61 = vpop.f32.mrb[73].mxu0 }
 0x591   : > { %v3602_v35 = vadd.f32 %v8947_v2, %v3601_v61  ;;  %v6663_v51 = vpop.f32.mrb[74].mxu0 }
 0x592   : > { %3718 = vst.msk [vmem:[%s8951_s19 + $0x30] sm:$0xff] %vm561_vm0, %v3610_v43  ;;  %v3613_v38 = vadd.f32 %v6663_v51, %v8947_v2  ;;  %v3604_v6 = vpop.f32.mrb[75].mxu0  ;;  %v5095_v41 = vld [vmem:[#allocation2 + $0x31] sm:$0xff] }
 0x593   : > { %3716 = vst.msk [vmem:[%s8951_s19 + $0x20] sm:$0xff] %vm561_vm0, %v3602_v35  ;;  %v3605_v0 = vadd.f32 %v8947_v2, %v3604_v6  ;;  %v4966_v54 = vld [vmem:[#allocation2 + $0x30] sm:$0xff]  ;;  %v4579_v32 = vld [vmem:[#allocation2 + $0x18] sm:$0xff] }
 0x594   : > { %3719 = vst.msk [vmem:[%s8951_s19 + $0x38] sm:$0xff] %vm561_vm0, %v3613_v38  ;;  %v5096_v19 = vld [vmem:[#allocation2 + $0x39] sm:$0xff] }
 0x595   : > { %3717 = vst.msk [vmem:[%s8951_s19 + $0x28] sm:$0xff] %vm561_vm0, %v3605_v0  ;;  %v4967_v30 = vld [vmem:[#allocation2 + $0x38] sm:$0xff]  ;;  %v5127_v31 = vpack.c.bf16 %v5096_v19, %v5095_v41  ;;  %v4580_v55 = vld [vmem:[#allocation2 + $0x20] sm:$0xff] }
 0x596   : > { %v4839_v22 = vld [vmem:[#allocation2 + $0x32] sm:$0xff]  ;;  %v4998_v57 = vpack.c.bf16 %v4967_v30, %v4966_v54  ;;  %v4840_v42 = vld [vmem:[#allocation2 + $0x3a] sm:$0xff]  ;;  %v4611_v63 = vpack.c.bf16 %v4580_v55, %v4579_v32  ;;  %v4838_v36 = vld [vmem:[#allocation2 + $0x22] sm:$0xff] }
 0x597   : > { %v4870_v52 = vpack.c.bf16 %v4840_v42, %v4839_v22  ;;  %5159 = vrot.lane.b32.xlu0 %v5127_v31, %s9877_s16  ;;  %v4709_v60 = vld [vmem:[#allocation2 + $0x21] sm:$0xff]  ;;  %v4708_v26 = vld [vmem:[#allocation2 + $0x19] sm:$0xff] }
 0x598   : > { %5030 = vrot.lane.b32.xlu1 %v4998_v57, %s9879_s26  ;;  %4307 = vst.msk [vmem:[#allocation4 + $0x20] sm:$0xff] %vm797_vm3, %v4998_v57  ;;  %4306 = vst.msk [vmem:[#allocation4 + $0x10] sm:$0xff] %vm797_vm3, %v4611_v63  ;;  %v4837_v25 = vld [vmem:[#allocation2 + $0x1a] sm:$0xff]  ;;  %v4740_v49 = vpack.c.bf16 %v4709_v60, %v4708_v26  ;;  %s9986_s26 = smov 112  }
 0x599   : > { %5272 = vst.msk [vmem:[#allocation4 + $0x8] sm:$0xff] %vm797_vm3, %v4870_v52  ;;  %v4869_v17 = vpack.c.bf16 %v4838_v36, %v4837_v25 }
 0x59b   : > { %4774 = vrot.lane.b32.xlu0 %v5127_v31, %s9903_s18 }
 0x59c   : > { %4645 = vrot.lane.b32.xlu1 %v4998_v57, %s6991_s15 }
 0x59f   : > { %4389 = vrot.lane.b32.xlu0 %v5127_v31, %s9985_s28 }
 0x5a0   : > { %4903 = vrot.lane.b32.xlu1 %v4870_v52, %s6992_s0  ;;  %v5289_v18 = vld [vmem:[#allocation4 + $0x8] sm:$0xff] }
 0x5a1   : > { %v6706_v45 = vpop.f32.mrb[104].mxu1  ;;  %6242 = vmatprep.mubr.msk.bf16.mxu0 %vm797_vm3, %v5289_v18 }
 0x5a2   : > { %v4090_v34 = vadd.f32 %v6706_v45, %v8966_v4  ;;  %v4081_v58 = vpop.f32.mrb[105].mxu1 }
 0x5a3   : > { %v4082_v48 = vadd.f32 %v8966_v4, %v4081_v58  ;;  %v6707_v13 = vpop.f32.mrb[106].mxu1  ;;  %4643 = vrot.lane.b32.xlu0 %v4611_v63, %s6991_s15 }
 0x5a4   : > { %v4198_v39 = vmax.f32 %v4090_v34, 0.0  ;;  %v4093_v23 = vadd.f32 %v6707_v13, %v8966_v4  ;;  %v4084_v5 = vpop.f32.mrb[107].mxu1  ;;  %4518 = vrot.lane.b32.xlu1 %v4870_v52, %s9904_s20 }
 0x5a5   : > { %v4196_v50 = vmax.f32 %v4082_v48, 0.0  ;;  %v4085_v8 = vadd.f32 %v8966_v4, %v4084_v5 }
 0x5a6   : > { %4231 = vst.msk [vmem:[#allocation2 + $0x61] sm:$0xff] %vm797_vm3, %v4198_v39  ;;  %v4199_v9 = vmax.f32 %v4093_v23, 0.0 }
 0x5a7   : > { %4229 = vst.msk [vmem:[#allocation2 + $0x49] sm:$0xff] %vm797_vm3, %v4196_v50  ;;  %v4197_v53 = vmax.f32 %v4085_v8, 0.0  ;;  %v6666_v16 = vpop.f32.mrb[76].mxu0  ;;  %4901 = vrot.lane.b32.xlu0 %v4869_v17, %s6992_s0 }
 0x5a8   : > { %4232 = vst.msk [vmem:[#allocation2 + $0x69] sm:$0xff] %vm797_vm3, %v4199_v9  ;;  %v3626_v12 = vadd.f32 %v6666_v16, %v8947_v2  ;;  %v3617_v46 = vpop.f32.mrb[77].mxu0  ;;  %4772 = vrot.lane.b32.xlu1 %v4740_v49, %s9903_s18 }
 0x5a9   : > { %4230 = vst.msk [vmem:[#allocation2 + $0x51] sm:$0xff] %vm797_vm3, %v4197_v53  ;;  %v3618_v20 = vadd.f32 %v8947_v2, %v3617_v46  ;;  %v6667_v27 = vpop.f32.mrb[78].mxu0 }
 0x5aa   : > { %3722 = vst.msk [vmem:[%s8951_s19 + $0x50] sm:$0xff] %vm561_vm0, %v3626_v12  ;;  %v3629_v3 = vadd.f32 %v6667_v27, %v8947_v2  ;;  %v3620_v37 = vpop.f32.mrb[79].mxu0 }
 0x5ab   : > { %3720 = vst.msk [vmem:[%s8951_s19 + $0x40] sm:$0xff] %vm561_vm0, %v3618_v20  ;;  %v3621_v29 = vadd.f32 %v8947_v2, %v3620_v37  ;;  %4516 = vrot.lane.b32.xlu0 %v4869_v17, %s9904_s20 }
 0x5ac   : > { %3723 = vst.msk [vmem:[%s8951_s19 + $0x58] sm:$0xff] %vm561_vm0, %v3629_v3  ;;  %4387 = vrot.lane.b32.xlu1 %v4740_v49, %s9985_s28 }
 0x5ad   : > { %3721 = vst.msk [vmem:[%s8951_s19 + $0x48] sm:$0xff] %vm561_vm0, %v3621_v29  ;;  %v5099_v1 = vld [vmem:[#allocation2 + $0x61] sm:$0xff] }
 0x5ae   : > { %v4970_v10 = vld [vmem:[#allocation2 + $0x60] sm:$0xff]  ;;  %v4263_v24 = vld [vmem:[#allocation2 + $0x48] sm:$0xff] }
 0x5af   : > { %v5100_v28 = vld [vmem:[#allocation2 + $0x69] sm:$0xff] }
 0x5b0   : > { %v4971_v15 = vld [vmem:[#allocation2 + $0x68] sm:$0xff]  ;;  %v5129_v47 = vpack.c.bf16 %v5100_v28, %v5099_v1  ;;  %v4842_v44 = vld [vmem:[#allocation2 + $0x52] sm:$0xff] }
 0x5b1   : > { %v5000_v7 = vpack.c.bf16 %v4971_v15, %v4970_v10  ;;  %v4841_v56 = vld [vmem:[#allocation2 + $0x4a] sm:$0xff]  ;;  %v5228_v35 = vld [vmem:[#allocation2 + $0x62] sm:$0xff] }
 0x5b2   : > { %v4264_v21 = vld [vmem:[#allocation2 + $0x50] sm:$0xff]  ;;  %5163 = vrot.lane.b32.xlu0 %v5129_v47, %s9986_s26  ;;  %v4871_v43 = vpack.c.bf16 %v4842_v44, %v4841_v56  ;;  %v4843_v6 = vld [vmem:[#allocation2 + $0x62] sm:$0xff] }
 0x5b3   : > { %5034 = vrot.lane.b32.xlu1 %v5000_v7, %s9987_s17  ;;  %4309 = vst.msk [vmem:[#allocation4 + $0x40] sm:$0xff] %vm797_vm3, %v5000_v7  ;;  %v4292_v61 = vpack.c.bf16 %v4264_v21, %v4263_v24  ;;  %v5229_v51 = vld [vmem:[#allocation2 + $0x6a] sm:$0xff] }
 0x5b4   : > { %v5258_v38 = vpack.c.bf16 %v5229_v51, %v5228_v35  ;;  %5273 = vst.msk [vmem:[#allocation4 + $0x18] sm:$0xff] %vm797_vm3, %v4871_v43  ;;  %v4844_v0 = vld [vmem:[#allocation2 + $0x6a] sm:$0xff] }
 0x5b5   : > { %4308 = vst.msk [vmem:[#allocation4 + $0x30] sm:$0xff] %vm797_vm3, %v4292_v61  ;;  %v4872_v14 = vpack.c.bf16 %v4844_v0, %v4843_v6  ;;  %v4969_v54 = vld [vmem:[#allocation2 + $0x50] sm:$0xff]  ;;  %v4968_v57 = vld [vmem:[#allocation2 + $0x48] sm:$0xff] }
 0x5b6   : > { %5274 = vst.msk [vmem:[#allocation4 + $0x28] sm:$0xff] %vm797_vm3, %v5258_v38  ;;  %4778 = vrot.lane.b32.xlu0 %v5129_v47, %s9903_s18  ;;  %v4999_v52 = vpack.c.bf16 %v4969_v54, %v4968_v57  ;;  %v5098_v11 = vld [vmem:[#allocation2 + $0x51] sm:$0xff]  ;;  %v5097_v58 = vld [vmem:[#allocation2 + $0x49] sm:$0xff] }
 0x5b7   : > { %4649 = vrot.lane.b32.xlu1 %v5000_v7, %s6991_s15  ;;  %v5128_v13 = vpack.c.bf16 %v5098_v11, %v5097_v58 }
 0x5b9   : > { %v6710_v41 = vpop.f32.mrb[108].mxu1 }
 0x5ba   : > { %v4106_v19 = vadd.f32 %v6710_v41, %v8966_v4  ;;  %4393 = vrot.lane.b32.xlu0 %v5129_v47, %s9985_s28  ;;  %v4097_v30 = vpop.f32.mrb[109].mxu1 }
 0x5bb   : > { %4907 = vrot.lane.b32.xlu1 %v4872_v14, %s6992_s0  ;;  %v4098_v22 = vadd.f32 %v8966_v4, %v4097_v30  ;;  %v6711_v31 = vpop.f32.mrb[110].mxu1 }
 0x5bc   : > { %v4202_v42 = vmax.f32 %v4106_v19, 0.0  ;;  %v4109_v32 = vadd.f32 %v6711_v31, %v8966_v4  ;;  %v4100_v55 = vpop.f32.mrb[111].mxu1 }
 0x5bd   : > { %v4200_v63 = vmax.f32 %v4098_v22, 0.0  ;;  %v4101_v40 = vadd.f32 %v8966_v4, %v4100_v55 }
 0x5be   : > { %4235 = vst.msk [vmem:[#allocation2 + $0x91] sm:$0xff] %vm797_vm3, %v4202_v42  ;;  %v4203_v45 = vmax.f32 %v4109_v32, 0.0  ;;  %5032 = vrot.lane.b32.xlu0 %v4999_v52, %s9987_s17 }
 0x5bf   : > { %4522 = vrot.lane.b32.xlu1 %v4872_v14, %s9904_s20  ;;  %4233 = vst.msk [vmem:[#allocation2 + $0x79] sm:$0xff] %vm797_vm3, %v4200_v63  ;;  %v4201_v59 = vmax.f32 %v4101_v40, 0.0  ;;  %v6670_v34 = vpop.f32.mrb[80].mxu0 }
 0x5c0   : > { %4236 = vst.msk [vmem:[#allocation2 + $0x99] sm:$0xff] %vm797_vm3, %v4203_v45  ;;  %v3642_v18 = vadd.f32 %v6670_v34, %v8947_v2  ;;  %v3633_v48 = vpop.f32.mrb[81].mxu0 }
 0x5c1   : > { %4234 = vst.msk [vmem:[#allocation2 + $0x81] sm:$0xff] %vm797_vm3, %v4201_v59  ;;  %v3634_v39 = vadd.f32 %v8947_v2, %v3633_v48  ;;  %v6671_v23 = vpop.f32.mrb[82].mxu0 }
 0x5c2   : > { %3726 = vst.msk [vmem:[%s8951_s19 + $0x70] sm:$0xff] %vm561_vm0, %v3642_v18  ;;  %v3645_v5 = vadd.f32 %v6671_v23, %v8947_v2  ;;  %4647 = vrot.lane.b32.xlu0 %v4999_v52, %s6991_s15  ;;  %v3636_v60 = vpop.f32.mrb[83].mxu0 }
 0x5c3   : > { %5161 = vrot.lane.b32.xlu1 %v5128_v13, %s9986_s26  ;;  %3724 = vst.msk [vmem:[%s8951_s19 + $0x60] sm:$0xff] %vm561_vm0, %v3634_v39  ;;  %v3637_v50 = vadd.f32 %v8947_v2, %v3636_v60 }
 0x5c4   : > { %3727 = vst.msk [vmem:[%s8951_s19 + $0x78] sm:$0xff] %vm561_vm0, %v3645_v5 }
 0x5c5   : > { %3725 = vst.msk [vmem:[%s8951_s19 + $0x68] sm:$0xff] %vm561_vm0, %v3637_v50  ;;  %v4269_v8 = vld [vmem:[#allocation2 + $0x90] sm:$0xff] }
 0x5c6   : > { %4905 = vrot.lane.b32.xlu0 %v4871_v43, %s6992_s0  ;;  %v4267_v33 = vld [vmem:[#allocation2 + $0x78] sm:$0xff]  ;;  %v4974_v27 = vld [vmem:[#allocation2 + $0x90] sm:$0xff] }
 0x5c7   : > { %4776 = vrot.lane.b32.xlu1 %v5128_v13, %s9903_s18  ;;  %v5104_v25 = vld [vmem:[#allocation2 + $0x99] sm:$0xff]  ;;  %v5103_v20 = vld [vmem:[#allocation2 + $0x91] sm:$0xff] }
 0x5c8   : > { %v4975_v36 = vld [vmem:[#allocation2 + $0x98] sm:$0xff]  ;;  %v4846_v53 = vld [vmem:[#allocation2 + $0x82] sm:$0xff]  ;;  %v5131_v29 = vpack.c.bf16 %v5104_v25, %v5103_v20 }
 0x5c9   : > { %v4845_v9 = vld [vmem:[#allocation2 + $0x7a] sm:$0xff]  ;;  %v5232_v49 = vld [vmem:[#allocation2 + $0x92] sm:$0xff]  ;;  %v5002_v62 = vpack.c.bf16 %v4975_v36, %v4974_v27 }
 0x5ca   : > { %v4270_v16 = vld [vmem:[#allocation2 + $0x98] sm:$0xff]  ;;  %4520 = vrot.lane.b32.xlu0 %v4871_v43, %s9904_s20  ;;  %v9101_v26 = vpack.c.bf16 %v4846_v53, %v4845_v9  ;;  %v4268_v46 = vld [vmem:[#allocation2 + $0x80] sm:$0xff] }
 0x5cb   : > { %4391 = vrot.lane.b32.xlu1 %v5128_v13, %s9985_s28  ;;  %v4295_v12 = vpack.c.bf16 %v4270_v16, %v4269_v8  ;;  %v5233_v17 = vld [vmem:[#allocation2 + $0x9a] sm:$0xff]  ;;  %v4294_v3 = vpack.c.bf16 %v4268_v46, %v4267_v33  ;;  %v4847_v28 = vld [vmem:[#allocation2 + $0x92] sm:$0xff] }
 0x5cc   : > { %v5260_v37 = vpack.c.bf16 %v5233_v17, %v5232_v49  ;;  %5275 = vst.msk [vmem:[#allocation4 + $0x38] sm:$0xff] %vm797_vm3, %v9101_v26  ;;  %v4848_v10 = vld [vmem:[#allocation2 + $0x9a] sm:$0xff] }
 0x5cd   : > { %4311 = vst.msk [vmem:[#allocation4 + $0x60] sm:$0xff] %vm797_vm3, %v4295_v12  ;;  %4310 = vst.msk [vmem:[#allocation4 + $0x50] sm:$0xff] %vm797_vm3, %v4294_v3  ;;  %v4874_v43 = vpack.c.bf16 %v4848_v10, %v4847_v28  ;;  %v4973_v51 = vld [vmem:[#allocation2 + $0x80] sm:$0xff]  ;;  %v4972_v14 = vld [vmem:[#allocation2 + $0x78] sm:$0xff] }
 0x5ce   : > { %5276 = vst.msk [vmem:[#allocation4 + $0x48] sm:$0xff] %vm797_vm3, %v5260_v37  ;;  %5167 = vrot.lane.b32.xlu0 %v5131_v29, %s9986_s26  ;;  %v5001_v19 = vpack.c.bf16 %v4973_v51, %v4972_v14  ;;  %v5102_v31 = vld [vmem:[#allocation2 + $0x81] sm:$0xff]  ;;  %v5101_v55 = vld [vmem:[#allocation2 + $0x79] sm:$0xff] }
 0x5cf   : > { %5038 = vrot.lane.b32.xlu1 %v5002_v62, %s9987_s17  ;;  %v5130_v52 = vpack.c.bf16 %v5102_v31, %v5101_v55 }
 0x5d1   : > { %v6714_v1 = vpop.f32.mrb[112].mxu1 }
 0x5d2   : > { %v4122_v15 = vadd.f32 %v6714_v1, %v8966_v4  ;;  %4782 = vrot.lane.b32.xlu0 %v5131_v29, %s9903_s18  ;;  %v4113_v47 = vpop.f32.mrb[113].mxu1 }
 0x5d3   : > { %4653 = vrot.lane.b32.xlu1 %v5002_v62, %s6991_s15  ;;  %v4114_v7 = vadd.f32 %v8966_v4, %v4113_v47  ;;  %v6715_v24 = vpop.f32.mrb[114].mxu1 }
 0x5d4   : > { %v4206_v56 = vmax.f32 %v4122_v15, 0.0  ;;  %v4125_v44 = vadd.f32 %v6715_v24, %v8966_v4  ;;  %v4116_v21 = vpop.f32.mrb[115].mxu1 }
 0x5d5   : > { %v4204_v61 = vmax.f32 %v4114_v7, 0.0  ;;  %v4117_v35 = vadd.f32 %v8966_v4, %v4116_v21 }
 0x5d6   : > { %4239 = vst.msk [vmem:[#allocation2 + $0xc1] sm:$0xff] %vm797_vm3, %v4206_v56  ;;  %v4207_v38 = vmax.f32 %v4125_v44, 0.0  ;;  %4397 = vrot.lane.b32.xlu0 %v5131_v29, %s9985_s28 }
 0x5d7   : > { %4911 = vrot.lane.b32.xlu1 %v4874_v43, %s6992_s0  ;;  %4237 = vst.msk [vmem:[#allocation2 + $0xa9] sm:$0xff] %vm797_vm3, %v4204_v61  ;;  %v4205_v6 = vmax.f32 %v4117_v35, 0.0  ;;  %v6674_v0 = vpop.f32.mrb[84].mxu0 }
 0x5d8   : > { %4240 = vst.msk [vmem:[#allocation2 + $0xc9] sm:$0xff] %vm797_vm3, %v4207_v38  ;;  %v3658_v41 = vadd.f32 %v6674_v0, %v8947_v2  ;;  %v3649_v54 = vpop.f32.mrb[85].mxu0 }
 0x5d9   : > { %4238 = vst.msk [vmem:[#allocation2 + $0xb1] sm:$0xff] %vm797_vm3, %v4205_v6  ;;  %v3650_v30 = vadd.f32 %v8947_v2, %v3649_v54  ;;  %v6675_v22 = vpop.f32.mrb[86].mxu0 }
 0x5da   : > { %3730 = vst.msk [vmem:[%s8951_s19 + $0x90] sm:$0xff] %vm561_vm0, %v3658_v41  ;;  %v3661_v57 = vadd.f32 %v6675_v22, %v8947_v2  ;;  %5036 = vrot.lane.b32.xlu0 %v5001_v19, %s9987_s17  ;;  %v3652_v42 = vpop.f32.mrb[87].mxu0 }
 0x5db   : > { %4526 = vrot.lane.b32.xlu1 %v4874_v43, %s9904_s20  ;;  %3728 = vst.msk [vmem:[%s8951_s19 + $0x80] sm:$0xff] %vm561_vm0, %v3650_v30  ;;  %v3653_v32 = vadd.f32 %v8947_v2, %v3652_v42 }
 0x5dc   : > { %3731 = vst.msk [vmem:[%s8951_s19 + $0x98] sm:$0xff] %vm561_vm0, %v3661_v57 }
 0x5dd   : > { %3729 = vst.msk [vmem:[%s8951_s19 + $0x88] sm:$0xff] %vm561_vm0, %v3653_v32  ;;  %v4273_v63 = vld [vmem:[#allocation2 + $0xc0] sm:$0xff] }
 0x5de   : > { %4651 = vrot.lane.b32.xlu0 %v5001_v19, %s6991_s15  ;;  %v4271_v40 = vld [vmem:[#allocation2 + $0xa8] sm:$0xff]  ;;  %v4978_v8 = vld [vmem:[#allocation2 + $0xc0] sm:$0xff] }
 0x5df   : > { %5165 = vrot.lane.b32.xlu1 %v5130_v52, %s9986_s26  ;;  %v4274_v59 = vld [vmem:[#allocation2 + $0xc8] sm:$0xff] }
 0x5e0   : > { %v4849_v11 = vld [vmem:[#allocation2 + $0xaa] sm:$0xff]  ;;  %v4850_v45 = vld [vmem:[#allocation2 + $0xb2] sm:$0xff]  ;;  %v4297_v58 = vpack.c.bf16 %v4274_v59, %v4273_v63  ;;  %v5236_v48 = vld [vmem:[#allocation2 + $0xc2] sm:$0xff] }
 0x5e1   : > { %v9141_v34 = vpack.c.bf16 %v4850_v45, %v4849_v11  ;;  %v4272_v18 = vld [vmem:[#allocation2 + $0xb0] sm:$0xff]  ;;  %v4979_v60 = vld [vmem:[#allocation2 + $0xc8] sm:$0xff] }
 0x5e2   : > { %4909 = vrot.lane.b32.xlu0 %v9101_v26, %s6992_s0  ;;  %v5237_v13 = vld [vmem:[#allocation2 + $0xca] sm:$0xff]  ;;  %v4296_v39 = vpack.c.bf16 %v4272_v18, %v4271_v40  ;;  %4313 = vst.msk [vmem:[#allocation4 + $0x80] sm:$0xff] %vm797_vm3, %v4297_v58  ;;  %v5107_v50 = vld [vmem:[#allocation2 + $0xc1] sm:$0xff]  ;;  %v5004_v36 = vpack.c.bf16 %v4979_v60, %v4978_v8 }
 0x5e3   : > { %4780 = vrot.lane.b32.xlu1 %v5130_v52, %s9903_s18  ;;  %v5262_v23 = vpack.c.bf16 %v5237_v13, %v5236_v48  ;;  %5277 = vst.msk [vmem:[#allocation4 + $0x58] sm:$0xff] %vm797_vm3, %v9141_v34  ;;  %v5108_v5 = vld [vmem:[#allocation2 + $0xc9] sm:$0xff]  ;;  %v5106_v61 = vld [vmem:[#allocation2 + $0xb1] sm:$0xff] }
 0x5e4   : > { %4312 = vst.msk [vmem:[#allocation4 + $0x70] sm:$0xff] %vm797_vm3, %v4296_v39  ;;  %v5133_v25 = vpack.c.bf16 %v5108_v5, %v5107_v50  ;;  %v4851_v27 = vld [vmem:[#allocation2 + $0xc2] sm:$0xff]  ;;  %v4852_v3 = vld [vmem:[#allocation2 + $0xca] sm:$0xff] }
 0x5e5   : > { %5278 = vst.msk [vmem:[#allocation4 + $0x68] sm:$0xff] %vm797_vm3, %v5262_v23  ;;  %v4876_v10 = vpack.c.bf16 %v4852_v3, %v4851_v27  ;;  %v4977_v7 = vld [vmem:[#allocation2 + $0xb0] sm:$0xff]  ;;  %v4976_v21 = vld [vmem:[#allocation2 + $0xa8] sm:$0xff] }
 0x5e6   : > { %4524 = vrot.lane.b32.xlu0 %v9101_v26, %s9904_s20  ;;  %v5003_v43 = vpack.c.bf16 %v4977_v7, %v4976_v21  ;;  %v5105_v35 = vld [vmem:[#allocation2 + $0xa9] sm:$0xff] }
 0x5e7   : > { %4395 = vrot.lane.b32.xlu1 %v5130_v52, %s9985_s28  ;;  %v5132_v51 = vpack.c.bf16 %v5106_v61, %v5105_v35 }
 0x5e9   : > { %v6718_v33 = vpop.f32.mrb[116].mxu1 }
 0x5ea   : > { %v4138_v9 = vadd.f32 %v6718_v33, %v8966_v4  ;;  %5171 = vrot.lane.b32.xlu0 %v5133_v25, %s9986_s26  ;;  %v4129_v53 = vpop.f32.mrb[117].mxu1 }
 0x5eb   : > { %5042 = vrot.lane.b32.xlu1 %v5004_v36, %s9987_s17  ;;  %v4130_v16 = vadd.f32 %v8966_v4, %v4129_v53  ;;  %v6719_v12 = vpop.f32.mrb[118].mxu1 }
 0x5ec   : > { %v4210_v46 = vmax.f32 %v4138_v9, 0.0  ;;  %v4141_v26 = vadd.f32 %v6719_v12, %v8966_v4  ;;  %v4132_v49 = vpop.f32.mrb[119].mxu1 }
 0x5ed   : > { %v4208_v17 = vmax.f32 %v4130_v16, 0.0  ;;  %v4133_v20 = vadd.f32 %v8966_v4, %v4132_v49 }
 0x5ee   : > { %4243 = vst.msk [vmem:[#allocation2 + $0xf1] sm:$0xff] %vm797_vm3, %v4210_v46  ;;  %v4211_v37 = vmax.f32 %v4141_v26, 0.0  ;;  %4786 = vrot.lane.b32.xlu0 %v5133_v25, %s9903_s18 }
 0x5ef   : > { %4657 = vrot.lane.b32.xlu1 %v5004_v36, %s6991_s15  ;;  %4241 = vst.msk [vmem:[#allocation2 + $0xd9] sm:$0xff] %vm797_vm3, %v4208_v17  ;;  %v4209_v29 = vmax.f32 %v4133_v20, 0.0  ;;  %v6678_v62 = vpop.f32.mrb[88].mxu0 }
 0x5f0   : > { %4244 = vst.msk [vmem:[#allocation2 + $0xf9] sm:$0xff] %vm797_vm3, %v4211_v37  ;;  %v3674_v1 = vadd.f32 %v6678_v62, %v8947_v2  ;;  %v3665_v28 = vpop.f32.mrb[89].mxu0 }
 0x5f1   : > { %4242 = vst.msk [vmem:[#allocation2 + $0xe1] sm:$0xff] %vm797_vm3, %v4209_v29  ;;  %v3666_v15 = vadd.f32 %v8947_v2, %v3665_v28  ;;  %v6679_v47 = vpop.f32.mrb[90].mxu0 }
 0x5f2   : > { %3734 = vst.msk [vmem:[%s8951_s19 + $0xb0] sm:$0xff] %vm561_vm0, %v3674_v1  ;;  %v3677_v24 = vadd.f32 %v6679_v47, %v8947_v2  ;;  %4401 = vrot.lane.b32.xlu0 %v5133_v25, %s9985_s28  ;;  %v3668_v56 = vpop.f32.mrb[91].mxu0 }
 0x5f3   : > { %4915 = vrot.lane.b32.xlu1 %v4876_v10, %s6992_s0  ;;  %3732 = vst.msk [vmem:[%s8951_s19 + $0xa0] sm:$0xff] %vm561_vm0, %v3666_v15  ;;  %v3669_v44 = vadd.f32 %v8947_v2, %v3668_v56 }
 0x5f4   : > { %3735 = vst.msk [vmem:[%s8951_s19 + $0xb8] sm:$0xff] %vm561_vm0, %v3677_v24 }
 0x5f5   : > { %3733 = vst.msk [vmem:[%s8951_s19 + $0xa8] sm:$0xff] %vm561_vm0, %v3669_v44  ;;  %v4277_v19 = vld [vmem:[#allocation2 + $0xf0] sm:$0xff] }
 0x5f6   : > { %5040 = vrot.lane.b32.xlu0 %v5003_v43, %s9987_s17  ;;  %v4980_v38 = vld [vmem:[#allocation2 + $0xd8] sm:$0xff]  ;;  %v4982_v48 = vld [vmem:[#allocation2 + $0xf0] sm:$0xff] }
 0x5f7   : > { %4530 = vrot.lane.b32.xlu1 %v4876_v10, %s9904_s20  ;;  %v4278_v30 = vld [vmem:[#allocation2 + $0xf8] sm:$0xff] }
 0x5f8   : > { %v4981_v6 = vld [vmem:[#allocation2 + $0xe0] sm:$0xff]  ;;  %v4299_v22 = vpack.c.bf16 %v4278_v30, %v4277_v19  ;;  %v5240_v31 = vld [vmem:[#allocation2 + $0xf2] sm:$0xff] }
 0x5f9   : > { %v9179_v0 = vpack.c.bf16 %v4981_v6, %v4980_v38  ;;  %v4853_v14 = vld [vmem:[#allocation2 + $0xda] sm:$0xff]  ;;  %v4854_v41 = vld [vmem:[#allocation2 + $0xe2] sm:$0xff]  ;;  %v5111_v11 = vld [vmem:[#allocation2 + $0xf1] sm:$0xff] }
 0x5fa   : > { %4655 = vrot.lane.b32.xlu0 %v5003_v43, %s6991_s15  ;;  %v9183_v54 = vpack.c.bf16 %v4854_v41, %v4853_v14  ;;  %v5241_v57 = vld [vmem:[#allocation2 + $0xfa] sm:$0xff]  ;;  %4315 = vst.msk [vmem:[#allocation4 + $0xa0] sm:$0xff] %vm797_vm3, %v4299_v22  ;;  %v4855_v46 = vld [vmem:[#allocation2 + $0xf2] sm:$0xff] }
 0x5fb   : > { %5169 = vrot.lane.b32.xlu1 %v5132_v51, %s9986_s26  ;;  %4314 = vst.msk [vmem:[#allocation4 + $0x90] sm:$0xff] %vm797_vm3, %v9179_v0  ;;  %v5264_v42 = vpack.c.bf16 %v5241_v57, %v5240_v31  ;;  %v5112_v32 = vld [vmem:[#allocation2 + $0xf9] sm:$0xff]  ;;  %v5110_v47 = vld [vmem:[#allocation2 + $0xe1] sm:$0xff] }
 0x5fc   : > { %5279 = vst.msk [vmem:[#allocation4 + $0x78] sm:$0xff] %vm797_vm3, %v9183_v54  ;;  %v4983_v52 = vld [vmem:[#allocation2 + $0xf8] sm:$0xff]  ;;  %v5135_v18 = vpack.c.bf16 %v5112_v32, %v5111_v11 }
 0x5fd   : > { %5280 = vst.msk [vmem:[#allocation4 + $0x88] sm:$0xff] %vm797_vm3, %v5264_v42  ;;  %v4856_v26 = vld [vmem:[#allocation2 + $0xfa] sm:$0xff] }
 0x5fe   : > { %4913 = vrot.lane.b32.xlu0 %v9141_v34, %s6992_s0  ;;  %v4878_v20 = vpack.c.bf16 %v4856_v26, %v4855_v46  ;;  %v5109_v43 = vld [vmem:[#allocation2 + $0xd9] sm:$0xff] }
 0x5ff   : > { %4784 = vrot.lane.b32.xlu1 %v5132_v51, %s9903_s18 }
 0x601   : > { %v6722_v55 = vpop.f32.mrb[120].mxu1 }
 0x602   : > { %v4154_v63 = vadd.f32 %v6722_v55, %v8966_v4  ;;  %4528 = vrot.lane.b32.xlu0 %v9141_v34, %s9904_s20  ;;  %v4145_v40 = vpop.f32.mrb[121].mxu1  ;;  %v5006_v34 = vpack.c.bf16 %v4983_v52, %v4982_v48 }
 0x603   : > { %4399 = vrot.lane.b32.xlu1 %v5132_v51, %s9985_s28  ;;  %v4146_v45 = vadd.f32 %v8966_v4, %v4145_v40  ;;  %v6682_v59 = vpop.f32.mrb[92].mxu0  ;;  %v6723_v58 = vpop.f32.mrb[122].mxu1  ;;  %v5134_v51 = vpack.c.bf16 %v5110_v47, %v5109_v43 }
 0x604   : > { %v4214_v13 = vmax.f32 %v4154_v63, 0.0  ;;  %v3690_v39 = vadd.f32 %v6682_v59, %v8947_v2  ;;  %v4157_v23 = vadd.f32 %v6723_v58, %v8966_v4  ;;  %v3681_v5 = vpop.f32.mrb[93].mxu0  ;;  %v4148_v60 = vpop.f32.mrb[123].mxu1 }
 0x605   : > { %v4212_v50 = vmax.f32 %v4146_v45, 0.0  ;;  %v3682_v8 = vadd.f32 %v8947_v2, %v3681_v5  ;;  %v4149_v25 = vadd.f32 %v8966_v4, %v4148_v60  ;;  %v6683_v36 = vpop.f32.mrb[94].mxu0 }
 0x606   : > { %4247 = vst.msk [vmem:[#allocation2 + $0x121] sm:$0xff] %vm797_vm3, %v4214_v13  ;;  %v4215_v33 = vmax.f32 %v4157_v23, 0.0  ;;  %v3693_v9 = vadd.f32 %v6683_v36, %v8947_v2  ;;  %5175 = vrot.lane.b32.xlu0 %v5135_v18, %s9986_s26  ;;  %v3684_v53 = vpop.f32.mrb[95].mxu0 }
 0x607   : > { %3738 = vst.msk [vmem:[%s8951_s19 + $0xd0] sm:$0xff] %vm561_vm0, %v3690_v39  ;;  %5046 = vrot.lane.b32.xlu1 %v5006_v34, %s9987_s17  ;;  %3736 = vst.msk [vmem:[%s8951_s19 + $0xc0] sm:$0xff] %vm561_vm0, %v3682_v8  ;;  %v4213_v16 = vmax.f32 %v4149_v25, 0.0  ;;  %v3685_v12 = vadd.f32 %v8947_v2, %v3684_v53 }
 0x608   : > { %4245 = vst.msk [vmem:[#allocation2 + $0x109] sm:$0xff] %vm797_vm3, %v4212_v50  ;;  %4248 = vst.msk [vmem:[#allocation2 + $0x129] sm:$0xff] %vm797_vm3, %v4215_v33 }
 0x609   : > { %3739 = vst.msk [vmem:[%s8951_s19 + $0xd8] sm:$0xff] %vm561_vm0, %v3693_v9  ;;  %3737 = vst.msk [vmem:[%s8951_s19 + $0xc8] sm:$0xff] %vm561_vm0, %v3685_v12  ;;  %v9221_v49 = vpop.permute.xlu0 %5159 }
 0x60a   : > { %4246 = vst.msk [vmem:[#allocation2 + $0x111] sm:$0xff] %vm797_vm3, %v4213_v16  ;;  %4790 = vrot.lane.b32.xlu0 %v5135_v18, %s9903_s18  ;;  %v9223_v17 = vpop.permute.xlu1 %5030 }
 0x60b   : > { %4661 = vrot.lane.b32.xlu1 %v5006_v34, %s6991_s15 }
 0x60d   : > { %v4986_v27 = vld [vmem:[#allocation2 + $0x120] sm:$0xff]  ;;  %v9227_v29 = vpop.permute.xlu0 %4774 }
 0x60e   : > { %4405 = vrot.lane.b32.xlu0 %v5135_v18, %s9985_s28  ;;  %v9229_v62 = vpop.permute.xlu1 %4645  ;;  %v5115_v39 = vld [vmem:[#allocation2 + $0x121] sm:$0xff] }
 0x60f   : > { %4919 = vrot.lane.b32.xlu1 %v4878_v20, %s6992_s0  ;;  %v4987_v3 = vld [vmem:[#allocation2 + $0x128] sm:$0xff] }
 0x610   : > { %v4859_v37 = vld [vmem:[#allocation2 + $0x122] sm:$0xff]  ;;  %v9231_v1 = vpack.c.bf16 %v4987_v3, %v4986_v27  ;;  %v4860_v28 = vld [vmem:[#allocation2 + $0x12a] sm:$0xff] }
 0x611   : > { %v4984_v10 = vld [vmem:[#allocation2 + $0x108] sm:$0xff]  ;;  %v4985_v15 = vld [vmem:[#allocation2 + $0x110] sm:$0xff]  ;;  %v9233_v7 = vpack.c.bf16 %v4860_v28, %v4859_v37  ;;  %v4390_v35 = vpop.permute.xlu0 %4389 }
 0x612   : > { %v9235_v24 = vpack.c.bf16 %v4985_v15, %v4984_v10  ;;  %v4857_v56 = vld [vmem:[#allocation2 + $0x10a] sm:$0xff]  ;;  %v4858_v44 = vld [vmem:[#allocation2 + $0x112] sm:$0xff]  ;;  %5044 = vrot.lane.b32.xlu0 %v9179_v0, %s9987_s17  ;;  %4317 = vst.msk [vmem:[#allocation4 + $0xc0] sm:$0xff] %vm797_vm3, %v9231_v1  ;;  %v9252_v14 = vpop.permute.xlu1 %4903 }
 0x613   : > { %4534 = vrot.lane.b32.xlu1 %v4878_v20, %s9904_s20  ;;  %v9240_v21 = vpack.c.bf16 %v4858_v44, %v4857_v56  ;;  %5282 = vst.msk [vmem:[#allocation4 + $0xa8] sm:$0xff] %vm797_vm3, %v9233_v7  ;;  %v5116_v13 = vld [vmem:[#allocation2 + $0x129] sm:$0xff] }
 0x614   : > { %4316 = vst.msk [vmem:[#allocation4 + $0xb0] sm:$0xff] %vm797_vm3, %v9235_v24  ;;  %v6686_v61 = vpop.f32.mrb[96].mxu0  ;;  %v5137_v5 = vpack.c.bf16 %v5116_v13, %v5115_v39  ;;  %v5291_v56 = vld [vmem:[#allocation4 + $0x18] sm:$0xff] }
 0x615   : > { %5281 = vst.msk [vmem:[#allocation4 + $0x98] sm:$0xff] %vm797_vm3, %v9240_v21  ;;  %v3706_v38 = vadd.f32 %v6686_v61, %v8947_v2  ;;  %v3697_v6 = vpop.f32.mrb[97].mxu0  ;;  %v6726_v30 = vpop.f32.mrb[124].mxu1 }
 0x616   : > { %4436 = vst.msk [vmem:[#allocation4 + $0x20] sm:$0xff] %vm4433_vm10, %v4390_v35  ;;  %v3698_v41 = vadd.f32 %v8947_v2, %v3697_v6  ;;  %v6687_v19 = vpop.f32.mrb[98].mxu0  ;;  %4659 = vrot.lane.b32.xlu0 %v9179_v0, %s6991_s15  ;;  %v4170_v31 = vadd.f32 %v6726_v30, %v8966_v4  ;;  %v4161_v42 = vpop.f32.mrb[125].mxu1  ;;  %v5114_v6 = vld [vmem:[#allocation2 + $0x111] sm:$0xff] }
 0x617   : > { %5173 = vrot.lane.b32.xlu1 %v5134_v51, %s9986_s26  ;;  %3742 = vst.msk [vmem:[%s8951_s19 + $0xf0] sm:$0xff] %vm561_vm0, %v3706_v38  ;;  %v3709_v22 = vadd.f32 %v6687_v19, %v8947_v2  ;;  %v3700_v57 = vpop.f32.mrb[99].mxu0  ;;  %v4162_v55 = vadd.f32 %v8966_v4, %v4161_v42  ;;  %v6727_v52 = vpop.f32.mrb[126].mxu1 }
 0x618   : > { %3740 = vst.msk [vmem:[%s8951_s19 + $0xe0] sm:$0xff] %vm561_vm0, %v3698_v41  ;;  %v3701_v32 = vadd.f32 %v8947_v2, %v3700_v57  ;;  %v4644_v63 = vpop.permute.xlu0 %4643  ;;  %v4218_v0 = vmax.f32 %v4170_v31, 0.0  ;;  %v4173_v40 = vadd.f32 %v6727_v52, %v8966_v4  ;;  %v4164_v11 = vpop.f32.mrb[127].mxu1 }
 0x619   : > { %3743 = vst.msk [vmem:[%s8951_s19 + $0xf8] sm:$0xff] %vm561_vm0, %v3709_v22  ;;  %v4519_v45 = vpop.permute.xlu1 %4518  ;;  %v4216_v59 = vmax.f32 %v4162_v55, 0.0  ;;  %v4165_v58 = vadd.f32 %v8966_v4, %v4164_v11 }
 0x61a   : > { %4692 = vst.msk [vmem:[#allocation4] sm:$0xff] %vm4691_vm12, %v4644_v63  ;;  %4917 = vrot.lane.b32.xlu0 %v9183_v54, %s6992_s0  ;;  %v4219_v2 = vmax.f32 %v4173_v40, 0.0 }
 0x61b   : > { %3741 = vst.msk [vmem:[%s8951_s19 + $0xe8] sm:$0xff] %vm561_vm0, %v3701_v32  ;;  %4788 = vrot.lane.b32.xlu1 %v5134_v51, %s9903_s18  ;;  %v4217_v18 = vmax.f32 %v4165_v58, 0.0 }
 0x61c   : > { %4565 = vst.msk [vmem:[#allocation4 + $0x20] sm:$0xff] %vm4562_vm11, %v4519_v45  ;;  %v4902_v48 = vpop.permute.xlu0 %4901 }
 0x61d   : > { %4251 = vst.msk [vmem:[#allocation2 + $0x151] sm:$0xff] %vm797_vm3, %v4218_v0  ;;  %4249 = vst.msk [vmem:[#allocation2 + $0x139] sm:$0xff] %vm797_vm3, %v4216_v59  ;;  %v4773_v4 = vpop.permute.xlu1 %4772 }
 0x61e   : > { %4252 = vst.msk [vmem:[#allocation2 + $0x159] sm:$0xff] %vm797_vm3, %v4219_v2  ;;  %4250 = vst.msk [vmem:[#allocation2 + $0x141] sm:$0xff] %vm797_vm3, %v4217_v18  ;;  %4532 = vrot.lane.b32.xlu0 %v9183_v54, %s9904_s20 }
 0x61f   : > { %4821 = vst.msk [vmem:[#allocation4] sm:$0xff] %vm4820_vm13, %v4773_v4  ;;  %4403 = vrot.lane.b32.xlu1 %v5134_v51, %s9985_s28  ;;  %v5293_v4 = vld [vmem:[#allocation4 + $0x28] sm:$0xff] }
 0x620   : > { %4950 = vst.msk [vmem:[#allocation4] sm:$0xff] %vm4949_vm14, %v4902_v48  ;;  %v4517_v23 = vpop.permute.xlu0 %4516 }
 0x621   : > { %5079 = vst.msk [vmem:[#allocation4] sm:$0xff] %vm5078_vm15, %v9223_v17  ;;  %v4388_v60 = vpop.permute.xlu1 %4387  ;;  %v6918_v17 = vld [vmem:[%s9773_s10 + $0x5] ss:$0 sm:$0xff] }
 0x622   : > { %5208 = vst.msk [vmem:[#allocation4] sm:$0xff] %vm5207_vm1, %v9221_v49  ;;  %5179 = vrot.lane.b32.xlu0 %v5137_v5, %s9986_s26 }
 0x623   : > { %4435 = vst.msk [vmem:[#allocation4 + $0x10] sm:$0xff] %vm4433_vm10, %v4388_v60  ;;  %5050 = vrot.lane.b32.xlu1 %v9231_v1, %s9987_s17  ;;  %v5295_v60 = vld [vmem:[#allocation4 + $0x38] sm:$0xff] }
 0x624   : > { %4564 = vst.msk [vmem:[#allocation4 + $0x10] sm:$0xff] %vm4562_vm11, %v4517_v23  ;;  %v9297_v54 = vpop.permute.xlu0 %5163  ;;  %v4990_v34 = vld [vmem:[#allocation2 + $0x150] sm:$0xff]  ;;  %v4988_v9 = vld [vmem:[#allocation2 + $0x138] sm:$0xff] }
 0x625   : > { %4693 = vst.msk [vmem:[#allocation4 + $0x10] sm:$0xff] %vm4691_vm12, %v9229_v62  ;;  %v4991_v50 = vld [vmem:[#allocation2 + $0x158] sm:$0xff]  ;;  %v9301_v25 = vpop.permute.xlu1 %5034  ;;  %v4989_v53 = vld [vmem:[#allocation2 + $0x140] sm:$0xff] }
 0x626   : > { %v4863_v8 = vld [vmem:[#allocation2 + $0x152] sm:$0xff]  ;;  %4822 = vst.msk [vmem:[#allocation4 + $0x10] sm:$0xff] %vm4820_vm13, %v9227_v29  ;;  %v9303_v36 = vpack.c.bf16 %v4991_v50, %v4990_v34  ;;  %v4864_v33 = vld [vmem:[#allocation2 + $0x15a] sm:$0xff]  ;;  %v6730_v16 = vpop.f32.mrb[128].mxu1  ;;  %4794 = vrot.lane.b32.xlu0 %v5137_v5, %s9903_s18  ;;  %v9312_v46 = vpack.c.bf16 %v4989_v53, %v4988_v9  ;;  %v4862_v49 = vld [vmem:[#allocation2 + $0x142] sm:$0xff] }
 0x627   : > { %4951 = vst.msk [vmem:[#allocation4 + $0x10] sm:$0xff] %vm4949_vm14, %v9252_v14  ;;  %4665 = vrot.lane.b32.xlu1 %v9231_v1, %s6991_s15  ;;  %v9310_v12 = vpack.c.bf16 %v4864_v33, %v4863_v8  ;;  %v4861_v26 = vld [vmem:[#allocation2 + $0x13a] sm:$0xff]  ;;  %v4186_v20 = vadd.f32 %v6918_v17, %v6730_v16  ;;  %v4177_v27 = vpop.f32.mrb[129].mxu1  ;;  %v5113_v14 = vld [vmem:[#allocation2 + $0x109] sm:$0xff]  ;;  %v5119_v58 = vld [vmem:[#allocation2 + $0x151] sm:$0xff] }
 0x628   : > { %v9317_v3 = vpack.c.bf16 %v4862_v49, %v4861_v26  ;;  %4319 = vst.msk [vmem:[#allocation4 + $0xe0] sm:$0xff] %vm797_vm3, %v9303_v36  ;;  %v4178_v37 = vadd.f32 %v6918_v17, %v4177_v27  ;;  %v6731_v29 = vpop.f32.mrb[130].mxu1  ;;  %v9321_v62 = vpop.permute.xlu0 %4778  ;;  %4318 = vst.msk [vmem:[#allocation4 + $0xd0] sm:$0xff] %vm797_vm3, %v9312_v46  ;;  %v5136_v19 = vpack.c.bf16 %v5114_v6, %v5113_v14  ;;  %v5120_v45 = vld [vmem:[#allocation2 + $0x159] sm:$0xff]  ;;  %v5118_v50 = vld [vmem:[#allocation2 + $0x141] sm:$0xff] }
 0x629   : > { %v5288_v1 = vld [vmem:[#allocation4] sm:$0xff]  ;;  %5284 = vst.msk [vmem:[#allocation4 + $0xc8] sm:$0xff] %vm797_vm3, %v9310_v12  ;;  %v4222_v28 = vmax.f32 %v4186_v20, 0.0  ;;  %v4189_v10 = vadd.f32 %v6918_v17, %v6731_v29  ;;  %v4180_v15 = vpop.f32.mrb[131].mxu1  ;;  %v9327_v47 = vpop.permute.xlu1 %4649  ;;  %v5139_v48 = vpack.c.bf16 %v5120_v45, %v5119_v58  ;;  %v5117_v8 = vld [vmem:[#allocation2 + $0x139] sm:$0xff]  ;;  %v5255_v6 = vld [vmem:[#allocation2 + $0x1a2] sm:$0xff] }
 0x62a   : > { %5477 = vmatmul.mubr.bf16.vlgmr.msra.gmra.mrb[100].mxu0 %v5288_v1  ;;  %5283 = vst.msk [vmem:[#allocation4 + $0xb8] sm:$0xff] %vm797_vm3, %v9317_v3  ;;  %v4220_v44 = vmax.f32 %v4178_v37, 0.0  ;;  %v4181_v43 = vadd.f32 %v6918_v17, %v4180_v15  ;;  %4409 = vrot.lane.b32.xlu0 %v5137_v5, %s9985_s28  ;;  %v5297_v1 = vld [vmem:[#allocation4 + $0x48] sm:$0xff] }
 0x62b   : > { %6243 = vmatprep.mubr.msk.bf16.mxu0 %vm797_vm3, %v5291_v56  ;;  %4923 = vrot.lane.b32.xlu1 %v9233_v7, %s6992_s0  ;;  %4255 = vst.msk [vmem:[#allocation2 + $0x181] sm:$0xff] %vm797_vm3, %v4222_v28  ;;  %v4223_v61 = vmax.f32 %v4189_v10, 0.0 }
 0x62c   : > { %4253 = vst.msk [vmem:[#allocation2 + $0x169] sm:$0xff] %vm797_vm3, %v4220_v44  ;;  %v4221_v35 = vmax.f32 %v4181_v43, 0.0  ;;  %v4394_v51 = vpop.permute.xlu0 %4393 }
 0x62d   : > { %4256 = vst.msk [vmem:[#allocation2 + $0x189] sm:$0xff] %vm797_vm3, %v4223_v61  ;;  %v4908_v38 = vpop.permute.xlu1 %4907  ;;  %v5299_v61 = vld [vmem:[#allocation4 + $0x58] sm:$0xff] }
 0x62e   : > { %4438 = vst.msk [vmem:[#allocation4 + $0x40] sm:$0xff] %vm4433_vm10, %v4394_v51  ;;  %5048 = vrot.lane.b32.xlu0 %v9235_v24, %s9987_s17 }
 0x62f   : > { %4254 = vst.msk [vmem:[#allocation2 + $0x171] sm:$0xff] %vm797_vm3, %v4221_v35  ;;  %4538 = vrot.lane.b32.xlu1 %v9233_v7, %s9904_s20 }
 0x630   : > { %v5033_v41 = vpop.permute.xlu0 %5032 }
 0x631   : > { %5080 = vst.msk [vmem:[#allocation4 + $0x10] sm:$0xff] %vm5078_vm15, %v5033_v41  ;;  %v4523_v30 = vpop.permute.xlu1 %4522 }
 0x632   : > { %4567 = vst.msk [vmem:[#allocation4 + $0x40] sm:$0xff] %vm4562_vm11, %v4523_v30  ;;  %4663 = vrot.lane.b32.xlu0 %v9235_v24, %s6991_s15  ;;  %v5123_v20 = vld [vmem:[#allocation2 + $0x181] sm:$0xff]  ;;  %v5125_v30 = vld [vmem:[#allocation2 + $0x199] sm:$0xff] }
 0x633   : > { %5177 = vrot.lane.b32.xlu1 %v5136_v19, %s9986_s26  ;;  %v4992_v57 = vld [vmem:[#allocation2 + $0x168] sm:$0xff] }
 0x634   : > { %v4648_v22 = vpop.permute.xlu0 %4647  ;;  %v4867_v31 = vld [vmem:[#allocation2 + $0x182] sm:$0xff]  ;;  %v4868_v63 = vld [vmem:[#allocation2 + $0x18a] sm:$0xff] }
 0x635   : > { %4694 = vst.msk [vmem:[#allocation4 + $0x20] sm:$0xff] %vm4691_vm12, %v4648_v22  ;;  %v5162_v7 = vpop.permute.xlu1 %5161  ;;  %v9358_v0 = vpack.c.bf16 %v4868_v63, %v4867_v31  ;;  %v4995_v26 = vld [vmem:[#allocation2 + $0x188] sm:$0xff] }
 0x636   : > { %v4993_v42 = vld [vmem:[#allocation2 + $0x170] sm:$0xff]  ;;  %5209 = vst.msk [vmem:[#allocation4 + $0x10] sm:$0xff] %vm5207_vm1, %v5162_v7  ;;  %4921 = vrot.lane.b32.xlu0 %v9240_v21, %s6992_s0  ;;  %v5126_v22 = vld [vmem:[#allocation2 + $0x1a1] sm:$0xff]  ;;  %v4996_v7 = vld [vmem:[#allocation2 + $0x198] sm:$0xff] }
 0x637   : > { %v4865_v32 = vld [vmem:[#allocation2 + $0x16a] sm:$0xff]  ;;  %4792 = vrot.lane.b32.xlu1 %v5136_v19, %s9903_s18  ;;  %v9352_v55 = vpack.c.bf16 %v4993_v42, %v4992_v57  ;;  %v4866_v52 = vld [vmem:[#allocation2 + $0x172] sm:$0xff]  ;;  %5286 = vst.msk [vmem:[#allocation4 + $0xe8] sm:$0xff] %vm797_vm3, %v9358_v0  ;;  %v4997_v57 = vld [vmem:[#allocation2 + $0x1a0] sm:$0xff] }
 0x638   : > { %v9356_v24 = vpack.c.bf16 %v4866_v52, %v4865_v32  ;;  %v4906_v40 = vpop.permute.xlu0 %4905  ;;  %v5124_v49 = vld [vmem:[#allocation2 + $0x189] sm:$0xff]  ;;  %v5122_v10 = vld [vmem:[#allocation2 + $0x171] sm:$0xff]  ;;  %v5142_v32 = vpack.c.bf16 %v5126_v22, %v5125_v30 }
 0x639   : > { %4320 = vst.msk [vmem:[#allocation4 + $0xf0] sm:$0xff] %vm797_vm3, %v9352_v55  ;;  %v4777_v11 = vpop.permute.xlu1 %4776  ;;  %v5121_v15 = vld [vmem:[#allocation2 + $0x169] sm:$0xff] }
 0x63a   : > { %5285 = vst.msk [vmem:[#allocation4 + $0xd8] sm:$0xff] %vm797_vm3, %v9356_v24  ;;  %4536 = vrot.lane.b32.xlu0 %v9240_v21, %s9904_s20  ;;  %v5140_v44 = vpack.c.bf16 %v5122_v10, %v5121_v15  ;;  %v5309_v10 = vld [vmem:[#allocation4 + $0xa8] sm:$0xff] }
 0x63b   : > { %4823 = vst.msk [vmem:[#allocation4 + $0x20] sm:$0xff] %vm4820_vm13, %v4777_v11  ;;  %4407 = vrot.lane.b32.xlu1 %v5136_v19, %s9985_s28 }
 0x63c   : > { %4952 = vst.msk [vmem:[#allocation4 + $0x20] sm:$0xff] %vm4949_vm14, %v4906_v40  ;;  %v4521_v59 = vpop.permute.xlu0 %4520 }
 0x63d   : > { %5081 = vst.msk [vmem:[#allocation4 + $0x20] sm:$0xff] %vm5078_vm15, %v9301_v25  ;;  %v4392_v2 = vpop.permute.xlu1 %4391  ;;  %v5290_v18 = vld [vmem:[#allocation4 + $0x10] sm:$0xff] }
 0x63e   : > { %5210 = vst.msk [vmem:[#allocation4 + $0x20] sm:$0xff] %vm5207_vm1, %v9297_v54  ;;  %5485 = vmatmul.mubr.bf16.gmra.mrb[104].mxu0 %v5290_v18  ;;  %5183 = vrot.lane.b32.xlu0 %v5139_v48, %s9986_s26 }
 0x63f   : > { %4437 = vst.msk [vmem:[#allocation4 + $0x30] sm:$0xff] %vm4433_vm10, %v4392_v2  ;;  %5054 = vrot.lane.b32.xlu1 %v9303_v36, %s9987_s17  ;;  %6244 = vmatprep.mubr.msk.bf16.mxu0 %vm797_vm3, %v5293_v4 }
 0x640   : > { %4566 = vst.msk [vmem:[#allocation4 + $0x30] sm:$0xff] %vm4562_vm11, %v4521_v59  ;;  %v5168_v21 = vpop.permute.xlu0 %5167 }
 0x641   : > { %4695 = vst.msk [vmem:[#allocation4 + $0x30] sm:$0xff] %vm4691_vm12, %v9327_v47  ;;  %v5039_v13 = vpop.permute.xlu1 %5038 }
 0x642   : > { %4824 = vst.msk [vmem:[#allocation4 + $0x30] sm:$0xff] %vm4820_vm13, %v9321_v62  ;;  %4798 = vrot.lane.b32.xlu0 %v5139_v48, %s9903_s18  ;;  %v5141_v62 = vpack.c.bf16 %v5124_v49, %v5123_v20 }
 0x643   : > { %4953 = vst.msk [vmem:[#allocation4 + $0x30] sm:$0xff] %vm4949_vm14, %v4908_v38  ;;  %4669 = vrot.lane.b32.xlu1 %v9303_v36, %s6991_s15  ;;  %v5138_v36 = vpack.c.bf16 %v5118_v50, %v5117_v8  ;;  %v5254_v38 = vld [vmem:[#allocation2 + $0x19a] sm:$0xff] }
 0x644   : > { %v4783_v39 = vpop.permute.xlu0 %4782  ;;  %v5271_v41 = vpack.c.bf16 %v5255_v6, %v5254_v38 }
 0x645   : > { %v5292_v23 = vld [vmem:[#allocation4 + $0x20] sm:$0xff]  ;;  %v4654_v5 = vpop.permute.xlu1 %4653 }
 0x646   : > { %5493 = vmatmul.mubr.bf16.gmra.mrb[108].mxu0 %v5292_v23  ;;  %4413 = vrot.lane.b32.xlu0 %v5139_v48, %s9985_s28  ;;  %5287 = vst.msk [vmem:[#allocation4 + $0xf8] sm:$0xff] %vm797_vm3, %v5271_v41  ;;  %v5303_v48 = vld [vmem:[#allocation4 + $0x78] sm:$0xff] }
 0x647   : > { %4927 = vrot.lane.b32.xlu1 %v9310_v12, %s6992_s0  ;;  %6245 = vmatprep.mubr.msk.bf16.mxu0 %vm797_vm3, %v5295_v60 }
 0x648   : > { %v4398_v54 = vpop.permute.xlu0 %4397 }
 0x649   : > { %4440 = vst.msk [vmem:[#allocation4 + $0x60] sm:$0xff] %vm4433_vm10, %v4398_v54  ;;  %v4912_v34 = vpop.permute.xlu1 %4911 }
 0x64a   : > { %5052 = vrot.lane.b32.xlu0 %v9312_v46, %s9987_s17 }
 0x64b   : > { %4542 = vrot.lane.b32.xlu1 %v9310_v12, %s9904_s20 }
 0x64c   : > { %v5037_v25 = vpop.permute.xlu0 %5036 }
 0x64d   : > { %5082 = vst.msk [vmem:[#allocation4 + $0x30] sm:$0xff] %vm5078_vm15, %v5037_v25  ;;  %v4527_v33 = vpop.permute.xlu1 %4526  ;;  %v5305_v25 = vld [vmem:[#allocation4 + $0x88] sm:$0xff] }
 0x64e   : > { %4569 = vst.msk [vmem:[#allocation4 + $0x60] sm:$0xff] %vm4562_vm11, %v4527_v33  ;;  %4667 = vrot.lane.b32.xlu0 %v9312_v46, %s6991_s15  ;;  %v4994_v46 = vld [vmem:[#allocation2 + $0x180] sm:$0xff] }
 0x64f   : > { %5181 = vrot.lane.b32.xlu1 %v5138_v36, %s9986_s26  ;;  %v5012_v27 = vpack.c.bf16 %v4995_v26, %v4994_v46  ;;  %v5307_v26 = vld [vmem:[#allocation4 + $0x98] sm:$0xff] }
 0x650   : > { %v4652_v9 = vpop.permute.xlu0 %4651 }
 0x651   : > { %4696 = vst.msk [vmem:[#allocation4 + $0x40] sm:$0xff] %vm4691_vm12, %v4652_v9  ;;  %v5166_v53 = vpop.permute.xlu1 %5165 }
 0x652   : > { %5211 = vst.msk [vmem:[#allocation4 + $0x30] sm:$0xff] %vm5207_vm1, %v5166_v53  ;;  %4925 = vrot.lane.b32.xlu0 %v9317_v3, %s6992_s0 }
 0x653   : > { %4796 = vrot.lane.b32.xlu1 %v5138_v36, %s9903_s18 }
 0x654   : > { %v4910_v16 = vpop.permute.xlu0 %4909 }
 0x655   : > { %v4781_v12 = vpop.permute.xlu1 %4780 }
 0x656   : > { %4825 = vst.msk [vmem:[#allocation4 + $0x40] sm:$0xff] %vm4820_vm13, %v4781_v12  ;;  %4540 = vrot.lane.b32.xlu0 %v9317_v3, %s9904_s20 }
 0x657   : > { %4411 = vrot.lane.b32.xlu1 %v5138_v36, %s9985_s28  ;;  %4954 = vst.msk [vmem:[#allocation4 + $0x40] sm:$0xff] %vm4949_vm14, %v4910_v16  ;;  %v6881_v16 = vld [vmem:[%s9771_s8] sm:$0xff]  }
 0x658   : > { %5083 = vst.msk [vmem:[#allocation4 + $0x40] sm:$0xff] %vm5078_vm15, %v5039_v13  ;;  %v4525_v17 = vpop.permute.xlu0 %4524  ;;  %6732 = vmatprep.subr.bf16.mxu1 %v6881_v16 }
 0x659   : > { %5212 = vst.msk [vmem:[#allocation4 + $0x40] sm:$0xff] %vm5207_vm1, %v5168_v21  ;;  %v4396_v37 = vpop.permute.xlu1 %4395  ;;  %v5294_v29 = vld [vmem:[#allocation4 + $0x30] sm:$0xff]  ;;  %6733 = vmatpush3.bf16.msra.mxu1 %v6881_v16 }
 0x65a   : > { %4439 = vst.msk [vmem:[#allocation4 + $0x50] sm:$0xff] %vm4433_vm10, %v4396_v37  ;;  %5501 = vmatmul.mubr.bf16.gmra.mrb[112].mxu0 %v5294_v29  ;;  %5187 = vrot.lane.b32.xlu0 %v5141_v62, %s9986_s26 }
 0x65b   : > { %5058 = vrot.lane.b32.xlu1 %v5012_v27, %s9987_s17  ;;  %4568 = vst.msk [vmem:[#allocation4 + $0x50] sm:$0xff] %vm4562_vm11, %v4525_v17  ;;  %6246 = vmatprep.mubr.msk.bf16.mxu0 %vm797_vm3, %v5297_v1 }
 0x65c   : > { %4697 = vst.msk [vmem:[#allocation4 + $0x50] sm:$0xff] %vm4691_vm12, %v4654_v5  ;;  %v5172_v3 = vpop.permute.xlu0 %5171 }
 0x65d   : > { %4826 = vst.msk [vmem:[#allocation4 + $0x50] sm:$0xff] %vm4820_vm13, %v4783_v39  ;;  %v5043_v28 = vpop.permute.xlu1 %5042 }
 0x65e   : > { %4955 = vst.msk [vmem:[#allocation4 + $0x50] sm:$0xff] %vm4949_vm14, %v4912_v34  ;;  %5056 = vrot.lane.b32.xlu0 %v9352_v55, %s9987_s17 }
 0x65f   : > { %4673 = vrot.lane.b32.xlu1 %v5012_v27, %s6991_s15 }
 0x660   : > { %v4787_v47 = vpop.permute.xlu0 %4786  ;;  %v5296_v56 = vld [vmem:[#allocation4 + $0x40] sm:$0xff] }
 0x661   : > { %v4658_v43 = vpop.permute.xlu1 %4657 }
 0x662   : > { %5509 = vmatmul.mubr.bf16.gmra.mrb[116].mxu0 %v5296_v56  ;;  %4671 = vrot.lane.b32.xlu0 %v9352_v55, %s6991_s15  ;;  %v5013_v55 = vpack.c.bf16 %v4997_v57, %v4996_v7  ;;  %v5313_v57 = vld [vmem:[#allocation4 + $0xc8] sm:$0xff] }
 0x663   : > { %5185 = vrot.lane.b32.xlu1 %v5140_v44, %s9986_s26  ;;  %6247 = vmatprep.mubr.msk.bf16.mxu0 %vm797_vm3, %v5299_v61  ;;  %v5311_v61 = vld [vmem:[#allocation4 + $0xb8] sm:$0xff] }
 0x664   : > { %v4402_v35 = vpop.permute.xlu0 %4401 }
 0x665   : > { %4442 = vst.msk [vmem:[#allocation4 + $0x80] sm:$0xff] %vm4433_vm10, %v4402_v35  ;;  %v4916_v51 = vpop.permute.xlu1 %4915 }
 0x666   : > { %4929 = vrot.lane.b32.xlu0 %v9356_v24, %s6992_s0 }
 0x667   : > { %4800 = vrot.lane.b32.xlu1 %v5140_v44, %s9903_s18 }
 0x668   : > { %v5041_v14 = vpop.permute.xlu0 %5040 }
 0x669   : > { %5084 = vst.msk [vmem:[#allocation4 + $0x50] sm:$0xff] %vm5078_vm15, %v5041_v14  ;;  %v4531_v19 = vpop.permute.xlu1 %4530 }
 0x66a   : > { %4571 = vst.msk [vmem:[#allocation4 + $0x80] sm:$0xff] %vm4562_vm11, %v4531_v19  ;;  %4802 = vrot.lane.b32.xlu0 %v5141_v62, %s9903_s18 }
 0x66b   : > { %4415 = vrot.lane.b32.xlu1 %v5140_v44, %s9985_s28  ;;  %s6993_s28 = smov [#allocation6]  }
 0x66c   : > { %v4656_v31 = vpop.permute.xlu0 %4655 }
 0x66d   : > { %4698 = vst.msk [vmem:[#allocation4 + $0x60] sm:$0xff] %vm4691_vm12, %v4656_v31  ;;  %v5170_v42 = vpop.permute.xlu1 %5169 }
 0x66e   : > { %5213 = vst.msk [vmem:[#allocation4 + $0x50] sm:$0xff] %vm5207_vm1, %v5170_v42  ;;  %4544 = vrot.lane.b32.xlu0 %v9356_v24, %s9904_s20  ;;  %v5301_v24 = vld [vmem:[#allocation4 + $0x68] sm:$0xff]  ;;  %s9988_s20 = sand.u32 1, %s6973_s22  }
 0x66f   : > { %4931 = vrot.lane.b32.xlu1 %v9358_v0, %s6992_s0  ;;  %s9722_s15 = scalar_lea.sflag [#allocation7], %s9988_s20  ;;  %s6919_s0 = scalar_lea.vmem %s9712_s29, 4096 }
 0x670   : > { %v4914_v52 = vpop.permute.xlu0 %4913  ;;  %p6920_p11 = scmp.ne.s32.totalorder %s9712_s29, %s6919_s0 }
 0x671   : > { %v4785_v63 = vpop.permute.xlu1 %4784 }
 0x672   : > { %4827 = vst.msk [vmem:[#allocation4 + $0x60] sm:$0xff] %vm4820_vm13, %v4785_v63  ;;  %5060 = vrot.lane.b32.xlu0 %v5013_v55, %s9987_s17  ;;  %s6283_s17 = sshll.u32 %s7082_s25, 12  ;;  %p6921_p12 = pnand %p6920_p11, %p7099_p5 }
 0x673   : > { %5189 = vrot.lane.b32.xlu1 %v5142_v32, %s9986_s26  ;;  %4956 = vst.msk [vmem:[#allocation4 + $0x60] sm:$0xff] %vm4949_vm14, %v4914_v52  ;;  %s9710_s18 = scalar_lea.hbm %s9775_s12, %s6283_s17  ;;  %s6923_s26 = sshll.u32 %s6993_s28, 4  ;;  %s6924_s26 = int_to_ptr.vmem [resolvable:$false] %s6923_s26 }
 0x674   : > { %5085 = vst.msk [vmem:[#allocation4 + $0x60] sm:$0xff] %vm5078_vm15, %v5043_v28  ;;  %v4529_v40 = vpop.permute.xlu0 %4528  ;;  %p6922_p13 = pneg %p6921_p12  ;;  %s6925_s17 = scalar_lea.vmem %s6924_s26, 8192 }
 0x675   : > { %5214 = vst.msk [vmem:[#allocation4 + $0x60] sm:$0xff] %vm5207_vm1, %v5172_v3  ;;  %v4400_v0 = vpop.permute.xlu1 %4399  ;;  %v5298_v11 = vld [vmem:[#allocation4 + $0x50] sm:$0xff]  ;;  %p6926_p0 = scmp.lt.s32.totalorder %s9712_s29, %s6924_s26  ;;  %p6927_p1 = scmp.lt.s32.totalorder %s6925_s17, %s6919_s0 }
 0x676   : > { %4441 = vst.msk [vmem:[#allocation4 + $0x70] sm:$0xff] %vm4433_vm10, %v4400_v0  ;;  %5517 = vmatmul.mubr.bf16.gmra.mrb[120].mxu0 %v5298_v11 }
 0x677   : > { %4570 = vst.msk [vmem:[#allocation4 + $0x70] sm:$0xff] %vm4562_vm11, %v4529_v40  ;;  %6248 = vmatprep.mubr.msk.bf16.mxu0 %vm797_vm3, %v5301_v24  ;;  %v5315_v40 = vld [vmem:[#allocation4 + $0xd8] sm:$0xff]  ;;  %p6928_p2 = por %p6927_p1, %p6926_p0 }
 0x678   : > { %4699 = vst.msk [vmem:[#allocation4 + $0x70] sm:$0xff] %vm4691_vm12, %v4658_v43  ;;  %v5176_v45 = vpop.permute.xlu0 %5175 }
 0x679   : > { %4828 = vst.msk [vmem:[#allocation4 + $0x70] sm:$0xff] %vm4820_vm13, %v4787_v47  ;;  %v5047_v59 = vpop.permute.xlu1 %5046  ;;  %p6929_p3 = pnand %p6928_p2, %p6922_p13 }
 0x67a   : > { %4957 = vst.msk [vmem:[#allocation4 + $0x70] sm:$0xff] %vm4949_vm14, %v4916_v51 }
 0x67c   : > { %v4791_v58 = vpop.permute.xlu0 %4790  ;;  %v5300_v2 = vld [vmem:[#allocation4 + $0x60] sm:$0xff] }
 0x67d   : > { %v4662_v18 = vpop.permute.xlu1 %4661 }
 0x67e   : > { %5525 = vmatmul.mubr.bf16.gmra.mrb[124].mxu0 %v5300_v2 }
 0x67f   : > { %6249 = vmatprep.mubr.msk.bf16.mxu0 %vm797_vm3, %v5303_v48 }
 0x680   : > { %v4406_v4 = vpop.permute.xlu0 %4405 }
 0x681   : > { %4444 = vst.msk [vmem:[#allocation4 + $0xa0] sm:$0xff] %vm4433_vm10, %v4406_v4  ;;  %v4920_v21 = vpop.permute.xlu1 %4919 }
 0x684   : > { %v5045_v13 = vpop.permute.xlu0 %5044 }
 0x685   : > { %5086 = vst.msk [vmem:[#allocation4 + $0x70] sm:$0xff] %vm5078_vm15, %v5045_v13  ;;  %v4535_v39 = vpop.permute.xlu1 %4534  ;;  %v5319_v13 = vld [vmem:[#allocation4 + $0xf8] sm:$0xff] }
 0x686   : > { %4573 = vst.msk [vmem:[#allocation4 + $0xa0] sm:$0xff] %vm4562_vm11, %v4535_v39 }
 0x688   : > { %v4660_v23 = vpop.permute.xlu0 %4659 }
 0x689   : > { %4700 = vst.msk [vmem:[#allocation4 + $0x80] sm:$0xff] %vm4691_vm12, %v4660_v23  ;;  %v5174_v5 = vpop.permute.xlu1 %5173 }
 0x68a   : > { %5215 = vst.msk [vmem:[#allocation4 + $0x70] sm:$0xff] %vm5207_vm1, %v5174_v5 }
 0x68c   : > { %v4918_v60 = vpop.permute.xlu0 %4917 }
 0x68d   : > { %v4789_v54 = vpop.permute.xlu1 %4788 }
 0x68e   : > { %4829 = vst.msk [vmem:[#allocation4 + $0x80] sm:$0xff] %vm4820_vm13, %v4789_v54 }
 0x68f   : > { %4958 = vst.msk [vmem:[#allocation4 + $0x80] sm:$0xff] %vm4949_vm14, %v4918_v60  ;;  %v9528_v60 = vld [vmem:[%s9773_s10 + $0x6] ss:$0 sm:$0xff] }
 0x690   : > { %5087 = vst.msk [vmem:[#allocation4 + $0x80] sm:$0xff] %vm5078_vm15, %v5047_v59  ;;  %v4533_v34 = vpop.permute.xlu0 %4532 }
 0x691   : > { %5216 = vst.msk [vmem:[#allocation4 + $0x80] sm:$0xff] %vm5207_vm1, %v5176_v45  ;;  %v4404_v50 = vpop.permute.xlu1 %4403  ;;  %v5302_v8 = vld [vmem:[#allocation4 + $0x70] sm:$0xff] }
 0x692   : > { %4443 = vst.msk [vmem:[#allocation4 + $0x90] sm:$0xff] %vm4433_vm10, %v4404_v50  ;;  %5533 = vmatmul.mubr.bf16.gmra.mrb[128].mxu0 %v5302_v8 }
 0x693   : > { %4572 = vst.msk [vmem:[#allocation4 + $0x90] sm:$0xff] %vm4562_vm11, %v4533_v34  ;;  %6250 = vmatprep.mubr.msk.bf16.mxu0 %vm797_vm3, %v5305_v25 }
 0x694   : > { %4701 = vst.msk [vmem:[#allocation4 + $0x90] sm:$0xff] %vm4691_vm12, %v4662_v18  ;;  %v5180_v36 = vpop.permute.xlu0 %5179  ;;  %v5317_v18 = vld [vmem:[#allocation4 + $0xe8] sm:$0xff] }
 0x695   : > { %4830 = vst.msk [vmem:[#allocation4 + $0x90] sm:$0xff] %vm4820_vm13, %v4791_v58  ;;  %v5051_v33 = vpop.permute.xlu1 %5050 }
 0x696   : > { %4959 = vst.msk [vmem:[#allocation4 + $0x90] sm:$0xff] %vm4949_vm14, %v4920_v21 }
 0x698   : > { %v4795_v9 = vpop.permute.xlu0 %4794  ;;  %v5304_v53 = vld [vmem:[#allocation4 + $0x80] sm:$0xff] }
 0x699   : > { %v4666_v12 = vpop.permute.xlu1 %4665 }
 0x69a   : > { %5541 = vmatmul.mubr.bf16.gmra.mrb[132].mxu0 %v5304_v53 }
 0x69b   : > { %6251 = vmatprep.mubr.msk.bf16.mxu0 %vm797_vm3, %v5307_v26 }
 0x69c   : > { %v4410_v49 = vpop.permute.xlu0 %4409 }
 0x69d   : > { %v4924_v46 = vpop.permute.xlu1 %4923  ;;  %4446 = vst.msk [vmem:[#allocation4 + $0xc0] sm:$0xff] %vm4433_vm10, %v4410_v49 }
 0x6a0   : > { %v5049_v17 = vpop.permute.xlu0 %5048 }
 0x6a1   : > { %v4539_v20 = vpop.permute.xlu1 %4538  ;;  %5088 = vst.msk [vmem:[#allocation4 + $0x90] sm:$0xff] %vm5078_vm15, %v5049_v17 }
 0x6a2   : > { %4575 = vst.msk [vmem:[#allocation4 + $0xc0] sm:$0xff] %vm4562_vm11, %v4539_v20 }
 0x6a4   : > { %v4664_v27 = vpop.permute.xlu0 %4663 }
 0x6a5   : > { %v5178_v37 = vpop.permute.xlu1 %5177  ;;  %4702 = vst.msk [vmem:[#allocation4 + $0xa0] sm:$0xff] %vm4691_vm12, %v4664_v27 }
 0x6a6   : > { %5217 = vst.msk [vmem:[#allocation4 + $0x90] sm:$0xff] %vm5207_vm1, %v5178_v37 }
 0x6a8   : > { %v4922_v29 = vpop.permute.xlu0 %4921 }
 0x6a9   : > { %v4793_v62 = vpop.permute.xlu1 %4792 }
 0x6aa   : > { %4831 = vst.msk [vmem:[#allocation4 + $0xa0] sm:$0xff] %vm4820_vm13, %v4793_v62 }
 0x6ab   : > { %4960 = vst.msk [vmem:[#allocation4 + $0xa0] sm:$0xff] %vm4949_vm14, %v4922_v29 }
 0x6ac   : > { %5089 = vst.msk [vmem:[#allocation4 + $0xa0] sm:$0xff] %vm5078_vm15, %v5051_v33  ;;  %v4537_v1 = vpop.permute.xlu0 %4536 }
 0x6ad   : > { %5218 = vst.msk [vmem:[#allocation4 + $0xa0] sm:$0xff] %vm5207_vm1, %v5180_v36  ;;  %v4408_v3 = vpop.permute.xlu1 %4407  ;;  %v5306_v28 = vld [vmem:[#allocation4 + $0x90] sm:$0xff] }
 0x6ae   : > { %4445 = vst.msk [vmem:[#allocation4 + $0xb0] sm:$0xff] %vm4433_vm10, %v4408_v3  ;;  %5549 = vmatmul.mubr.bf16.gmra.mrb[136].mxu0 %v5306_v28 }
 0x6af   : > { %4574 = vst.msk [vmem:[#allocation4 + $0xb0] sm:$0xff] %vm4562_vm11, %v4537_v1  ;;  %6252 = vmatprep.mubr.msk.bf16.mxu0 %vm797_vm3, %v5309_v10 }
 0x6b0   : > { %4703 = vst.msk [vmem:[#allocation4 + $0xb0] sm:$0xff] %vm4691_vm12, %v4666_v12  ;;  %v5184_v15 = vpop.permute.xlu0 %5183 }
 0x6b1   : > { %4832 = vst.msk [vmem:[#allocation4 + $0xb0] sm:$0xff] %vm4820_vm13, %v4795_v9  ;;  %v5055_v47 = vpop.permute.xlu1 %5054 }
 0x6b2   : > { %4961 = vst.msk [vmem:[#allocation4 + $0xb0] sm:$0xff] %vm4949_vm14, %v4924_v46 }
 0x6b4   : > { %v5308_v56 = vld [vmem:[#allocation4 + $0xa0] sm:$0xff]  ;;  %v4799_v44 = vpop.permute.xlu0 %4798 }
 0x6b5   : > { %v4670_v43 = vpop.permute.xlu1 %4669 }
 0x6b6   : > { %5557 = vmatmul.mubr.bf16.gmra.mrb[140].mxu0 %v5308_v56 }
 0x6b7   : > { %6253 = vmatprep.mubr.msk.bf16.mxu0 %vm797_vm3, %v5311_v61 }
 0x6b8   : > { %v4414_v35 = vpop.permute.xlu0 %4413 }
 0x6b9   : > { %v4928_v51 = vpop.permute.xlu1 %4927  ;;  %4448 = vst.msk [vmem:[#allocation4 + $0xe0] sm:$0xff] %vm4433_vm10, %v4414_v35 }
 0x6bc   : > { %v5053_v38 = vpop.permute.xlu0 %5052 }
 0x6bd   : > { %v4543_v6 = vpop.permute.xlu1 %4542  ;;  %5090 = vst.msk [vmem:[#allocation4 + $0xb0] sm:$0xff] %vm5078_vm15, %v5053_v38 }
 0x6be   : > { %4577 = vst.msk [vmem:[#allocation4 + $0xe0] sm:$0xff] %vm4562_vm11, %v4543_v6 }
 0x6c0   : > { %v4668_v14 = vpop.permute.xlu0 %4667 }
 0x6c1   : > { %v5182_v41 = vpop.permute.xlu1 %5181  ;;  %4704 = vst.msk [vmem:[#allocation4 + $0xc0] sm:$0xff] %vm4691_vm12, %v4668_v14 }
 0x6c2   : > { %5219 = vst.msk [vmem:[#allocation4 + $0xb0] sm:$0xff] %vm5207_vm1, %v5182_v41 }
 0x6c4   : > { %v4926_v19 = vpop.permute.xlu0 %4925 }
 0x6c5   : > { %v4797_v30 = vpop.permute.xlu1 %4796 }
 0x6c6   : > { %4833 = vst.msk [vmem:[#allocation4 + $0xc0] sm:$0xff] %vm4820_vm13, %v4797_v30 }
 0x6c7   : > { %4962 = vst.msk [vmem:[#allocation4 + $0xc0] sm:$0xff] %vm4949_vm14, %v4926_v19 }
 0x6c8   : > { %5091 = vst.msk [vmem:[#allocation4 + $0xc0] sm:$0xff] %vm5078_vm15, %v5055_v47  ;;  %v4541_v22 = vpop.permute.xlu0 %4540 }
 0x6c9   : > { %5220 = vst.msk [vmem:[#allocation4 + $0xc0] sm:$0xff] %vm5207_vm1, %v5184_v15  ;;  %v4412_v31 = vpop.permute.xlu1 %4411  ;;  %v5310_v7 = vld [vmem:[#allocation4 + $0xb0] sm:$0xff] }
 0x6ca   : > { %4447 = vst.msk [vmem:[#allocation4 + $0xd0] sm:$0xff] %vm4433_vm10, %v4412_v31  ;;  %5565 = vmatmul.mubr.bf16.gmra.mrb[144].mxu0 %v5310_v7 }
 0x6cb   : > { %4576 = vst.msk [vmem:[#allocation4 + $0xd0] sm:$0xff] %vm4562_vm11, %v4541_v22  ;;  %6254 = vmatprep.mubr.msk.bf16.mxu0 %vm797_vm3, %v5313_v57 }
 0x6cc   : > { %4705 = vst.msk [vmem:[#allocation4 + $0xd0] sm:$0xff] %vm4691_vm12, %v4670_v43  ;;  %v5188_v42 = vpop.permute.xlu0 %5187 }
 0x6cd   : > { %4834 = vst.msk [vmem:[#allocation4 + $0xd0] sm:$0xff] %vm4820_vm13, %v4799_v44  ;;  %v5059_v32 = vpop.permute.xlu1 %5058 }
 0x6ce   : > { %4963 = vst.msk [vmem:[#allocation4 + $0xd0] sm:$0xff] %vm4949_vm14, %v4928_v51 }
 0x6d0   : > { %v5312_v55 = vld [vmem:[#allocation4 + $0xc0] sm:$0xff]  ;;  %v5057_v52 = vpop.permute.xlu0 %5056 }
 0x6d1   : > { %v4674_v63 = vpop.permute.xlu1 %4673  ;;  %5092 = vst.msk [vmem:[#allocation4 + $0xd0] sm:$0xff] %vm5078_vm15, %v5057_v52 }
 0x6d2   : > { %5573 = vmatmul.mubr.bf16.gmra.mrb[148].mxu0 %v5312_v55 }
 0x6d3   : > { %6255 = vmatprep.mubr.msk.bf16.mxu0 %vm797_vm3, %v5315_v40 }
 0x6d4   : > { %v4672_v0 = vpop.permute.xlu0 %4671 }
 0x6d5   : > { %v5186_v11 = vpop.permute.xlu1 %5185  ;;  %4706 = vst.msk [vmem:[#allocation4 + $0xe0] sm:$0xff] %vm4691_vm12, %v4672_v0 }
 0x6d6   : > { %5221 = vst.msk [vmem:[#allocation4 + $0xd0] sm:$0xff] %vm5207_vm1, %v5186_v11 }
 0x6d8   : > { %v4930_v24 = vpop.permute.xlu0 %4929 }
 0x6d9   : > { %v4801_v45 = vpop.permute.xlu1 %4800 }
 0x6da   : > { %4835 = vst.msk [vmem:[#allocation4 + $0xe0] sm:$0xff] %vm4820_vm13, %v4801_v45 }
 0x6db   : > { %4964 = vst.msk [vmem:[#allocation4 + $0xe0] sm:$0xff] %vm4949_vm14, %v4930_v24 }
 0x6dc   : > { %5093 = vst.msk [vmem:[#allocation4 + $0xe0] sm:$0xff] %vm5078_vm15, %v5059_v32  ;;  %v4803_v59 = vpop.permute.xlu0 %4802 }
 0x6dd   : > { %5222 = vst.msk [vmem:[#allocation4 + $0xe0] sm:$0xff] %vm5207_vm1, %v5188_v42  ;;  %v4416_v58 = vpop.permute.xlu1 %4415  ;;  %v5314_v2 = vld [vmem:[#allocation4 + $0xd0] sm:$0xff] }
 0x6de   : > { %4449 = vst.msk [vmem:[#allocation4 + $0xf0] sm:$0xff] %vm4433_vm10, %v4416_v58  ;;  %5581 = vmatmul.mubr.bf16.gmra.mrb[152].mxu0 %v5314_v2 }
 0x6df   : > { %6256 = vmatprep.mubr.msk.bf16.mxu0 %vm797_vm3, %v5317_v18 }
 0x6e0   : > { %v4545_v48 = vpop.permute.xlu0 %4544 }
 0x6e1   : > { %v4932_v4 = vpop.permute.xlu1 %4931  ;;  %4578 = vst.msk [vmem:[#allocation4 + $0xf0] sm:$0xff] %vm4562_vm11, %v4545_v48 }
 0x6e2   : > { %4707 = vst.msk [vmem:[#allocation4 + $0xf0] sm:$0xff] %vm4691_vm12, %v4674_v63 }
 0x6e3   : > { %4836 = vst.msk [vmem:[#allocation4 + $0xf0] sm:$0xff] %vm4820_vm13, %v4803_v59 }
 0x6e4   : > { %v5316_v21 = vld [vmem:[#allocation4 + $0xe0] sm:$0xff]  ;;  %4965 = vst.msk [vmem:[#allocation4 + $0xf0] sm:$0xff] %vm4949_vm14, %v4932_v4  ;;  %v5061_v39 = vpop.permute.xlu0 %5060 }
 0x6e5   : > { %v5190_v23 = vpop.permute.xlu1 %5189  ;;  %5094 = vst.msk [vmem:[#allocation4 + $0xf0] sm:$0xff] %vm5078_vm15, %v5061_v39 }
 0x6e6   : > { %5589 = vmatmul.mubr.bf16.gmra.mrb[156].mxu0 %v5316_v21  ;;  %5223 = vst.msk [vmem:[#allocation4 + $0xf0] sm:$0xff] %vm5207_vm1, %v5190_v23 }
 0x6e7   : > { %6257 = vmatprep.mubr.msk.bf16.mxu0 %vm797_vm3, %v5319_v13 }
 0x6ed   : > { %v5318_v5 = vld [vmem:[#allocation4 + $0xf0] sm:$0xff] }
 0x6ee   : > { %5597 = vmatmul.mubr.bf16.gmra.mrb[160].mxu0 %v5318_v5 }
 0x6fd   : > { %v5478_v54 = vpop.f32.mrb[100].mxu0 }
 0x6fe   : > { %v5479_v34 = vadd.f32 %v9528_v60, %v5478_v54  ;;  %v5480_v50 = vpop.f32.mrb[101].mxu0 }
 0x6ff   : > { %v5481_v8 = vpop.f32.mrb[102].mxu0 }
 0x700   : > { %v5482_v25 = vadd.f32 %v9528_v60, %v5481_v8  ;;  %v5483_v36 = vpop.f32.mrb[103].mxu0  ;;  %v5605_v33 = vmax.f32 %v5479_v34, 0.0 }
 0x702   : > { %v5606_v9 = vmax.f32 %v5482_v25, 0.0 }
 0x704   : > { %v5637_v53 = vpack.c.bf16 %v5606_v9, %v5605_v33 }
 0x706   : > { %6734 = vmatprep.mubr.msk.bf16.mxu1 %vm797_vm3, %v5637_v53 }
 0x711   : > { %v5486_v16 = vpop.f32.mrb[104].mxu0 }
 0x712   : > { %v5487_v12 = vadd.f32 %v9528_v60, %v5486_v16  ;;  %v5488_v26 = vpop.f32.mrb[105].mxu0 }
 0x713   : > { %v5489_v49 = vpop.f32.mrb[106].mxu0 }
 0x714   : > { %v5490_v46 = vadd.f32 %v9528_v60, %v5489_v49  ;;  %v5491_v17 = vpop.f32.mrb[107].mxu0  ;;  %v5607_v20 = vmax.f32 %v5487_v12, 0.0 }
 0x716   : > { %v5608_v27 = vmax.f32 %v5490_v46, 0.0 }
 0x718   : > { %v5638_v37 = vpack.c.bf16 %v5608_v27, %v5607_v20 }
 0x719   : > { %v5494_v29 = vpop.f32.mrb[108].mxu0 }
 0x71a   : > { %v5495_v62 = vadd.f32 %v9528_v60, %v5494_v29  ;;  %v5496_v1 = vpop.f32.mrb[109].mxu0  ;;  %6735 = vmatmul.mubr.msk.bf16.vlgmr.msra.gmra.mrb[132].mxu1 %vm797_vm3, %v5638_v37 }
 0x71b   : > { %v5497_v3 = vpop.f32.mrb[110].mxu0 }
 0x71c   : > { %v5498_v28 = vadd.f32 %v9528_v60, %v5497_v3  ;;  %v5499_v10 = vpop.f32.mrb[111].mxu0  ;;  %v5609_v15 = vmax.f32 %v5495_v62, 0.0 }
 0x71e   : > { %v5610_v47 = vmax.f32 %v5498_v28, 0.0 }
 0x720   : > { %v5639_v56 = vpack.c.bf16 %v5610_v47, %v5609_v15 }
 0x722   : > { %6738 = vmatprep.mubr.msk.bf16.mxu1 %vm797_vm3, %v5639_v56 }
 0x72d   : > { %v5502_v44 = vpop.f32.mrb[112].mxu0 }
 0x72e   : > { %v5503_v43 = vadd.f32 %v9528_v60, %v5502_v44  ;;  %v5504_v61 = vpop.f32.mrb[113].mxu0 }
 0x72f   : > { %v5505_v35 = vpop.f32.mrb[114].mxu0 }
 0x730   : > { %v5506_v51 = vadd.f32 %v9528_v60, %v5505_v35  ;;  %v5507_v38 = vpop.f32.mrb[115].mxu0  ;;  %v5611_v6 = vmax.f32 %v5503_v43, 0.0 }
 0x732   : > { %v5612_v14 = vmax.f32 %v5506_v51, 0.0 }
 0x734   : > { %v5640_v41 = vpack.c.bf16 %v5612_v14, %v5611_v6 }
 0x735   : > { %v5510_v19 = vpop.f32.mrb[116].mxu0 }
 0x736   : > { %v5511_v30 = vadd.f32 %v9528_v60, %v5510_v19  ;;  %v5512_v22 = vpop.f32.mrb[117].mxu0  ;;  %6739 = vmatmul.mubr.msk.bf16.gmra.mrb[136].mxu1 %vm797_vm3, %v5640_v41 }
 0x737   : > { %v5513_v31 = vpop.f32.mrb[118].mxu0 }
 0x738   : > { %v5514_v7 = vadd.f32 %v9528_v60, %v5513_v31  ;;  %v5515_v57 = vpop.f32.mrb[119].mxu0  ;;  %v5613_v42 = vmax.f32 %v5511_v30, 0.0 }
 0x73a   : > { %v5614_v32 = vmax.f32 %v5514_v7, 0.0 }
 0x73c   : > { %v5641_v55 = vpack.c.bf16 %v5614_v32, %v5613_v42 }
 0x73e   : > { %6742 = vmatprep.mubr.msk.bf16.mxu1 %vm797_vm3, %v5641_v55 }
 0x749   : > { %v5518_v52 = vpop.f32.mrb[120].mxu0 }
 0x74a   : > { %v5519_v63 = vadd.f32 %v9528_v60, %v5518_v52  ;;  %v5520_v40 = vpop.f32.mrb[121].mxu0 }
 0x74b   : > { %v5521_v0 = vpop.f32.mrb[122].mxu0 }
 0x74c   : > { %v5522_v11 = vadd.f32 %v9528_v60, %v5521_v0  ;;  %v5523_v24 = vpop.f32.mrb[123].mxu0  ;;  %v5615_v45 = vmax.f32 %v5519_v63, 0.0 }
 0x74e   : > { %v5616_v59 = vmax.f32 %v5522_v11, 0.0 }
 0x750   : > { %v5642_v58 = vpack.c.bf16 %v5616_v59, %v5615_v45 }
 0x751   : > { %v5526_v2 = vpop.f32.mrb[124].mxu0 }
 0x752   : > { %v5527_v18 = vadd.f32 %v9528_v60, %v5526_v2  ;;  %v5528_v48 = vpop.f32.mrb[125].mxu0  ;;  %6743 = vmatmul.mubr.msk.bf16.gmra.mrb[140].mxu1 %vm797_vm3, %v5642_v58 }
 0x753   : > { %v5529_v4 = vpop.f32.mrb[126].mxu0 }
 0x754   : > { %v5530_v21 = vadd.f32 %v9528_v60, %v5529_v4  ;;  %v5531_v13 = vpop.f32.mrb[127].mxu0  ;;  %v5617_v39 = vmax.f32 %v5527_v18, 0.0 }
 0x756   : > { %v5618_v23 = vmax.f32 %v5530_v21, 0.0 }
 0x758   : > { %v5643_v5 = vpack.c.bf16 %v5618_v23, %v5617_v39 }
 0x75a   : > { %6746 = vmatprep.mubr.msk.bf16.mxu1 %vm797_vm3, %v5643_v5 }
 0x765   : > { %v5534_v54 = vpop.f32.mrb[128].mxu0 }
 0x766   : > { %v5535_v34 = vadd.f32 %v9528_v60, %v5534_v54  ;;  %v5536_v50 = vpop.f32.mrb[129].mxu0 }
 0x767   : > { %v5537_v8 = vpop.f32.mrb[130].mxu0 }
 0x768   : > { %v5538_v25 = vadd.f32 %v9528_v60, %v5537_v8  ;;  %v5539_v36 = vpop.f32.mrb[131].mxu0  ;;  %v5619_v33 = vmax.f32 %v5535_v34, 0.0 }
 0x76a   : > { %v5620_v9 = vmax.f32 %v5538_v25, 0.0 }
 0x76c   : > { %v5644_v53 = vpack.c.bf16 %v5620_v9, %v5619_v33 }
 0x76d   : > { %v5542_v16 = vpop.f32.mrb[132].mxu0 }
 0x76e   : > { %v5543_v12 = vadd.f32 %v9528_v60, %v5542_v16  ;;  %v5544_v26 = vpop.f32.mrb[133].mxu0  ;;  %6747 = vmatmul.mubr.msk.bf16.gmra.mrb[144].mxu1 %vm797_vm3, %v5644_v53 }
 0x76f   : > { %v5545_v49 = vpop.f32.mrb[134].mxu0 }
 0x770   : > { %v5546_v46 = vadd.f32 %v9528_v60, %v5545_v49  ;;  %v5547_v17 = vpop.f32.mrb[135].mxu0  ;;  %v5621_v20 = vmax.f32 %v5543_v12, 0.0 }
 0x772   : > { %v5622_v27 = vmax.f32 %v5546_v46, 0.0 }
 0x774   : > { %v5645_v37 = vpack.c.bf16 %v5622_v27, %v5621_v20 }
 0x776   : > { %6750 = vmatprep.mubr.msk.bf16.mxu1 %vm797_vm3, %v5645_v37 }
 0x781   : > { %v5550_v29 = vpop.f32.mrb[136].mxu0 }
 0x782   : > { %v5551_v62 = vadd.f32 %v9528_v60, %v5550_v29  ;;  %v5552_v1 = vpop.f32.mrb[137].mxu0  ;;  %v9581_v29 = vld [vmem:[%s9773_s10 + $0x7] ss:$0 sm:$0xff] }
 0x783   : > { %v5553_v3 = vpop.f32.mrb[138].mxu0 }
 0x784   : > { %v5554_v28 = vadd.f32 %v9528_v60, %v5553_v3  ;;  %v5555_v10 = vpop.f32.mrb[139].mxu0  ;;  %v5623_v15 = vmax.f32 %v5551_v62, 0.0 }
 0x786   : > { %v5624_v47 = vmax.f32 %v5554_v28, 0.0 }
 0x788   : > { %v5646_v56 = vpack.c.bf16 %v5624_v47, %v5623_v15  ;;  %v5875_v47 = vld [vmem:[%s8951_s19] sm:$0xff] }
 0x789   : > { %v5558_v44 = vpop.f32.mrb[140].mxu0 }
 0x78a   : > { %v5559_v43 = vadd.f32 %v9528_v60, %v5558_v44  ;;  %v5560_v61 = vpop.f32.mrb[141].mxu0  ;;  %6751 = vmatmul.mubr.msk.bf16.gmra.mrb[148].mxu1 %vm797_vm3, %v5646_v56 }
 0x78b   : > { %v5561_v35 = vpop.f32.mrb[142].mxu0  ;;  %v5878_v61 = vld [vmem:[%s8951_s19 + $0x18] sm:$0xff] }
 0x78c   : > { %v5562_v51 = vadd.f32 %v9528_v60, %v5561_v35  ;;  %v5563_v38 = vpop.f32.mrb[143].mxu0  ;;  %v5625_v6 = vmax.f32 %v5559_v43, 0.0 }
 0x78d   : > { %v5876_v38 = vld [vmem:[%s8951_s19 + $0x8] sm:$0xff] }
 0x78e   : > { %v5626_v14 = vmax.f32 %v5562_v51, 0.0 }
 0x790   : > { %v5647_v41 = vpack.c.bf16 %v5626_v14, %v5625_v6 }
 0x792   : > { %6754 = vmatprep.mubr.msk.bf16.mxu1 %vm797_vm3, %v5647_v41 }
 0x79d   : > { %v5566_v19 = vpop.f32.mrb[144].mxu0 }
 0x79e   : > { %v5567_v30 = vadd.f32 %v9528_v60, %v5566_v19  ;;  %v5568_v22 = vpop.f32.mrb[145].mxu0 }
 0x79f   : > { %v5569_v31 = vpop.f32.mrb[146].mxu0 }
 0x7a0   : > { %v5570_v7 = vadd.f32 %v9528_v60, %v5569_v31  ;;  %v5571_v57 = vpop.f32.mrb[147].mxu0  ;;  %v5627_v42 = vmax.f32 %v5567_v30, 0.0  ;;  %v5881_v30 = vld [vmem:[%s8951_s19 + $0x30] sm:$0xff] }
 0x7a1   : > { %v5879_v57 = vld [vmem:[%s8951_s19 + $0x20] sm:$0xff] }
 0x7a2   : > { %v5628_v32 = vmax.f32 %v5570_v7, 0.0 }
 0x7a4   : > { %v5648_v55 = vpack.c.bf16 %v5628_v32, %v5627_v42 }
 0x7a5   : > { %v5574_v52 = vpop.f32.mrb[148].mxu0 }
 0x7a6   : > { %v5575_v63 = vadd.f32 %v9528_v60, %v5574_v52  ;;  %v5576_v40 = vpop.f32.mrb[149].mxu0  ;;  %6755 = vmatmul.mubr.msk.bf16.gmra.mrb[152].mxu1 %vm797_vm3, %v5648_v55  ;;  %v5882_v52 = vld [vmem:[%s8951_s19 + $0x38] sm:$0xff] }
 0x7a7   : > { %v5577_v0 = vpop.f32.mrb[150].mxu0 }
 0x7a8   : > { %v5578_v11 = vadd.f32 %v9528_v60, %v5577_v0  ;;  %v5579_v24 = vpop.f32.mrb[151].mxu0  ;;  %v5629_v45 = vmax.f32 %v5575_v63, 0.0  ;;  %v5880_v0 = vld [vmem:[%s8951_s19 + $0x28] sm:$0xff] }
 0x7aa   : > { %v5630_v59 = vmax.f32 %v5578_v11, 0.0 }
 0x7ac   : > { %v5649_v58 = vpack.c.bf16 %v5630_v59, %v5629_v45 }
 0x7ae   : > { %6758 = vmatprep.mubr.msk.bf16.mxu1 %vm797_vm3, %v5649_v58  ;;  %v5885_v58 = vld [vmem:[%s8951_s19 + $0x50] sm:$0xff] }
 0x7b1   : > { %v5582_v2 = vpop.f32.mrb[152].mxu0 }
 0x7b2   : > { %v5583_v18 = vadd.f32 %v9528_v60, %v5582_v2  ;;  %v5584_v48 = vpop.f32.mrb[153].mxu0 }
 0x7b3   : > { %v5585_v4 = vpop.f32.mrb[154].mxu0 }
 0x7b4   : > { %v5586_v21 = vadd.f32 %v9528_v60, %v5585_v4  ;;  %v5587_v13 = vpop.f32.mrb[155].mxu0  ;;  %v5631_v39 = vmax.f32 %v5583_v18, 0.0  ;;  %v5883_v4 = vld [vmem:[%s8951_s19 + $0x40] sm:$0xff] }
 0x7b6   : > { %v5632_v23 = vmax.f32 %v5586_v21, 0.0 }
 0x7b8   : > { %v5650_v5 = vpack.c.bf16 %v5632_v23, %v5631_v39  ;;  %v5886_v23 = vld [vmem:[%s8951_s19 + $0x58] sm:$0xff] }
 0x7b9   : > { %v5590_v54 = vpop.f32.mrb[156].mxu0 }
 0x7ba   : > { %v5591_v34 = vadd.f32 %v9528_v60, %v5590_v54  ;;  %v5592_v50 = vpop.f32.mrb[157].mxu0  ;;  %6759 = vmatmul.mubr.msk.bf16.gmra.mrb[156].mxu1 %vm797_vm3, %v5650_v5 }
 0x7bb   : > { %v5593_v8 = vpop.f32.mrb[158].mxu0 }
 0x7bc   : > { %v5594_v25 = vadd.f32 %v9528_v60, %v5593_v8  ;;  %v5595_v36 = vpop.f32.mrb[159].mxu0  ;;  %v5633_v33 = vmax.f32 %v5591_v34, 0.0  ;;  %v5884_v34 = vld [vmem:[%s8951_s19 + $0x48] sm:$0xff] }
 0x7be   : > { %v5634_v9 = vmax.f32 %v5594_v25, 0.0 }
 0x7c0   : > { %v5651_v53 = vpack.c.bf16 %v5634_v9, %v5633_v33  ;;  %v5889_v33 = vld [vmem:[%s8951_s19 + $0x70] sm:$0xff] }
 0x7c1   : > { %v5598_v16 = vpop.f32.mrb[160].mxu0 }
 0x7c2   : > { %6762 = vmatprep.mubr.msk.bf16.mxu1 %vm797_vm3, %v5651_v53  ;;  %v5599_v12 = vadd.f32 %v9528_v60, %v5598_v16  ;;  %v5600_v26 = vpop.f32.mrb[161].mxu0 }
 0x7c3   : > { %v5601_v49 = vpop.f32.mrb[162].mxu0 }
 0x7c4   : > { %v5602_v46 = vadd.f32 %v9528_v60, %v5601_v49  ;;  %v5603_v17 = vpop.f32.mrb[163].mxu0  ;;  %v5635_v20 = vmax.f32 %v5599_v12, 0.0  ;;  %v5877_v60 = vld [vmem:[%s8951_s19 + $0x10] sm:$0xff]  ;;  %v5887_v12 = vld [vmem:[%s8951_s19 + $0x60] sm:$0xff] }
 0x7c5   : > { %v5890_v17 = vld [vmem:[%s8951_s19 + $0x78] sm:$0xff] }
 0x7c6   : > { %v5636_v27 = vmax.f32 %v5602_v46, 0.0 }
 0x7c8   : > { %v5652_v37 = vpack.c.bf16 %v5636_v27, %v5635_v20 }
 0x7ca   : > { %6763 = vmatmul.mubr.msk.bf16.gmra.mrb[160].mxu1 %vm797_vm3, %v5652_v37  ;;  %v5888_v37 = vld [vmem:[%s8951_s19 + $0x68] sm:$0xff] }
 0x7ed   : > { %v6736_v62 = vpop.f32.mrb[132].mxu1 }
 0x7ee   : > { %v5757_v1 = vadd.f32 %v6736_v62, %v9581_v29  ;;  %v5748_v3 = vpop.f32.mrb[133].mxu1 }
 0x7ef   : > { %v5749_v28 = vadd.f32 %v9581_v29, %v5748_v3  ;;  %v6737_v10 = vpop.f32.mrb[134].mxu1 }
 0x7f0   : > { %v5909_v15 = vadd.f32 %v5877_v60, %v5757_v1  ;;  %v5760_v56 = vadd.f32 %v6737_v10, %v9581_v29  ;;  %v5751_v44 = vpop.f32.mrb[135].mxu1 }
 0x7f1   : > { %v5907_v43 = vadd.f32 %v5875_v47, %v5749_v28  ;;  %v5752_v35 = vadd.f32 %v9581_v29, %v5751_v44  ;;  %v5893_v28 = vld [vmem:[%s8951_s19 + $0x90] sm:$0xff] }
 0x7f2   : > { %5941 = vst.msk [vmem:[%s8951_s19 + $0x10] sm:$0xff] %vm561_vm0, %v5909_v15  ;;  %v5910_v51 = vadd.f32 %v5878_v61, %v5760_v56  ;;  %v5891_v56 = vld [vmem:[%s8951_s19 + $0x80] sm:$0xff] }
 0x7f3   : > { %5939 = vst.msk [vmem:[%s8951_s19] sm:$0xff] %vm561_vm0, %v5907_v43  ;;  %v5908_v6 = vadd.f32 %v5876_v38, %v5752_v35  ;;  %v5894_v35 = vld [vmem:[%s8951_s19 + $0x98] sm:$0xff] }
 0x7f4   : > { %5942 = vst.msk [vmem:[%s8951_s19 + $0x18] sm:$0xff] %vm561_vm0, %v5910_v51 }
 0x7f5   : > { %5940 = vst.msk [vmem:[%s8951_s19 + $0x8] sm:$0xff] %vm561_vm0, %v5908_v6  ;;  %v5892_v6 = vld [vmem:[%s8951_s19 + $0x88] sm:$0xff] }
 0x809   : > { %v6740_v14 = vpop.f32.mrb[136].mxu1 }
 0x80a   : > { %v5773_v41 = vadd.f32 %v6740_v14, %v9581_v29  ;;  %v5764_v19 = vpop.f32.mrb[137].mxu1 }
 0x80b   : > { %v5765_v22 = vadd.f32 %v9581_v29, %v5764_v19  ;;  %v6741_v31 = vpop.f32.mrb[138].mxu1 }
 0x80c   : > { %v5913_v7 = vadd.f32 %v5881_v30, %v5773_v41  ;;  %v5776_v42 = vadd.f32 %v6741_v31, %v9581_v29  ;;  %v5767_v32 = vpop.f32.mrb[139].mxu1 }
 0x80d   : > { %v5911_v55 = vadd.f32 %v5879_v57, %v5765_v22  ;;  %v5768_v63 = vadd.f32 %v9581_v29, %v5767_v32  ;;  %v5897_v22 = vld [vmem:[%s8951_s19 + $0xb0] sm:$0xff] }
 0x80e   : > { %5945 = vst.msk [vmem:[%s8951_s19 + $0x30] sm:$0xff] %vm561_vm0, %v5913_v7  ;;  %v5914_v40 = vadd.f32 %v5882_v52, %v5776_v42  ;;  %v5895_v42 = vld [vmem:[%s8951_s19 + $0xa0] sm:$0xff] }
 0x80f   : > { %5943 = vst.msk [vmem:[%s8951_s19 + $0x20] sm:$0xff] %vm561_vm0, %v5911_v55  ;;  %v5912_v11 = vadd.f32 %v5880_v0, %v5768_v63  ;;  %v5898_v63 = vld [vmem:[%s8951_s19 + $0xb8] sm:$0xff] }
 0x810   : > { %5946 = vst.msk [vmem:[%s8951_s19 + $0x38] sm:$0xff] %vm561_vm0, %v5914_v40 }
 0x811   : > { %5944 = vst.msk [vmem:[%s8951_s19 + $0x28] sm:$0xff] %vm561_vm0, %v5912_v11  ;;  %v5896_v11 = vld [vmem:[%s8951_s19 + $0xa8] sm:$0xff] }
 0x825   : > { %v6744_v24 = vpop.f32.mrb[140].mxu1 }
 0x826   : > { %v5789_v45 = vadd.f32 %v6744_v24, %v9581_v29  ;;  %v5780_v59 = vpop.f32.mrb[141].mxu1 }
 0x827   : > { %v5781_v2 = vadd.f32 %v9581_v29, %v5780_v59  ;;  %v6745_v18 = vpop.f32.mrb[142].mxu1 }
 0x828   : > { %v5917_v48 = vadd.f32 %v5885_v58, %v5789_v45  ;;  %v5792_v21 = vadd.f32 %v6745_v18, %v9581_v29  ;;  %v5783_v13 = vpop.f32.mrb[143].mxu1 }
 0x829   : > { %v5915_v39 = vadd.f32 %v5883_v4, %v5781_v2  ;;  %v5784_v5 = vadd.f32 %v9581_v29, %v5783_v13  ;;  %v5901_v2 = vld [vmem:[%s8951_s19 + $0xd0] sm:$0xff] }
 0x82a   : > { %5949 = vst.msk [vmem:[%s8951_s19 + $0x50] sm:$0xff] %vm561_vm0, %v5917_v48  ;;  %v5918_v54 = vadd.f32 %v5886_v23, %v5792_v21  ;;  %v5899_v21 = vld [vmem:[%s8951_s19 + $0xc0] sm:$0xff] }
 0x82b   : > { %5947 = vst.msk [vmem:[%s8951_s19 + $0x40] sm:$0xff] %vm561_vm0, %v5915_v39  ;;  %v5916_v50 = vadd.f32 %v5884_v34, %v5784_v5  ;;  %v5902_v5 = vld [vmem:[%s8951_s19 + $0xd8] sm:$0xff] }
 0x82c   : > { %5950 = vst.msk [vmem:[%s8951_s19 + $0x58] sm:$0xff] %vm561_vm0, %v5918_v54 }
 0x82d   : > { %5948 = vst.msk [vmem:[%s8951_s19 + $0x48] sm:$0xff] %vm561_vm0, %v5916_v50  ;;  %v5900_v50 = vld [vmem:[%s8951_s19 + $0xc8] sm:$0xff] }
 0x841   : > { %v6748_v8 = vpop.f32.mrb[144].mxu1 }
 0x842   : > { %v5805_v25 = vadd.f32 %v6748_v8, %v9581_v29  ;;  %v5796_v36 = vpop.f32.mrb[145].mxu1 }
 0x843   : > { %v5797_v9 = vadd.f32 %v9581_v29, %v5796_v36  ;;  %v6749_v53 = vpop.f32.mrb[146].mxu1 }
 0x844   : > { %v5921_v16 = vadd.f32 %v5889_v33, %v5805_v25  ;;  %v5808_v26 = vadd.f32 %v6749_v53, %v9581_v29  ;;  %v5799_v49 = vpop.f32.mrb[147].mxu1 }
 0x845   : > { %v5919_v46 = vadd.f32 %v5887_v12, %v5797_v9  ;;  %v5800_v20 = vadd.f32 %v9581_v29, %v5799_v49  ;;  %v5905_v9 = vld [vmem:[%s8951_s19 + $0xf0] sm:$0xff] }
 0x846   : > { %5953 = vst.msk [vmem:[%s8951_s19 + $0x70] sm:$0xff] %vm561_vm0, %v5921_v16  ;;  %v5922_v27 = vadd.f32 %v5890_v17, %v5808_v26  ;;  %v5903_v26 = vld [vmem:[%s8951_s19 + $0xe0] sm:$0xff] }
 0x847   : > { %5951 = vst.msk [vmem:[%s8951_s19 + $0x60] sm:$0xff] %vm561_vm0, %v5919_v46  ;;  %v5920_v62 = vadd.f32 %v5888_v37, %v5800_v20  ;;  %v5906_v20 = vld [vmem:[%s8951_s19 + $0xf8] sm:$0xff] }
 0x848   : > { %5954 = vst.msk [vmem:[%s8951_s19 + $0x78] sm:$0xff] %vm561_vm0, %v5922_v27 }
 0x849   : > { %5952 = vst.msk [vmem:[%s8951_s19 + $0x68] sm:$0xff] %vm561_vm0, %v5920_v62  ;;  %v5904_v62 = vld [vmem:[%s8951_s19 + $0xe8] sm:$0xff] }
 0x85d   : > { %v6752_v1 = vpop.f32.mrb[148].mxu1 }
 0x85e   : > { %v5821_v3 = vadd.f32 %v6752_v1, %v9581_v29  ;;  %v5812_v60 = vpop.f32.mrb[149].mxu1 }
 0x85f   : > { %v5813_v10 = vadd.f32 %v9581_v29, %v5812_v60  ;;  %v6753_v15 = vpop.f32.mrb[150].mxu1 }
 0x860   : > { %v5925_v47 = vadd.f32 %v5893_v28, %v5821_v3  ;;  %v5824_v44 = vadd.f32 %v6753_v15, %v9581_v29  ;;  %v5815_v43 = vpop.f32.mrb[151].mxu1 }
 0x861   : > { %v5923_v61 = vadd.f32 %v5891_v56, %v5813_v10  ;;  %v5816_v51 = vadd.f32 %v9581_v29, %v5815_v43 }
 0x862   : > { %5957 = vst.msk [vmem:[%s8951_s19 + $0x90] sm:$0xff] %vm561_vm0, %v5925_v47  ;;  %v5926_v38 = vadd.f32 %v5894_v35, %v5824_v44 }
 0x863   : > { %5955 = vst.msk [vmem:[%s8951_s19 + $0x80] sm:$0xff] %vm561_vm0, %v5923_v61  ;;  %v5924_v14 = vadd.f32 %v5892_v6, %v5816_v51 }
 0x864   : > { %5958 = vst.msk [vmem:[%s8951_s19 + $0x98] sm:$0xff] %vm561_vm0, %v5926_v38 }
 0x865   : > { %5956 = vst.msk [vmem:[%s8951_s19 + $0x88] sm:$0xff] %vm561_vm0, %v5924_v14 }
 0x879   : > { %v6756_v41 = vpop.f32.mrb[152].mxu1 }
 0x87a   : > { %v5837_v19 = vadd.f32 %v6756_v41, %v9581_v29  ;;  %v5828_v30 = vpop.f32.mrb[153].mxu1 }
 0x87b   : > { %v5829_v31 = vadd.f32 %v9581_v29, %v5828_v30  ;;  %v6757_v7 = vpop.f32.mrb[154].mxu1 }
 0x87c   : > { %v5929_v57 = vadd.f32 %v5897_v22, %v5837_v19  ;;  %v5840_v32 = vadd.f32 %v6757_v7, %v9581_v29  ;;  %v5831_v55 = vpop.f32.mrb[155].mxu1 }
 0x87d   : > { %v5927_v52 = vadd.f32 %v5895_v42, %v5829_v31  ;;  %v5832_v40 = vadd.f32 %v9581_v29, %v5831_v55 }
 0x87e   : > { %5961 = vst.msk [vmem:[%s8951_s19 + $0xb0] sm:$0xff] %vm561_vm0, %v5929_v57  ;;  %v5930_v0 = vadd.f32 %v5898_v63, %v5840_v32 }
 0x87f   : > { %5959 = vst.msk [vmem:[%s8951_s19 + $0xa0] sm:$0xff] %vm561_vm0, %v5927_v52  ;;  %v5928_v24 = vadd.f32 %v5896_v11, %v5832_v40 }
 0x880   : > { %5962 = vst.msk [vmem:[%s8951_s19 + $0xb8] sm:$0xff] %vm561_vm0, %v5930_v0 }
 0x881   : > { %5960 = vst.msk [vmem:[%s8951_s19 + $0xa8] sm:$0xff] %vm561_vm0, %v5928_v24 }
 0x88d   : > { %v6760_v45 = vpop.f32.mrb[156].mxu1 }
 0x88e   : > { %v5853_v59 = vadd.f32 %v6760_v45, %v9581_v29  ;;  %v5844_v58 = vpop.f32.mrb[157].mxu1 }
 0x88f   : > { %v5845_v18 = vadd.f32 %v9581_v29, %v5844_v58  ;;  %v6761_v48 = vpop.f32.mrb[158].mxu1 }
 0x890   : > { %v5933_v4 = vadd.f32 %v5901_v2, %v5853_v59  ;;  %v5856_v13 = vadd.f32 %v6761_v48, %v9581_v29  ;;  %v5847_v39 = vpop.f32.mrb[159].mxu1 }
 0x891   : > { %v5931_v23 = vadd.f32 %v5899_v21, %v5845_v18  ;;  %v5848_v54 = vadd.f32 %v9581_v29, %v5847_v39 }
 0x892   : > { %5965 = vst.msk [vmem:[%s8951_s19 + $0xd0] sm:$0xff] %vm561_vm0, %v5933_v4  ;;  %v5934_v34 = vadd.f32 %v5902_v5, %v5856_v13 }
 0x893   : > { %5963 = vst.msk [vmem:[%s8951_s19 + $0xc0] sm:$0xff] %vm561_vm0, %v5931_v23  ;;  %v5932_v8 = vadd.f32 %v5900_v50, %v5848_v54 }
 0x894   : > { %5966 = vst.msk [vmem:[%s8951_s19 + $0xd8] sm:$0xff] %vm561_vm0, %v5934_v34 }
 0x895   : > { %5964 = vst.msk [vmem:[%s8951_s19 + $0xc8] sm:$0xff] %vm561_vm0, %v5932_v8 }
 0x89d   : > { %v6764_v25 = vpop.f32.mrb[160].mxu1 }
 0x89e   : > { %v5869_v36 = vadd.f32 %v6764_v25, %v9581_v29  ;;  %v5860_v33 = vpop.f32.mrb[161].mxu1 }
 0x89f   : > { %v5861_v53 = vadd.f32 %v9581_v29, %v5860_v33  ;;  %v6765_v16 = vpop.f32.mrb[162].mxu1 }
 0x8a0   : > { %v5937_v12 = vadd.f32 %v5905_v9, %v5869_v36  ;;  %v5872_v49 = vadd.f32 %v6765_v16, %v9581_v29  ;;  %v5863_v46 = vpop.f32.mrb[163].mxu1 }
 0x8a1   : > { %v5935_v17 = vadd.f32 %v5903_v26, %v5861_v53  ;;  %v5864_v27 = vadd.f32 %v9581_v29, %v5863_v46 }
 0x8a2   : > { %5969 = vst.msk [vmem:[%s8951_s19 + $0xf0] sm:$0xff] %vm561_vm0, %v5937_v12  ;;  %v5938_v37 = vadd.f32 %v5906_v20, %v5872_v49 }
 0x8a3   : > { %5967 = vst.msk [vmem:[%s8951_s19 + $0xe0] sm:$0xff] %vm561_vm0, %v5935_v17  ;;  %v5936_v1 = vadd.f32 %v5904_v62, %v5864_v27 }
 0x8a4   : > { %5970 = vst.msk [vmem:[%s8951_s19 + $0xf8] sm:$0xff] %vm561_vm0, %v5938_v37 }
 0x8a5   : > { %5968 = vst.msk [vmem:[%s8951_s19 + $0xe8] sm:$0xff] %vm561_vm0, %v5936_v1 }
 0x8a6   : > { %6932 = shalt.err (!%p6929_p3)
}
 0x8a7   : > { %s6933_s19 = scalar_lea.hbm %s9710_s18, 4096  ;;  %s6937_s20 = scalar_lea.hbm %s9775_s12, 8192 }
 0x8a8   : > { %p6934_p4 = scmp.ne.s32.totalorder %s9710_s18, %s6933_s19  ;;  %p6938_p9 = scmp.lt.u32.totalorder %s9710_s18, %s9775_s12 }
 0x8a9   : > { %p6939_p10 = scmp.lt.u32.totalorder %s6937_s20, %s6933_s19  ;;  %p6941_p12 = scmp.lt.u32.totalorder %s6933_s19, %s9710_s18 }
 0x8aa   : > { %p6935_p7 = pnand %p6934_p4, %p7099_p5 }
 0x8ab   : > { %p6940_p11 = por %p6939_p10, %p6938_p9 }
 0x8ac   : > { %p6936_p8 = pneg %p6935_p7 }
 0x8ad   : > { %p6942_p13 = por %p6941_p12, %p6940_p11 }
 0x8af   : > { %p6943_p0 = pnand %p6942_p13, %p6936_p8 }
 0x8b1   : > { %6946 = shalt.err (!%p6943_p0)
}
 0x8b2   : > { %s6994_s0 = smov 128   ;;  %s6995_s17 = smov 8  }
 0x8b3   : > { %6766 = dma.vmem_to_hbm [thread:$0]  (%p7099_p5), %s9712_s29, 4096, %s9710_s18, %s9722_s15, %s6994_s0, %s6994_s0, %s6995_s17  }
 0x8b4 PF: > { %p6772_p1 = scmp.ge.s32.totalorder %s6981_s24, 2  ;;  %s6000_s16 = sand.u32 1, %s6969_s21  }
 0x8b5   : > { %s6001_s19 = scalar_lea.sflag [#allocation7], %s6000_s16 }
 0x8b6   : > { %p6769_p2 = pnand %p6772_p1, %p7103_p6 }
 0x8b8   : > { %6964 = dma.done.wait (!%p6769_p2), %s6001_s19, 4096  }
 0x8b9   : > { %6966 = vsyncadd (!%p6769_p2), %s6001_s19, 4294963200  ;;  %p22_p3 = scmp.ge.s32.totalorder %s7086_s27, 4   ;;  %s9989_s21 = smov %s6973_s22 }
 0x8ba   : > { %s9990_s22 = smov %s6977_s23  ;;  %s9991_s23 = smov %s7097_s30 }
 0x8bb   : > { %s9992_s24 = smov %s7086_s27  ;;  %24 = sbr.rel (!%p22_p3) target bundleno = 5 (0x5), region = 110 }
 0x8c2   :  { %6006 = vsyncpa [#allocation7], 1 }
 0x8c3   :  { %6008 = vsyncpa [#allocation7 + $0x1], 1 }

</bundles_post_ra>
